<compile_context>
chip_gen: v7x
topology: tpu7x:2x2x1
jax: 0.10.0
libtpu: 0.0.40
codegen_flags: <defaults>
</compile_context>

<pallas_src>
import functools

import jax
import jax.numpy as jnp
import numpy as np
from jax import lax
from jax.experimental import pallas as pl
from jax.experimental.pallas import tpu as pltpu

H = 51          # hidden size of both LSTM cells
HP = 128        # per-gate padded width (lane-aligned gate slices on all gens)
G = 4 * HP      # fused gate width per cell (gate order i, f, g, o)


def _lstm_seq_kernel(chunk, B,
                     x_ref,       # (chunk, B, 1)   time chunk of the input
                     wa_ref,      # (HP, 2G) bf16   [w1h | wih2] applied to h1
                     wb_ref,      # (HP, G)  bf16   whh2 applied to h2
                     w1x_ref,     # (1, G)   f32    cell-1 input weight row
                     b1_ref,      # (1, G)   f32    cell-1 fused bias
                     b2_ref,      # (1, G)   f32    cell-2 fused bias
                     wlin_ref,    # (1, HP)  f32    final Linear weight row
                     blin_ref,    # (1, 1)   f32    final Linear bias
                     out_ref,     # (B, chunk)      lane-dense output chunk
                     hist_ref,    # VMEM (chunk, B, HP) h2 history (this chunk)
                     state_ref):  # VMEM (4, B, HP)     h1, c1, h2, c2 carry
    @pl.when(pl.program_id(0) == 0)
    def _init():                                  # torch.zeros initial state
        state_ref[...] = jnp.zeros_like(state_ref)

    # small loop-invariant parameters, hoisted into vregs
    w1x = w1x_ref[...]                            # (1, G)
    b1 = b1_ref[...]                              # (1, G)
    b2 = b2_ref[...]                              # (1, G)

    def xin(idx):
        # cell-1 input projection + bias: (B,1)*(1,G) broadcast, pure VPU
        return x_ref[idx] * w1x + b1              # (B, G)

    def lstm_gates(pre, c):
        # lanes [0,HP)=i, [HP,2HP)=f, [2HP,3HP)=g, [3HP,4HP)=o
        sig_if = jax.nn.sigmoid(pre[:, :2 * HP])  # i and f in one EUP slab
        i_g = sig_if[:, :HP]
        f_g = sig_if[:, HP:]
        g_g = jnp.tanh(pre[:, 2 * HP:3 * HP])
        o_g = jax.nn.sigmoid(pre[:, 3 * HP:])
        c_new = f_g * c + i_g * g_g
        h_new = o_g * jnp.tanh(c_new)
        return h_new, c_new

    # ---- per-chunk prologue: rebuild pre1 for the chunk's first step --------
    h1 = state_ref[0]
    c1 = state_ref[1]
    h2 = state_ref[2]
    c2 = state_ref[3]
    pre1 = xin(0) + jnp.dot(h1.astype(jnp.bfloat16), wa_ref[...],
                            preferred_element_type=jnp.float32)[:, :G]

    def step(tl, carry):
        pre1, c1, h2_prev, c2, _ = carry
        # --- critical chain: gates1 -> fused matmul_A on h1 ------------------
        h1, c1 = lstm_gates(pre1, c1)
        z = jnp.dot(h1.astype(jnp.bfloat16), wa_ref[...],
                    preferred_element_type=jnp.float32)        # (B, 2G)
        # --- off the critical path: h2 recurrence -----------------------------
        r = jnp.dot(h2_prev.astype(jnp.bfloat16), wb_ref[...],
                    preferred_element_type=jnp.float32)        # (B, G)
        pre2 = z[:, G:] + r + b2
        h2, c2 = lstm_gates(pre2, c2)
        hist_ref[tl] = h2                 # final Linear applied after the loop
        # --- skewed pre1 for the next step (clamped at the chunk boundary;
        #     the next chunk's prologue recomputes its pre1 from carried h1) ---
        pre1_next = z[:, :G] + xin(jnp.minimum(tl + 1, chunk - 1))
        return pre1_next, c1, h2, c2, h1

    unroll = True if chunk <= 32 else 16
    _, c1_f, h2_f, c2_f, h1_f = lax.fori_loop(
        0, chunk, step, (pre1, c1, h2, c2, h1), unroll=unroll)

    # ---- chunk epilogue: state writeback + hoisted Linear, lane-dense store --
    state_ref[0] = h1_f
    state_ref[1] = c1_f
    state_ref[2] = h2_f
    state_ref[3] = c2_f
    h_all = hist_ref[...]                                        # (chunk, B, HP)
    y = jnp.sum(h_all * wlin_ref[...][None, :, :], axis=-1)      # (chunk, B)
    out_ref[...] = jnp.transpose(y) + blin_ref[...]              # (B, chunk)


def _pack_params(p):
    """Pack per-gate params into fused, lane-padded layouts (gate order i,f,g,o).

    Padded lanes/rows are zero, so (with zero-initialized state) the padded
    lanes of h and c stay exactly 0 through the recurrence; bf16 casts keep
    zeros exact.
    """
    def gates_to_lanes(w):                         # (4, r, H) -> (r, G)
        out = jnp.zeros((w.shape[1], G), jnp.float32)
        for k in range(4):
            out = out.at[:, k * HP:k * HP + H].set(w[k])
        return out

    def pad_rows(w, rows):                         # (r, G) -> (rows, G)
        return jnp.zeros((rows, G), jnp.float32).at[:w.shape[0]].set(w)

    w1x = gates_to_lanes(p["wih1"])                               # (1, G)
    b1 = gates_to_lanes(p["b1"])                                  # (1, G)
    w1h = pad_rows(gates_to_lanes(p["whh1"]), HP)                 # (HP, G)
    wih2 = pad_rows(gates_to_lanes(p["wih2"]), HP)                # (HP, G)
    whh2 = pad_rows(gates_to_lanes(p["whh2"]), HP)                # (HP, G)
    wa = jnp.concatenate([w1h, wih2], axis=1).astype(jnp.bfloat16)  # (HP, 2G)
    wb = whh2.astype(jnp.bfloat16)                                  # (HP, G)
    b2 = gates_to_lanes(p["b2"])                                  # (1, G)
    wlin = jnp.zeros((1, HP), jnp.float32).at[0, :H].set(p["wlin"][:, 0])
    blin = p["blin"].astype(jnp.float32)                          # (1, 1)
    return wa, wb, w1x, b1, b2, wlin, blin


def _const_spec(arr):
    nd = arr.ndim

    def idx(c):
        return (0,) * nd

    return pl.BlockSpec(arr.shape, idx)


def sequence_forward(x, p, future=0):
    """x: (B, T) float32 -> (B, T + future) float32 (Pallas kernel)."""
    B, T = x.shape
    total = T + future
    chunk = 128 if total > 128 else total
    num_chunks = (total + chunk - 1) // chunk
    t_pad = num_chunks * chunk

    # In practice packing would be done once at init; it is pure layout.
    wa, wb, w1x, b1, b2, wlin, blin = _pack_params(p)

    x = x.astype(jnp.float32)
    if t_pad > T:   # future steps (and chunk padding) re-feed the last column
        x = jnp.concatenate([x, jnp.tile(x[:, -1:], (1, t_pad - T))], axis=1)
    # (t_pad, B, 1): first-axis (time) indexing in-kernel yields (B, 1) columns
    # that broadcast against (1, G) weights with zero relayout cost.  The
    # per-chunk VMEM block is small (chunk x B_pad x 128 f32); for very large B
    # shrink `chunk` to bound the lane padding.
    x_tm = jnp.transpose(x)[:, :, None]

    kernel = functools.partial(_lstm_seq_kernel, chunk, B)

    bpad = ((B + 7) // 8) * 8
    vmem_est = (2 * chunk * bpad * 128 * 4                      # x blocks (2x)
                + 2 * (wa.size + wb.size) * 2                   # bf16 weights
                + 2 * (w1x.size + b1.size + b2.size + wlin.size + blin.size) * 4
                + 2 * bpad * max(chunk, 128) * 4                # out blocks
                + chunk * bpad * 128 * 4                        # hist scratch
                + 4 * bpad * 128 * 4)                           # carried state
    vmem_limit = int(min(100 * 2**20, max(16 * 2**20, 2 * vmem_est)))

    out = pl.pallas_call(
        kernel,
        out_shape=jax.ShapeDtypeStruct((B, t_pad), jnp.float32),
        grid_spec=pltpu.PrefetchScalarGridSpec(
            num_scalar_prefetch=0,
            grid=(num_chunks,),
            in_specs=[pl.BlockSpec((chunk, B, 1), lambda c: (c, 0, 0)),
                      _const_spec(wa), _const_spec(wb), _const_spec(w1x),
                      _const_spec(b1), _const_spec(b2), _const_spec(wlin),
                      _const_spec(blin)],
            out_specs=pl.BlockSpec((B, chunk), lambda c: (0, c)),
            scratch_shapes=[pltpu.VMEM((chunk, B, HP), jnp.float32),   # hist
                            pltpu.VMEM((4, B, HP), jnp.float32)]),     # state
        compiler_params=pltpu.CompilerParams(
            dimension_semantics=("arbitrary",),      # sequential recurrence
            vmem_limit_bytes=vmem_limit),
    )(x_tm, wa, wb, w1x, b1, b2, wlin, blin)
    return out[:, :total]


def init_params(key):
    """Deterministic init mirroring PyTorch default uniform(-1/sqrt(H), 1/sqrt(H)).

    Weights stored per-gate, already transposed for x @ W use:
      wih: (4, in_dim, H), whh: (4, H, H), b: (4, 1, H) (= b_ih + b_hh),
      wlin: (H, 1), blin: (1, 1).  Gate order: i, f, g, o.
    """
    bound = 1.0 / np.sqrt(H)
    ks = jax.random.split(key, 10)

    def u(k, shape):
        return jax.random.uniform(k, shape, jnp.float32, -bound, bound)

    return {
        "wih1": u(ks[0], (4, 1, H)),
        "whh1": u(ks[1], (4, H, H)),
        "b1":   u(ks[2], (4, 1, H)) + u(ks[3], (4, 1, H)),
        "wih2": u(ks[4], (4, H, H)),
        "whh2": u(ks[5], (4, H, H)),
        "b2":   u(ks[6], (4, 1, H)) + u(ks[7], (4, 1, H)),
        "wlin": u(ks[8], (H, 1)),
        "blin": u(ks[9], (1, 1)),
    }


def sequence_forward_ref(x, p, future=0):
    """Plain-JAX f32 reference of the PyTorch forward (correctness check)."""
    B, T = x.shape
    h1 = jnp.zeros((B, H), jnp.float32)
    c1 = jnp.zeros((B, H), jnp.float32)
    h2 = jnp.zeros((B, H), jnp.float32)
    c2 = jnp.zeros((B, H), jnp.float32)

    def cell(x_t, h, c, wih, whh, b):
        def pre(k):
            return x_t @ wih[k] + h @ whh[k] + b[k]
        i = jax.nn.sigmoid(pre(0))
        f = jax.nn.sigmoid(pre(1))
        g = jnp.tanh(pre(2))
        o = jax.nn.sigmoid(pre(3))
        c = f * c + i * g
        h = o * jnp.tanh(c)
        return h, c

    outs = []
    x_t = x[:, 0:1]
    for t in range(T):
        x_t = x[:, t:t + 1]
        h1, c1 = cell(x_t, h1, c1, p["wih1"], p["whh1"], p["b1"])
        h2, c2 = cell(h1, h2, c2, p["wih2"], p["whh2"], p["b2"])
        outs.append(h2 @ p["wlin"] + p["blin"])
    for _ in range(future):        # spec feeds the last input column again
        h1, c1 = cell(x_t, h1, c1, p["wih1"], p["whh1"], p["b1"])
        h2, c2 = cell(h1, h2, c2, p["wih2"], p["whh2"], p["b2"])
        outs.append(h2 @ p["wlin"] + p["blin"])
    return jnp.concatenate(outs, axis=1)  # (B, T + future)


if __name__ == "__main__":
    key = jax.random.PRNGKey(0)
    pkey, xkey = jax.random.split(key)

    B, T, FUT = 2, 8, 4
    params = init_params(pkey)
    x = jax.random.normal(xkey, (B, T), jnp.float32)

    out = sequence_forward(x, params, future=FUT)
    out = jax.block_until_ready(out)

    ref = sequence_forward_ref(x, params, future=FUT)
    assert out.shape == (B, T + FUT), out.shape
    # Tolerance loosened vs. the all-f32 version: matmul operands are bf16
    # (weights + per-step LHS), accumulation f32.
    np.testing.assert_allclose(np.asarray(out), np.asarray(ref),
                               rtol=2e-2, atol=2e-2)
    print("KERNEL_OK")
</pallas_src>

<mosaic_0001>
module attributes {stable_mosaic.version = 11 : i64} {
  func.func @_lstm_seq_kernel(%arg0: i32, %arg1: memref<12x2x1xf32, #tpu.memory_space<vmem>>, %arg2: memref<128x1024xbf16, #tpu.memory_space<vmem>>, %arg3: memref<128x512xbf16, #tpu.memory_space<vmem>>, %arg4: memref<1x512xf32, #tpu.memory_space<vmem>>, %arg5: memref<1x512xf32, #tpu.memory_space<vmem>>, %arg6: memref<1x512xf32, #tpu.memory_space<vmem>>, %arg7: memref<1x128xf32, #tpu.memory_space<vmem>>, %arg8: memref<1x1xf32, #tpu.memory_space<vmem>>, %arg9: memref<2x12xf32, #tpu.memory_space<vmem>>, %arg10: memref<12x2x128xf32, #tpu.memory_space<vmem>>, %arg11: memref<4x2x128xf32, #tpu.memory_space<vmem>>) attributes {dimension_semantics = [#tpu.dimension_semantics<arbitrary>], iteration_bounds = array<i64: 1>, scalar_prefetch = 0 : i64, scratch_operands = 2 : i64, tpu.core_type = #tpu.core_type<tc>, window_params = [{transform_indices = @transform_0, window_bounds = array<i64: 12, 2, 1>}, {pipeline_mode = #tpu.pipeline_mode<synchronous>, transform_indices = @transform_1, window_bounds = array<i64: 128, 1024>}, {pipeline_mode = #tpu.pipeline_mode<synchronous>, transform_indices = @transform_2, window_bounds = array<i64: 128, 512>}, {pipeline_mode = #tpu.pipeline_mode<synchronous>, transform_indices = @transform_3, window_bounds = array<i64: 1, 512>}, {pipeline_mode = #tpu.pipeline_mode<synchronous>, transform_indices = @transform_4, window_bounds = array<i64: 1, 512>}, {pipeline_mode = #tpu.pipeline_mode<synchronous>, transform_indices = @transform_5, window_bounds = array<i64: 1, 512>}, {pipeline_mode = #tpu.pipeline_mode<synchronous>, transform_indices = @transform_6, window_bounds = array<i64: 1, 128>}, {pipeline_mode = #tpu.pipeline_mode<synchronous>, transform_indices = @transform_7, window_bounds = array<i64: 1, 1>}, {transform_indices = @transform_8, window_bounds = array<i64: 2, 12>}]} {
    %c0_i32 = arith.constant 0 : i32
    %0 = arith.cmpi eq, %arg0, %c0_i32 : i32
    %1 = arith.extui %0 : i1 to i32
    %c0_i32_0 = arith.constant 0 : i32
    %2 = arith.cmpi ne, %1, %c0_i32_0 : i32
    scf.if %2 {
      %cst_235 = arith.constant 0.000000e+00 : f32
      %865 = vector.broadcast %cst_235 : f32 to vector<4x2x128xf32>
      %c0_236 = arith.constant 0 : index
      %c0_237 = arith.constant 0 : index
      %c0_238 = arith.constant 0 : index
      %866 = vector.load %arg11[%c0_236, %c0_237, %c0_238] : memref<4x2x128xf32, #tpu.memory_space<vmem>>, vector<4x2x128xf32>
      tpu.vector_store %arg11[%c0_236, %c0_237, %c0_238], %865 {strides = array<i32>} : memref<4x2x128xf32, #tpu.memory_space<vmem>>, vector<4x2x128xf32>,
    } else {
    }
    %c0 = arith.constant 0 : index
    %c0_1 = arith.constant 0 : index
    %3 = vector.load %arg4[%c0, %c0_1] : memref<1x512xf32, #tpu.memory_space<vmem>>, vector<1x512xf32>
    %c0_2 = arith.constant 0 : index
    %c0_3 = arith.constant 0 : index
    %4 = vector.load %arg5[%c0_2, %c0_3] : memref<1x512xf32, #tpu.memory_space<vmem>>, vector<1x512xf32>
    %c0_4 = arith.constant 0 : index
    %c0_5 = arith.constant 0 : index
    %5 = vector.load %arg6[%c0_4, %c0_5] : memref<1x512xf32, #tpu.memory_space<vmem>>, vector<1x512xf32>
    %c0_6 = arith.constant 0 : index
    %c0_7 = arith.constant 0 : index
    %c0_8 = arith.constant 0 : index
    %6 = vector.load %arg11[%c0_6, %c0_7, %c0_8] : memref<4x2x128xf32, #tpu.memory_space<vmem>>, vector<1x2x128xf32>
    %7 = vector.shape_cast %6 : vector<1x2x128xf32> to vector<2x128xf32>
    %c1 = arith.constant 1 : index
    %c0_9 = arith.constant 0 : index
    %c0_10 = arith.constant 0 : index
    %8 = vector.load %arg11[%c1, %c0_9, %c0_10] : memref<4x2x128xf32, #tpu.memory_space<vmem>>, vector<1x2x128xf32>
    %9 = vector.shape_cast %8 : vector<1x2x128xf32> to vector<2x128xf32>
    %c2 = arith.constant 2 : index
    %c0_11 = arith.constant 0 : index
    %c0_12 = arith.constant 0 : index
    %10 = vector.load %arg11[%c2, %c0_11, %c0_12] : memref<4x2x128xf32, #tpu.memory_space<vmem>>, vector<1x2x128xf32>
    %11 = vector.shape_cast %10 : vector<1x2x128xf32> to vector<2x128xf32>
    %c3 = arith.constant 3 : index
    %c0_13 = arith.constant 0 : index
    %c0_14 = arith.constant 0 : index
    %12 = vector.load %arg11[%c3, %c0_13, %c0_14] : memref<4x2x128xf32, #tpu.memory_space<vmem>>, vector<1x2x128xf32>
    %13 = vector.shape_cast %12 : vector<1x2x128xf32> to vector<2x128xf32>
    %c0_15 = arith.constant 0 : index
    %c0_16 = arith.constant 0 : index
    %c0_17 = arith.constant 0 : index
    %14 = vector.load %arg1[%c0_15, %c0_16, %c0_17] : memref<12x2x1xf32, #tpu.memory_space<vmem>>, vector<1x2x1xf32>
    %15 = vector.shape_cast %14 : vector<1x2x1xf32> to vector<2x1xf32>
    %16 = vector.broadcast %15 : vector<2x1xf32> to vector<2x512xf32>
    %17 = vector.broadcast %3 : vector<1x512xf32> to vector<2x512xf32>
    %18 = arith.mulf %16, %17 : vector<2x512xf32>
    %19 = vector.broadcast %4 : vector<1x512xf32> to vector<2x512xf32>
    %20 = arith.addf %18, %19 : vector<2x512xf32>
    %21 = arith.truncf %7 : vector<2x128xf32> to vector<2x128xbf16>
    %c0_18 = arith.constant 0 : index
    %c0_19 = arith.constant 0 : index
    %22 = vector.load %arg2[%c0_18, %c0_19] : memref<128x1024xbf16, #tpu.memory_space<vmem>>, vector<128x1024xbf16>
    %cst = arith.constant dense<0.000000e+00> : vector<2x1024xf32>
    %23 = tpu.matmul %21, %22, %cst {dimension_numbers = #tpu.dot_dimension_numbers<[1], [0], [0], [1], [0, 0, 1, 1], [], []>} : vector<2x128xbf16>, vector<128x1024xbf16>, vector<2x1024xf32> -> vector<2x1024xf32>
    %24 = vector.extract_strided_slice %23 {offsets = [0, 0], sizes = [2, 512], strides = [1, 1]} : vector<2x1024xf32> to vector<2x512xf32>
    %25 = arith.addf %20, %24 : vector<2x512xf32>
    %c0_i32_20 = arith.constant 0 : i32
    %26 = vector.extract_strided_slice %25 {offsets = [0, 0], sizes = [2, 256], strides = [1, 1]} : vector<2x512xf32> to vector<2x256xf32>
    %27 = arith.negf %26 : vector<2x256xf32>
    %28 = math.exp %27 : vector<2x256xf32>
    %cst_21 = arith.constant 1.000000e+00 : f32
    %29 = vector.broadcast %cst_21 : f32 to vector<2x256xf32>
    %30 = arith.addf %29, %28 : vector<2x256xf32>
    %31 = arith.divf %29, %30 : vector<2x256xf32>
    %32 = vector.extract_strided_slice %31 {offsets = [0, 0], sizes = [2, 128], strides = [1, 1]} : vector<2x256xf32> to vector<2x128xf32>
    %33 = vector.extract_strided_slice %31 {offsets = [0, 128], sizes = [2, 128], strides = [1, 1]} : vector<2x256xf32> to vector<2x128xf32>
    %34 = vector.extract_strided_slice %25 {offsets = [0, 256], sizes = [2, 128], strides = [1, 1]} : vector<2x512xf32> to vector<2x128xf32>
    %35 = math.tanh %34 : vector<2x128xf32>
    %36 = vector.extract_strided_slice %25 {offsets = [0, 384], sizes = [2, 128], strides = [1, 1]} : vector<2x512xf32> to vector<2x128xf32>
    %37 = arith.negf %36 : vector<2x128xf32>
    %38 = math.exp %37 : vector<2x128xf32>
    %cst_22 = arith.constant 1.000000e+00 : f32
    %39 = vector.broadcast %cst_22 : f32 to vector<2x128xf32>
    %40 = arith.addf %39, %38 : vector<2x128xf32>
    %41 = arith.divf %39, %40 : vector<2x128xf32>
    %42 = arith.mulf %33, %9 : vector<2x128xf32>
    %43 = arith.mulf %32, %35 : vector<2x128xf32>
    %44 = arith.addf %42, %43 : vector<2x128xf32>
    %45 = math.tanh %44 : vector<2x128xf32>
    %46 = arith.mulf %41, %45 : vector<2x128xf32>
    %47 = arith.truncf %46 : vector<2x128xf32> to vector<2x128xbf16>
    %c0_23 = arith.constant 0 : index
    %c0_24 = arith.constant 0 : index
    %48 = vector.load %arg2[%c0_23, %c0_24] : memref<128x1024xbf16, #tpu.memory_space<vmem>>, vector<128x1024xbf16>
    %cst_25 = arith.constant dense<0.000000e+00> : vector<2x1024xf32>
    %49 = tpu.matmul %47, %48, %cst_25 {dimension_numbers = #tpu.dot_dimension_numbers<[1], [0], [0], [1], [0, 0, 1, 1], [], []>} : vector<2x128xbf16>, vector<128x1024xbf16>, vector<2x1024xf32> -> vector<2x1024xf32>
    %50 = arith.truncf %11 : vector<2x128xf32> to vector<2x128xbf16>
    %c0_26 = arith.constant 0 : index
    %c0_27 = arith.constant 0 : index
    %51 = vector.load %arg3[%c0_26, %c0_27] : memref<128x512xbf16, #tpu.memory_space<vmem>>, vector<128x512xbf16>
    %cst_28 = arith.constant dense<0.000000e+00> : vector<2x512xf32>
    %52 = tpu.matmul %50, %51, %cst_28 {dimension_numbers = #tpu.dot_dimension_numbers<[1], [0], [0], [1], [0, 0, 1, 1], [], []>} : vector<2x128xbf16>, vector<128x512xbf16>, vector<2x512xf32> -> vector<2x512xf32>
    %53 = vector.extract_strided_slice %49 {offsets = [0, 512], sizes = [2, 512], strides = [1, 1]} : vector<2x1024xf32> to vector<2x512xf32>
    %54 = arith.addf %53, %52 : vector<2x512xf32>
    %55 = vector.broadcast %5 : vector<1x512xf32> to vector<2x512xf32>
    %56 = arith.addf %54, %55 : vector<2x512xf32>
    %57 = vector.extract_strided_slice %56 {offsets = [0, 0], sizes = [2, 256], strides = [1, 1]} : vector<2x512xf32> to vector<2x256xf32>
    %58 = arith.negf %57 : vector<2x256xf32>
    %59 = math.exp %58 : vector<2x256xf32>
    %cst_29 = arith.constant 1.000000e+00 : f32
    %60 = vector.broadcast %cst_29 : f32 to vector<2x256xf32>
    %61 = arith.addf %60, %59 : vector<2x256xf32>
    %62 = arith.divf %60, %61 : vector<2x256xf32>
    %63 = vector.extract_strided_slice %62 {offsets = [0, 0], sizes = [2, 128], strides = [1, 1]} : vector<2x256xf32> to vector<2x128xf32>
    %64 = vector.extract_strided_slice %62 {offsets = [0, 128], sizes = [2, 128], strides = [1, 1]} : vector<2x256xf32> to vector<2x128xf32>
    %65 = vector.extract_strided_slice %56 {offsets = [0, 256], sizes = [2, 128], strides = [1, 1]} : vector<2x512xf32> to vector<2x128xf32>
    %66 = math.tanh %65 : vector<2x128xf32>
    %67 = vector.extract_strided_slice %56 {offsets = [0, 384], sizes = [2, 128], strides = [1, 1]} : vector<2x512xf32> to vector<2x128xf32>
    %68 = arith.negf %67 : vector<2x128xf32>
    %69 = math.exp %68 : vector<2x128xf32>
    %cst_30 = arith.constant 1.000000e+00 : f32
    %70 = vector.broadcast %cst_30 : f32 to vector<2x128xf32>
    %71 = arith.addf %70, %69 : vector<2x128xf32>
    %72 = arith.divf %70, %71 : vector<2x128xf32>
    %73 = arith.mulf %64, %13 : vector<2x128xf32>
    %74 = arith.mulf %63, %66 : vector<2x128xf32>
    %75 = arith.addf %73, %74 : vector<2x128xf32>
    %76 = math.tanh %75 : vector<2x128xf32>
    %77 = arith.mulf %72, %76 : vector<2x128xf32>
    %78 = arith.index_cast %c0_i32_20 : i32 to index
    %c0_31 = arith.constant 0 : index
    %c0_32 = arith.constant 0 : index
    %79 = vector.load %arg10[%78, %c0_31, %c0_32] : memref<12x2x128xf32, #tpu.memory_space<vmem>>, vector<1x2x128xf32>
    %80 = vector.shape_cast %79 : vector<1x2x128xf32> to vector<2x128xf32>
    %81 = vector.shape_cast %77 : vector<2x128xf32> to vector<1x2x128xf32>
    tpu.vector_store %arg10[%78, %c0_31, %c0_32], %81 {strides = array<i32>} : memref<12x2x128xf32, #tpu.memory_space<vmem>>, vector<1x2x128xf32>,
    %82 = vector.extract_strided_slice %49 {offsets = [0, 0], sizes = [2, 512], strides = [1, 1]} : vector<2x1024xf32> to vector<2x512xf32>
    %c1_i32 = arith.constant 1 : i32
    %83 = arith.addi %c0_i32_20, %c1_i32 : i32
    %c11_i32 = arith.constant 11 : i32
    %84 = arith.minsi %83, %c11_i32 : i32
    %85 = arith.index_cast %84 : i32 to index
    %c0_33 = arith.constant 0 : index
    %c0_34 = arith.constant 0 : index
    %86 = vector.load %arg1[%85, %c0_33, %c0_34] : memref<12x2x1xf32, #tpu.memory_space<vmem>>, vector<1x2x1xf32>
    %87 = vector.shape_cast %86 : vector<1x2x1xf32> to vector<2x1xf32>
    %88 = vector.broadcast %87 : vector<2x1xf32> to vector<2x512xf32>
    %89 = vector.broadcast %3 : vector<1x512xf32> to vector<2x512xf32>
    %90 = arith.mulf %88, %89 : vector<2x512xf32>
    %91 = vector.broadcast %4 : vector<1x512xf32> to vector<2x512xf32>
    %92 = arith.addf %90, %91 : vector<2x512xf32>
    %93 = arith.addf %82, %92 : vector<2x512xf32>
    %c1_i32_35 = arith.constant 1 : i32
    %94 = vector.extract_strided_slice %93 {offsets = [0, 0], sizes = [2, 256], strides = [1, 1]} : vector<2x512xf32> to vector<2x256xf32>
    %95 = arith.negf %94 : vector<2x256xf32>
    %96 = math.exp %95 : vector<2x256xf32>
    %cst_36 = arith.constant 1.000000e+00 : f32
    %97 = vector.broadcast %cst_36 : f32 to vector<2x256xf32>
    %98 = arith.addf %97, %96 : vector<2x256xf32>
    %99 = arith.divf %97, %98 : vector<2x256xf32>
    %100 = vector.extract_strided_slice %99 {offsets = [0, 0], sizes = [2, 128], strides = [1, 1]} : vector<2x256xf32> to vector<2x128xf32>
    %101 = vector.extract_strided_slice %99 {offsets = [0, 128], sizes = [2, 128], strides = [1, 1]} : vector<2x256xf32> to vector<2x128xf32>
    %102 = vector.extract_strided_slice %93 {offsets = [0, 256], sizes = [2, 128], strides = [1, 1]} : vector<2x512xf32> to vector<2x128xf32>
    %103 = math.tanh %102 : vector<2x128xf32>
    %104 = vector.extract_strided_slice %93 {offsets = [0, 384], sizes = [2, 128], strides = [1, 1]} : vector<2x512xf32> to vector<2x128xf32>
    %105 = arith.negf %104 : vector<2x128xf32>
    %106 = math.exp %105 : vector<2x128xf32>
    %cst_37 = arith.constant 1.000000e+00 : f32
    %107 = vector.broadcast %cst_37 : f32 to vector<2x128xf32>
    %108 = arith.addf %107, %106 : vector<2x128xf32>
    %109 = arith.divf %107, %108 : vector<2x128xf32>
    %110 = arith.mulf %101, %44 : vector<2x128xf32>
    %111 = arith.mulf %100, %103 : vector<2x128xf32>
    %112 = arith.addf %110, %111 : vector<2x128xf32>
    %113 = math.tanh %112 : vector<2x128xf32>
    %114 = arith.mulf %109, %113 : vector<2x128xf32>
    %115 = arith.truncf %114 : vector<2x128xf32> to vector<2x128xbf16>
    %c0_38 = arith.constant 0 : index
    %c0_39 = arith.constant 0 : index
    %116 = vector.load %arg2[%c0_38, %c0_39] : memref<128x1024xbf16, #tpu.memory_space<vmem>>, vector<128x1024xbf16>
    %cst_40 = arith.constant dense<0.000000e+00> : vector<2x1024xf32>
    %117 = tpu.matmul %115, %116, %cst_40 {dimension_numbers = #tpu.dot_dimension_numbers<[1], [0], [0], [1], [0, 0, 1, 1], [], []>} : vector<2x128xbf16>, vector<128x1024xbf16>, vector<2x1024xf32> -> vector<2x1024xf32>
    %118 = arith.truncf %77 : vector<2x128xf32> to vector<2x128xbf16>
    %c0_41 = arith.constant 0 : index
    %c0_42 = arith.constant 0 : index
    %119 = vector.load %arg3[%c0_41, %c0_42] : memref<128x512xbf16, #tpu.memory_space<vmem>>, vector<128x512xbf16>
    %cst_43 = arith.constant dense<0.000000e+00> : vector<2x512xf32>
    %120 = tpu.matmul %118, %119, %cst_43 {dimension_numbers = #tpu.dot_dimension_numbers<[1], [0], [0], [1], [0, 0, 1, 1], [], []>} : vector<2x128xbf16>, vector<128x512xbf16>, vector<2x512xf32> -> vector<2x512xf32>
    %121 = vector.extract_strided_slice %117 {offsets = [0, 512], sizes = [2, 512], strides = [1, 1]} : vector<2x1024xf32> to vector<2x512xf32>
    %122 = arith.addf %121, %120 : vector<2x512xf32>
    %123 = vector.broadcast %5 : vector<1x512xf32> to vector<2x512xf32>
    %124 = arith.addf %122, %123 : vector<2x512xf32>
    %125 = vector.extract_strided_slice %124 {offsets = [0, 0], sizes = [2, 256], strides = [1, 1]} : vector<2x512xf32> to vector<2x256xf32>
    %126 = arith.negf %125 : vector<2x256xf32>
    %127 = math.exp %126 : vector<2x256xf32>
    %cst_44 = arith.constant 1.000000e+00 : f32
    %128 = vector.broadcast %cst_44 : f32 to vector<2x256xf32>
    %129 = arith.addf %128, %127 : vector<2x256xf32>
    %130 = arith.divf %128, %129 : vector<2x256xf32>
    %131 = vector.extract_strided_slice %130 {offsets = [0, 0], sizes = [2, 128], strides = [1, 1]} : vector<2x256xf32> to vector<2x128xf32>
    %132 = vector.extract_strided_slice %130 {offsets = [0, 128], sizes = [2, 128], strides = [1, 1]} : vector<2x256xf32> to vector<2x128xf32>
    %133 = vector.extract_strided_slice %124 {offsets = [0, 256], sizes = [2, 128], strides = [1, 1]} : vector<2x512xf32> to vector<2x128xf32>
    %134 = math.tanh %133 : vector<2x128xf32>
    %135 = vector.extract_strided_slice %124 {offsets = [0, 384], sizes = [2, 128], strides = [1, 1]} : vector<2x512xf32> to vector<2x128xf32>
    %136 = arith.negf %135 : vector<2x128xf32>
    %137 = math.exp %136 : vector<2x128xf32>
    %cst_45 = arith.constant 1.000000e+00 : f32
    %138 = vector.broadcast %cst_45 : f32 to vector<2x128xf32>
    %139 = arith.addf %138, %137 : vector<2x128xf32>
    %140 = arith.divf %138, %139 : vector<2x128xf32>
    %141 = arith.mulf %132, %75 : vector<2x128xf32>
    %142 = arith.mulf %131, %134 : vector<2x128xf32>
    %143 = arith.addf %141, %142 : vector<2x128xf32>
    %144 = math.tanh %143 : vector<2x128xf32>
    %145 = arith.mulf %140, %144 : vector<2x128xf32>
    %146 = arith.index_cast %c1_i32_35 : i32 to index
    %c0_46 = arith.constant 0 : index
    %c0_47 = arith.constant 0 : index
    %147 = vector.load %arg10[%146, %c0_46, %c0_47] : memref<12x2x128xf32, #tpu.memory_space<vmem>>, vector<1x2x128xf32>
    %148 = vector.shape_cast %147 : vector<1x2x128xf32> to vector<2x128xf32>
    %149 = vector.shape_cast %145 : vector<2x128xf32> to vector<1x2x128xf32>
    tpu.vector_store %arg10[%146, %c0_46, %c0_47], %149 {strides = array<i32>} : memref<12x2x128xf32, #tpu.memory_space<vmem>>, vector<1x2x128xf32>,
    %150 = vector.extract_strided_slice %117 {offsets = [0, 0], sizes = [2, 512], strides = [1, 1]} : vector<2x1024xf32> to vector<2x512xf32>
    %c1_i32_48 = arith.constant 1 : i32
    %151 = arith.addi %c1_i32_35, %c1_i32_48 : i32
    %c11_i32_49 = arith.constant 11 : i32
    %152 = arith.minsi %151, %c11_i32_49 : i32
    %153 = arith.index_cast %152 : i32 to index
    %c0_50 = arith.constant 0 : index
    %c0_51 = arith.constant 0 : index
    %154 = vector.load %arg1[%153, %c0_50, %c0_51] : memref<12x2x1xf32, #tpu.memory_space<vmem>>, vector<1x2x1xf32>
    %155 = vector.shape_cast %154 : vector<1x2x1xf32> to vector<2x1xf32>
    %156 = vector.broadcast %155 : vector<2x1xf32> to vector<2x512xf32>
    %157 = vector.broadcast %3 : vector<1x512xf32> to vector<2x512xf32>
    %158 = arith.mulf %156, %157 : vector<2x512xf32>
    %159 = vector.broadcast %4 : vector<1x512xf32> to vector<2x512xf32>
    %160 = arith.addf %158, %159 : vector<2x512xf32>
    %161 = arith.addf %150, %160 : vector<2x512xf32>
    %c2_i32 = arith.constant 2 : i32
    %162 = vector.extract_strided_slice %161 {offsets = [0, 0], sizes = [2, 256], strides = [1, 1]} : vector<2x512xf32> to vector<2x256xf32>
    %163 = arith.negf %162 : vector<2x256xf32>
    %164 = math.exp %163 : vector<2x256xf32>
    %cst_52 = arith.constant 1.000000e+00 : f32
    %165 = vector.broadcast %cst_52 : f32 to vector<2x256xf32>
    %166 = arith.addf %165, %164 : vector<2x256xf32>
    %167 = arith.divf %165, %166 : vector<2x256xf32>
    %168 = vector.extract_strided_slice %167 {offsets = [0, 0], sizes = [2, 128], strides = [1, 1]} : vector<2x256xf32> to vector<2x128xf32>
    %169 = vector.extract_strided_slice %167 {offsets = [0, 128], sizes = [2, 128], strides = [1, 1]} : vector<2x256xf32> to vector<2x128xf32>
    %170 = vector.extract_strided_slice %161 {offsets = [0, 256], sizes = [2, 128], strides = [1, 1]} : vector<2x512xf32> to vector<2x128xf32>
    %171 = math.tanh %170 : vector<2x128xf32>
    %172 = vector.extract_strided_slice %161 {offsets = [0, 384], sizes = [2, 128], strides = [1, 1]} : vector<2x512xf32> to vector<2x128xf32>
    %173 = arith.negf %172 : vector<2x128xf32>
    %174 = math.exp %173 : vector<2x128xf32>
    %cst_53 = arith.constant 1.000000e+00 : f32
    %175 = vector.broadcast %cst_53 : f32 to vector<2x128xf32>
    %176 = arith.addf %175, %174 : vector<2x128xf32>
    %177 = arith.divf %175, %176 : vector<2x128xf32>
    %178 = arith.mulf %169, %112 : vector<2x128xf32>
    %179 = arith.mulf %168, %171 : vector<2x128xf32>
    %180 = arith.addf %178, %179 : vector<2x128xf32>
    %181 = math.tanh %180 : vector<2x128xf32>
    %182 = arith.mulf %177, %181 : vector<2x128xf32>
    %183 = arith.truncf %182 : vector<2x128xf32> to vector<2x128xbf16>
    %c0_54 = arith.constant 0 : index
    %c0_55 = arith.constant 0 : index
    %184 = vector.load %arg2[%c0_54, %c0_55] : memref<128x1024xbf16, #tpu.memory_space<vmem>>, vector<128x1024xbf16>
    %cst_56 = arith.constant dense<0.000000e+00> : vector<2x1024xf32>
    %185 = tpu.matmul %183, %184, %cst_56 {dimension_numbers = #tpu.dot_dimension_numbers<[1], [0], [0], [1], [0, 0, 1, 1], [], []>} : vector<2x128xbf16>, vector<128x1024xbf16>, vector<2x1024xf32> -> vector<2x1024xf32>
    %186 = arith.truncf %145 : vector<2x128xf32> to vector<2x128xbf16>
    %c0_57 = arith.constant 0 : index
    %c0_58 = arith.constant 0 : index
    %187 = vector.load %arg3[%c0_57, %c0_58] : memref<128x512xbf16, #tpu.memory_space<vmem>>, vector<128x512xbf16>
    %cst_59 = arith.constant dense<0.000000e+00> : vector<2x512xf32>
    %188 = tpu.matmul %186, %187, %cst_59 {dimension_numbers = #tpu.dot_dimension_numbers<[1], [0], [0], [1], [0, 0, 1, 1], [], []>} : vector<2x128xbf16>, vector<128x512xbf16>, vector<2x512xf32> -> vector<2x512xf32>
    %189 = vector.extract_strided_slice %185 {offsets = [0, 512], sizes = [2, 512], strides = [1, 1]} : vector<2x1024xf32> to vector<2x512xf32>
    %190 = arith.addf %189, %188 : vector<2x512xf32>
    %191 = vector.broadcast %5 : vector<1x512xf32> to vector<2x512xf32>
    %192 = arith.addf %190, %191 : vector<2x512xf32>
    %193 = vector.extract_strided_slice %192 {offsets = [0, 0], sizes = [2, 256], strides = [1, 1]} : vector<2x512xf32> to vector<2x256xf32>
    %194 = arith.negf %193 : vector<2x256xf32>
    %195 = math.exp %194 : vector<2x256xf32>
    %cst_60 = arith.constant 1.000000e+00 : f32
    %196 = vector.broadcast %cst_60 : f32 to vector<2x256xf32>
    %197 = arith.addf %196, %195 : vector<2x256xf32>
    %198 = arith.divf %196, %197 : vector<2x256xf32>
    %199 = vector.extract_strided_slice %198 {offsets = [0, 0], sizes = [2, 128], strides = [1, 1]} : vector<2x256xf32> to vector<2x128xf32>
    %200 = vector.extract_strided_slice %198 {offsets = [0, 128], sizes = [2, 128], strides = [1, 1]} : vector<2x256xf32> to vector<2x128xf32>
    %201 = vector.extract_strided_slice %192 {offsets = [0, 256], sizes = [2, 128], strides = [1, 1]} : vector<2x512xf32> to vector<2x128xf32>
    %202 = math.tanh %201 : vector<2x128xf32>
    %203 = vector.extract_strided_slice %192 {offsets = [0, 384], sizes = [2, 128], strides = [1, 1]} : vector<2x512xf32> to vector<2x128xf32>
    %204 = arith.negf %203 : vector<2x128xf32>
    %205 = math.exp %204 : vector<2x128xf32>
    %cst_61 = arith.constant 1.000000e+00 : f32
    %206 = vector.broadcast %cst_61 : f32 to vector<2x128xf32>
    %207 = arith.addf %206, %205 : vector<2x128xf32>
    %208 = arith.divf %206, %207 : vector<2x128xf32>
    %209 = arith.mulf %200, %143 : vector<2x128xf32>
    %210 = arith.mulf %199, %202 : vector<2x128xf32>
    %211 = arith.addf %209, %210 : vector<2x128xf32>
    %212 = math.tanh %211 : vector<2x128xf32>
    %213 = arith.mulf %208, %212 : vector<2x128xf32>
    %214 = arith.index_cast %c2_i32 : i32 to index
    %c0_62 = arith.constant 0 : index
    %c0_63 = arith.constant 0 : index
    %215 = vector.load %arg10[%214, %c0_62, %c0_63] : memref<12x2x128xf32, #tpu.memory_space<vmem>>, vector<1x2x128xf32>
    %216 = vector.shape_cast %215 : vector<1x2x128xf32> to vector<2x128xf32>
    %217 = vector.shape_cast %213 : vector<2x128xf32> to vector<1x2x128xf32>
    tpu.vector_store %arg10[%214, %c0_62, %c0_63], %217 {strides = array<i32>} : memref<12x2x128xf32, #tpu.memory_space<vmem>>, vector<1x2x128xf32>,
    %218 = vector.extract_strided_slice %185 {offsets = [0, 0], sizes = [2, 512], strides = [1, 1]} : vector<2x1024xf32> to vector<2x512xf32>
    %c1_i32_64 = arith.constant 1 : i32
    %219 = arith.addi %c2_i32, %c1_i32_64 : i32
    %c11_i32_65 = arith.constant 11 : i32
    %220 = arith.minsi %219, %c11_i32_65 : i32
    %221 = arith.index_cast %220 : i32 to index
    %c0_66 = arith.constant 0 : index
    %c0_67 = arith.constant 0 : index
    %222 = vector.load %arg1[%221, %c0_66, %c0_67] : memref<12x2x1xf32, #tpu.memory_space<vmem>>, vector<1x2x1xf32>
    %223 = vector.shape_cast %222 : vector<1x2x1xf32> to vector<2x1xf32>
    %224 = vector.broadcast %223 : vector<2x1xf32> to vector<2x512xf32>
    %225 = vector.broadcast %3 : vector<1x512xf32> to vector<2x512xf32>
    %226 = arith.mulf %224, %225 : vector<2x512xf32>
    %227 = vector.broadcast %4 : vector<1x512xf32> to vector<2x512xf32>
    %228 = arith.addf %226, %227 : vector<2x512xf32>
    %229 = arith.addf %218, %228 : vector<2x512xf32>
    %c3_i32 = arith.constant 3 : i32
    %230 = vector.extract_strided_slice %229 {offsets = [0, 0], sizes = [2, 256], strides = [1, 1]} : vector<2x512xf32> to vector<2x256xf32>
    %231 = arith.negf %230 : vector<2x256xf32>
    %232 = math.exp %231 : vector<2x256xf32>
    %cst_68 = arith.constant 1.000000e+00 : f32
    %233 = vector.broadcast %cst_68 : f32 to vector<2x256xf32>
    %234 = arith.addf %233, %232 : vector<2x256xf32>
    %235 = arith.divf %233, %234 : vector<2x256xf32>
    %236 = vector.extract_strided_slice %235 {offsets = [0, 0], sizes = [2, 128], strides = [1, 1]} : vector<2x256xf32> to vector<2x128xf32>
    %237 = vector.extract_strided_slice %235 {offsets = [0, 128], sizes = [2, 128], strides = [1, 1]} : vector<2x256xf32> to vector<2x128xf32>
    %238 = vector.extract_strided_slice %229 {offsets = [0, 256], sizes = [2, 128], strides = [1, 1]} : vector<2x512xf32> to vector<2x128xf32>
    %239 = math.tanh %238 : vector<2x128xf32>
    %240 = vector.extract_strided_slice %229 {offsets = [0, 384], sizes = [2, 128], strides = [1, 1]} : vector<2x512xf32> to vector<2x128xf32>
    %241 = arith.negf %240 : vector<2x128xf32>
    %242 = math.exp %241 : vector<2x128xf32>
    %cst_69 = arith.constant 1.000000e+00 : f32
    %243 = vector.broadcast %cst_69 : f32 to vector<2x128xf32>
    %244 = arith.addf %243, %242 : vector<2x128xf32>
    %245 = arith.divf %243, %244 : vector<2x128xf32>
    %246 = arith.mulf %237, %180 : vector<2x128xf32>
    %247 = arith.mulf %236, %239 : vector<2x128xf32>
    %248 = arith.addf %246, %247 : vector<2x128xf32>
    %249 = math.tanh %248 : vector<2x128xf32>
    %250 = arith.mulf %245, %249 : vector<2x128xf32>
    %251 = arith.truncf %250 : vector<2x128xf32> to vector<2x128xbf16>
    %c0_70 = arith.constant 0 : index
    %c0_71 = arith.constant 0 : index
    %252 = vector.load %arg2[%c0_70, %c0_71] : memref<128x1024xbf16, #tpu.memory_space<vmem>>, vector<128x1024xbf16>
    %cst_72 = arith.constant dense<0.000000e+00> : vector<2x1024xf32>
    %253 = tpu.matmul %251, %252, %cst_72 {dimension_numbers = #tpu.dot_dimension_numbers<[1], [0], [0], [1], [0, 0, 1, 1], [], []>} : vector<2x128xbf16>, vector<128x1024xbf16>, vector<2x1024xf32> -> vector<2x1024xf32>
    %254 = arith.truncf %213 : vector<2x128xf32> to vector<2x128xbf16>
    %c0_73 = arith.constant 0 : index
    %c0_74 = arith.constant 0 : index
    %255 = vector.load %arg3[%c0_73, %c0_74] : memref<128x512xbf16, #tpu.memory_space<vmem>>, vector<128x512xbf16>
    %cst_75 = arith.constant dense<0.000000e+00> : vector<2x512xf32>
    %256 = tpu.matmul %254, %255, %cst_75 {dimension_numbers = #tpu.dot_dimension_numbers<[1], [0], [0], [1], [0, 0, 1, 1], [], []>} : vector<2x128xbf16>, vector<128x512xbf16>, vector<2x512xf32> -> vector<2x512xf32>
    %257 = vector.extract_strided_slice %253 {offsets = [0, 512], sizes = [2, 512], strides = [1, 1]} : vector<2x1024xf32> to vector<2x512xf32>
    %258 = arith.addf %257, %256 : vector<2x512xf32>
    %259 = vector.broadcast %5 : vector<1x512xf32> to vector<2x512xf32>
    %260 = arith.addf %258, %259 : vector<2x512xf32>
    %261 = vector.extract_strided_slice %260 {offsets = [0, 0], sizes = [2, 256], strides = [1, 1]} : vector<2x512xf32> to vector<2x256xf32>
    %262 = arith.negf %261 : vector<2x256xf32>
    %263 = math.exp %262 : vector<2x256xf32>
    %cst_76 = arith.constant 1.000000e+00 : f32
    %264 = vector.broadcast %cst_76 : f32 to vector<2x256xf32>
    %265 = arith.addf %264, %263 : vector<2x256xf32>
    %266 = arith.divf %264, %265 : vector<2x256xf32>
    %267 = vector.extract_strided_slice %266 {offsets = [0, 0], sizes = [2, 128], strides = [1, 1]} : vector<2x256xf32> to vector<2x128xf32>
    %268 = vector.extract_strided_slice %266 {offsets = [0, 128], sizes = [2, 128], strides = [1, 1]} : vector<2x256xf32> to vector<2x128xf32>
    %269 = vector.extract_strided_slice %260 {offsets = [0, 256], sizes = [2, 128], strides = [1, 1]} : vector<2x512xf32> to vector<2x128xf32>
    %270 = math.tanh %269 : vector<2x128xf32>
    %271 = vector.extract_strided_slice %260 {offsets = [0, 384], sizes = [2, 128], strides = [1, 1]} : vector<2x512xf32> to vector<2x128xf32>
    %272 = arith.negf %271 : vector<2x128xf32>
    %273 = math.exp %272 : vector<2x128xf32>
    %cst_77 = arith.constant 1.000000e+00 : f32
    %274 = vector.broadcast %cst_77 : f32 to vector<2x128xf32>
    %275 = arith.addf %274, %273 : vector<2x128xf32>
    %276 = arith.divf %274, %275 : vector<2x128xf32>
    %277 = arith.mulf %268, %211 : vector<2x128xf32>
    %278 = arith.mulf %267, %270 : vector<2x128xf32>
    %279 = arith.addf %277, %278 : vector<2x128xf32>
    %280 = math.tanh %279 : vector<2x128xf32>
    %281 = arith.mulf %276, %280 : vector<2x128xf32>
    %282 = arith.index_cast %c3_i32 : i32 to index
    %c0_78 = arith.constant 0 : index
    %c0_79 = arith.constant 0 : index
    %283 = vector.load %arg10[%282, %c0_78, %c0_79] : memref<12x2x128xf32, #tpu.memory_space<vmem>>, vector<1x2x128xf32>
    %284 = vector.shape_cast %283 : vector<1x2x128xf32> to vector<2x128xf32>
    %285 = vector.shape_cast %281 : vector<2x128xf32> to vector<1x2x128xf32>
    tpu.vector_store %arg10[%282, %c0_78, %c0_79], %285 {strides = array<i32>} : memref<12x2x128xf32, #tpu.memory_space<vmem>>, vector<1x2x128xf32>,
    %286 = vector.extract_strided_slice %253 {offsets = [0, 0], sizes = [2, 512], strides = [1, 1]} : vector<2x1024xf32> to vector<2x512xf32>
    %c1_i32_80 = arith.constant 1 : i32
    %287 = arith.addi %c3_i32, %c1_i32_80 : i32
    %c11_i32_81 = arith.constant 11 : i32
    %288 = arith.minsi %287, %c11_i32_81 : i32
    %289 = arith.index_cast %288 : i32 to index
    %c0_82 = arith.constant 0 : index
    %c0_83 = arith.constant 0 : index
    %290 = vector.load %arg1[%289, %c0_82, %c0_83] : memref<12x2x1xf32, #tpu.memory_space<vmem>>, vector<1x2x1xf32>
    %291 = vector.shape_cast %290 : vector<1x2x1xf32> to vector<2x1xf32>
    %292 = vector.broadcast %291 : vector<2x1xf32> to vector<2x512xf32>
    %293 = vector.broadcast %3 : vector<1x512xf32> to vector<2x512xf32>
    %294 = arith.mulf %292, %293 : vector<2x512xf32>
    %295 = vector.broadcast %4 : vector<1x512xf32> to vector<2x512xf32>
    %296 = arith.addf %294, %295 : vector<2x512xf32>
    %297 = arith.addf %286, %296 : vector<2x512xf32>
    %c4_i32 = arith.constant 4 : i32
    %298 = vector.extract_strided_slice %297 {offsets = [0, 0], sizes = [2, 256], strides = [1, 1]} : vector<2x512xf32> to vector<2x256xf32>
    %299 = arith.negf %298 : vector<2x256xf32>
    %300 = math.exp %299 : vector<2x256xf32>
    %cst_84 = arith.constant 1.000000e+00 : f32
    %301 = vector.broadcast %cst_84 : f32 to vector<2x256xf32>
    %302 = arith.addf %301, %300 : vector<2x256xf32>
    %303 = arith.divf %301, %302 : vector<2x256xf32>
    %304 = vector.extract_strided_slice %303 {offsets = [0, 0], sizes = [2, 128], strides = [1, 1]} : vector<2x256xf32> to vector<2x128xf32>
    %305 = vector.extract_strided_slice %303 {offsets = [0, 128], sizes = [2, 128], strides = [1, 1]} : vector<2x256xf32> to vector<2x128xf32>
    %306 = vector.extract_strided_slice %297 {offsets = [0, 256], sizes = [2, 128], strides = [1, 1]} : vector<2x512xf32> to vector<2x128xf32>
    %307 = math.tanh %306 : vector<2x128xf32>
    %308 = vector.extract_strided_slice %297 {offsets = [0, 384], sizes = [2, 128], strides = [1, 1]} : vector<2x512xf32> to vector<2x128xf32>
    %309 = arith.negf %308 : vector<2x128xf32>
    %310 = math.exp %309 : vector<2x128xf32>
    %cst_85 = arith.constant 1.000000e+00 : f32
    %311 = vector.broadcast %cst_85 : f32 to vector<2x128xf32>
    %312 = arith.addf %311, %310 : vector<2x128xf32>
    %313 = arith.divf %311, %312 : vector<2x128xf32>
    %314 = arith.mulf %305, %248 : vector<2x128xf32>
    %315 = arith.mulf %304, %307 : vector<2x128xf32>
    %316 = arith.addf %314, %315 : vector<2x128xf32>
    %317 = math.tanh %316 : vector<2x128xf32>
    %318 = arith.mulf %313, %317 : vector<2x128xf32>
    %319 = arith.truncf %318 : vector<2x128xf32> to vector<2x128xbf16>
    %c0_86 = arith.constant 0 : index
    %c0_87 = arith.constant 0 : index
    %320 = vector.load %arg2[%c0_86, %c0_87] : memref<128x1024xbf16, #tpu.memory_space<vmem>>, vector<128x1024xbf16>
    %cst_88 = arith.constant dense<0.000000e+00> : vector<2x1024xf32>
    %321 = tpu.matmul %319, %320, %cst_88 {dimension_numbers = #tpu.dot_dimension_numbers<[1], [0], [0], [1], [0, 0, 1, 1], [], []>} : vector<2x128xbf16>, vector<128x1024xbf16>, vector<2x1024xf32> -> vector<2x1024xf32>
    %322 = arith.truncf %281 : vector<2x128xf32> to vector<2x128xbf16>
    %c0_89 = arith.constant 0 : index
    %c0_90 = arith.constant 0 : index
    %323 = vector.load %arg3[%c0_89, %c0_90] : memref<128x512xbf16, #tpu.memory_space<vmem>>, vector<128x512xbf16>
    %cst_91 = arith.constant dense<0.000000e+00> : vector<2x512xf32>
    %324 = tpu.matmul %322, %323, %cst_91 {dimension_numbers = #tpu.dot_dimension_numbers<[1], [0], [0], [1], [0, 0, 1, 1], [], []>} : vector<2x128xbf16>, vector<128x512xbf16>, vector<2x512xf32> -> vector<2x512xf32>
    %325 = vector.extract_strided_slice %321 {offsets = [0, 512], sizes = [2, 512], strides = [1, 1]} : vector<2x1024xf32> to vector<2x512xf32>
    %326 = arith.addf %325, %324 : vector<2x512xf32>
    %327 = vector.broadcast %5 : vector<1x512xf32> to vector<2x512xf32>
    %328 = arith.addf %326, %327 : vector<2x512xf32>
    %329 = vector.extract_strided_slice %328 {offsets = [0, 0], sizes = [2, 256], strides = [1, 1]} : vector<2x512xf32> to vector<2x256xf32>
    %330 = arith.negf %329 : vector<2x256xf32>
    %331 = math.exp %330 : vector<2x256xf32>
    %cst_92 = arith.constant 1.000000e+00 : f32
    %332 = vector.broadcast %cst_92 : f32 to vector<2x256xf32>
    %333 = arith.addf %332, %331 : vector<2x256xf32>
    %334 = arith.divf %332, %333 : vector<2x256xf32>
    %335 = vector.extract_strided_slice %334 {offsets = [0, 0], sizes = [2, 128], strides = [1, 1]} : vector<2x256xf32> to vector<2x128xf32>
    %336 = vector.extract_strided_slice %334 {offsets = [0, 128], sizes = [2, 128], strides = [1, 1]} : vector<2x256xf32> to vector<2x128xf32>
    %337 = vector.extract_strided_slice %328 {offsets = [0, 256], sizes = [2, 128], strides = [1, 1]} : vector<2x512xf32> to vector<2x128xf32>
    %338 = math.tanh %337 : vector<2x128xf32>
    %339 = vector.extract_strided_slice %328 {offsets = [0, 384], sizes = [2, 128], strides = [1, 1]} : vector<2x512xf32> to vector<2x128xf32>
    %340 = arith.negf %339 : vector<2x128xf32>
    %341 = math.exp %340 : vector<2x128xf32>
    %cst_93 = arith.constant 1.000000e+00 : f32
    %342 = vector.broadcast %cst_93 : f32 to vector<2x128xf32>
    %343 = arith.addf %342, %341 : vector<2x128xf32>
    %344 = arith.divf %342, %343 : vector<2x128xf32>
    %345 = arith.mulf %336, %279 : vector<2x128xf32>
    %346 = arith.mulf %335, %338 : vector<2x128xf32>
    %347 = arith.addf %345, %346 : vector<2x128xf32>
    %348 = math.tanh %347 : vector<2x128xf32>
    %349 = arith.mulf %344, %348 : vector<2x128xf32>
    %350 = arith.index_cast %c4_i32 : i32 to index
    %c0_94 = arith.constant 0 : index
    %c0_95 = arith.constant 0 : index
    %351 = vector.load %arg10[%350, %c0_94, %c0_95] : memref<12x2x128xf32, #tpu.memory_space<vmem>>, vector<1x2x128xf32>
    %352 = vector.shape_cast %351 : vector<1x2x128xf32> to vector<2x128xf32>
    %353 = vector.shape_cast %349 : vector<2x128xf32> to vector<1x2x128xf32>
    tpu.vector_store %arg10[%350, %c0_94, %c0_95], %353 {strides = array<i32>} : memref<12x2x128xf32, #tpu.memory_space<vmem>>, vector<1x2x128xf32>,
    %354 = vector.extract_strided_slice %321 {offsets = [0, 0], sizes = [2, 512], strides = [1, 1]} : vector<2x1024xf32> to vector<2x512xf32>
    %c1_i32_96 = arith.constant 1 : i32
    %355 = arith.addi %c4_i32, %c1_i32_96 : i32
    %c11_i32_97 = arith.constant 11 : i32
    %356 = arith.minsi %355, %c11_i32_97 : i32
    %357 = arith.index_cast %356 : i32 to index
    %c0_98 = arith.constant 0 : index
    %c0_99 = arith.constant 0 : index
    %358 = vector.load %arg1[%357, %c0_98, %c0_99] : memref<12x2x1xf32, #tpu.memory_space<vmem>>, vector<1x2x1xf32>
    %359 = vector.shape_cast %358 : vector<1x2x1xf32> to vector<2x1xf32>
    %360 = vector.broadcast %359 : vector<2x1xf32> to vector<2x512xf32>
    %361 = vector.broadcast %3 : vector<1x512xf32> to vector<2x512xf32>
    %362 = arith.mulf %360, %361 : vector<2x512xf32>
    %363 = vector.broadcast %4 : vector<1x512xf32> to vector<2x512xf32>
    %364 = arith.addf %362, %363 : vector<2x512xf32>
    %365 = arith.addf %354, %364 : vector<2x512xf32>
    %c5_i32 = arith.constant 5 : i32
    %366 = vector.extract_strided_slice %365 {offsets = [0, 0], sizes = [2, 256], strides = [1, 1]} : vector<2x512xf32> to vector<2x256xf32>
    %367 = arith.negf %366 : vector<2x256xf32>
    %368 = math.exp %367 : vector<2x256xf32>
    %cst_100 = arith.constant 1.000000e+00 : f32
    %369 = vector.broadcast %cst_100 : f32 to vector<2x256xf32>
    %370 = arith.addf %369, %368 : vector<2x256xf32>
    %371 = arith.divf %369, %370 : vector<2x256xf32>
    %372 = vector.extract_strided_slice %371 {offsets = [0, 0], sizes = [2, 128], strides = [1, 1]} : vector<2x256xf32> to vector<2x128xf32>
    %373 = vector.extract_strided_slice %371 {offsets = [0, 128], sizes = [2, 128], strides = [1, 1]} : vector<2x256xf32> to vector<2x128xf32>
    %374 = vector.extract_strided_slice %365 {offsets = [0, 256], sizes = [2, 128], strides = [1, 1]} : vector<2x512xf32> to vector<2x128xf32>
    %375 = math.tanh %374 : vector<2x128xf32>
    %376 = vector.extract_strided_slice %365 {offsets = [0, 384], sizes = [2, 128], strides = [1, 1]} : vector<2x512xf32> to vector<2x128xf32>
    %377 = arith.negf %376 : vector<2x128xf32>
    %378 = math.exp %377 : vector<2x128xf32>
    %cst_101 = arith.constant 1.000000e+00 : f32
    %379 = vector.broadcast %cst_101 : f32 to vector<2x128xf32>
    %380 = arith.addf %379, %378 : vector<2x128xf32>
    %381 = arith.divf %379, %380 : vector<2x128xf32>
    %382 = arith.mulf %373, %316 : vector<2x128xf32>
    %383 = arith.mulf %372, %375 : vector<2x128xf32>
    %384 = arith.addf %382, %383 : vector<2x128xf32>
    %385 = math.tanh %384 : vector<2x128xf32>
    %386 = arith.mulf %381, %385 : vector<2x128xf32>
    %387 = arith.truncf %386 : vector<2x128xf32> to vector<2x128xbf16>
    %c0_102 = arith.constant 0 : index
    %c0_103 = arith.constant 0 : index
    %388 = vector.load %arg2[%c0_102, %c0_103] : memref<128x1024xbf16, #tpu.memory_space<vmem>>, vector<128x1024xbf16>
    %cst_104 = arith.constant dense<0.000000e+00> : vector<2x1024xf32>
    %389 = tpu.matmul %387, %388, %cst_104 {dimension_numbers = #tpu.dot_dimension_numbers<[1], [0], [0], [1], [0, 0, 1, 1], [], []>} : vector<2x128xbf16>, vector<128x1024xbf16>, vector<2x1024xf32> -> vector<2x1024xf32>
    %390 = arith.truncf %349 : vector<2x128xf32> to vector<2x128xbf16>
    %c0_105 = arith.constant 0 : index
    %c0_106 = arith.constant 0 : index
    %391 = vector.load %arg3[%c0_105, %c0_106] : memref<128x512xbf16, #tpu.memory_space<vmem>>, vector<128x512xbf16>
    %cst_107 = arith.constant dense<0.000000e+00> : vector<2x512xf32>
    %392 = tpu.matmul %390, %391, %cst_107 {dimension_numbers = #tpu.dot_dimension_numbers<[1], [0], [0], [1], [0, 0, 1, 1], [], []>} : vector<2x128xbf16>, vector<128x512xbf16>, vector<2x512xf32> -> vector<2x512xf32>
    %393 = vector.extract_strided_slice %389 {offsets = [0, 512], sizes = [2, 512], strides = [1, 1]} : vector<2x1024xf32> to vector<2x512xf32>
    %394 = arith.addf %393, %392 : vector<2x512xf32>
    %395 = vector.broadcast %5 : vector<1x512xf32> to vector<2x512xf32>
    %396 = arith.addf %394, %395 : vector<2x512xf32>
    %397 = vector.extract_strided_slice %396 {offsets = [0, 0], sizes = [2, 256], strides = [1, 1]} : vector<2x512xf32> to vector<2x256xf32>
    %398 = arith.negf %397 : vector<2x256xf32>
    %399 = math.exp %398 : vector<2x256xf32>
    %cst_108 = arith.constant 1.000000e+00 : f32
    %400 = vector.broadcast %cst_108 : f32 to vector<2x256xf32>
    %401 = arith.addf %400, %399 : vector<2x256xf32>
    %402 = arith.divf %400, %401 : vector<2x256xf32>
    %403 = vector.extract_strided_slice %402 {offsets = [0, 0], sizes = [2, 128], strides = [1, 1]} : vector<2x256xf32> to vector<2x128xf32>
    %404 = vector.extract_strided_slice %402 {offsets = [0, 128], sizes = [2, 128], strides = [1, 1]} : vector<2x256xf32> to vector<2x128xf32>
    %405 = vector.extract_strided_slice %396 {offsets = [0, 256], sizes = [2, 128], strides = [1, 1]} : vector<2x512xf32> to vector<2x128xf32>
    %406 = math.tanh %405 : vector<2x128xf32>
    %407 = vector.extract_strided_slice %396 {offsets = [0, 384], sizes = [2, 128], strides = [1, 1]} : vector<2x512xf32> to vector<2x128xf32>
    %408 = arith.negf %407 : vector<2x128xf32>
    %409 = math.exp %408 : vector<2x128xf32>
    %cst_109 = arith.constant 1.000000e+00 : f32
    %410 = vector.broadcast %cst_109 : f32 to vector<2x128xf32>
    %411 = arith.addf %410, %409 : vector<2x128xf32>
    %412 = arith.divf %410, %411 : vector<2x128xf32>
    %413 = arith.mulf %404, %347 : vector<2x128xf32>
    %414 = arith.mulf %403, %406 : vector<2x128xf32>
    %415 = arith.addf %413, %414 : vector<2x128xf32>
    %416 = math.tanh %415 : vector<2x128xf32>
    %417 = arith.mulf %412, %416 : vector<2x128xf32>
    %418 = arith.index_cast %c5_i32 : i32 to index
    %c0_110 = arith.constant 0 : index
    %c0_111 = arith.constant 0 : index
    %419 = vector.load %arg10[%418, %c0_110, %c0_111] : memref<12x2x128xf32, #tpu.memory_space<vmem>>, vector<1x2x128xf32>
    %420 = vector.shape_cast %419 : vector<1x2x128xf32> to vector<2x128xf32>
    %421 = vector.shape_cast %417 : vector<2x128xf32> to vector<1x2x128xf32>
    tpu.vector_store %arg10[%418, %c0_110, %c0_111], %421 {strides = array<i32>} : memref<12x2x128xf32, #tpu.memory_space<vmem>>, vector<1x2x128xf32>,
    %422 = vector.extract_strided_slice %389 {offsets = [0, 0], sizes = [2, 512], strides = [1, 1]} : vector<2x1024xf32> to vector<2x512xf32>
    %c1_i32_112 = arith.constant 1 : i32
    %423 = arith.addi %c5_i32, %c1_i32_112 : i32
    %c11_i32_113 = arith.constant 11 : i32
    %424 = arith.minsi %423, %c11_i32_113 : i32
    %425 = arith.index_cast %424 : i32 to index
    %c0_114 = arith.constant 0 : index
    %c0_115 = arith.constant 0 : index
    %426 = vector.load %arg1[%425, %c0_114, %c0_115] : memref<12x2x1xf32, #tpu.memory_space<vmem>>, vector<1x2x1xf32>
    %427 = vector.shape_cast %426 : vector<1x2x1xf32> to vector<2x1xf32>
    %428 = vector.broadcast %427 : vector<2x1xf32> to vector<2x512xf32>
    %429 = vector.broadcast %3 : vector<1x512xf32> to vector<2x512xf32>
    %430 = arith.mulf %428, %429 : vector<2x512xf32>
    %431 = vector.broadcast %4 : vector<1x512xf32> to vector<2x512xf32>
    %432 = arith.addf %430, %431 : vector<2x512xf32>
    %433 = arith.addf %422, %432 : vector<2x512xf32>
    %c6_i32 = arith.constant 6 : i32
    %434 = vector.extract_strided_slice %433 {offsets = [0, 0], sizes = [2, 256], strides = [1, 1]} : vector<2x512xf32> to vector<2x256xf32>
    %435 = arith.negf %434 : vector<2x256xf32>
    %436 = math.exp %435 : vector<2x256xf32>
    %cst_116 = arith.constant 1.000000e+00 : f32
    %437 = vector.broadcast %cst_116 : f32 to vector<2x256xf32>
    %438 = arith.addf %437, %436 : vector<2x256xf32>
    %439 = arith.divf %437, %438 : vector<2x256xf32>
    %440 = vector.extract_strided_slice %439 {offsets = [0, 0], sizes = [2, 128], strides = [1, 1]} : vector<2x256xf32> to vector<2x128xf32>
    %441 = vector.extract_strided_slice %439 {offsets = [0, 128], sizes = [2, 128], strides = [1, 1]} : vector<2x256xf32> to vector<2x128xf32>
    %442 = vector.extract_strided_slice %433 {offsets = [0, 256], sizes = [2, 128], strides = [1, 1]} : vector<2x512xf32> to vector<2x128xf32>
    %443 = math.tanh %442 : vector<2x128xf32>
    %444 = vector.extract_strided_slice %433 {offsets = [0, 384], sizes = [2, 128], strides = [1, 1]} : vector<2x512xf32> to vector<2x128xf32>
    %445 = arith.negf %444 : vector<2x128xf32>
    %446 = math.exp %445 : vector<2x128xf32>
    %cst_117 = arith.constant 1.000000e+00 : f32
    %447 = vector.broadcast %cst_117 : f32 to vector<2x128xf32>
    %448 = arith.addf %447, %446 : vector<2x128xf32>
    %449 = arith.divf %447, %448 : vector<2x128xf32>
    %450 = arith.mulf %441, %384 : vector<2x128xf32>
    %451 = arith.mulf %440, %443 : vector<2x128xf32>
    %452 = arith.addf %450, %451 : vector<2x128xf32>
    %453 = math.tanh %452 : vector<2x128xf32>
    %454 = arith.mulf %449, %453 : vector<2x128xf32>
    %455 = arith.truncf %454 : vector<2x128xf32> to vector<2x128xbf16>
    %c0_118 = arith.constant 0 : index
    %c0_119 = arith.constant 0 : index
    %456 = vector.load %arg2[%c0_118, %c0_119] : memref<128x1024xbf16, #tpu.memory_space<vmem>>, vector<128x1024xbf16>
    %cst_120 = arith.constant dense<0.000000e+00> : vector<2x1024xf32>
    %457 = tpu.matmul %455, %456, %cst_120 {dimension_numbers = #tpu.dot_dimension_numbers<[1], [0], [0], [1], [0, 0, 1, 1], [], []>} : vector<2x128xbf16>, vector<128x1024xbf16>, vector<2x1024xf32> -> vector<2x1024xf32>
    %458 = arith.truncf %417 : vector<2x128xf32> to vector<2x128xbf16>
    %c0_121 = arith.constant 0 : index
    %c0_122 = arith.constant 0 : index
    %459 = vector.load %arg3[%c0_121, %c0_122] : memref<128x512xbf16, #tpu.memory_space<vmem>>, vector<128x512xbf16>
    %cst_123 = arith.constant dense<0.000000e+00> : vector<2x512xf32>
    %460 = tpu.matmul %458, %459, %cst_123 {dimension_numbers = #tpu.dot_dimension_numbers<[1], [0], [0], [1], [0, 0, 1, 1], [], []>} : vector<2x128xbf16>, vector<128x512xbf16>, vector<2x512xf32> -> vector<2x512xf32>
    %461 = vector.extract_strided_slice %457 {offsets = [0, 512], sizes = [2, 512], strides = [1, 1]} : vector<2x1024xf32> to vector<2x512xf32>
    %462 = arith.addf %461, %460 : vector<2x512xf32>
    %463 = vector.broadcast %5 : vector<1x512xf32> to vector<2x512xf32>
    %464 = arith.addf %462, %463 : vector<2x512xf32>
    %465 = vector.extract_strided_slice %464 {offsets = [0, 0], sizes = [2, 256], strides = [1, 1]} : vector<2x512xf32> to vector<2x256xf32>
    %466 = arith.negf %465 : vector<2x256xf32>
    %467 = math.exp %466 : vector<2x256xf32>
    %cst_124 = arith.constant 1.000000e+00 : f32
    %468 = vector.broadcast %cst_124 : f32 to vector<2x256xf32>
    %469 = arith.addf %468, %467 : vector<2x256xf32>
    %470 = arith.divf %468, %469 : vector<2x256xf32>
    %471 = vector.extract_strided_slice %470 {offsets = [0, 0], sizes = [2, 128], strides = [1, 1]} : vector<2x256xf32> to vector<2x128xf32>
    %472 = vector.extract_strided_slice %470 {offsets = [0, 128], sizes = [2, 128], strides = [1, 1]} : vector<2x256xf32> to vector<2x128xf32>
    %473 = vector.extract_strided_slice %464 {offsets = [0, 256], sizes = [2, 128], strides = [1, 1]} : vector<2x512xf32> to vector<2x128xf32>
    %474 = math.tanh %473 : vector<2x128xf32>
    %475 = vector.extract_strided_slice %464 {offsets = [0, 384], sizes = [2, 128], strides = [1, 1]} : vector<2x512xf32> to vector<2x128xf32>
    %476 = arith.negf %475 : vector<2x128xf32>
    %477 = math.exp %476 : vector<2x128xf32>
    %cst_125 = arith.constant 1.000000e+00 : f32
    %478 = vector.broadcast %cst_125 : f32 to vector<2x128xf32>
    %479 = arith.addf %478, %477 : vector<2x128xf32>
    %480 = arith.divf %478, %479 : vector<2x128xf32>
    %481 = arith.mulf %472, %415 : vector<2x128xf32>
    %482 = arith.mulf %471, %474 : vector<2x128xf32>
    %483 = arith.addf %481, %482 : vector<2x128xf32>
    %484 = math.tanh %483 : vector<2x128xf32>
    %485 = arith.mulf %480, %484 : vector<2x128xf32>
    %486 = arith.index_cast %c6_i32 : i32 to index
    %c0_126 = arith.constant 0 : index
    %c0_127 = arith.constant 0 : index
    %487 = vector.load %arg10[%486, %c0_126, %c0_127] : memref<12x2x128xf32, #tpu.memory_space<vmem>>, vector<1x2x128xf32>
    %488 = vector.shape_cast %487 : vector<1x2x128xf32> to vector<2x128xf32>
    %489 = vector.shape_cast %485 : vector<2x128xf32> to vector<1x2x128xf32>
    tpu.vector_store %arg10[%486, %c0_126, %c0_127], %489 {strides = array<i32>} : memref<12x2x128xf32, #tpu.memory_space<vmem>>, vector<1x2x128xf32>,
    %490 = vector.extract_strided_slice %457 {offsets = [0, 0], sizes = [2, 512], strides = [1, 1]} : vector<2x1024xf32> to vector<2x512xf32>
    %c1_i32_128 = arith.constant 1 : i32
    %491 = arith.addi %c6_i32, %c1_i32_128 : i32
    %c11_i32_129 = arith.constant 11 : i32
    %492 = arith.minsi %491, %c11_i32_129 : i32
    %493 = arith.index_cast %492 : i32 to index
    %c0_130 = arith.constant 0 : index
    %c0_131 = arith.constant 0 : index
    %494 = vector.load %arg1[%493, %c0_130, %c0_131] : memref<12x2x1xf32, #tpu.memory_space<vmem>>, vector<1x2x1xf32>
    %495 = vector.shape_cast %494 : vector<1x2x1xf32> to vector<2x1xf32>
    %496 = vector.broadcast %495 : vector<2x1xf32> to vector<2x512xf32>
    %497 = vector.broadcast %3 : vector<1x512xf32> to vector<2x512xf32>
    %498 = arith.mulf %496, %497 : vector<2x512xf32>
    %499 = vector.broadcast %4 : vector<1x512xf32> to vector<2x512xf32>
    %500 = arith.addf %498, %499 : vector<2x512xf32>
    %501 = arith.addf %490, %500 : vector<2x512xf32>
    %c7_i32 = arith.constant 7 : i32
    %502 = vector.extract_strided_slice %501 {offsets = [0, 0], sizes = [2, 256], strides = [1, 1]} : vector<2x512xf32> to vector<2x256xf32>
    %503 = arith.negf %502 : vector<2x256xf32>
    %504 = math.exp %503 : vector<2x256xf32>
    %cst_132 = arith.constant 1.000000e+00 : f32
    %505 = vector.broadcast %cst_132 : f32 to vector<2x256xf32>
    %506 = arith.addf %505, %504 : vector<2x256xf32>
    %507 = arith.divf %505, %506 : vector<2x256xf32>
    %508 = vector.extract_strided_slice %507 {offsets = [0, 0], sizes = [2, 128], strides = [1, 1]} : vector<2x256xf32> to vector<2x128xf32>
    %509 = vector.extract_strided_slice %507 {offsets = [0, 128], sizes = [2, 128], strides = [1, 1]} : vector<2x256xf32> to vector<2x128xf32>
    %510 = vector.extract_strided_slice %501 {offsets = [0, 256], sizes = [2, 128], strides = [1, 1]} : vector<2x512xf32> to vector<2x128xf32>
    %511 = math.tanh %510 : vector<2x128xf32>
    %512 = vector.extract_strided_slice %501 {offsets = [0, 384], sizes = [2, 128], strides = [1, 1]} : vector<2x512xf32> to vector<2x128xf32>
    %513 = arith.negf %512 : vector<2x128xf32>
    %514 = math.exp %513 : vector<2x128xf32>
    %cst_133 = arith.constant 1.000000e+00 : f32
    %515 = vector.broadcast %cst_133 : f32 to vector<2x128xf32>
    %516 = arith.addf %515, %514 : vector<2x128xf32>
    %517 = arith.divf %515, %516 : vector<2x128xf32>
    %518 = arith.mulf %509, %452 : vector<2x128xf32>
    %519 = arith.mulf %508, %511 : vector<2x128xf32>
    %520 = arith.addf %518, %519 : vector<2x128xf32>
    %521 = math.tanh %520 : vector<2x128xf32>
    %522 = arith.mulf %517, %521 : vector<2x128xf32>
    %523 = arith.truncf %522 : vector<2x128xf32> to vector<2x128xbf16>
    %c0_134 = arith.constant 0 : index
    %c0_135 = arith.constant 0 : index
    %524 = vector.load %arg2[%c0_134, %c0_135] : memref<128x1024xbf16, #tpu.memory_space<vmem>>, vector<128x1024xbf16>
    %cst_136 = arith.constant dense<0.000000e+00> : vector<2x1024xf32>
    %525 = tpu.matmul %523, %524, %cst_136 {dimension_numbers = #tpu.dot_dimension_numbers<[1], [0], [0], [1], [0, 0, 1, 1], [], []>} : vector<2x128xbf16>, vector<128x1024xbf16>, vector<2x1024xf32> -> vector<2x1024xf32>
    %526 = arith.truncf %485 : vector<2x128xf32> to vector<2x128xbf16>
    %c0_137 = arith.constant 0 : index
    %c0_138 = arith.constant 0 : index
    %527 = vector.load %arg3[%c0_137, %c0_138] : memref<128x512xbf16, #tpu.memory_space<vmem>>, vector<128x512xbf16>
    %cst_139 = arith.constant dense<0.000000e+00> : vector<2x512xf32>
    %528 = tpu.matmul %526, %527, %cst_139 {dimension_numbers = #tpu.dot_dimension_numbers<[1], [0], [0], [1], [0, 0, 1, 1], [], []>} : vector<2x128xbf16>, vector<128x512xbf16>, vector<2x512xf32> -> vector<2x512xf32>
    %529 = vector.extract_strided_slice %525 {offsets = [0, 512], sizes = [2, 512], strides = [1, 1]} : vector<2x1024xf32> to vector<2x512xf32>
    %530 = arith.addf %529, %528 : vector<2x512xf32>
    %531 = vector.broadcast %5 : vector<1x512xf32> to vector<2x512xf32>
    %532 = arith.addf %530, %531 : vector<2x512xf32>
    %533 = vector.extract_strided_slice %532 {offsets = [0, 0], sizes = [2, 256], strides = [1, 1]} : vector<2x512xf32> to vector<2x256xf32>
    %534 = arith.negf %533 : vector<2x256xf32>
    %535 = math.exp %534 : vector<2x256xf32>
    %cst_140 = arith.constant 1.000000e+00 : f32
    %536 = vector.broadcast %cst_140 : f32 to vector<2x256xf32>
    %537 = arith.addf %536, %535 : vector<2x256xf32>
    %538 = arith.divf %536, %537 : vector<2x256xf32>
    %539 = vector.extract_strided_slice %538 {offsets = [0, 0], sizes = [2, 128], strides = [1, 1]} : vector<2x256xf32> to vector<2x128xf32>
    %540 = vector.extract_strided_slice %538 {offsets = [0, 128], sizes = [2, 128], strides = [1, 1]} : vector<2x256xf32> to vector<2x128xf32>
    %541 = vector.extract_strided_slice %532 {offsets = [0, 256], sizes = [2, 128], strides = [1, 1]} : vector<2x512xf32> to vector<2x128xf32>
    %542 = math.tanh %541 : vector<2x128xf32>
    %543 = vector.extract_strided_slice %532 {offsets = [0, 384], sizes = [2, 128], strides = [1, 1]} : vector<2x512xf32> to vector<2x128xf32>
    %544 = arith.negf %543 : vector<2x128xf32>
    %545 = math.exp %544 : vector<2x128xf32>
    %cst_141 = arith.constant 1.000000e+00 : f32
    %546 = vector.broadcast %cst_141 : f32 to vector<2x128xf32>
    %547 = arith.addf %546, %545 : vector<2x128xf32>
    %548 = arith.divf %546, %547 : vector<2x128xf32>
    %549 = arith.mulf %540, %483 : vector<2x128xf32>
    %550 = arith.mulf %539, %542 : vector<2x128xf32>
    %551 = arith.addf %549, %550 : vector<2x128xf32>
    %552 = math.tanh %551 : vector<2x128xf32>
    %553 = arith.mulf %548, %552 : vector<2x128xf32>
    %554 = arith.index_cast %c7_i32 : i32 to index
    %c0_142 = arith.constant 0 : index
    %c0_143 = arith.constant 0 : index
    %555 = vector.load %arg10[%554, %c0_142, %c0_143] : memref<12x2x128xf32, #tpu.memory_space<vmem>>, vector<1x2x128xf32>
    %556 = vector.shape_cast %555 : vector<1x2x128xf32> to vector<2x128xf32>
    %557 = vector.shape_cast %553 : vector<2x128xf32> to vector<1x2x128xf32>
    tpu.vector_store %arg10[%554, %c0_142, %c0_143], %557 {strides = array<i32>} : memref<12x2x128xf32, #tpu.memory_space<vmem>>, vector<1x2x128xf32>,
    %558 = vector.extract_strided_slice %525 {offsets = [0, 0], sizes = [2, 512], strides = [1, 1]} : vector<2x1024xf32> to vector<2x512xf32>
    %c1_i32_144 = arith.constant 1 : i32
    %559 = arith.addi %c7_i32, %c1_i32_144 : i32
    %c11_i32_145 = arith.constant 11 : i32
    %560 = arith.minsi %559, %c11_i32_145 : i32
    %561 = arith.index_cast %560 : i32 to index
    %c0_146 = arith.constant 0 : index
    %c0_147 = arith.constant 0 : index
    %562 = vector.load %arg1[%561, %c0_146, %c0_147] : memref<12x2x1xf32, #tpu.memory_space<vmem>>, vector<1x2x1xf32>
    %563 = vector.shape_cast %562 : vector<1x2x1xf32> to vector<2x1xf32>
    %564 = vector.broadcast %563 : vector<2x1xf32> to vector<2x512xf32>
    %565 = vector.broadcast %3 : vector<1x512xf32> to vector<2x512xf32>
    %566 = arith.mulf %564, %565 : vector<2x512xf32>
    %567 = vector.broadcast %4 : vector<1x512xf32> to vector<2x512xf32>
    %568 = arith.addf %566, %567 : vector<2x512xf32>
    %569 = arith.addf %558, %568 : vector<2x512xf32>
    %c8_i32 = arith.constant 8 : i32
    %570 = vector.extract_strided_slice %569 {offsets = [0, 0], sizes = [2, 256], strides = [1, 1]} : vector<2x512xf32> to vector<2x256xf32>
    %571 = arith.negf %570 : vector<2x256xf32>
    %572 = math.exp %571 : vector<2x256xf32>
    %cst_148 = arith.constant 1.000000e+00 : f32
    %573 = vector.broadcast %cst_148 : f32 to vector<2x256xf32>
    %574 = arith.addf %573, %572 : vector<2x256xf32>
    %575 = arith.divf %573, %574 : vector<2x256xf32>
    %576 = vector.extract_strided_slice %575 {offsets = [0, 0], sizes = [2, 128], strides = [1, 1]} : vector<2x256xf32> to vector<2x128xf32>
    %577 = vector.extract_strided_slice %575 {offsets = [0, 128], sizes = [2, 128], strides = [1, 1]} : vector<2x256xf32> to vector<2x128xf32>
    %578 = vector.extract_strided_slice %569 {offsets = [0, 256], sizes = [2, 128], strides = [1, 1]} : vector<2x512xf32> to vector<2x128xf32>
    %579 = math.tanh %578 : vector<2x128xf32>
    %580 = vector.extract_strided_slice %569 {offsets = [0, 384], sizes = [2, 128], strides = [1, 1]} : vector<2x512xf32> to vector<2x128xf32>
    %581 = arith.negf %580 : vector<2x128xf32>
    %582 = math.exp %581 : vector<2x128xf32>
    %cst_149 = arith.constant 1.000000e+00 : f32
    %583 = vector.broadcast %cst_149 : f32 to vector<2x128xf32>
    %584 = arith.addf %583, %582 : vector<2x128xf32>
    %585 = arith.divf %583, %584 : vector<2x128xf32>
    %586 = arith.mulf %577, %520 : vector<2x128xf32>
    %587 = arith.mulf %576, %579 : vector<2x128xf32>
    %588 = arith.addf %586, %587 : vector<2x128xf32>
    %589 = math.tanh %588 : vector<2x128xf32>
    %590 = arith.mulf %585, %589 : vector<2x128xf32>
    %591 = arith.truncf %590 : vector<2x128xf32> to vector<2x128xbf16>
    %c0_150 = arith.constant 0 : index
    %c0_151 = arith.constant 0 : index
    %592 = vector.load %arg2[%c0_150, %c0_151] : memref<128x1024xbf16, #tpu.memory_space<vmem>>, vector<128x1024xbf16>
    %cst_152 = arith.constant dense<0.000000e+00> : vector<2x1024xf32>
    %593 = tpu.matmul %591, %592, %cst_152 {dimension_numbers = #tpu.dot_dimension_numbers<[1], [0], [0], [1], [0, 0, 1, 1], [], []>} : vector<2x128xbf16>, vector<128x1024xbf16>, vector<2x1024xf32> -> vector<2x1024xf32>
    %594 = arith.truncf %553 : vector<2x128xf32> to vector<2x128xbf16>
    %c0_153 = arith.constant 0 : index
    %c0_154 = arith.constant 0 : index
    %595 = vector.load %arg3[%c0_153, %c0_154] : memref<128x512xbf16, #tpu.memory_space<vmem>>, vector<128x512xbf16>
    %cst_155 = arith.constant dense<0.000000e+00> : vector<2x512xf32>
    %596 = tpu.matmul %594, %595, %cst_155 {dimension_numbers = #tpu.dot_dimension_numbers<[1], [0], [0], [1], [0, 0, 1, 1], [], []>} : vector<2x128xbf16>, vector<128x512xbf16>, vector<2x512xf32> -> vector<2x512xf32>
    %597 = vector.extract_strided_slice %593 {offsets = [0, 512], sizes = [2, 512], strides = [1, 1]} : vector<2x1024xf32> to vector<2x512xf32>
    %598 = arith.addf %597, %596 : vector<2x512xf32>
    %599 = vector.broadcast %5 : vector<1x512xf32> to vector<2x512xf32>
    %600 = arith.addf %598, %599 : vector<2x512xf32>
    %601 = vector.extract_strided_slice %600 {offsets = [0, 0], sizes = [2, 256], strides = [1, 1]} : vector<2x512xf32> to vector<2x256xf32>
    %602 = arith.negf %601 : vector<2x256xf32>
    %603 = math.exp %602 : vector<2x256xf32>
    %cst_156 = arith.constant 1.000000e+00 : f32
    %604 = vector.broadcast %cst_156 : f32 to vector<2x256xf32>
    %605 = arith.addf %604, %603 : vector<2x256xf32>
    %606 = arith.divf %604, %605 : vector<2x256xf32>
    %607 = vector.extract_strided_slice %606 {offsets = [0, 0], sizes = [2, 128], strides = [1, 1]} : vector<2x256xf32> to vector<2x128xf32>
    %608 = vector.extract_strided_slice %606 {offsets = [0, 128], sizes = [2, 128], strides = [1, 1]} : vector<2x256xf32> to vector<2x128xf32>
    %609 = vector.extract_strided_slice %600 {offsets = [0, 256], sizes = [2, 128], strides = [1, 1]} : vector<2x512xf32> to vector<2x128xf32>
    %610 = math.tanh %609 : vector<2x128xf32>
    %611 = vector.extract_strided_slice %600 {offsets = [0, 384], sizes = [2, 128], strides = [1, 1]} : vector<2x512xf32> to vector<2x128xf32>
    %612 = arith.negf %611 : vector<2x128xf32>
    %613 = math.exp %612 : vector<2x128xf32>
    %cst_157 = arith.constant 1.000000e+00 : f32
    %614 = vector.broadcast %cst_157 : f32 to vector<2x128xf32>
    %615 = arith.addf %614, %613 : vector<2x128xf32>
    %616 = arith.divf %614, %615 : vector<2x128xf32>
    %617 = arith.mulf %608, %551 : vector<2x128xf32>
    %618 = arith.mulf %607, %610 : vector<2x128xf32>
    %619 = arith.addf %617, %618 : vector<2x128xf32>
    %620 = math.tanh %619 : vector<2x128xf32>
    %621 = arith.mulf %616, %620 : vector<2x128xf32>
    %622 = arith.index_cast %c8_i32 : i32 to index
    %c0_158 = arith.constant 0 : index
    %c0_159 = arith.constant 0 : index
    %623 = vector.load %arg10[%622, %c0_158, %c0_159] : memref<12x2x128xf32, #tpu.memory_space<vmem>>, vector<1x2x128xf32>
    %624 = vector.shape_cast %623 : vector<1x2x128xf32> to vector<2x128xf32>
    %625 = vector.shape_cast %621 : vector<2x128xf32> to vector<1x2x128xf32>
    tpu.vector_store %arg10[%622, %c0_158, %c0_159], %625 {strides = array<i32>} : memref<12x2x128xf32, #tpu.memory_space<vmem>>, vector<1x2x128xf32>,
    %626 = vector.extract_strided_slice %593 {offsets = [0, 0], sizes = [2, 512], strides = [1, 1]} : vector<2x1024xf32> to vector<2x512xf32>
    %c1_i32_160 = arith.constant 1 : i32
    %627 = arith.addi %c8_i32, %c1_i32_160 : i32
    %c11_i32_161 = arith.constant 11 : i32
    %628 = arith.minsi %627, %c11_i32_161 : i32
    %629 = arith.index_cast %628 : i32 to index
    %c0_162 = arith.constant 0 : index
    %c0_163 = arith.constant 0 : index
    %630 = vector.load %arg1[%629, %c0_162, %c0_163] : memref<12x2x1xf32, #tpu.memory_space<vmem>>, vector<1x2x1xf32>
    %631 = vector.shape_cast %630 : vector<1x2x1xf32> to vector<2x1xf32>
    %632 = vector.broadcast %631 : vector<2x1xf32> to vector<2x512xf32>
    %633 = vector.broadcast %3 : vector<1x512xf32> to vector<2x512xf32>
    %634 = arith.mulf %632, %633 : vector<2x512xf32>
    %635 = vector.broadcast %4 : vector<1x512xf32> to vector<2x512xf32>
    %636 = arith.addf %634, %635 : vector<2x512xf32>
    %637 = arith.addf %626, %636 : vector<2x512xf32>
    %c9_i32 = arith.constant 9 : i32
    %638 = vector.extract_strided_slice %637 {offsets = [0, 0], sizes = [2, 256], strides = [1, 1]} : vector<2x512xf32> to vector<2x256xf32>
    %639 = arith.negf %638 : vector<2x256xf32>
    %640 = math.exp %639 : vector<2x256xf32>
    %cst_164 = arith.constant 1.000000e+00 : f32
    %641 = vector.broadcast %cst_164 : f32 to vector<2x256xf32>
    %642 = arith.addf %641, %640 : vector<2x256xf32>
    %643 = arith.divf %641, %642 : vector<2x256xf32>
    %644 = vector.extract_strided_slice %643 {offsets = [0, 0], sizes = [2, 128], strides = [1, 1]} : vector<2x256xf32> to vector<2x128xf32>
    %645 = vector.extract_strided_slice %643 {offsets = [0, 128], sizes = [2, 128], strides = [1, 1]} : vector<2x256xf32> to vector<2x128xf32>
    %646 = vector.extract_strided_slice %637 {offsets = [0, 256], sizes = [2, 128], strides = [1, 1]} : vector<2x512xf32> to vector<2x128xf32>
    %647 = math.tanh %646 : vector<2x128xf32>
    %648 = vector.extract_strided_slice %637 {offsets = [0, 384], sizes = [2, 128], strides = [1, 1]} : vector<2x512xf32> to vector<2x128xf32>
    %649 = arith.negf %648 : vector<2x128xf32>
    %650 = math.exp %649 : vector<2x128xf32>
    %cst_165 = arith.constant 1.000000e+00 : f32
    %651 = vector.broadcast %cst_165 : f32 to vector<2x128xf32>
    %652 = arith.addf %651, %650 : vector<2x128xf32>
    %653 = arith.divf %651, %652 : vector<2x128xf32>
    %654 = arith.mulf %645, %588 : vector<2x128xf32>
    %655 = arith.mulf %644, %647 : vector<2x128xf32>
    %656 = arith.addf %654, %655 : vector<2x128xf32>
    %657 = math.tanh %656 : vector<2x128xf32>
    %658 = arith.mulf %653, %657 : vector<2x128xf32>
    %659 = arith.truncf %658 : vector<2x128xf32> to vector<2x128xbf16>
    %c0_166 = arith.constant 0 : index
    %c0_167 = arith.constant 0 : index
    %660 = vector.load %arg2[%c0_166, %c0_167] : memref<128x1024xbf16, #tpu.memory_space<vmem>>, vector<128x1024xbf16>
    %cst_168 = arith.constant dense<0.000000e+00> : vector<2x1024xf32>
    %661 = tpu.matmul %659, %660, %cst_168 {dimension_numbers = #tpu.dot_dimension_numbers<[1], [0], [0], [1], [0, 0, 1, 1], [], []>} : vector<2x128xbf16>, vector<128x1024xbf16>, vector<2x1024xf32> -> vector<2x1024xf32>
    %662 = arith.truncf %621 : vector<2x128xf32> to vector<2x128xbf16>
    %c0_169 = arith.constant 0 : index
    %c0_170 = arith.constant 0 : index
    %663 = vector.load %arg3[%c0_169, %c0_170] : memref<128x512xbf16, #tpu.memory_space<vmem>>, vector<128x512xbf16>
    %cst_171 = arith.constant dense<0.000000e+00> : vector<2x512xf32>
    %664 = tpu.matmul %662, %663, %cst_171 {dimension_numbers = #tpu.dot_dimension_numbers<[1], [0], [0], [1], [0, 0, 1, 1], [], []>} : vector<2x128xbf16>, vector<128x512xbf16>, vector<2x512xf32> -> vector<2x512xf32>
    %665 = vector.extract_strided_slice %661 {offsets = [0, 512], sizes = [2, 512], strides = [1, 1]} : vector<2x1024xf32> to vector<2x512xf32>
    %666 = arith.addf %665, %664 : vector<2x512xf32>
    %667 = vector.broadcast %5 : vector<1x512xf32> to vector<2x512xf32>
    %668 = arith.addf %666, %667 : vector<2x512xf32>
    %669 = vector.extract_strided_slice %668 {offsets = [0, 0], sizes = [2, 256], strides = [1, 1]} : vector<2x512xf32> to vector<2x256xf32>
    %670 = arith.negf %669 : vector<2x256xf32>
    %671 = math.exp %670 : vector<2x256xf32>
    %cst_172 = arith.constant 1.000000e+00 : f32
    %672 = vector.broadcast %cst_172 : f32 to vector<2x256xf32>
    %673 = arith.addf %672, %671 : vector<2x256xf32>
    %674 = arith.divf %672, %673 : vector<2x256xf32>
    %675 = vector.extract_strided_slice %674 {offsets = [0, 0], sizes = [2, 128], strides = [1, 1]} : vector<2x256xf32> to vector<2x128xf32>
    %676 = vector.extract_strided_slice %674 {offsets = [0, 128], sizes = [2, 128], strides = [1, 1]} : vector<2x256xf32> to vector<2x128xf32>
    %677 = vector.extract_strided_slice %668 {offsets = [0, 256], sizes = [2, 128], strides = [1, 1]} : vector<2x512xf32> to vector<2x128xf32>
    %678 = math.tanh %677 : vector<2x128xf32>
    %679 = vector.extract_strided_slice %668 {offsets = [0, 384], sizes = [2, 128], strides = [1, 1]} : vector<2x512xf32> to vector<2x128xf32>
    %680 = arith.negf %679 : vector<2x128xf32>
    %681 = math.exp %680 : vector<2x128xf32>
    %cst_173 = arith.constant 1.000000e+00 : f32
    %682 = vector.broadcast %cst_173 : f32 to vector<2x128xf32>
    %683 = arith.addf %682, %681 : vector<2x128xf32>
    %684 = arith.divf %682, %683 : vector<2x128xf32>
    %685 = arith.mulf %676, %619 : vector<2x128xf32>
    %686 = arith.mulf %675, %678 : vector<2x128xf32>
    %687 = arith.addf %685, %686 : vector<2x128xf32>
    %688 = math.tanh %687 : vector<2x128xf32>
    %689 = arith.mulf %684, %688 : vector<2x128xf32>
    %690 = arith.index_cast %c9_i32 : i32 to index
    %c0_174 = arith.constant 0 : index
    %c0_175 = arith.constant 0 : index
    %691 = vector.load %arg10[%690, %c0_174, %c0_175] : memref<12x2x128xf32, #tpu.memory_space<vmem>>, vector<1x2x128xf32>
    %692 = vector.shape_cast %691 : vector<1x2x128xf32> to vector<2x128xf32>
    %693 = vector.shape_cast %689 : vector<2x128xf32> to vector<1x2x128xf32>
    tpu.vector_store %arg10[%690, %c0_174, %c0_175], %693 {strides = array<i32>} : memref<12x2x128xf32, #tpu.memory_space<vmem>>, vector<1x2x128xf32>,
    %694 = vector.extract_strided_slice %661 {offsets = [0, 0], sizes = [2, 512], strides = [1, 1]} : vector<2x1024xf32> to vector<2x512xf32>
    %c1_i32_176 = arith.constant 1 : i32
    %695 = arith.addi %c9_i32, %c1_i32_176 : i32
    %c11_i32_177 = arith.constant 11 : i32
    %696 = arith.minsi %695, %c11_i32_177 : i32
    %697 = arith.index_cast %696 : i32 to index
    %c0_178 = arith.constant 0 : index
    %c0_179 = arith.constant 0 : index
    %698 = vector.load %arg1[%697, %c0_178, %c0_179] : memref<12x2x1xf32, #tpu.memory_space<vmem>>, vector<1x2x1xf32>
    %699 = vector.shape_cast %698 : vector<1x2x1xf32> to vector<2x1xf32>
    %700 = vector.broadcast %699 : vector<2x1xf32> to vector<2x512xf32>
    %701 = vector.broadcast %3 : vector<1x512xf32> to vector<2x512xf32>
    %702 = arith.mulf %700, %701 : vector<2x512xf32>
    %703 = vector.broadcast %4 : vector<1x512xf32> to vector<2x512xf32>
    %704 = arith.addf %702, %703 : vector<2x512xf32>
    %705 = arith.addf %694, %704 : vector<2x512xf32>
    %c10_i32 = arith.constant 10 : i32
    %706 = vector.extract_strided_slice %705 {offsets = [0, 0], sizes = [2, 256], strides = [1, 1]} : vector<2x512xf32> to vector<2x256xf32>
    %707 = arith.negf %706 : vector<2x256xf32>
    %708 = math.exp %707 : vector<2x256xf32>
    %cst_180 = arith.constant 1.000000e+00 : f32
    %709 = vector.broadcast %cst_180 : f32 to vector<2x256xf32>
    %710 = arith.addf %709, %708 : vector<2x256xf32>
    %711 = arith.divf %709, %710 : vector<2x256xf32>
    %712 = vector.extract_strided_slice %711 {offsets = [0, 0], sizes = [2, 128], strides = [1, 1]} : vector<2x256xf32> to vector<2x128xf32>
    %713 = vector.extract_strided_slice %711 {offsets = [0, 128], sizes = [2, 128], strides = [1, 1]} : vector<2x256xf32> to vector<2x128xf32>
    %714 = vector.extract_strided_slice %705 {offsets = [0, 256], sizes = [2, 128], strides = [1, 1]} : vector<2x512xf32> to vector<2x128xf32>
    %715 = math.tanh %714 : vector<2x128xf32>
    %716 = vector.extract_strided_slice %705 {offsets = [0, 384], sizes = [2, 128], strides = [1, 1]} : vector<2x512xf32> to vector<2x128xf32>
    %717 = arith.negf %716 : vector<2x128xf32>
    %718 = math.exp %717 : vector<2x128xf32>
    %cst_181 = arith.constant 1.000000e+00 : f32
    %719 = vector.broadcast %cst_181 : f32 to vector<2x128xf32>
    %720 = arith.addf %719, %718 : vector<2x128xf32>
    %721 = arith.divf %719, %720 : vector<2x128xf32>
    %722 = arith.mulf %713, %656 : vector<2x128xf32>
    %723 = arith.mulf %712, %715 : vector<2x128xf32>
    %724 = arith.addf %722, %723 : vector<2x128xf32>
    %725 = math.tanh %724 : vector<2x128xf32>
    %726 = arith.mulf %721, %725 : vector<2x128xf32>
    %727 = arith.truncf %726 : vector<2x128xf32> to vector<2x128xbf16>
    %c0_182 = arith.constant 0 : index
    %c0_183 = arith.constant 0 : index
    %728 = vector.load %arg2[%c0_182, %c0_183] : memref<128x1024xbf16, #tpu.memory_space<vmem>>, vector<128x1024xbf16>
    %cst_184 = arith.constant dense<0.000000e+00> : vector<2x1024xf32>
    %729 = tpu.matmul %727, %728, %cst_184 {dimension_numbers = #tpu.dot_dimension_numbers<[1], [0], [0], [1], [0, 0, 1, 1], [], []>} : vector<2x128xbf16>, vector<128x1024xbf16>, vector<2x1024xf32> -> vector<2x1024xf32>
    %730 = arith.truncf %689 : vector<2x128xf32> to vector<2x128xbf16>
    %c0_185 = arith.constant 0 : index
    %c0_186 = arith.constant 0 : index
    %731 = vector.load %arg3[%c0_185, %c0_186] : memref<128x512xbf16, #tpu.memory_space<vmem>>, vector<128x512xbf16>
    %cst_187 = arith.constant dense<0.000000e+00> : vector<2x512xf32>
    %732 = tpu.matmul %730, %731, %cst_187 {dimension_numbers = #tpu.dot_dimension_numbers<[1], [0], [0], [1], [0, 0, 1, 1], [], []>} : vector<2x128xbf16>, vector<128x512xbf16>, vector<2x512xf32> -> vector<2x512xf32>
    %733 = vector.extract_strided_slice %729 {offsets = [0, 512], sizes = [2, 512], strides = [1, 1]} : vector<2x1024xf32> to vector<2x512xf32>
    %734 = arith.addf %733, %732 : vector<2x512xf32>
    %735 = vector.broadcast %5 : vector<1x512xf32> to vector<2x512xf32>
    %736 = arith.addf %734, %735 : vector<2x512xf32>
    %737 = vector.extract_strided_slice %736 {offsets = [0, 0], sizes = [2, 256], strides = [1, 1]} : vector<2x512xf32> to vector<2x256xf32>
    %738 = arith.negf %737 : vector<2x256xf32>
    %739 = math.exp %738 : vector<2x256xf32>
    %cst_188 = arith.constant 1.000000e+00 : f32
    %740 = vector.broadcast %cst_188 : f32 to vector<2x256xf32>
    %741 = arith.addf %740, %739 : vector<2x256xf32>
    %742 = arith.divf %740, %741 : vector<2x256xf32>
    %743 = vector.extract_strided_slice %742 {offsets = [0, 0], sizes = [2, 128], strides = [1, 1]} : vector<2x256xf32> to vector<2x128xf32>
    %744 = vector.extract_strided_slice %742 {offsets = [0, 128], sizes = [2, 128], strides = [1, 1]} : vector<2x256xf32> to vector<2x128xf32>
    %745 = vector.extract_strided_slice %736 {offsets = [0, 256], sizes = [2, 128], strides = [1, 1]} : vector<2x512xf32> to vector<2x128xf32>
    %746 = math.tanh %745 : vector<2x128xf32>
    %747 = vector.extract_strided_slice %736 {offsets = [0, 384], sizes = [2, 128], strides = [1, 1]} : vector<2x512xf32> to vector<2x128xf32>
    %748 = arith.negf %747 : vector<2x128xf32>
    %749 = math.exp %748 : vector<2x128xf32>
    %cst_189 = arith.constant 1.000000e+00 : f32
    %750 = vector.broadcast %cst_189 : f32 to vector<2x128xf32>
    %751 = arith.addf %750, %749 : vector<2x128xf32>
    %752 = arith.divf %750, %751 : vector<2x128xf32>
    %753 = arith.mulf %744, %687 : vector<2x128xf32>
    %754 = arith.mulf %743, %746 : vector<2x128xf32>
    %755 = arith.addf %753, %754 : vector<2x128xf32>
    %756 = math.tanh %755 : vector<2x128xf32>
    %757 = arith.mulf %752, %756 : vector<2x128xf32>
    %758 = arith.index_cast %c10_i32 : i32 to index
    %c0_190 = arith.constant 0 : index
    %c0_191 = arith.constant 0 : index
    %759 = vector.load %arg10[%758, %c0_190, %c0_191] : memref<12x2x128xf32, #tpu.memory_space<vmem>>, vector<1x2x128xf32>
    %760 = vector.shape_cast %759 : vector<1x2x128xf32> to vector<2x128xf32>
    %761 = vector.shape_cast %757 : vector<2x128xf32> to vector<1x2x128xf32>
    tpu.vector_store %arg10[%758, %c0_190, %c0_191], %761 {strides = array<i32>} : memref<12x2x128xf32, #tpu.memory_space<vmem>>, vector<1x2x128xf32>,
    %762 = vector.extract_strided_slice %729 {offsets = [0, 0], sizes = [2, 512], strides = [1, 1]} : vector<2x1024xf32> to vector<2x512xf32>
    %c1_i32_192 = arith.constant 1 : i32
    %763 = arith.addi %c10_i32, %c1_i32_192 : i32
    %c11_i32_193 = arith.constant 11 : i32
    %764 = arith.minsi %763, %c11_i32_193 : i32
    %765 = arith.index_cast %764 : i32 to index
    %c0_194 = arith.constant 0 : index
    %c0_195 = arith.constant 0 : index
    %766 = vector.load %arg1[%765, %c0_194, %c0_195] : memref<12x2x1xf32, #tpu.memory_space<vmem>>, vector<1x2x1xf32>
    %767 = vector.shape_cast %766 : vector<1x2x1xf32> to vector<2x1xf32>
    %768 = vector.broadcast %767 : vector<2x1xf32> to vector<2x512xf32>
    %769 = vector.broadcast %3 : vector<1x512xf32> to vector<2x512xf32>
    %770 = arith.mulf %768, %769 : vector<2x512xf32>
    %771 = vector.broadcast %4 : vector<1x512xf32> to vector<2x512xf32>
    %772 = arith.addf %770, %771 : vector<2x512xf32>
    %773 = arith.addf %762, %772 : vector<2x512xf32>
    %c11_i32_196 = arith.constant 11 : i32
    %774 = vector.extract_strided_slice %773 {offsets = [0, 0], sizes = [2, 256], strides = [1, 1]} : vector<2x512xf32> to vector<2x256xf32>
    %775 = arith.negf %774 : vector<2x256xf32>
    %776 = math.exp %775 : vector<2x256xf32>
    %cst_197 = arith.constant 1.000000e+00 : f32
    %777 = vector.broadcast %cst_197 : f32 to vector<2x256xf32>
    %778 = arith.addf %777, %776 : vector<2x256xf32>
    %779 = arith.divf %777, %778 : vector<2x256xf32>
    %780 = vector.extract_strided_slice %779 {offsets = [0, 0], sizes = [2, 128], strides = [1, 1]} : vector<2x256xf32> to vector<2x128xf32>
    %781 = vector.extract_strided_slice %779 {offsets = [0, 128], sizes = [2, 128], strides = [1, 1]} : vector<2x256xf32> to vector<2x128xf32>
    %782 = vector.extract_strided_slice %773 {offsets = [0, 256], sizes = [2, 128], strides = [1, 1]} : vector<2x512xf32> to vector<2x128xf32>
    %783 = math.tanh %782 : vector<2x128xf32>
    %784 = vector.extract_strided_slice %773 {offsets = [0, 384], sizes = [2, 128], strides = [1, 1]} : vector<2x512xf32> to vector<2x128xf32>
    %785 = arith.negf %784 : vector<2x128xf32>
    %786 = math.exp %785 : vector<2x128xf32>
    %cst_198 = arith.constant 1.000000e+00 : f32
    %787 = vector.broadcast %cst_198 : f32 to vector<2x128xf32>
    %788 = arith.addf %787, %786 : vector<2x128xf32>
    %789 = arith.divf %787, %788 : vector<2x128xf32>
    %790 = arith.mulf %781, %724 : vector<2x128xf32>
    %791 = arith.mulf %780, %783 : vector<2x128xf32>
    %792 = arith.addf %790, %791 : vector<2x128xf32>
    %793 = math.tanh %792 : vector<2x128xf32>
    %794 = arith.mulf %789, %793 : vector<2x128xf32>
    %795 = arith.truncf %794 : vector<2x128xf32> to vector<2x128xbf16>
    %c0_199 = arith.constant 0 : index
    %c0_200 = arith.constant 0 : index
    %796 = vector.load %arg2[%c0_199, %c0_200] : memref<128x1024xbf16, #tpu.memory_space<vmem>>, vector<128x1024xbf16>
    %cst_201 = arith.constant dense<0.000000e+00> : vector<2x1024xf32>
    %797 = tpu.matmul %795, %796, %cst_201 {dimension_numbers = #tpu.dot_dimension_numbers<[1], [0], [0], [1], [0, 0, 1, 1], [], []>} : vector<2x128xbf16>, vector<128x1024xbf16>, vector<2x1024xf32> -> vector<2x1024xf32>
    %798 = arith.truncf %757 : vector<2x128xf32> to vector<2x128xbf16>
    %c0_202 = arith.constant 0 : index
    %c0_203 = arith.constant 0 : index
    %799 = vector.load %arg3[%c0_202, %c0_203] : memref<128x512xbf16, #tpu.memory_space<vmem>>, vector<128x512xbf16>
    %cst_204 = arith.constant dense<0.000000e+00> : vector<2x512xf32>
    %800 = tpu.matmul %798, %799, %cst_204 {dimension_numbers = #tpu.dot_dimension_numbers<[1], [0], [0], [1], [0, 0, 1, 1], [], []>} : vector<2x128xbf16>, vector<128x512xbf16>, vector<2x512xf32> -> vector<2x512xf32>
    %801 = vector.extract_strided_slice %797 {offsets = [0, 512], sizes = [2, 512], strides = [1, 1]} : vector<2x1024xf32> to vector<2x512xf32>
    %802 = arith.addf %801, %800 : vector<2x512xf32>
    %803 = vector.broadcast %5 : vector<1x512xf32> to vector<2x512xf32>
    %804 = arith.addf %802, %803 : vector<2x512xf32>
    %805 = vector.extract_strided_slice %804 {offsets = [0, 0], sizes = [2, 256], strides = [1, 1]} : vector<2x512xf32> to vector<2x256xf32>
    %806 = arith.negf %805 : vector<2x256xf32>
    %807 = math.exp %806 : vector<2x256xf32>
    %cst_205 = arith.constant 1.000000e+00 : f32
    %808 = vector.broadcast %cst_205 : f32 to vector<2x256xf32>
    %809 = arith.addf %808, %807 : vector<2x256xf32>
    %810 = arith.divf %808, %809 : vector<2x256xf32>
    %811 = vector.extract_strided_slice %810 {offsets = [0, 0], sizes = [2, 128], strides = [1, 1]} : vector<2x256xf32> to vector<2x128xf32>
    %812 = vector.extract_strided_slice %810 {offsets = [0, 128], sizes = [2, 128], strides = [1, 1]} : vector<2x256xf32> to vector<2x128xf32>
    %813 = vector.extract_strided_slice %804 {offsets = [0, 256], sizes = [2, 128], strides = [1, 1]} : vector<2x512xf32> to vector<2x128xf32>
    %814 = math.tanh %813 : vector<2x128xf32>
    %815 = vector.extract_strided_slice %804 {offsets = [0, 384], sizes = [2, 128], strides = [1, 1]} : vector<2x512xf32> to vector<2x128xf32>
    %816 = arith.negf %815 : vector<2x128xf32>
    %817 = math.exp %816 : vector<2x128xf32>
    %cst_206 = arith.constant 1.000000e+00 : f32
    %818 = vector.broadcast %cst_206 : f32 to vector<2x128xf32>
    %819 = arith.addf %818, %817 : vector<2x128xf32>
    %820 = arith.divf %818, %819 : vector<2x128xf32>
    %821 = arith.mulf %812, %755 : vector<2x128xf32>
    %822 = arith.mulf %811, %814 : vector<2x128xf32>
    %823 = arith.addf %821, %822 : vector<2x128xf32>
    %824 = math.tanh %823 : vector<2x128xf32>
    %825 = arith.mulf %820, %824 : vector<2x128xf32>
    %826 = arith.index_cast %c11_i32_196 : i32 to index
    %c0_207 = arith.constant 0 : index
    %c0_208 = arith.constant 0 : index
    %827 = vector.load %arg10[%826, %c0_207, %c0_208] : memref<12x2x128xf32, #tpu.memory_space<vmem>>, vector<1x2x128xf32>
    %828 = vector.shape_cast %827 : vector<1x2x128xf32> to vector<2x128xf32>
    %829 = vector.shape_cast %825 : vector<2x128xf32> to vector<1x2x128xf32>
    tpu.vector_store %arg10[%826, %c0_207, %c0_208], %829 {strides = array<i32>} : memref<12x2x128xf32, #tpu.memory_space<vmem>>, vector<1x2x128xf32>,
    %830 = vector.extract_strided_slice %797 {offsets = [0, 0], sizes = [2, 512], strides = [1, 1]} : vector<2x1024xf32> to vector<2x512xf32>
    %c1_i32_209 = arith.constant 1 : i32
    %831 = arith.addi %c11_i32_196, %c1_i32_209 : i32
    %c11_i32_210 = arith.constant 11 : i32
    %832 = arith.minsi %831, %c11_i32_210 : i32
    %833 = arith.index_cast %832 : i32 to index
    %c0_211 = arith.constant 0 : index
    %c0_212 = arith.constant 0 : index
    %834 = vector.load %arg1[%833, %c0_211, %c0_212] : memref<12x2x1xf32, #tpu.memory_space<vmem>>, vector<1x2x1xf32>
    %835 = vector.shape_cast %834 : vector<1x2x1xf32> to vector<2x1xf32>
    %836 = vector.broadcast %835 : vector<2x1xf32> to vector<2x512xf32>
    %837 = vector.broadcast %3 : vector<1x512xf32> to vector<2x512xf32>
    %838 = arith.mulf %836, %837 : vector<2x512xf32>
    %839 = vector.broadcast %4 : vector<1x512xf32> to vector<2x512xf32>
    %840 = arith.addf %838, %839 : vector<2x512xf32>
    %841 = arith.addf %830, %840 : vector<2x512xf32>
    %c12_i32 = arith.constant 12 : i32
    %c0_213 = arith.constant 0 : index
    %c0_214 = arith.constant 0 : index
    %c0_215 = arith.constant 0 : index
    %842 = vector.load %arg11[%c0_213, %c0_214, %c0_215] : memref<4x2x128xf32, #tpu.memory_space<vmem>>, vector<1x2x128xf32>
    %843 = vector.shape_cast %842 : vector<1x2x128xf32> to vector<2x128xf32>
    %844 = vector.shape_cast %794 : vector<2x128xf32> to vector<1x2x128xf32>
    tpu.vector_store %arg11[%c0_213, %c0_214, %c0_215], %844 {strides = array<i32>} : memref<4x2x128xf32, #tpu.memory_space<vmem>>, vector<1x2x128xf32>,
    %c1_216 = arith.constant 1 : index
    %c0_217 = arith.constant 0 : index
    %c0_218 = arith.constant 0 : index
    %845 = vector.load %arg11[%c1_216, %c0_217, %c0_218] : memref<4x2x128xf32, #tpu.memory_space<vmem>>, vector<1x2x128xf32>
    %846 = vector.shape_cast %845 : vector<1x2x128xf32> to vector<2x128xf32>
    %847 = vector.shape_cast %792 : vector<2x128xf32> to vector<1x2x128xf32>
    tpu.vector_store %arg11[%c1_216, %c0_217, %c0_218], %847 {strides = array<i32>} : memref<4x2x128xf32, #tpu.memory_space<vmem>>, vector<1x2x128xf32>,
    %c2_219 = arith.constant 2 : index
    %c0_220 = arith.constant 0 : index
    %c0_221 = arith.constant 0 : index
    %848 = vector.load %arg11[%c2_219, %c0_220, %c0_221] : memref<4x2x128xf32, #tpu.memory_space<vmem>>, vector<1x2x128xf32>
    %849 = vector.shape_cast %848 : vector<1x2x128xf32> to vector<2x128xf32>
    %850 = vector.shape_cast %825 : vector<2x128xf32> to vector<1x2x128xf32>
    tpu.vector_store %arg11[%c2_219, %c0_220, %c0_221], %850 {strides = array<i32>} : memref<4x2x128xf32, #tpu.memory_space<vmem>>, vector<1x2x128xf32>,
    %c3_222 = arith.constant 3 : index
    %c0_223 = arith.constant 0 : index
    %c0_224 = arith.constant 0 : index
    %851 = vector.load %arg11[%c3_222, %c0_223, %c0_224] : memref<4x2x128xf32, #tpu.memory_space<vmem>>, vector<1x2x128xf32>
    %852 = vector.shape_cast %851 : vector<1x2x128xf32> to vector<2x128xf32>
    %853 = vector.shape_cast %823 : vector<2x128xf32> to vector<1x2x128xf32>
    tpu.vector_store %arg11[%c3_222, %c0_223, %c0_224], %853 {strides = array<i32>} : memref<4x2x128xf32, #tpu.memory_space<vmem>>, vector<1x2x128xf32>,
    %c0_225 = arith.constant 0 : index
    %c0_226 = arith.constant 0 : index
    %c0_227 = arith.constant 0 : index
    %854 = vector.load %arg10[%c0_225, %c0_226, %c0_227] : memref<12x2x128xf32, #tpu.memory_space<vmem>>, vector<12x2x128xf32>
    %c0_228 = arith.constant 0 : index
    %c0_229 = arith.constant 0 : index
    %855 = vector.load %arg7[%c0_228, %c0_229] : memref<1x128xf32, #tpu.memory_space<vmem>>, vector<1x128xf32>
    %856 = vector.shape_cast %855 : vector<1x128xf32> to vector<1x1x128xf32>
    %857 = vector.broadcast %856 : vector<1x1x128xf32> to vector<12x2x128xf32>
    %858 = arith.mulf %854, %857 : vector<12x2x128xf32>
    %cst_230 = arith.constant dense<0.000000e+00> : vector<12x2xf32>
    %859 = vector.multi_reduction <add>, %858, %cst_230 [2] : vector<12x2x128xf32> to vector<12x2xf32>
    %860 = tpu.transpose %859, [1, 0] : vector<12x2xf32> -> vector<2x12xf32>
    %c0_231 = arith.constant 0 : index
    %c0_232 = arith.constant 0 : index
    %861 = vector.load %arg8[%c0_231, %c0_232] : memref<1x1xf32, #tpu.memory_space<vmem>>, vector<1x1xf32>
    %862 = vector.broadcast %861 : vector<1x1xf32> to vector<2x12xf32>
    %863 = arith.addf %860, %862 : vector<2x12xf32>
    %c0_233 = arith.constant 0 : index
    %c0_234 = arith.constant 0 : index
    %864 = vector.load %arg9[%c0_233, %c0_234] : memref<2x12xf32, #tpu.memory_space<vmem>>, vector<2x12xf32>
    tpu.vector_store %arg9[%c0_233, %c0_234], %863 {strides = array<i32>} : memref<2x12xf32, #tpu.memory_space<vmem>>, vector<2x12xf32>,
    return
  }
  func.func @transform_0(%arg0: i32) -> (i32, i32, i32) {
    %c0_i32 = arith.constant 0 : i32
    %c0_i32_0 = arith.constant 0 : i32
    %c0_i32_1 = arith.constant 0 : i32
    return %arg0, %c0_i32, %c0_i32_0 : i32, i32, i32
  }
  func.func @transform_1(%arg0: i32) -> (i32, i32) {
    %c0_i32 = arith.constant 0 : i32
    %c0_i32_0 = arith.constant 0 : i32
    %c0_i32_1 = arith.constant 0 : i32
    return %c0_i32, %c0_i32_0 : i32, i32
  }
  func.func @transform_2(%arg0: i32) -> (i32, i32) {
    %c0_i32 = arith.constant 0 : i32
    %c0_i32_0 = arith.constant 0 : i32
    %c0_i32_1 = arith.constant 0 : i32
    return %c0_i32, %c0_i32_0 : i32, i32
  }
  func.func @transform_3(%arg0: i32) -> (i32, i32) {
    %c0_i32 = arith.constant 0 : i32
    %c0_i32_0 = arith.constant 0 : i32
    %c0_i32_1 = arith.constant 0 : i32
    return %c0_i32, %c0_i32_0 : i32, i32
  }
  func.func @transform_4(%arg0: i32) -> (i32, i32) {
    %c0_i32 = arith.constant 0 : i32
    %c0_i32_0 = arith.constant 0 : i32
    %c0_i32_1 = arith.constant 0 : i32
    return %c0_i32, %c0_i32_0 : i32, i32
  }
  func.func @transform_5(%arg0: i32) -> (i32, i32) {
    %c0_i32 = arith.constant 0 : i32
    %c0_i32_0 = arith.constant 0 : i32
    %c0_i32_1 = arith.constant 0 : i32
    return %c0_i32, %c0_i32_0 : i32, i32
  }
  func.func @transform_6(%arg0: i32) -> (i32, i32) {
    %c0_i32 = arith.constant 0 : i32
    %c0_i32_0 = arith.constant 0 : i32
    %c0_i32_1 = arith.constant 0 : i32
    return %c0_i32, %c0_i32_0 : i32, i32
  }
  func.func @transform_7(%arg0: i32) -> (i32, i32) {
    %c0_i32 = arith.constant 0 : i32
    %c0_i32_0 = arith.constant 0 : i32
    %c0_i32_1 = arith.constant 0 : i32
    return %c0_i32, %c0_i32_0 : i32, i32
  }
  func.func @transform_8(%arg0: i32) -> (i32, i32) {
    %c0_i32 = arith.constant 0 : i32
    %c0_i32_0 = arith.constant 0 : i32
    return %c0_i32, %arg0 : i32, i32
  }
}

</mosaic_0001>

<bundles_post_ra>
// kernel: tpu_custom_call.1
= control target key start
LH: loop header
LB: loop body
LE: loop exit
PB: predicated region body
PF: predicated region fallthrough
CT: control target
= control target key end

     0   :  { %s15799_s0 = inlined_call_operand.vmem [shape: f32[12,2,1], index: 0, kind: input, shape index: {}]   ;;  %s15800_s1 = inlined_call_operand.hbm [shape: bf16[128,1024], index: 1, kind: input, shape index: {}]   ;;  %s15801_s2 = inlined_call_operand.hbm [shape: bf16[128,512], index: 2, kind: input, shape index: {}]   ;;  %s15802_s3 = inlined_call_operand.vmem [shape: f32[1,512], index: 3, kind: input, shape index: {}]   ;;  %s15803_s4 = inlined_call_operand.vmem [shape: f32[1,512], index: 4, kind: input, shape index: {}]   ;;  %s15804_s5 = inlined_call_operand.vmem [shape: f32[1,512], index: 5, kind: input, shape index: {}]   ;;  %s15805_s6 = inlined_call_operand.vmem [shape: f32[1,128], index: 6, kind: input, shape index: {}]   ;;  %s15806_s7 = inlined_call_operand.<no memory space> [shape: f32[1,1], index: 7, kind: input, shape index: {}]   ;;  %s15807_s8 = inlined_call_operand.hbm [shape: f32[2,12], index: 8, kind: output, shape index: {}]  }
   0x1   :  { %v13_v0 = vstv %s15806_s7 }
   0x2   :  { %14 = vst [vmem:[#allocation4] sm:$0x1] %v13_v0 }
   0x3   :  { %15 = vsyncpa [#allocation6], 0 }
   0x4   :  { %16 = vsyncpa [#allocation9], 0 }
   0x5   :  { %17 = vsyncpa [#allocation7], 0  ;;  %s12940_s29 = smov [#allocation5]   ;;  %s12868_s11 = scalar_lea.hbm %s15800_s1, 8192 }
   0x6   :  { %s25_s30 = sshll.u32 %s12940_s29, 4  ;;  %p12869_p0 = scmp.ne.s32.totalorder %s15800_s1, %s12868_s11  ;;  %s26_s30 = int_to_ptr.vmem [resolvable:$true] %s25_s30 }
   0x7   :  { %p12872_p1 = scmp.lt.u32.totalorder %s12868_s11, %s15800_s1 }
   0x9   :  { %p12874_p2 = pnand %p12872_p1, %p12869_p0 }
   0xb   :  { %12877 = shalt.err (!%p12874_p2)
}
   0xc   :  { %s12878_s7 = scalar_lea.vmem %s26_s30, 8192  ;;  %p12883_p4 = scmp.lt.s32.totalorder %s26_s30, %s26_s30 }
   0xd   :  { %p12879_p3 = scmp.ne.s32.totalorder %s26_s30, %s12878_s7  ;;  %p12884_p5 = scmp.lt.s32.totalorder %s12878_s7, %s12878_s7 }
   0xf   :  { %p12885_p6 = por %p12884_p5, %p12883_p4 }
  0x11   :  { %p12886_p7 = pnand %p12885_p6, %p12879_p3 }
  0x13   :  { %12889 = shalt.err (!%p12886_p7)
}
  0x14   :  { %s12941_s16 = smov 512   ;;  %s12942_s17 = smov 32  }
  0x15   :  { %31 = dma.hbm_to_vmem [thread:$0]  %s15800_s1, 8192, %s26_s30, [#allocation6], %s12941_s16, %s12941_s16, %s12942_s17  }
  0x16   :  { %s12943_s20 = smov [#allocation8]   ;;  %s12890_s24 = scalar_lea.hbm %s15801_s2, 4096 }
  0x17   :  { %s37_s21 = sshll.u32 %s12943_s20, 4  ;;  %p12891_p8 = scmp.ne.s32.totalorder %s15801_s2, %s12890_s24  ;;  %s38_s21 = int_to_ptr.vmem [resolvable:$true] %s37_s21 }
  0x18   :  { %p12894_p9 = scmp.lt.u32.totalorder %s12890_s24, %s15801_s2 }
  0x1a   :  { %p12896_p10 = pnand %p12894_p9, %p12891_p8 }
  0x1c   :  { %12899 = shalt.err (!%p12896_p10)
}
  0x1d   :  { %s12900_s29 = scalar_lea.vmem %s38_s21, 4096  ;;  %p12905_p12 = scmp.lt.s32.totalorder %s38_s21, %s38_s21 }
  0x1e   :  { %p12901_p11 = scmp.ne.s32.totalorder %s38_s21, %s12900_s29  ;;  %p12906_p13 = scmp.lt.s32.totalorder %s12900_s29, %s12900_s29 }
  0x20   :  { %p12907_p0 = por %p12906_p13, %p12905_p12 }
  0x22   :  { %p12908_p1 = pnand %p12907_p0, %p12901_p11 }
  0x24   :  { %12911 = shalt.err (!%p12908_p1)
}
  0x25   :  { %s12944_s1 = smov 256   ;;  %s12945_s30 = smov 16  }
  0x26   :  { %43 = dma.hbm_to_vmem [thread:$0]  %s15801_s2, 4096, %s38_s21, [#allocation9], %s12944_s1, %s12944_s1, %s12945_s30  }
  0x27   :  { %12934 = dma.done.wait [#allocation6], 8192  }
  0x28   :  { %12935 = vsyncadd [#allocation6], 4294959104 }
  0x29   :  { %12936 = dma.done.wait [#allocation9], 4096  }
  0x2a   :  { %12937 = vsyncadd [#allocation9], 4294963200  ;;  %v15809_v1 = vmov 0   ;;  %v12947_v2 = vmov 0.0   ;;  %v136_v3 = vld [vmem:[#allocation5] sm:$0xff]  ;;  %v137_v5 = vld [vmem:[#allocation5 + $0x8] sm:$0xff] }
  0x2b   :  { %392 = vmatprep.mubr.bf16.mxu0 %v15809_v1  ;;  %433 = vmatprep.mubr.bf16.mxu1 %v15809_v1  ;;  %65 = vst [vmem:[#allocation3] sm:$0x3] %v12947_v2  ;;  %66 = vst [vmem:[#allocation3 + $0x2] sm:$0x3] %v12947_v2  ;;  %v140_v4 = vld [vmem:[#allocation5 + $0x20] sm:$0xff]  ;;  %v141_v7 = vld [vmem:[#allocation5 + $0x28] sm:$0xff] }
  0x2c   :  { %68 = vst [vmem:[#allocation3 + $0x6] sm:$0x3] %v12947_v2  ;;  %67 = vst [vmem:[#allocation3 + $0x4] sm:$0x3] %v12947_v2  ;;  %12189 = vset.pattern.permute.xlu0 %v15809_v1  ;;  %12190 = vset.pattern.permute.xlu1 %v15809_v1  ;;  %v13025_v6 = vcombine.high %v136_v3, %v140_v4  ;;  %v13027_v8 = vcombine.low %v136_v3, %v140_v4  ;;  %v144_v9 = vld [vmem:[#allocation5 + $0x40] sm:$0xff]  ;;  %v145_v14 = vld [vmem:[#allocation5 + $0x48] sm:$0xff] }
  0x2d   :  { %v148_v10 = vld [vmem:[#allocation5 + $0x60] sm:$0xff]  ;;  %v13029_v11 = vcombine.high %v137_v5, %v141_v7  ;;  %v13031_v12 = vcombine.low %v137_v5, %v141_v7  ;;  %v149_v15 = vld [vmem:[#allocation5 + $0x68] sm:$0xff]  ;;  %vm10796_vm0 = vcmask 1041408   ;;  %vm10895_vm1 = vcmask 1041409  }
  0x2e   :  { %v13033_v13 = vcombine.high %v144_v9, %v148_v10  ;;  %v152_v16 = vld [vmem:[#allocation5 + $0x80] sm:$0xff]  ;;  %360 = vmatprep.subr.bf16.mxu0 %v13025_v6  ;;  %v13036_v17 = vcombine.high %v145_v14, %v149_v15  ;;  %v153_v19 = vld [vmem:[#allocation5 + $0x88] sm:$0xff]  ;;  %v13040_v21 = vcombine.low %v144_v9, %v148_v10  ;;  %v13044_v22 = vcombine.low %v145_v14, %v149_v15  ;;  %v12004_v10 = vld [vmem:[%s15799_s0 + $0x14] sm:$0x3] }
  0x2f   :  { %v156_v18 = vld [vmem:[#allocation5 + $0xa0] sm:$0xff]  ;;  %v157_v20 = vld [vmem:[#allocation5 + $0xa8] sm:$0xff]  ;;  %401 = vmatprep.subr.bf16.mxu1 %v13029_v11  ;;  %361 = vmatpush1.bf16.msra.mxu0 %v13027_v8  ;;  %vm10897_vm2 = vcmask 1042434   ;;  %vm10899_vm3 = vcmask 1043459   ;;  %vm10901_vm4 = vcmask 1044484   ;;  %vm10903_vm5 = vcmask 1045509  }
  0x30   :  { %402 = vmatpush1.bf16.msra.mxu1 %v13031_v12  ;;  %362 = vmatprep.subr.bf16.mxu0 %v13033_v13  ;;  %v13046_v23 = vcombine.high %v152_v16, %v156_v18  ;;  %v13049_v24 = vcombine.high %v153_v19, %v157_v20  ;;  %v160_v25 = vld [vmem:[#allocation5 + $0xc0] sm:$0xff]  ;;  %v161_v27 = vld [vmem:[#allocation5 + $0xc8] sm:$0xff]  ;;  %v13052_v29 = vcombine.low %v152_v16, %v156_v18  ;;  %v138_v18 = vld [vmem:[#allocation5 + $0x10] sm:$0xff]  ;;  %vm10905_vm6 = vcmask 1046534  }
  0x31   :  { %403 = vmatprep.subr.bf16.mxu1 %v13036_v17  ;;  %v164_v26 = vld [vmem:[#allocation5 + $0xe0] sm:$0xff]  ;;  %v165_v28 = vld [vmem:[#allocation5 + $0xe8] sm:$0xff]  ;;  %v13056_v30 = vcombine.low %v153_v19, %v157_v20  ;;  %v142_v19 = vld [vmem:[#allocation5 + $0x30] sm:$0xff]  ;;  %vm10907_vm7 = vcmask 1047559   ;;  %vm10957_vm8 = vcmask 91136  }
  0x32   :  { %v13058_v31 = vcombine.high %v160_v25, %v164_v26  ;;  %v13061_v32 = vcombine.high %v161_v27, %v165_v28  ;;  %v168_v33 = vld [vmem:[#allocation5 + $0x100] sm:$0xff]  ;;  %v169_v35 = vld [vmem:[#allocation5 + $0x108] sm:$0xff]  ;;  %v13067_v38 = vcombine.low %v160_v25, %v164_v26  ;;  %v13074_v42 = vcombine.low %v161_v27, %v165_v28  ;;  %v72_v9 = vld [vmem:[#allocation3] sm:$0x3] }
  0x33   :  { %363 = vmatpush1.bf16.msra.mxu0 %v13040_v21  ;;  %v172_v34 = vld [vmem:[#allocation5 + $0x120] sm:$0xff]  ;;  %v173_v36 = vld [vmem:[#allocation5 + $0x128] sm:$0xff]  ;;  %v135_v16 = vpack.c.bf16 %v72_v9, %v72_v9  ;;  %v139_v20 = vld [vmem:[#allocation5 + $0x18] sm:$0xff]  ;;  %v13173_v25 = vcombine.low %v138_v18, %v142_v19  ;;  %v13175_v26 = vcombine.high %v138_v18, %v142_v19 }
  0x34   :  { %404 = vmatpush1.bf16.msra.mxu1 %v13044_v22  ;;  %364 = vmatprep.subr.bf16.mxu0 %v13046_v23  ;;  %v79_v37 = vld [vmem:[%s15799_s0] sm:$0x3]  ;;  %v11077_v41 = vld [vmem:[%s15799_s0 + $0x2] sm:$0x3]  ;;  %v13076_v43 = vcombine.high %v168_v33, %v172_v34  ;;  %v177_v44 = vld [vmem:[#allocation5 + $0x148] sm:$0xff]  ;;  %v13079_v46 = vcombine.high %v169_v35, %v173_v36  ;;  %v13085_v48 = vcombine.low %v168_v33, %v172_v34  ;;  %v15808_v34 = vlaneseq }
  0x35   :  { %405 = vmatprep.subr.bf16.mxu1 %v13049_v24  ;;  %v176_v39 = vld [vmem:[#allocation5 + $0x140] sm:$0xff]  ;;  %82 = vperm.xlu0 %12189, %v79_v37   ;;  %v181_v45 = vld [vmem:[#allocation5 + $0x168] sm:$0xff]  ;;  %v13089_v51 = vcombine.low %v169_v35, %v173_v36  ;;  %16120 = vst [vmem:[#allocation14_spill] sm:$0xff] %v13173_v25  ;;  %v143_v27 = vld [vmem:[#allocation5 + $0x38] sm:$0xff] }
  0x36   :  { %v180_v40 = vld [vmem:[#allocation5 + $0x160] sm:$0xff]  ;;  %v185_v53 = vld [vmem:[#allocation5 + $0x188] sm:$0xff]  ;;  %v13094_v55 = vcombine.high %v177_v44, %v181_v45  ;;  %v13104_v60 = vcombine.low %v177_v44, %v181_v45  ;;  %v13177_v28 = vcombine.low %v139_v20, %v143_v27  ;;  %v13179_v33 = vcombine.high %v139_v20, %v143_v27 }
  0x37   :  { %365 = vmatpush1.bf16.msra.mxu0 %v13052_v29  ;;  %v11386_v47 = vld [vmem:[%s15799_s0 + $0x8] sm:$0x3]  ;;  %v13091_v52 = vcombine.high %v176_v39, %v180_v40  ;;  %v11592_v56 = vld [vmem:[%s15799_s0 + $0xc] sm:$0x3]  ;;  %v13100_v57 = vcombine.low %v176_v39, %v180_v40  ;;  %v11798_v2 = vld [vmem:[%s15799_s0 + $0x10] sm:$0x3] }
  0x38   :  { %406 = vmatpush1.bf16.msra.mxu1 %v13056_v30  ;;  %366 = vmatprep.subr.bf16.mxu0 %v13058_v31  ;;  %v184_v49 = vld [vmem:[#allocation5 + $0x180] sm:$0xff]  ;;  %v189_v54 = vld [vmem:[#allocation5 + $0x1a8] sm:$0xff]  ;;  %16121 = vst [vmem:[#allocation15_spill] sm:$0xff] %v13177_v28  ;;  %v13184_v35 = vshrl.u32 %v15808_v34, 7 }
  0x39   :  { %407 = vmatprep.subr.bf16.mxu1 %v13061_v32  ;;  %v188_v50 = vld [vmem:[#allocation5 + $0x1a0] sm:$0xff]  ;;  %1128 = vperm.xlu0 %12189, %v11077_v41   ;;  %v193_v62 = vld [vmem:[#allocation5 + $0x1c8] sm:$0xff]  ;;  %v13109_v0 = vcombine.high %v185_v53, %v189_v54  ;;  %v13119_v4 = vcombine.low %v185_v53, %v189_v54 }
  0x3a   :  { %v192_v58 = vld [vmem:[#allocation5 + $0x1c0] sm:$0xff]  ;;  %v13106_v61 = vcombine.high %v184_v49, %v188_v50  ;;  %v197_v63 = vld [vmem:[#allocation5 + $0x1e8] sm:$0xff]  ;;  %v13115_v3 = vcombine.low %v184_v49, %v188_v50  ;;  %16122 = vst [vmem:[#allocation16_spill] sm:$0xff] %v13184_v35  ;;  %v13187_v36 = vsub.s32 0, %v13184_v35  ;;  %v13193_v39 = vsub.s32 1, %v13184_v35 }
  0x3b   :  { %367 = vmatpush1.bf16.msra.mxu0 %v13067_v38  ;;  %v196_v59 = vld [vmem:[#allocation5 + $0x1e0] sm:$0xff]  ;;  %v13124_v7 = vcombine.high %v193_v62, %v197_v63  ;;  %v13134_v15 = vcombine.low %v193_v62, %v197_v63 }
  0x3c   :  { %408 = vmatpush1.bf16.msra.mxu1 %v13074_v42  ;;  %368 = vmatprep.subr.bf16.mxu0 %v13076_v43  ;;  %v13121_v5 = vcombine.high %v192_v58, %v196_v59  ;;  %v13130_v14 = vcombine.low %v192_v58, %v196_v59  ;;  %16123 = vst [vmem:[#allocation17_spill] sm:$0xff] %v13187_v36  ;;  %v69_v37 = vld [vmem:[%s15802_s3] sm:$0xf]  ;;  %16124 = vst [vmem:[#allocation18_spill] sm:$0xff] %v13193_v39  ;;  %v13220_v59 = vsub.s32 2, %v13184_v35 }
  0x3d   :  { %409 = vmatprep.subr.bf16.mxu1 %v13079_v46  ;;  %3831 = vperm.xlu0 %12189, %v11386_v47   ;;  %v13196_v40 = vrot.slane %v69_v37, %v13187_v36  ;;  %v70_v41 = vld [vmem:[%s15803_s4] sm:$0xf]  ;;  %v13202_v44 = vrot.slane %v69_v37, %v13193_v39  ;;  %v13205_v47 = vsub.s32 3, %v13184_v35 }
  0x3e   :  { %v13209_v50 = vrot.slane %v70_v41, %v13187_v36  ;;  %v13213_v54 = vrot.slane %v70_v41, %v13193_v39  ;;  %16131 = vst [vmem:[#allocation25_spill] sm:$0xff] %v13220_v59 }
  0x3f   :  { %369 = vmatpush1.bf16.msra.mxu0 %v13085_v48  ;;  %16125 = vst [vmem:[#allocation19_spill] sm:$0xff] %v13196_v40  ;;  %16126 = vst [vmem:[#allocation20_spill] sm:$0xff] %v13202_v44  ;;  %v13225_v9 = vrot.slane %v70_v41, %v13205_v47 }
  0x40   :  { %410 = vmatpush1.bf16.msra.mxu1 %v13089_v51  ;;  %370 = vmatprep.subr.bf16.mxu0 %v13091_v52  ;;  %16127 = vst [vmem:[#allocation21_spill] sm:$0xff] %v13205_v47  ;;  %16128 = vst [vmem:[#allocation22_spill] sm:$0xff] %v13209_v50 }
  0x41   :  { %411 = vmatprep.subr.bf16.mxu1 %v13094_v55  ;;  %5633 = vperm.xlu0 %12189, %v11592_v56   ;;  %16129 = vst [vmem:[#allocation23_spill] sm:$0xff] %v13213_v54  ;;  %v13216_v56 = vrot.slane %v69_v37, %v13205_v47  ;;  %16132 = vst [vmem:[#allocation26_spill] sm:$0xff] %v13225_v9 }
  0x43   :  { %371 = vmatpush1.bf16.msra.mxu0 %v13100_v57  ;;  %16130 = vst [vmem:[#allocation24_spill] sm:$0xff] %v13216_v56 }
  0x44   :  { %412 = vmatpush1.bf16.msra.mxu1 %v13104_v60  ;;  %372 = vmatprep.subr.bf16.mxu0 %v13106_v61 }
  0x45   :  { %413 = vmatprep.subr.bf16.mxu1 %v13109_v0  ;;  %7435 = vperm.xlu0 %12189, %v11798_v2  }
  0x47   :  { %373 = vmatpush1.bf16.msra.mxu0 %v13115_v3 }
  0x48   :  { %414 = vmatpush1.bf16.msra.mxu1 %v13119_v4  ;;  %374 = vmatprep.subr.bf16.mxu0 %v13121_v5 }
  0x49   :  { %415 = vmatprep.subr.bf16.mxu1 %v13124_v7  ;;  %9237 = vperm.xlu0 %12189, %v12004_v10  }
  0x4b   :  { %375 = vmatpush1.bf16.msra.mxu0 %v13130_v14 }
  0x4c   :  { %416 = vmatpush1.bf16.msra.mxu1 %v13134_v15  ;;  %631 = vmatprep.subr.bf16.mxu0 %v13025_v6 }
  0x4d   :  { %672 = vmatprep.subr.bf16.mxu1 %v13029_v11 }
  0x4e   :  { %393 = vmatmul.mubr.bf16.vlgmr.msra.gmra.mrb[0].mxu0 %v135_v16 }
  0x4f   :  { %434 = vmatmul.mubr.bf16.vlgmr.msra.gmra.mrb[0].mxu1 %v135_v16  ;;  %632 = vmatpush1.bf16.msra.mxu0 %v13027_v8  ;;  %v13228_v16 = vrot.slane %v69_v37, %v13220_v59 }
  0x50   :  { %673 = vmatpush1.bf16.msra.mxu1 %v13031_v12  ;;  %633 = vmatprep.subr.bf16.mxu0 %v13033_v13 }
  0x51   :  { %674 = vmatprep.subr.bf16.mxu1 %v13036_v17  ;;  %663 = vmatprep.mubr.bf16.mxu0 %v15809_v1  ;;  %16133 = vst [vmem:[#allocation27_spill] sm:$0xff] %v13228_v16 }
  0x52   :  { %704 = vmatprep.mubr.bf16.mxu1 %v15809_v1 }
  0x53   :  { %634 = vmatpush1.bf16.msra.mxu0 %v13040_v21 }
  0x54   :  { %675 = vmatpush1.bf16.msra.mxu1 %v13044_v22  ;;  %635 = vmatprep.subr.bf16.mxu0 %v13046_v23 }
  0x55   :  { %676 = vmatprep.subr.bf16.mxu1 %v13049_v24 }
  0x57   :  { %636 = vmatpush1.bf16.msra.mxu0 %v13052_v29 }
  0x58   :  { %677 = vmatpush1.bf16.msra.mxu1 %v13056_v30  ;;  %637 = vmatprep.subr.bf16.mxu0 %v13058_v31 }
  0x59   :  { %678 = vmatprep.subr.bf16.mxu1 %v13061_v32 }
  0x5b   :  { %638 = vmatpush1.bf16.msra.mxu0 %v13067_v38 }
  0x5c   :  { %679 = vmatpush1.bf16.msra.mxu1 %v13074_v42  ;;  %639 = vmatprep.subr.bf16.mxu0 %v13076_v43 }
  0x5d   :  { %680 = vmatprep.subr.bf16.mxu1 %v13079_v46 }
  0x5f   :  { %640 = vmatpush1.bf16.msra.mxu0 %v13085_v48 }
  0x60   :  { %681 = vmatpush1.bf16.msra.mxu1 %v13089_v51  ;;  %641 = vmatprep.subr.bf16.mxu0 %v13091_v52 }
  0x61   :  { %682 = vmatprep.subr.bf16.mxu1 %v13094_v55 }
  0x63   :  { %642 = vmatpush1.bf16.msra.mxu0 %v13100_v57 }
  0x64   :  { %683 = vmatpush1.bf16.msra.mxu1 %v13104_v60  ;;  %643 = vmatprep.subr.bf16.mxu0 %v13106_v61 }
  0x65   :  { %684 = vmatprep.subr.bf16.mxu1 %v13109_v0 }
  0x67   :  { %644 = vmatpush1.bf16.msra.mxu0 %v13115_v3 }
  0x68   :  { %685 = vmatpush1.bf16.msra.mxu1 %v13119_v4  ;;  %645 = vmatprep.subr.bf16.mxu0 %v13121_v5 }
  0x69   :  { %686 = vmatprep.subr.bf16.mxu1 %v13124_v7 }
  0x6b   :  { %646 = vmatpush1.bf16.msra.mxu0 %v13130_v14 }
  0x6c   :  { %687 = vmatpush1.bf16.msra.mxu1 %v13134_v15  ;;  %713 = vmatprep.subr.bf16.mxu0 %v13175_v26 }
  0x6d   :  { %754 = vmatprep.subr.bf16.mxu1 %v13179_v33 }
  0xb4   :  { %v83_v45 = vpop.permute.xlu0 %82 }
  0xb5   :  { %v106_v49 = vmul.f32 %v13196_v40, %v83_v45  ;;  %v107_v53 = vmul.f32 %v13202_v44, %v83_v45  ;;  %v109_v2 = vmul.f32 %v13216_v56, %v83_v45  ;;  %v108_v47 = vmul.f32 %v13228_v16, %v83_v45  ;;  %v74_v45 = vld [vmem:[#allocation3 + $0x2] sm:$0x3] }
  0xb7   :  { %v131_v58 = vadd.f32 %v13209_v50, %v106_v49  ;;  %v132_v62 = vadd.f32 %v13213_v54, %v107_v53  ;;  %v134_v53 = vadd.f32 %v13225_v9, %v109_v2 }
 0x121   :  { %v394_v63 = vpop.f32.mrb[0].mxu0 }
 0x122   :  { %v442_v10 = vadd.f32 %v394_v63, %v131_v58  ;;  %v435_v18 = vpop.f32.mrb[0].mxu1  ;;  %v396_v19 = vpop.f32.mrb[1].mxu0  ;;  %v13233_v58 = vrot.slane %v70_v41, %v13220_v59  ;;  %v167_v59 = vld [vmem:[#allocation5 + $0xf8] sm:$0xff] }
 0x123   :  { %v443_v20 = vadd.f32 %v396_v19, %v132_v62  ;;  %v437_v27 = vpop.f32.mrb[1].mxu1  ;;  %v398_v49 = vpop.f32.mrb[2].mxu0 }
 0x124   :  { %v11007_v34 = vmul.f32 -1.442695, %v442_v10  ;;  %v399_v1 = vpop.f32.mrb[3].mxu0  ;;  %v439_v35 = vpop.f32.mrb[2].mxu1  ;;  %16134 = vst [vmem:[#allocation28_spill] sm:$0xff] %v13233_v58  ;;  %v445_v37 = vadd.f32 %v437_v27, %v134_v53  ;;  %v133_v63 = vadd.f32 %v13233_v58, %v108_v47 }
 0x125   :  { %v11008_v39 = vmul.f32 -1.442695, %v443_v20  ;;  %v440_v36 = vpop.f32.mrb[3].mxu1 }
 0x126   :  { %12479 = vpow2.f32 %v11007_v34  ;;  %v11009_v62 = vmul.f32 -1.442695, %v445_v37  ;;  %v444_v19 = vadd.f32 %v435_v18, %v133_v63  ;;  %v146_v18 = vld [vmem:[#allocation5 + $0x50] sm:$0xff] }
 0x127   :  { %12481 = vpow2.f32 %v11008_v39  ;;  %v150_v63 = vld [vmem:[#allocation5 + $0x70] sm:$0xff] }
 0x128   :  { %12483 = vpow2.f32 %v11009_v62  ;;  %v147_v62 = vld [vmem:[#allocation5 + $0x58] sm:$0xff] }
 0x129   :  { %12485 = vtanh.f32 %v444_v19  ;;  %v151_v19 = vld [vmem:[#allocation5 + $0x78] sm:$0xff] }
 0x130   :  { %v12480_v49 = vpop.eup %12479 }
 0x131   :  { %v12482_v10 = vpop.eup %12481  ;;  %v452_v1 = vadd.f32 1.0, %v12480_v49 }
 0x132   :  { %v453_v35 = vadd.f32 1.0, %v12482_v10  ;;  %v12484_v34 = vpop.eup %12483 }
 0x133   :  { %12487 = vrcp.f32 %v452_v1  ;;  %v12486_v36 = vpop.eup %12485  ;;  %v462_v39 = vadd.f32 1.0, %v12484_v34  ;;  %v13241_v1 = vcombine.high %v146_v18, %v150_v63  ;;  %v154_v34 = vld [vmem:[#allocation5 + $0x90] sm:$0xff] }
 0x134   :  { %12489 = vrcp.f32 %v453_v35  ;;  %v13243_v35 = vcombine.high %v147_v62, %v151_v19 }
 0x135   :  { %12491 = vrcp.f32 %v462_v39  ;;  %16136 = vst [vmem:[#allocation30_spill] sm:$0xff] %v13241_v1 }
 0x136   :  { %16137 = vst [vmem:[#allocation31_spill] sm:$0xff] %v13243_v35 }
 0x13d   :  { %v12488_v2 = vpop.eup %12487 }
 0x13e   :  { %v12490_v41 = vpop.eup %12489  ;;  %v466_v20 = vmul.f32 %v12488_v2, %v12486_v36  ;;  %v158_v36 = vld [vmem:[#allocation5 + $0xb0] sm:$0xff]  ;;  %v159_v2 = vld [vmem:[#allocation5 + $0xb8] sm:$0xff] }
 0x13f   :  { %v465_v27 = vmul.f32 %v12490_v41, %v74_v45  ;;  %v12492_v47 = vpop.eup %12491  ;;  %v155_v45 = vld [vmem:[#allocation5 + $0x98] sm:$0xff]  ;;  %v13249_v41 = vcombine.low %v146_v18, %v150_v63  ;;  %v13255_v39 = vcombine.high %v154_v34, %v158_v36  ;;  %v13263_v18 = vcombine.low %v154_v34, %v158_v36 }
 0x140   :  { %v13265_v63 = vcombine.low %v155_v45, %v159_v2 }
 0x141   :  { %v13236_v53 = vadd.f32 %v466_v20, %v465_v27  ;;  %16138 = vst [vmem:[#allocation32_spill] sm:$0xff] %v13249_v41  ;;  %v13251_v20 = vcombine.low %v147_v62, %v151_v19  ;;  %16140 = vst [vmem:[#allocation34_spill] sm:$0xff] %v13255_v39  ;;  %v13257_v27 = vcombine.high %v155_v45, %v159_v2 }
 0x142   :  { %16143 = vst [vmem:[#allocation36_spill] sm:$0xff] %v13263_v18  ;;  %16144 = vst [vmem:[#allocation37_spill] sm:$0xff] %v13265_v63 }
 0x143   :  { %16135 = vst [vmem:[#allocation29_spill] sm:$0xff] %v13236_v53  ;;  %12493 = vtanh.f32 %v13236_v53  ;;  %16139 = vst [vmem:[#allocation33_spill] sm:$0xff] %v13251_v20  ;;  %v16142_v53 = vmov 0  }
 0x144   :  { %16141 = vst [vmem:[#allocation35_spill] sm:$0xff] %v13257_v27 }
 0x14d   :  { %v12494_v37 = vpop.eup %12493 }
 0x14e   :  { %v469_v49 = vmul.f32 %v12494_v37, %v12492_v47  ;;  %v162_v47 = vld [vmem:[#allocation5 + $0xd0] sm:$0xff] }
 0x14f   :  { %v166_v37 = vld [vmem:[#allocation5 + $0xf0] sm:$0xff] }
 0x150   :  { %v13239_v10 = vpack.c.bf16 %v469_v49, %v469_v49  ;;  %v163_v49 = vld [vmem:[#allocation5 + $0xd8] sm:$0xff]  ;;  %v13269_v62 = vcombine.high %v162_v47, %v166_v37  ;;  %v13275_v34 = vcombine.low %v162_v47, %v166_v37 }
 0x151   :  { %v13271_v19 = vcombine.high %v163_v49, %v167_v59  ;;  %v13277_v36 = vcombine.low %v163_v49, %v167_v59 }
 0x152   :  { %664 = vmatmul.mubr.bf16.vlgmr.msra.gmra.mrb[4].mxu0 %v13239_v10  ;;  %705 = vmatmul.mubr.bf16.vlgmr.msra.gmra.mrb[4].mxu1 %v13239_v10  ;;  %16145 = vst [vmem:[#allocation38_spill] sm:$0xff] %v13269_v62  ;;  %16147 = vst [vmem:[#allocation40_spill] sm:$0xff] %v13275_v34 }
 0x153   :  { %714 = vmatpush1.bf16.msra.mxu0 %v13173_v25  ;;  %755 = vmatpush1.bf16.msra.mxu1 %v13177_v28  ;;  %16146 = vst [vmem:[#allocation39_spill] sm:$0xff] %v13271_v19  ;;  %v171_v28 = vld [vmem:[#allocation5 + $0x118] sm:$0xff]  ;;  %16148 = vst [vmem:[#allocation41_spill] sm:$0xff] %v13277_v36 }
 0x154   :  { %715 = vmatprep.subr.bf16.mxu0 %v13241_v1  ;;  %756 = vmatprep.subr.bf16.mxu1 %v13243_v35  ;;  %v170_v35 = vld [vmem:[#allocation5 + $0x110] sm:$0xff]  ;;  %v175_v25 = vld [vmem:[#allocation5 + $0x138] sm:$0xff] }
 0x155   :  { %745 = vmatprep.mubr.bf16.mxu0 %v16142_v53  ;;  %786 = vmatprep.mubr.bf16.mxu1 %v16142_v53  ;;  %v174_v1 = vld [vmem:[#allocation5 + $0x130] sm:$0xff]  ;;  %v13283_v2 = vcombine.high %v171_v28, %v175_v25  ;;  %v13289_v59 = vcombine.low %v171_v28, %v175_v25 }
 0x156   :  { %v13281_v45 = vcombine.high %v170_v35, %v174_v1  ;;  %v13287_v47 = vcombine.low %v170_v35, %v174_v1 }
 0x157   :  { %716 = vmatpush1.bf16.msra.mxu0 %v13249_v41  ;;  %757 = vmatpush1.bf16.msra.mxu1 %v13251_v20  ;;  %16150 = vst [vmem:[#allocation43_spill] sm:$0xff] %v13283_v2  ;;  %v179_v20 = vld [vmem:[#allocation5 + $0x158] sm:$0xff] }
 0x158   :  { %717 = vmatprep.subr.bf16.mxu0 %v13255_v39  ;;  %758 = vmatprep.subr.bf16.mxu1 %v13257_v27  ;;  %16149 = vst [vmem:[#allocation42_spill] sm:$0xff] %v13281_v45  ;;  %v178_v27 = vld [vmem:[#allocation5 + $0x150] sm:$0xff]  ;;  %v183_v41 = vld [vmem:[#allocation5 + $0x178] sm:$0xff] }
 0x159   :  { %v182_v39 = vld [vmem:[#allocation5 + $0x170] sm:$0xff]  ;;  %v13295_v49 = vcombine.high %v179_v20, %v183_v41  ;;  %v13301_v25 = vcombine.low %v179_v20, %v183_v41 }
 0x15a   :  { %v13293_v37 = vcombine.high %v178_v27, %v182_v39  ;;  %v13299_v1 = vcombine.low %v178_v27, %v182_v39 }
 0x15b   :  { %718 = vmatpush1.bf16.msra.mxu0 %v13263_v18  ;;  %759 = vmatpush1.bf16.msra.mxu1 %v13265_v63  ;;  %16151 = vst [vmem:[#allocation44_spill] sm:$0xff] %v13295_v49  ;;  %v187_v63 = vld [vmem:[#allocation5 + $0x198] sm:$0xff] }
 0x15c   :  { %719 = vmatprep.subr.bf16.mxu0 %v13269_v62  ;;  %760 = vmatprep.subr.bf16.mxu1 %v13271_v19  ;;  %v186_v19 = vld [vmem:[#allocation5 + $0x190] sm:$0xff]  ;;  %v191_v18 = vld [vmem:[#allocation5 + $0x1b8] sm:$0xff]  ;;  %16152 = vst [vmem:[#allocation45_spill] sm:$0xff] %v13299_v1 }
 0x15d   :  { %v190_v62 = vld [vmem:[#allocation5 + $0x1b0] sm:$0xff]  ;;  %v13307_v35 = vcombine.high %v187_v63, %v191_v18  ;;  %v13313_v41 = vcombine.low %v187_v63, %v191_v18  ;;  %v13331_v63 = vld [vmem:[#allocation8 + $0xc] ss:$16 sps:$4 sm:$0xff]  }
 0x15e   :  { %v13305_v28 = vcombine.high %v186_v19, %v190_v62  ;;  %v13311_v39 = vcombine.low %v186_v19, %v190_v62  ;;  %v13329_v18 = vld [vmem:[#allocation8 + $0x4] ss:$16 sps:$4 sm:$0xff]   ;;  %16154 = vst [vmem:[#allocation47_spill] sm:$0xff] %v13331_v63  ;;  %v13335_v62 = vld [vmem:[#allocation8] ss:$16 sps:$4 sm:$0xff]  }
 0x15f   :  { %720 = vmatpush1.bf16.msra.mxu0 %v13275_v34  ;;  %761 = vmatpush1.bf16.msra.mxu1 %v13277_v36  ;;  %v195_v36 = vld [vmem:[#allocation5 + $0x1d8] sm:$0xff]  ;;  %16153 = vst [vmem:[#allocation46_spill] sm:$0xff] %v13329_v18  ;;  %16155 = vst [vmem:[#allocation48_spill] sm:$0xff] %v13335_v62 }
 0x160   :  { %721 = vmatprep.subr.bf16.mxu0 %v13281_v45  ;;  %762 = vmatprep.subr.bf16.mxu1 %v13283_v2  ;;  %v194_v2 = vld [vmem:[#allocation5 + $0x1d0] sm:$0xff]  ;;  %v199_v34 = vld [vmem:[#allocation5 + $0x1f8] sm:$0xff] }
 0x161   :  { %v198_v45 = vld [vmem:[#allocation5 + $0x1f0] sm:$0xff]  ;;  %v13319_v27 = vcombine.high %v195_v36, %v199_v34  ;;  %v13337_v19 = vld [vmem:[#allocation8 + $0x8] ss:$16 sps:$4 sm:$0xff]  }
 0x162   :  { %v13317_v20 = vcombine.high %v194_v2, %v198_v45  ;;  %16156 = vst [vmem:[#allocation49_spill] sm:$0xff] %v13337_v19 }
 0x163   :  { %722 = vmatpush1.bf16.msra.mxu0 %v13287_v47  ;;  %763 = vmatpush1.bf16.msra.mxu1 %v13289_v59 }
 0x164   :  { %723 = vmatprep.subr.bf16.mxu0 %v13293_v37  ;;  %764 = vmatprep.subr.bf16.mxu1 %v13295_v49  ;;  %v13323_v49 = vcombine.low %v194_v2, %v198_v45  ;;  %v13349_v45 = vld [vmem:[#allocation8 + $0x20] ss:$16 sps:$4 sm:$0xff]   ;;  %v13351_v2 = vld [vmem:[#allocation8 + $0x28] ss:$16 sps:$4 sm:$0xff]  }
 0x165   :  { %16159 = vst [vmem:[#allocation52_spill] sm:$0xff] %v13349_v45  ;;  %16160 = vst [vmem:[#allocation53_spill] sm:$0xff] %v13351_v2 }
 0x167   :  { %724 = vmatpush1.bf16.msra.mxu0 %v13299_v1  ;;  %765 = vmatpush1.bf16.msra.mxu1 %v13301_v25  ;;  %v13325_v1 = vcombine.low %v195_v36, %v199_v34  ;;  %v13341_v34 = vld [vmem:[#allocation8 + $0x24] ss:$16 sps:$4 sm:$0xff]   ;;  %v13343_v36 = vld [vmem:[#allocation8 + $0x2c] ss:$16 sps:$4 sm:$0xff]  }
 0x168   :  { %725 = vmatprep.subr.bf16.mxu0 %v13305_v28  ;;  %766 = vmatprep.subr.bf16.mxu1 %v13307_v35  ;;  %16157 = vst [vmem:[#allocation50_spill] sm:$0xff] %v13341_v34  ;;  %16158 = vst [vmem:[#allocation51_spill] sm:$0xff] %v13343_v36 }
 0x16b   :  { %726 = vmatpush1.bf16.msra.mxu0 %v13311_v39  ;;  %767 = vmatpush1.bf16.msra.mxu1 %v13313_v41 }
 0x16c   :  { %727 = vmatprep.subr.bf16.mxu0 %v13317_v20  ;;  %768 = vmatprep.subr.bf16.mxu1 %v13319_v27 }
 0x16f   :  { %728 = vmatpush1.bf16.msra.mxu0 %v13323_v49  ;;  %769 = vmatpush1.bf16.msra.mxu1 %v13325_v1 }
 0x170   :  { %988 = vmatprep.subr.bf16.mxu0 %v13329_v18  ;;  %1029 = vmatprep.subr.bf16.mxu1 %v13331_v63  ;;  %v13355_v63 = vld [vmem:[#allocation8 + $0x44] ss:$16 sps:$4 sm:$0xff]   ;;  %v13357_v18 = vld [vmem:[#allocation8 + $0x4c] ss:$16 sps:$4 sm:$0xff]  }
 0x171   :  { %16161 = vst [vmem:[#allocation54_spill] sm:$0xff] %v13355_v63  ;;  %16162 = vst [vmem:[#allocation55_spill] sm:$0xff] %v13357_v18 }
 0x172   :  { %746 = vmatmul.mubr.bf16.vlgmr.msra.gmra.mrb[8].mxu0 %v13239_v10  ;;  %787 = vmatmul.mubr.bf16.vlgmr.msra.gmra.mrb[8].mxu1 %v13239_v10  ;;  %v13363_v10 = vld [vmem:[#allocation8 + $0x40] ss:$16 sps:$4 sm:$0xff]  }
 0x173   :  { %989 = vmatpush1.bf16.msra.mxu0 %v13335_v62  ;;  %1030 = vmatpush1.bf16.msra.mxu1 %v13337_v19  ;;  %16163 = vst [vmem:[#allocation56_spill] sm:$0xff] %v13363_v10  ;;  %v13365_v19 = vld [vmem:[#allocation8 + $0x48] ss:$16 sps:$4 sm:$0xff]   ;;  %v13375_v62 = vld [vmem:[#allocation8 + $0x60] ss:$16 sps:$4 sm:$0xff]  }
 0x174   :  { %990 = vmatprep.subr.bf16.mxu0 %v13341_v34  ;;  %1031 = vmatprep.subr.bf16.mxu1 %v13343_v36  ;;  %16164 = vst [vmem:[#allocation57_spill] sm:$0xff] %v13365_v19  ;;  %v13369_v36 = vld [vmem:[#allocation8 + $0x64] ss:$16 sps:$4 sm:$0xff]   ;;  %v13371_v34 = vld [vmem:[#allocation8 + $0x6c] ss:$16 sps:$4 sm:$0xff]   ;;  %16167 = vst [vmem:[#allocation60_spill] sm:$0xff] %v13375_v62 }
 0x175   :  { %1020 = vmatprep.mubr.bf16.mxu0 %v16142_v53  ;;  %1061 = vmatprep.mubr.bf16.mxu1 %v16142_v53  ;;  %16165 = vst [vmem:[#allocation58_spill] sm:$0xff] %v13369_v36  ;;  %16166 = vst [vmem:[#allocation59_spill] sm:$0xff] %v13371_v34 }
 0x177   :  { %991 = vmatpush1.bf16.msra.mxu0 %v13349_v45  ;;  %1032 = vmatpush1.bf16.msra.mxu1 %v13351_v2  ;;  %v13377_v45 = vld [vmem:[#allocation8 + $0x68] ss:$16 sps:$4 sm:$0xff]   ;;  %v13381_v2 = vld [vmem:[#allocation8 + $0x84] ss:$16 sps:$4 sm:$0xff]  }
 0x178   :  { %992 = vmatprep.subr.bf16.mxu0 %v13355_v63  ;;  %1033 = vmatprep.subr.bf16.mxu1 %v13357_v18  ;;  %16168 = vst [vmem:[#allocation61_spill] sm:$0xff] %v13377_v45  ;;  %16169 = vst [vmem:[#allocation62_spill] sm:$0xff] %v13381_v2  ;;  %v13383_v63 = vld [vmem:[#allocation8 + $0x8c] ss:$16 sps:$4 sm:$0xff]   ;;  %v13387_v18 = vld [vmem:[#allocation8 + $0x80] ss:$16 sps:$4 sm:$0xff]  }
 0x179   :  { %16170 = vst [vmem:[#allocation63_spill] sm:$0xff] %v13383_v63  ;;  %16171 = vst [vmem:[#allocation64_spill] sm:$0xff] %v13387_v18 }
 0x17b   :  { %993 = vmatpush1.bf16.msra.mxu0 %v13363_v10  ;;  %1034 = vmatpush1.bf16.msra.mxu1 %v13365_v19  ;;  %v13389_v10 = vld [vmem:[#allocation8 + $0x88] ss:$16 sps:$4 sm:$0xff]   ;;  %v13393_v19 = vld [vmem:[#allocation8 + $0xa4] ss:$16 sps:$4 sm:$0xff]  }
 0x17c   :  { %994 = vmatprep.subr.bf16.mxu0 %v13369_v36  ;;  %1035 = vmatprep.subr.bf16.mxu1 %v13371_v34  ;;  %16172 = vst [vmem:[#allocation65_spill] sm:$0xff] %v13389_v10  ;;  %16173 = vst [vmem:[#allocation66_spill] sm:$0xff] %v13393_v19  ;;  %v13395_v36 = vld [vmem:[#allocation8 + $0xac] ss:$16 sps:$4 sm:$0xff]   ;;  %v13399_v34 = vld [vmem:[#allocation8 + $0xa0] ss:$16 sps:$4 sm:$0xff]  }
 0x17d   :  { %16174 = vst [vmem:[#allocation67_spill] sm:$0xff] %v13395_v36  ;;  %16175 = vst [vmem:[#allocation68_spill] sm:$0xff] %v13399_v34 }
 0x17f   :  { %995 = vmatpush1.bf16.msra.mxu0 %v13375_v62  ;;  %1036 = vmatpush1.bf16.msra.mxu1 %v13377_v45  ;;  %v13401_v62 = vld [vmem:[#allocation8 + $0xa8] ss:$16 sps:$4 sm:$0xff]   ;;  %v13405_v45 = vld [vmem:[#allocation8 + $0xc4] ss:$16 sps:$4 sm:$0xff]  }
 0x180   :  { %996 = vmatprep.subr.bf16.mxu0 %v13381_v2  ;;  %1037 = vmatprep.subr.bf16.mxu1 %v13383_v63  ;;  %16176 = vst [vmem:[#allocation69_spill] sm:$0xff] %v13401_v62  ;;  %16177 = vst [vmem:[#allocation70_spill] sm:$0xff] %v13405_v45  ;;  %v13407_v2 = vld [vmem:[#allocation8 + $0xcc] ss:$16 sps:$4 sm:$0xff]   ;;  %v13411_v63 = vld [vmem:[#allocation8 + $0xc0] ss:$16 sps:$4 sm:$0xff]  }
 0x183   :  { %997 = vmatpush1.bf16.msra.mxu0 %v13387_v18  ;;  %1038 = vmatpush1.bf16.msra.mxu1 %v13389_v10  ;;  %v13413_v18 = vld [vmem:[#allocation8 + $0xc8] ss:$16 sps:$4 sm:$0xff]   ;;  %v13417_v10 = vld [vmem:[#allocation8 + $0xe4] ss:$16 sps:$4 sm:$0xff]  }
 0x184   :  { %998 = vmatprep.subr.bf16.mxu0 %v13393_v19  ;;  %1039 = vmatprep.subr.bf16.mxu1 %v13395_v36  ;;  %v13419_v19 = vld [vmem:[#allocation8 + $0xec] ss:$16 sps:$4 sm:$0xff]   ;;  %v13423_v36 = vld [vmem:[#allocation8 + $0xe0] ss:$16 sps:$4 sm:$0xff]  }
 0x187   :  { %999 = vmatpush1.bf16.msra.mxu0 %v13399_v34  ;;  %1040 = vmatpush1.bf16.msra.mxu1 %v13401_v62  ;;  %v13425_v34 = vld [vmem:[#allocation8 + $0xe8] ss:$16 sps:$4 sm:$0xff]  }
 0x188   :  { %1000 = vmatprep.subr.bf16.mxu0 %v13405_v45  ;;  %1041 = vmatprep.subr.bf16.mxu1 %v13407_v2  ;;  %v76_v62 = vld [vmem:[#allocation3 + $0x4] sm:$0x3] }
 0x189   :  { %v795_v45 = vpack.c.bf16 %v76_v62, %v76_v62 }
 0x18b   :  { %1001 = vmatpush1.bf16.msra.mxu0 %v13411_v63  ;;  %1042 = vmatpush1.bf16.msra.mxu1 %v13413_v18 }
 0x18c   :  { %1002 = vmatprep.subr.bf16.mxu0 %v13417_v10  ;;  %1043 = vmatprep.subr.bf16.mxu1 %v13419_v19 }
 0x18f   :  { %1003 = vmatpush1.bf16.msra.mxu0 %v13423_v36  ;;  %1044 = vmatpush1.bf16.msra.mxu1 %v13425_v34 }
 0x190   :  { %1552 = vmatprep.subr.bf16.mxu0 %v13025_v6  ;;  %1593 = vmatprep.subr.bf16.mxu1 %v13029_v11  ;;  %v11180_v6 = vld [vmem:[%s15799_s0 + $0x4] sm:$0x3]  ;;  %v11489_v11 = vld [vmem:[%s15799_s0 + $0xa] sm:$0x3] }
 0x191   :  { %2029 = vperm.xlu1 %12190, %v11180_v6  }
 0x192   :  { %1021 = vmatmul.mubr.bf16.vlgmr.msra.gmra.mrb[12].mxu0 %v795_v45  ;;  %1062 = vmatmul.mubr.bf16.vlgmr.msra.gmra.mrb[12].mxu1 %v795_v45 }
 0x193   :  { %1553 = vmatpush1.bf16.msra.mxu0 %v13027_v8  ;;  %1594 = vmatpush1.bf16.msra.mxu1 %v13031_v12  ;;  %v11283_v8 = vld [vmem:[%s15799_s0 + $0x6] sm:$0x3]  ;;  %v1129_v12 = vpop.permute.xlu0 %1128 }
 0x194   :  { %1554 = vmatprep.subr.bf16.mxu0 %v13033_v13  ;;  %1595 = vmatprep.subr.bf16.mxu1 %v13036_v17  ;;  %v1131_v13 = vmul.f32 %v1129_v12, %v13196_v40  ;;  %v1132_v17 = vmul.f32 %v1129_v12, %v13202_v44 }
 0x195   :  { %1584 = vmatprep.mubr.bf16.mxu0 %v16142_v53  ;;  %1625 = vmatprep.mubr.bf16.mxu1 %v16142_v53 }
 0x196   :  { %2930 = vperm.xlu1 %12190, %v11283_v8  }
 0x197   :  { %1555 = vmatpush1.bf16.msra.mxu0 %v13040_v21  ;;  %1596 = vmatpush1.bf16.msra.mxu1 %v13044_v22  ;;  %v11695_v21 = vld [vmem:[%s15799_s0 + $0xe] sm:$0x3]  ;;  %v11901_v22 = vld [vmem:[%s15799_s0 + $0x12] sm:$0x3] }
 0x198   :  { %1556 = vmatprep.subr.bf16.mxu0 %v13046_v23  ;;  %1597 = vmatprep.subr.bf16.mxu1 %v13049_v24  ;;  %v1135_v23 = vadd.f32 %v1131_v13, %v13209_v50 }
 0x19a   :  { %4732 = vperm.xlu1 %12190, %v11489_v11  }
 0x19b   :  { %1557 = vmatpush1.bf16.msra.mxu0 %v13052_v29  ;;  %1598 = vmatpush1.bf16.msra.mxu1 %v13056_v30  ;;  %v1136_v30 = vadd.f32 %v1132_v17, %v13213_v54 }
 0x19c   :  { %1558 = vmatprep.subr.bf16.mxu0 %v13058_v31  ;;  %1599 = vmatprep.subr.bf16.mxu1 %v13061_v32 }
 0x19e   :  { %6534 = vperm.xlu1 %12190, %v11695_v21  }
 0x19f   :  { %1559 = vmatpush1.bf16.msra.mxu0 %v13067_v38  ;;  %1600 = vmatpush1.bf16.msra.mxu1 %v13074_v42 }
 0x1a0   :  { %1560 = vmatprep.subr.bf16.mxu0 %v13076_v43  ;;  %1601 = vmatprep.subr.bf16.mxu1 %v13079_v46  ;;  %v1134_v43 = vmul.f32 %v1129_v12, %v13216_v56 }
 0x1a2   :  { %8336 = vperm.xlu1 %12190, %v11901_v22  }
 0x1a3   :  { %1561 = vmatpush1.bf16.msra.mxu0 %v13085_v48  ;;  %1602 = vmatpush1.bf16.msra.mxu1 %v13089_v51  ;;  %v12107_v51 = vld [vmem:[%s15799_s0 + $0x16] sm:$0x3] }
 0x1a4   :  { %1562 = vmatprep.subr.bf16.mxu0 %v13091_v52  ;;  %1603 = vmatprep.subr.bf16.mxu1 %v13094_v55 }
 0x1a6   :  { %10138 = vperm.xlu1 %12190, %v12107_v51   ;;  %v16179_v51 = vld [vmem:[#allocation14_spill] sm:$0xff] }
 0x1a7   :  { %1563 = vmatpush1.bf16.msra.mxu0 %v13100_v57  ;;  %1604 = vmatpush1.bf16.msra.mxu1 %v13104_v60 }
 0x1a8   :  { %1564 = vmatprep.subr.bf16.mxu0 %v13106_v61  ;;  %1605 = vmatprep.subr.bf16.mxu1 %v13109_v0  ;;  %v1138_v61 = vadd.f32 %v1134_v43, %v13225_v9  ;;  %v1133_v0 = vmul.f32 %v1129_v12, %v13228_v16  ;;  %v16178_v12 = vld [vmem:[#allocation29_spill] sm:$0xff] }
 0x1ab   :  { %1565 = vmatpush1.bf16.msra.mxu0 %v13115_v3  ;;  %1606 = vmatpush1.bf16.msra.mxu1 %v13119_v4  ;;  %v1137_v4 = vadd.f32 %v1133_v0, %v13233_v58  ;;  %v16185_v0 = vld [vmem:[#allocation34_spill] sm:$0xff] }
 0x1ac   :  { %1566 = vmatprep.subr.bf16.mxu0 %v13121_v5  ;;  %1607 = vmatprep.subr.bf16.mxu1 %v13124_v7 }
 0x1af   :  { %1567 = vmatpush1.bf16.msra.mxu0 %v13130_v14  ;;  %1608 = vmatpush1.bf16.msra.mxu1 %v13134_v15 }
 0x1b0   :  { %1634 = vmatprep.subr.bf16.mxu0 %v13175_v26  ;;  %1675 = vmatprep.subr.bf16.mxu1 %v13179_v33 }
 0x225   :  { %v665_v24 = vpop.f32.mrb[4].mxu0  ;;  %v706_v29 = vpop.f32.mrb[4].mxu1 }
 0x226   :  { %v1139_v31 = vadd.f32 %v1135_v23, %v665_v24  ;;  %v667_v32 = vpop.f32.mrb[5].mxu0  ;;  %v708_v38 = vpop.f32.mrb[5].mxu1  ;;  %v1141_v7 = vadd.f32 %v1137_v4, %v706_v29  ;;  %v16187_v4 = vld [vmem:[#allocation36_spill] sm:$0xff] }
 0x227   :  { %v1140_v42 = vadd.f32 %v1136_v30, %v667_v32  ;;  %v669_v46 = vpop.f32.mrb[6].mxu0  ;;  %v710_v48 = vpop.f32.mrb[6].mxu1  ;;  %v1142_v3 = vadd.f32 %v1138_v61, %v708_v38  ;;  %v16184_v61 = vld [vmem:[#allocation33_spill] sm:$0xff] }
 0x228   :  { %v11078_v52 = vmul.f32 -1.442695, %v1139_v31  ;;  %v670_v55 = vpop.f32.mrb[7].mxu0  ;;  %v711_v57 = vpop.f32.mrb[7].mxu1 }
 0x229   :  { %v11079_v60 = vmul.f32 -1.442695, %v1140_v42  ;;  %v11080_v5 = vmul.f32 -1.442695, %v1142_v3  ;;  %v16181_v55 = vld [vmem:[#allocation30_spill] sm:$0xff]  ;;  %v16182_v57 = vld [vmem:[#allocation31_spill] sm:$0xff] }
 0x22a   :  { %12495 = vpow2.f32 %v11078_v52  ;;  %v16180_v52 = vld [vmem:[#allocation15_spill] sm:$0xff] }
 0x22b   :  { %12497 = vpow2.f32 %v11079_v60  ;;  %v16183_v60 = vld [vmem:[#allocation32_spill] sm:$0xff]  ;;  %v16186_v3 = vld [vmem:[#allocation35_spill] sm:$0xff] }
 0x22c   :  { %12499 = vpow2.f32 %v11080_v5  ;;  %v16188_v5 = vld [vmem:[#allocation37_spill] sm:$0xff] }
 0x22d   :  { %12501 = vtanh.f32 %v1141_v7  ;;  %v16189_v7 = vld [vmem:[#allocation38_spill] sm:$0xff] }
 0x234   :  { %v12496_v14 = vpop.eup %12495 }
 0x235   :  { %v12498_v15 = vpop.eup %12497  ;;  %v1149_v26 = vadd.f32 1.0, %v12496_v14  ;;  %v16190_v14 = vld [vmem:[#allocation39_spill] sm:$0xff] }
 0x236   :  { %v1150_v33 = vadd.f32 1.0, %v12498_v15  ;;  %v12500_v62 = vpop.eup %12499  ;;  %v71_v15 = vld [vmem:[%s15804_s5] sm:$0xf] }
 0x237   :  { %12503 = vrcp.f32 %v1149_v26  ;;  %v12502_v45 = vpop.eup %12501  ;;  %v1159_v13 = vadd.f32 1.0, %v12500_v62  ;;  %v16191_v26 = vld [vmem:[#allocation40_spill] sm:$0xff]  ;;  %v16193_v62 = vld [vmem:[#allocation17_spill] sm:$0xff] }
 0x238   :  { %12505 = vrcp.f32 %v1150_v33  ;;  %v16192_v33 = vld [vmem:[#allocation41_spill] sm:$0xff] }
 0x239   :  { %12507 = vrcp.f32 %v1159_v13 }
 0x241   :  { %v12504_v6 = vpop.eup %12503 }
 0x242   :  { %v12506_v8 = vpop.eup %12505  ;;  %v1163_v11 = vmul.f32 %v12504_v6, %v12502_v45  ;;  %v13521_v45 = vrot.slane %v71_v15, %v16193_v62  ;;  %v16195_v6 = vld [vmem:[#allocation42_spill] sm:$0xff] }
 0x243   :  { %v1162_v17 = vmul.f32 %v12506_v8, %v16178_v12  ;;  %v12508_v42 = vpop.eup %12507  ;;  %v16196_v8 = vld [vmem:[#allocation43_spill] sm:$0xff]  ;;  %v16197_v12 = vld [vmem:[#allocation18_spill] sm:$0xff] }
 0x244   :  { %16194 = vst [vmem:[#allocation29_spill] sm:$0xff] %v13521_v45  ;;  %v16217_v62 = vld [vmem:[#allocation58_spill] sm:$0xff] }
 0x245   :  { %v13494_v21 = vadd.f32 %v1163_v11, %v1162_v17  ;;  %v747_v22 = vpop.f32.mrb[8].mxu0  ;;  %v788_v23 = vpop.f32.mrb[8].mxu1  ;;  %v13526_v17 = vrot.slane %v71_v15, %v16197_v12 }
 0x246   :  { %v749_v24 = vpop.f32.mrb[9].mxu0  ;;  %v790_v29 = vpop.f32.mrb[9].mxu1 }
 0x247   :  { %v751_v30 = vpop.f32.mrb[10].mxu0  ;;  %v792_v31 = vpop.f32.mrb[10].mxu1  ;;  %12509 = vtanh.f32 %v13494_v21  ;;  %16198 = vst [vmem:[#allocation14_spill] sm:$0xff] %v13526_v17 }
 0x248   :  { %v752_v32 = vpop.f32.mrb[11].mxu0  ;;  %v793_v38 = vpop.f32.mrb[11].mxu1 }
 0x251   :  { %v12510_v43 = vpop.eup %12509 }
 0x252   :  { %v1166_v46 = vmul.f32 %v12510_v43, %v12508_v42 }
 0x254   :  { %v13497_v48 = vpack.c.bf16 %v1166_v46, %v1166_v46 }
 0x256   :  { %1585 = vmatmul.mubr.bf16.vlgmr.msra.gmra.mrb[16].mxu0 %v13497_v48  ;;  %1626 = vmatmul.mubr.bf16.vlgmr.msra.gmra.mrb[16].mxu1 %v13497_v48 }
 0x257   :  { %1635 = vmatpush1.bf16.msra.mxu0 %v16179_v51  ;;  %1676 = vmatpush1.bf16.msra.mxu1 %v16180_v52 }
 0x258   :  { %1636 = vmatprep.subr.bf16.mxu0 %v16181_v55  ;;  %1677 = vmatprep.subr.bf16.mxu1 %v16182_v57  ;;  %v16199_v57 = vld [vmem:[#allocation44_spill] sm:$0xff] }
 0x259   :  { %1666 = vmatprep.mubr.bf16.mxu0 %v16142_v53  ;;  %1707 = vmatprep.mubr.bf16.mxu1 %v16142_v53 }
 0x25b   :  { %1637 = vmatpush1.bf16.msra.mxu0 %v16183_v60  ;;  %1678 = vmatpush1.bf16.msra.mxu1 %v16184_v61 }
 0x25c   :  { %1638 = vmatprep.subr.bf16.mxu0 %v16185_v0  ;;  %1679 = vmatprep.subr.bf16.mxu1 %v16186_v3  ;;  %v16202_v0 = vld [vmem:[#allocation45_spill] sm:$0xff]  ;;  %v16206_v3 = vld [vmem:[#allocation47_spill] sm:$0xff] }
 0x25f   :  { %1639 = vmatpush1.bf16.msra.mxu0 %v16187_v4  ;;  %1680 = vmatpush1.bf16.msra.mxu1 %v16188_v5  ;;  %v16208_v4 = vld [vmem:[#allocation49_spill] sm:$0xff]  ;;  %v16210_v5 = vld [vmem:[#allocation51_spill] sm:$0xff] }
 0x260   :  { %1640 = vmatprep.subr.bf16.mxu0 %v16189_v7  ;;  %1681 = vmatprep.subr.bf16.mxu1 %v16190_v14  ;;  %v16212_v7 = vld [vmem:[#allocation53_spill] sm:$0xff]  ;;  %v16213_v14 = vld [vmem:[#allocation54_spill] sm:$0xff] }
 0x263   :  { %1641 = vmatpush1.bf16.msra.mxu0 %v16191_v26  ;;  %1682 = vmatpush1.bf16.msra.mxu1 %v16192_v33  ;;  %v16215_v26 = vld [vmem:[#allocation56_spill] sm:$0xff]  ;;  %v16216_v33 = vld [vmem:[#allocation57_spill] sm:$0xff] }
 0x264   :  { %1642 = vmatprep.subr.bf16.mxu0 %v16195_v6  ;;  %1683 = vmatprep.subr.bf16.mxu1 %v16196_v8  ;;  %v16218_v6 = vld [vmem:[#allocation59_spill] sm:$0xff] }
 0x265   :  { %v1022_v11 = vpop.f32.mrb[12].mxu0  ;;  %v1063_v13 = vpop.f32.mrb[12].mxu1 }
 0x266   :  { %v1070_v30 = vadd.f32 %v1022_v11, %v747_v22  ;;  %v1072_v31 = vadd.f32 %v1063_v13, %v788_v23  ;;  %v1024_v32 = vpop.f32.mrb[13].mxu0  ;;  %v1065_v38 = vpop.f32.mrb[13].mxu1  ;;  %v78_v13 = vld [vmem:[#allocation3 + $0x6] sm:$0x3] }
 0x267   :  { %v1071_v42 = vadd.f32 %v1024_v32, %v749_v24  ;;  %v1073_v43 = vadd.f32 %v1065_v38, %v790_v29  ;;  %v1026_v46 = vpop.f32.mrb[14].mxu0  ;;  %1643 = vmatpush1.bf16.msra.mxu0 %v13287_v47  ;;  %1684 = vmatpush1.bf16.msra.mxu1 %v13289_v59  ;;  %v1067_v51 = vpop.f32.mrb[14].mxu1  ;;  %v16200_v24 = vld [vmem:[#allocation21_spill] sm:$0xff] }
 0x268   :  { %v1095_v52 = vadd.f32 %v13521_v45, %v1070_v30  ;;  %v1027_v55 = vpop.f32.mrb[15].mxu0  ;;  %1644 = vmatprep.subr.bf16.mxu0 %v13293_v37  ;;  %1685 = vmatprep.subr.bf16.mxu1 %v16199_v57  ;;  %v1068_v60 = vpop.f32.mrb[15].mxu1  ;;  %v13535_v29 = vrot.slane %v71_v15, %v16200_v24  ;;  %v16203_v59 = vld [vmem:[#allocation25_spill] sm:$0xff]  ;;  %v16219_v30 = vld [vmem:[#allocation60_spill] sm:$0xff]  ;;  %v16222_v46 = vld [vmem:[#allocation63_spill] sm:$0xff] }
 0x269   :  { %v1096_v22 = vadd.f32 %v13526_v17, %v1071_v42  ;;  %v13545_v37 = vrot.slane %v71_v15, %v16203_v59  ;;  %v16214_v15 = vld [vmem:[#allocation55_spill] sm:$0xff]  ;;  %v16223_v55 = vld [vmem:[#allocation64_spill] sm:$0xff]  ;;  %v16224_v57 = vld [vmem:[#allocation65_spill] sm:$0xff] }
 0x26a   :  { %v11074_v23 = vmul.f32 -1.442695, %v1095_v52  ;;  %16201 = vst [vmem:[#allocation15_spill] sm:$0xff] %v13535_v29  ;;  %v1098_v47 = vadd.f32 %v13535_v29, %v1073_v43  ;;  %v16221_v43 = vld [vmem:[#allocation62_spill] sm:$0xff] }
 0x26b   :  { %v11075_v61 = vmul.f32 -1.442695, %v1096_v22  ;;  %1645 = vmatpush1.bf16.msra.mxu0 %v16202_v0  ;;  %1686 = vmatpush1.bf16.msra.mxu1 %v13301_v25  ;;  %16204 = vst [vmem:[#allocation30_spill] sm:$0xff] %v13545_v37  ;;  %v16225_v60 = vld [vmem:[#allocation66_spill] sm:$0xff]  ;;  %v16226_v22 = vld [vmem:[#allocation67_spill] sm:$0xff] }
 0x26c   :  { %12511 = vpow2.f32 %v11074_v23  ;;  %1646 = vmatprep.subr.bf16.mxu0 %v13305_v28  ;;  %1687 = vmatprep.subr.bf16.mxu1 %v13307_v35  ;;  %v11076_v25 = vmul.f32 -1.442695, %v1098_v47  ;;  %v1097_v28 = vadd.f32 %v13545_v37, %v1072_v31  ;;  %v16205_v35 = vld [vmem:[#allocation46_spill] sm:$0xff]  ;;  %v16220_v31 = vld [vmem:[#allocation61_spill] sm:$0xff]  ;;  %v16227_v23 = vld [vmem:[#allocation68_spill] sm:$0xff] }
 0x26d   :  { %12513 = vpow2.f32 %v11075_v61  ;;  %v16228_v61 = vld [vmem:[#allocation69_spill] sm:$0xff]  ;;  %v16229_v24 = vld [vmem:[#allocation70_spill] sm:$0xff] }
 0x26e   :  { %12515 = vpow2.f32 %v11076_v25 }
 0x26f   :  { %1647 = vmatpush1.bf16.msra.mxu0 %v13311_v39  ;;  %1688 = vmatpush1.bf16.msra.mxu1 %v13313_v41  ;;  %12517 = vtanh.f32 %v1097_v28 }
 0x270   :  { %1648 = vmatprep.subr.bf16.mxu0 %v13317_v20  ;;  %1689 = vmatprep.subr.bf16.mxu1 %v13319_v27  ;;  %v16207_v27 = vld [vmem:[#allocation48_spill] sm:$0xff] }
 0x273   :  { %1649 = vmatpush1.bf16.msra.mxu0 %v13323_v49  ;;  %1690 = vmatpush1.bf16.msra.mxu1 %v13325_v1  ;;  %v16209_v1 = vld [vmem:[#allocation50_spill] sm:$0xff] }
 0x274   :  { %1909 = vmatprep.subr.bf16.mxu0 %v16205_v35  ;;  %1950 = vmatprep.subr.bf16.mxu1 %v16206_v3  ;;  %v2074_v35 = vld [vmem:[#allocation5 + $0x28] sm:$0xff] }
 0x276   :  { %v12512_v39 = vpop.eup %12511  ;;  %1667 = vmatmul.mubr.bf16.vlgmr.msra.gmra.mrb[20].mxu0 %v13497_v48  ;;  %1708 = vmatmul.mubr.bf16.vlgmr.msra.gmra.mrb[20].mxu1 %v13497_v48  ;;  %v16211_v48 = vld [vmem:[#allocation52_spill] sm:$0xff] }
 0x277   :  { %v12514_v41 = vpop.eup %12513  ;;  %v1105_v20 = vadd.f32 1.0, %v12512_v39  ;;  %1910 = vmatpush1.bf16.msra.mxu0 %v16207_v27  ;;  %1951 = vmatpush1.bf16.msra.mxu1 %v16208_v4  ;;  %v2081_v27 = vld [vmem:[#allocation5 + $0x60] sm:$0xff]  ;;  %v2078_v4 = vld [vmem:[#allocation5 + $0x48] sm:$0xff] }
 0x278   :  { %v1106_v49 = vadd.f32 1.0, %v12514_v41  ;;  %1911 = vmatprep.subr.bf16.mxu0 %v16209_v1  ;;  %1952 = vmatprep.subr.bf16.mxu1 %v16210_v5  ;;  %v12516_v8 = vpop.eup %12515  ;;  %v2082_v1 = vld [vmem:[#allocation5 + $0x68] sm:$0xff] }
 0x279   :  { %12519 = vrcp.f32 %v1105_v20  ;;  %1941 = vmatprep.mubr.bf16.mxu0 %v16142_v53  ;;  %1982 = vmatprep.mubr.bf16.mxu1 %v16142_v53  ;;  %v12518_v11 = vpop.eup %12517  ;;  %v1115_v42 = vadd.f32 1.0, %v12516_v8  ;;  %v2077_v20 = vld [vmem:[#allocation5 + $0x40] sm:$0xff] }
 0x27a   :  { %12521 = vrcp.f32 %v1106_v49  ;;  %v13612_v49 = vcombine.high %v2077_v20, %v2081_v27  ;;  %v13614_v5 = vcombine.low %v2077_v20, %v2081_v27  ;;  %v2122_v20 = vld [vmem:[#allocation5 + $0x1a8] sm:$0xff]  ;;  %v2125_v27 = vld [vmem:[#allocation5 + $0x1c0] sm:$0xff] }
 0x27b   :  { %1912 = vmatpush1.bf16.msra.mxu0 %v16211_v48  ;;  %1953 = vmatpush1.bf16.msra.mxu1 %v16212_v7  ;;  %12523 = vrcp.f32 %v1115_v42  ;;  %v13616_v48 = vcombine.low %v2078_v4, %v2082_v1  ;;  %v13618_v7 = vcombine.high %v2078_v4, %v2082_v1  ;;  %v2129_v1 = vld [vmem:[#allocation5 + $0x1e0] sm:$0xff] }
 0x27c   :  { %1913 = vmatprep.subr.bf16.mxu0 %v16213_v14  ;;  %1954 = vmatprep.subr.bf16.mxu1 %v16214_v15  ;;  %v2085_v14 = vld [vmem:[#allocation5 + $0x80] sm:$0xff] }
 0x27d   :  { %v2089_v15 = vld [vmem:[#allocation5 + $0xa0] sm:$0xff] }
 0x27f   :  { %1914 = vmatpush1.bf16.msra.mxu0 %v16215_v26  ;;  %1955 = vmatpush1.bf16.msra.mxu1 %v16216_v33  ;;  %v2086_v26 = vld [vmem:[#allocation5 + $0x88] sm:$0xff]  ;;  %v13624_v33 = vcombine.high %v2085_v14, %v2089_v15 }
 0x280   :  { %1915 = vmatprep.subr.bf16.mxu0 %v16217_v62  ;;  %1956 = vmatprep.subr.bf16.mxu1 %v16218_v6  ;;  %v2090_v62 = vld [vmem:[#allocation5 + $0xa8] sm:$0xff]  ;;  %v13626_v6 = vcombine.low %v2085_v14, %v2089_v15 }
 0x281   :  { %v13628_v8 = vcombine.low %v2086_v26, %v2090_v62  ;;  %v2126_v14 = vld [vmem:[#allocation5 + $0x1c8] sm:$0xff] }
 0x282   :  { %v2130_v15 = vld [vmem:[#allocation5 + $0x1e8] sm:$0xff] }
 0x283   :  { %v12520_v12 = vpop.eup %12519  ;;  %1916 = vmatpush1.bf16.msra.mxu0 %v16219_v30  ;;  %1957 = vmatpush1.bf16.msra.mxu1 %v16220_v31  ;;  %v2094_v30 = vld [vmem:[#allocation5 + $0xc8] sm:$0xff] }
 0x284   :  { %v12522_v32 = vpop.eup %12521  ;;  %v1119_v38 = vmul.f32 %v12520_v12, %v12518_v11  ;;  %1917 = vmatprep.subr.bf16.mxu0 %v16221_v43  ;;  %1958 = vmatprep.subr.bf16.mxu1 %v16222_v46  ;;  %v13630_v11 = vcombine.high %v2086_v26, %v2090_v62  ;;  %v2097_v12 = vld [vmem:[#allocation5 + $0xe0] sm:$0xff]  ;;  %v2071_v62 = vld [vmem:[#allocation5 + $0x10] sm:$0xff] }
 0x285   :  { %v1118_v51 = vmul.f32 %v12522_v32, %v78_v13  ;;  %v12524_v0 = vpop.eup %12523  ;;  %v2093_v13 = vld [vmem:[#allocation5 + $0xc0] sm:$0xff]  ;;  %v2098_v32 = vld [vmem:[#allocation5 + $0xe8] sm:$0xff] }
 0x286   :  { %v13636_v31 = vcombine.high %v2093_v13, %v2097_v12  ;;  %v13640_v42 = vcombine.low %v2094_v30, %v2098_v32  ;;  %v13642_v43 = vcombine.high %v2094_v30, %v2098_v32  ;;  %v2101_v46 = vld [vmem:[#allocation5 + $0x100] sm:$0xff]  ;;  %v13681_v32 = vcombine.high %v2125_v27, %v2129_v1 }
 0x287   :  { %v13574_v52 = vadd.f32 %v1119_v38, %v1118_v51  ;;  %1918 = vmatpush1.bf16.msra.mxu0 %v16223_v55  ;;  %1959 = vmatpush1.bf16.msra.mxu1 %v16224_v57  ;;  %v13638_v38 = vcombine.low %v2093_v13, %v2097_v12  ;;  %v2105_v51 = vld [vmem:[#allocation5 + $0x120] sm:$0xff]  ;;  %v2102_v55 = vld [vmem:[#allocation5 + $0x108] sm:$0xff]  ;;  %v2075_v13 = vld [vmem:[#allocation5 + $0x30] sm:$0xff] }
 0x288   :  { %1919 = vmatprep.subr.bf16.mxu0 %v16225_v60  ;;  %1960 = vmatprep.subr.bf16.mxu1 %v16226_v22  ;;  %v13648_v57 = vcombine.high %v2101_v46, %v2105_v51  ;;  %v2106_v60 = vld [vmem:[#allocation5 + $0x128] sm:$0xff]  ;;  %v13650_v22 = vcombine.low %v2101_v46, %v2105_v51  ;;  %v2072_v12 = vld [vmem:[#allocation5 + $0x18] sm:$0xff]  ;;  %v13683_v46 = vcombine.low %v2071_v62, %v2075_v13 }
 0x289   :  { %12525 = vtanh.f32 %v13574_v52  ;;  %v2076_v51 = vld [vmem:[#allocation5 + $0x38] sm:$0xff] }
 0x28a   :  { %16230 = vst [vmem:[#allocation31_spill] sm:$0xff] %v13683_v46 }
 0x28b   :  { %1920 = vmatpush1.bf16.msra.mxu0 %v16227_v23  ;;  %1961 = vmatpush1.bf16.msra.mxu1 %v16228_v61  ;;  %v13652_v23 = vcombine.low %v2102_v55, %v2106_v60  ;;  %v13654_v61 = vcombine.high %v2102_v55, %v2106_v60  ;;  %v13686_v55 = vcombine.high %v2126_v14, %v2130_v15 }
 0x28c   :  { %1921 = vmatprep.subr.bf16.mxu0 %v16229_v24  ;;  %1962 = vmatprep.subr.bf16.mxu1 %v13407_v2  ;;  %v2073_v2 = vld [vmem:[#allocation5 + $0x20] sm:$0xff]  ;;  %v13688_v60 = vcombine.low %v2072_v12, %v2076_v51 }
 0x28d   :  { %v2109_v24 = vld [vmem:[#allocation5 + $0x140] sm:$0xff]  ;;  %16231 = vst [vmem:[#allocation32_spill] sm:$0xff] %v13686_v55 }
 0x28e   :  { %16232 = vst [vmem:[#allocation33_spill] sm:$0xff] %v13688_v60 }
 0x28f   :  { %1922 = vmatpush1.bf16.msra.mxu0 %v13411_v63  ;;  %1963 = vmatpush1.bf16.msra.mxu1 %v13413_v18  ;;  %v13596_v18 = vld [vmem:[%s15805_s6] ss:$0 sm:$0xff] }
 0x290   :  { %1923 = vmatprep.subr.bf16.mxu0 %v13417_v10  ;;  %1964 = vmatprep.subr.bf16.mxu1 %v13419_v19  ;;  %v2070_v10 = vld [vmem:[#allocation5 + $0x8] sm:$0xff] }
 0x291   :  { %v13604_v39 = vcombine.low %v2070_v10, %v2074_v35  ;;  %v13606_v41 = vcombine.high %v2070_v10, %v2074_v35  ;;  %v2118_v35 = vld [vmem:[#allocation5 + $0x188] sm:$0xff] }
 0x292   :  { %v13671_v4 = vcombine.high %v2118_v35, %v2122_v20  ;;  %v13679_v30 = vcombine.low %v2118_v35, %v2122_v20 }
 0x293   :  { %v12526_v47 = vpop.eup %12525  ;;  %1924 = vmatpush1.bf16.msra.mxu0 %v13423_v36  ;;  %1965 = vmatpush1.bf16.msra.mxu1 %v13425_v34  ;;  %v2069_v36 = vld [vmem:[#allocation5] sm:$0xff] }
 0x294   :  { %v1122_v59 = vmul.f32 %v12526_v47, %v12524_v0  ;;  %v13600_v28 = vcombine.high %v2069_v36, %v2073_v2  ;;  %v13602_v3 = vcombine.low %v2069_v36, %v2073_v2  ;;  %2494 = vmatprep.subr.bf16.mxu1 %v13606_v41  ;;  %v2113_v0 = vld [vmem:[#allocation5 + $0x160] sm:$0xff]  ;;  %v2110_v47 = vld [vmem:[#allocation5 + $0x148] sm:$0xff] }
 0x296   :  { %1123 = vst [vmem:[#allocation2] sm:$0x3] %v1122_v59  ;;  %v1716_v25 = vpack.c.bf16 %v1122_v59, %v1122_v59  ;;  %2453 = vmatprep.subr.bf16.mxu0 %v13600_v28  ;;  %v13660_v59 = vcombine.low %v2109_v24, %v2113_v0 }
 0x298   :  { %1942 = vmatmul.mubr.bf16.vlgmr.msra.gmra.mrb[24].mxu0 %v1716_v25  ;;  %1983 = vmatmul.mubr.bf16.vlgmr.msra.gmra.mrb[24].mxu1 %v1716_v25  ;;  %v13662_v25 = vcombine.high %v2109_v24, %v2113_v0  ;;  %v13691_v24 = vcombine.low %v2125_v27, %v2129_v1  ;;  %v13695_v0 = vcombine.low %v2126_v14, %v2130_v15 }
 0x299   :  { %2485 = vmatprep.mubr.bf16.mxu0 %v16142_v53  ;;  %2526 = vmatprep.mubr.bf16.mxu1 %v16142_v53 }
 0x29a   :  { %2454 = vmatpush1.bf16.msra.mxu0 %v13602_v3  ;;  %2495 = vmatpush1.bf16.msra.mxu1 %v13604_v39  ;;  %16233 = vst [vmem:[#allocation34_spill] sm:$0xff] %v13691_v24  ;;  %16234 = vst [vmem:[#allocation35_spill] sm:$0xff] %v13695_v0 }
 0x29b   :  { %2455 = vmatprep.subr.bf16.mxu0 %v13612_v49  ;;  %2496 = vmatprep.subr.bf16.mxu1 %v13618_v7 }
 0x29d   :  { %v10765_v63 = vld [vmem:[#allocation2] sm:$0x3] }
 0x29e   :  { %v10784_v19 = vmul.f32 %v13596_v18, %v10765_v63  ;;  %2456 = vmatpush1.bf16.msra.mxu0 %v13614_v5  ;;  %2497 = vmatpush1.bf16.msra.mxu1 %v13616_v48  ;;  %v2114_v63 = vld [vmem:[#allocation5 + $0x168] sm:$0xff] }
 0x29f   :  { %2457 = vmatprep.subr.bf16.mxu0 %v13624_v33  ;;  %2498 = vmatprep.subr.bf16.mxu1 %v13630_v11  ;;  %v13664_v36 = vcombine.low %v2110_v47, %v2114_v63  ;;  %v13666_v2 = vcombine.high %v2110_v47, %v2114_v63  ;;  %v13697_v47 = vcombine.high %v2071_v62, %v2075_v13 }
 0x2a0   :  { %v10797_v34 = vsel %vm10796_vm0, %v10784_v19, 0.0  ;;  %v2117_v19 = vld [vmem:[#allocation5 + $0x180] sm:$0xff]  ;;  %v13700_v63 = vcombine.high %v2072_v12, %v2076_v51 }
 0x2a1   :  { %10798 = vadd.xlane.f32.xlu0 %v10797_v34  ;;  %v2121_v34 = vld [vmem:[#allocation5 + $0x1a0] sm:$0xff]  ;;  %16235 = vst [vmem:[#allocation36_spill] sm:$0xff] %v13697_v47 }
 0x2a2   :  { %2458 = vmatpush1.bf16.msra.mxu0 %v13626_v6  ;;  %2499 = vmatpush1.bf16.msra.mxu1 %v13628_v8  ;;  %v13668_v10 = vcombine.high %v2117_v19, %v2121_v34  ;;  %v13675_v26 = vcombine.low %v2117_v19, %v2121_v34  ;;  %16236 = vst [vmem:[#allocation37_spill] sm:$0xff] %v13700_v63  ;;  %v2030_v19 = vpop.permute.xlu1 %2029 }
 0x2a3   :  { %2459 = vmatprep.subr.bf16.mxu0 %v13636_v31  ;;  %2500 = vmatprep.subr.bf16.mxu1 %v13642_v43  ;;  %v2032_v34 = vmul.f32 %v2030_v19, %v13196_v40  ;;  %v2033_v35 = vmul.f32 %v2030_v19, %v13202_v44  ;;  %v2035_v15 = vmul.f32 %v2030_v19, %v13216_v56 }
 0x2a5   :  { %v2036_v20 = vadd.f32 %v2032_v34, %v13209_v50  ;;  %v2037_v27 = vadd.f32 %v2033_v35, %v13213_v54  ;;  %v2039_v44 = vadd.f32 %v2035_v15, %v13225_v9  ;;  %v2034_v34 = vmul.f32 %v2030_v19, %v13228_v16  ;;  %v2128_v9 = vld [vmem:[#allocation5 + $0x1d8] sm:$0xff] }
 0x2a6   :  { %2460 = vmatpush1.bf16.msra.mxu0 %v13638_v38  ;;  %2501 = vmatpush1.bf16.msra.mxu1 %v13640_v42 }
 0x2a7   :  { %2461 = vmatprep.subr.bf16.mxu0 %v13648_v57  ;;  %2502 = vmatprep.subr.bf16.mxu1 %v13654_v61  ;;  %v2038_v54 = vadd.f32 %v2034_v34, %v13233_v58 }
 0x2aa   :  { %2462 = vmatpush1.bf16.msra.mxu0 %v13650_v22  ;;  %2503 = vmatpush1.bf16.msra.mxu1 %v13652_v23 }
 0x2ab   :  { %2463 = vmatprep.subr.bf16.mxu0 %v13662_v25  ;;  %2504 = vmatprep.subr.bf16.mxu1 %v13666_v2 }
 0x2ae   :  { %2464 = vmatpush1.bf16.msra.mxu0 %v13660_v59  ;;  %2505 = vmatpush1.bf16.msra.mxu1 %v13664_v36 }
 0x2af   :  { %2465 = vmatprep.subr.bf16.mxu0 %v13668_v10  ;;  %2506 = vmatprep.subr.bf16.mxu1 %v13671_v4 }
 0x2b2   :  { %2466 = vmatpush1.bf16.msra.mxu0 %v13675_v26  ;;  %2507 = vmatpush1.bf16.msra.mxu1 %v13679_v30 }
 0x2b3   :  { %2467 = vmatprep.subr.bf16.mxu0 %v13681_v32  ;;  %2508 = vmatprep.subr.bf16.mxu1 %v13686_v55 }
 0x2b6   :  { %2468 = vmatpush1.bf16.msra.mxu0 %v13691_v24  ;;  %2509 = vmatpush1.bf16.msra.mxu1 %v13695_v0 }
 0x2b7   :  { %2535 = vmatprep.subr.bf16.mxu0 %v13697_v47  ;;  %2576 = vmatprep.subr.bf16.mxu1 %v13700_v63 }
 0x329   :  { %v1586_v1 = vpop.f32.mrb[16].mxu0  ;;  %v1627_v14 = vpop.f32.mrb[16].mxu1 }
 0x32a   :  { %v2040_v62 = vadd.f32 %v2036_v20, %v1586_v1  ;;  %v1588_v13 = vpop.f32.mrb[17].mxu0  ;;  %v1629_v12 = vpop.f32.mrb[17].mxu1  ;;  %v2042_v20 = vadd.f32 %v2038_v54, %v1627_v14 }
 0x32b   :  { %v2041_v51 = vadd.f32 %v2037_v27, %v1588_v13  ;;  %v1590_v47 = vpop.f32.mrb[18].mxu0  ;;  %v1631_v0 = vpop.f32.mrb[18].mxu1  ;;  %v2043_v35 = vadd.f32 %v2039_v44, %v1629_v12 }
 0x32c   :  { %v11181_v63 = vmul.f32 -1.442695, %v2040_v62  ;;  %v1591_v24 = vpop.f32.mrb[19].mxu0  ;;  %v1632_v55 = vpop.f32.mrb[19].mxu1 }
 0x32d   :  { %v11182_v40 = vmul.f32 -1.442695, %v2041_v51  ;;  %v11183_v56 = vmul.f32 -1.442695, %v2043_v35  ;;  %v2079_v35 = vld [vmem:[#allocation5 + $0x50] sm:$0xff] }
 0x32e   :  { %12527 = vpow2.f32 %v11181_v63 }
 0x32f   :  { %12529 = vpow2.f32 %v11182_v40 }
 0x330   :  { %12531 = vpow2.f32 %v11183_v56 }
 0x331   :  { %12533 = vtanh.f32 %v2042_v20  ;;  %v2083_v20 = vld [vmem:[#allocation5 + $0x70] sm:$0xff] }
 0x338   :  { %v12528_v1 = vpop.eup %12527 }
 0x339   :  { %v12530_v50 = vpop.eup %12529  ;;  %v2050_v27 = vadd.f32 1.0, %v12528_v1  ;;  %v2080_v1 = vld [vmem:[#allocation5 + $0x58] sm:$0xff] }
 0x33a   :  { %v2051_v0 = vadd.f32 1.0, %v12530_v50  ;;  %v12532_v55 = vpop.eup %12531 }
 0x33b   :  { %12535 = vrcp.f32 %v2050_v27  ;;  %v12534_v24 = vpop.eup %12533  ;;  %v2060_v19 = vadd.f32 1.0, %v12532_v55  ;;  %v2084_v27 = vld [vmem:[#allocation5 + $0x78] sm:$0xff] }
 0x33c   :  { %12537 = vrcp.f32 %v2051_v0 }
 0x33d   :  { %12539 = vrcp.f32 %v2060_v19  ;;  %v2088_v19 = vld [vmem:[#allocation5 + $0x98] sm:$0xff] }
 0x345   :  { %v12536_v47 = vpop.eup %12535 }
 0x346   :  { %v12538_v63 = vpop.eup %12537  ;;  %v2064_v15 = vmul.f32 %v12536_v47, %v12534_v24  ;;  %v13728_v24 = vcombine.high %v2079_v35, %v2083_v20  ;;  %v13730_v47 = vcombine.high %v2080_v1, %v2084_v27 }
 0x347   :  { %v2063_v40 = vmul.f32 %v12538_v63, %v13494_v21  ;;  %v12540_v34 = vpop.eup %12539  ;;  %v2087_v63 = vld [vmem:[#allocation5 + $0x90] sm:$0xff] }
 0x348   :  { %16238 = vst [vmem:[#allocation39_spill] sm:$0xff] %v13728_v24  ;;  %16239 = vst [vmem:[#allocation40_spill] sm:$0xff] %v13730_v47 }
 0x349   :  { %v13715_v44 = vadd.f32 %v2064_v15, %v2063_v40  ;;  %v13717_v62 = vpop.f32.mrb[20].mxu0  ;;  %v13719_v54 = vpop.f32.mrb[20].mxu1  ;;  %v2091_v15 = vld [vmem:[#allocation5 + $0xb0] sm:$0xff]  ;;  %v2092_v40 = vld [vmem:[#allocation5 + $0xb8] sm:$0xff] }
 0x34a   :  { %v13721_v56 = vpop.f32.mrb[21].mxu0  ;;  %v13723_v50 = vpop.f32.mrb[21].mxu1 }
 0x34b   :  { %16237 = vst [vmem:[#allocation38_spill] sm:$0xff] %v13715_v44  ;;  %v1672_v14 = vpop.f32.mrb[22].mxu0  ;;  %v1713_v13 = vpop.f32.mrb[22].mxu1  ;;  %12541 = vtanh.f32 %v13715_v44  ;;  %v2100_v44 = vld [vmem:[#allocation5 + $0xf8] sm:$0xff] }
 0x34c   :  { %v1673_v12 = vpop.f32.mrb[23].mxu0  ;;  %v1714_v51 = vpop.f32.mrb[23].mxu1  ;;  %v13736_v14 = vcombine.low %v2079_v35, %v2083_v20  ;;  %v13738_v13 = vcombine.low %v2080_v1, %v2084_v27  ;;  %v13750_v35 = vcombine.low %v2087_v63, %v2091_v15  ;;  %v13752_v20 = vcombine.low %v2088_v19, %v2092_v40 }
 0x34d   :  { %v13742_v12 = vcombine.high %v2087_v63, %v2091_v15  ;;  %v13744_v51 = vcombine.high %v2088_v19, %v2092_v40 }
 0x34e   :  { %16240 = vst [vmem:[#allocation41_spill] sm:$0xff] %v13736_v14  ;;  %16241 = vst [vmem:[#allocation17_spill] sm:$0xff] %v13738_v13 }
 0x34f   :  { %16242 = vst [vmem:[#allocation42_spill] sm:$0xff] %v13742_v12  ;;  %16243 = vst [vmem:[#allocation43_spill] sm:$0xff] %v13744_v51 }
 0x350   :  { %16244 = vst [vmem:[#allocation18_spill] sm:$0xff] %v13750_v35  ;;  %16245 = vst [vmem:[#allocation44_spill] sm:$0xff] %v13752_v20 }
 0x355   :  { %v12542_v21 = vpop.eup %12541 }
 0x356   :  { %v2067_v0 = vmul.f32 %v12542_v21, %v12540_v34  ;;  %v2095_v34 = vld [vmem:[#allocation5 + $0xd0] sm:$0xff] }
 0x357   :  { %v2099_v21 = vld [vmem:[#allocation5 + $0xf0] sm:$0xff] }
 0x358   :  { %v13726_v55 = vpack.c.bf16 %v2067_v0, %v2067_v0  ;;  %v2096_v0 = vld [vmem:[#allocation5 + $0xd8] sm:$0xff]  ;;  %v13756_v1 = vcombine.high %v2095_v34, %v2099_v21  ;;  %v13762_v63 = vcombine.low %v2095_v34, %v2099_v21 }
 0x359   :  { %v13758_v27 = vcombine.high %v2096_v0, %v2100_v44  ;;  %v13764_v15 = vcombine.low %v2096_v0, %v2100_v44 }
 0x35a   :  { %2486 = vmatmul.mubr.bf16.vlgmr.msra.gmra.mrb[28].mxu0 %v13726_v55  ;;  %2527 = vmatmul.mubr.bf16.vlgmr.msra.gmra.mrb[28].mxu1 %v13726_v55  ;;  %16246 = vst [vmem:[#allocation21_spill] sm:$0xff] %v13756_v1  ;;  %16248 = vst [vmem:[#allocation25_spill] sm:$0xff] %v13762_v63 }
 0x35b   :  { %2536 = vmatpush1.bf16.msra.mxu0 %v13683_v46  ;;  %2577 = vmatpush1.bf16.msra.mxu1 %v13688_v60  ;;  %16247 = vst [vmem:[#allocation45_spill] sm:$0xff] %v13758_v27  ;;  %v2104_v60 = vld [vmem:[#allocation5 + $0x118] sm:$0xff]  ;;  %16249 = vst [vmem:[#allocation46_spill] sm:$0xff] %v13764_v15 }
 0x35c   :  { %2537 = vmatprep.subr.bf16.mxu0 %v13728_v24  ;;  %2578 = vmatprep.subr.bf16.mxu1 %v13730_v47  ;;  %v2103_v47 = vld [vmem:[#allocation5 + $0x110] sm:$0xff]  ;;  %v2108_v46 = vld [vmem:[#allocation5 + $0x138] sm:$0xff] }
 0x35d   :  { %2567 = vmatprep.mubr.bf16.mxu0 %v16142_v53  ;;  %2608 = vmatprep.mubr.bf16.mxu1 %v16142_v53  ;;  %v2107_v24 = vld [vmem:[#allocation5 + $0x130] sm:$0xff]  ;;  %v13770_v40 = vcombine.high %v2104_v60, %v2108_v46  ;;  %v13776_v44 = vcombine.low %v2104_v60, %v2108_v46 }
 0x35e   :  { %v13768_v19 = vcombine.high %v2103_v47, %v2107_v24  ;;  %v13774_v34 = vcombine.low %v2103_v47, %v2107_v24 }
 0x35f   :  { %2538 = vmatpush1.bf16.msra.mxu0 %v13736_v14  ;;  %2579 = vmatpush1.bf16.msra.mxu1 %v13738_v13  ;;  %16251 = vst [vmem:[#allocation48_spill] sm:$0xff] %v13770_v40  ;;  %v2112_v13 = vld [vmem:[#allocation5 + $0x158] sm:$0xff]  ;;  %16253 = vst [vmem:[#allocation50_spill] sm:$0xff] %v13776_v44 }
 0x360   :  { %2539 = vmatprep.subr.bf16.mxu0 %v13742_v12  ;;  %2580 = vmatprep.subr.bf16.mxu1 %v13744_v51  ;;  %16250 = vst [vmem:[#allocation47_spill] sm:$0xff] %v13768_v19  ;;  %v2111_v51 = vld [vmem:[#allocation5 + $0x150] sm:$0xff]  ;;  %v2116_v14 = vld [vmem:[#allocation5 + $0x178] sm:$0xff]  ;;  %16252 = vst [vmem:[#allocation49_spill] sm:$0xff] %v13774_v34 }
 0x361   :  { %v2115_v12 = vld [vmem:[#allocation5 + $0x170] sm:$0xff]  ;;  %v13782_v0 = vcombine.high %v2112_v13, %v2116_v14  ;;  %v13788_v60 = vcombine.low %v2112_v13, %v2116_v14 }
 0x362   :  { %v13780_v21 = vcombine.high %v2111_v51, %v2115_v12  ;;  %v13786_v46 = vcombine.low %v2111_v51, %v2115_v12 }
 0x363   :  { %2540 = vmatpush1.bf16.msra.mxu0 %v13750_v35  ;;  %2581 = vmatpush1.bf16.msra.mxu1 %v13752_v20  ;;  %16255 = vst [vmem:[#allocation52_spill] sm:$0xff] %v13782_v0  ;;  %v2120_v20 = vld [vmem:[#allocation5 + $0x198] sm:$0xff] }
 0x364   :  { %2541 = vmatprep.subr.bf16.mxu0 %v13756_v1  ;;  %2582 = vmatprep.subr.bf16.mxu1 %v13758_v27  ;;  %16254 = vst [vmem:[#allocation51_spill] sm:$0xff] %v13780_v21  ;;  %v2119_v27 = vld [vmem:[#allocation5 + $0x190] sm:$0xff]  ;;  %v2124_v35 = vld [vmem:[#allocation5 + $0x1b8] sm:$0xff] }
 0x365   :  { %v2123_v1 = vld [vmem:[#allocation5 + $0x1b0] sm:$0xff]  ;;  %v13796_v16 = vcombine.high %v2120_v20, %v2124_v35 }
 0x366   :  { %v13790_v24 = vcombine.high %v2119_v27, %v2123_v1 }
 0x367   :  { %2542 = vmatpush1.bf16.msra.mxu0 %v13762_v63  ;;  %2583 = vmatpush1.bf16.msra.mxu1 %v13764_v15 }
 0x368   :  { %2543 = vmatprep.subr.bf16.mxu0 %v13768_v19  ;;  %2584 = vmatprep.subr.bf16.mxu1 %v13770_v40 }
 0x36b   :  { %v1943_v58 = vpop.f32.mrb[24].mxu0  ;;  %v1984_v63 = vpop.f32.mrb[24].mxu1  ;;  %2544 = vmatpush1.bf16.msra.mxu0 %v13774_v34  ;;  %2585 = vmatpush1.bf16.msra.mxu1 %v13776_v44  ;;  %v2127_v34 = vld [vmem:[#allocation5 + $0x1d0] sm:$0xff] }
 0x36c   :  { %v1991_v47 = vadd.f32 %v1943_v58, %v13717_v62  ;;  %v1993_v40 = vadd.f32 %v1984_v63, %v13719_v54  ;;  %v1945_v19 = vpop.f32.mrb[25].mxu0  ;;  %v1986_v15 = vpop.f32.mrb[25].mxu1  ;;  %2545 = vmatprep.subr.bf16.mxu0 %v13780_v21  ;;  %2586 = vmatprep.subr.bf16.mxu1 %v13782_v0  ;;  %v2131_v44 = vld [vmem:[#allocation5 + $0x1f0] sm:$0xff]  ;;  %v2132_v58 = vld [vmem:[#allocation5 + $0x1f8] sm:$0xff]  ;;  %v13804_v0 = vcombine.low %v2119_v27, %v2123_v1 }
 0x36d   :  { %v1992_v12 = vadd.f32 %v1945_v19, %v13721_v56  ;;  %v1994_v14 = vadd.f32 %v1986_v15, %v13723_v50  ;;  %v1947_v13 = vpop.f32.mrb[26].mxu0  ;;  %v1988_v51 = vpop.f32.mrb[26].mxu1  ;;  %v13806_v56 = vcombine.low %v2120_v20, %v2124_v35  ;;  %v13810_v15 = vcombine.high %v2127_v34, %v2131_v44  ;;  %v13822_v20 = vld [vmem:[#allocation8 + $0x4] ss:$16 sps:$4 sm:$0xff]   ;;  %v13824_v27 = vld [vmem:[#allocation8 + $0xc] ss:$16 sps:$4 sm:$0xff]  }
 0x36e   :  { %v1995_v62 = vadd.f32 %v1991_v47, %v13521_v45  ;;  %v1948_v54 = vpop.f32.mrb[27].mxu0  ;;  %v1989_v63 = vpop.f32.mrb[27].mxu1  ;;  %v13812_v19 = vcombine.high %v2128_v9, %v2132_v58  ;;  %v13816_v1 = vcombine.low %v2127_v34, %v2131_v44  ;;  %v13818_v35 = vcombine.low %v2128_v9, %v2132_v58  ;;  %v13831_v34 = vld [vmem:[#allocation8 + $0x8] ss:$16 sps:$4 sm:$0xff]   ;;  %v13835_v9 = vld [vmem:[#allocation8 + $0x24] ss:$16 sps:$4 sm:$0xff]  }
 0x36f   :  { %v1996_v21 = vadd.f32 %v1992_v12, %v13526_v17  ;;  %2546 = vmatpush1.bf16.msra.mxu0 %v13786_v46  ;;  %2587 = vmatpush1.bf16.msra.mxu1 %v13788_v60  ;;  %v13829_v12 = vld [vmem:[#allocation8] ss:$16 sps:$4 sm:$0xff]   ;;  %16256 = vst [vmem:[#allocation53_spill] sm:$0xff] %v13835_v9  ;;  %v13837_v44 = vld [vmem:[#allocation8 + $0x2c] ss:$16 sps:$4 sm:$0xff]   ;;  %v1997_v51 = vadd.f32 %v1993_v40, %v13545_v37 }
 0x370   :  { %v11177_v50 = vmul.f32 -1.442695, %v1995_v62  ;;  %2547 = vmatprep.subr.bf16.mxu0 %v13790_v24  ;;  %2588 = vmatprep.subr.bf16.mxu1 %v13796_v16  ;;  %16257 = vst [vmem:[#allocation54_spill] sm:$0xff] %v13837_v44  ;;  %v13846_v58 = vld [vmem:[#allocation8 + $0x28] ss:$16 sps:$4 sm:$0xff]  }
 0x371   :  { %v11178_v47 = vmul.f32 -1.442695, %v1996_v21  ;;  %v1998_v21 = vadd.f32 %v1994_v14, %v13535_v29  ;;  %v13844_v14 = vld [vmem:[#allocation8 + $0x20] ss:$16 sps:$4 sm:$0xff]   ;;  %16259 = vst [vmem:[#allocation56_spill] sm:$0xff] %v13846_v58 }
 0x372   :  { %12543 = vpow2.f32 %v11177_v50  ;;  %16258 = vst [vmem:[#allocation55_spill] sm:$0xff] %v13844_v14  ;;  %v13850_v54 = vld [vmem:[#allocation8 + $0x44] ss:$16 sps:$4 sm:$0xff]   ;;  %v13852_v40 = vld [vmem:[#allocation8 + $0x4c] ss:$16 sps:$4 sm:$0xff]  }
 0x373   :  { %12545 = vpow2.f32 %v11178_v47  ;;  %2548 = vmatpush1.bf16.msra.mxu0 %v13804_v0  ;;  %2589 = vmatpush1.bf16.msra.mxu1 %v13806_v56  ;;  %v11179_v13 = vmul.f32 -1.442695, %v1998_v21  ;;  %16260 = vst [vmem:[#allocation57_spill] sm:$0xff] %v13850_v54  ;;  %16261 = vst [vmem:[#allocation58_spill] sm:$0xff] %v13852_v40  ;;  %v13858_v47 = vld [vmem:[#allocation8 + $0x40] ss:$16 sps:$4 sm:$0xff]  }
 0x374   :  { %2549 = vmatprep.subr.bf16.mxu0 %v13810_v15  ;;  %2590 = vmatprep.subr.bf16.mxu1 %v13812_v19  ;;  %16262 = vst [vmem:[#allocation59_spill] sm:$0xff] %v13858_v47  ;;  %v13860_v21 = vld [vmem:[#allocation8 + $0x48] ss:$16 sps:$4 sm:$0xff]  }
 0x375   :  { %12547 = vpow2.f32 %v11179_v13  ;;  %16263 = vst [vmem:[#allocation60_spill] sm:$0xff] %v13860_v21  ;;  %v13864_v13 = vld [vmem:[#allocation8 + $0x64] ss:$16 sps:$4 sm:$0xff]   ;;  %v13897_v37 = vld [vmem:[#allocation8 + $0xa8] ss:$16 sps:$4 sm:$0xff]  }
 0x376   :  { %12549 = vtanh.f32 %v1997_v51  ;;  %16264 = vst [vmem:[#allocation61_spill] sm:$0xff] %v13864_v13  ;;  %v13870_v51 = vld [vmem:[#allocation8 + $0x60] ss:$16 sps:$4 sm:$0xff]  }
 0x377   :  { %2550 = vmatpush1.bf16.msra.mxu0 %v13816_v1  ;;  %2591 = vmatpush1.bf16.msra.mxu1 %v13818_v35  ;;  %16266 = vst [vmem:[#allocation63_spill] sm:$0xff] %v13870_v51 }
 0x378   :  { %2810 = vmatprep.subr.bf16.mxu0 %v13822_v20  ;;  %2851 = vmatprep.subr.bf16.mxu1 %v13824_v27 }
 0x37a   :  { %2568 = vmatmul.mubr.bf16.vlgmr.msra.gmra.mrb[32].mxu0 %v13726_v55  ;;  %2609 = vmatmul.mubr.bf16.vlgmr.msra.gmra.mrb[32].mxu1 %v13726_v55 }
 0x37b   :  { %2811 = vmatpush1.bf16.msra.mxu0 %v13829_v12  ;;  %2852 = vmatpush1.bf16.msra.mxu1 %v13831_v34 }
 0x37c   :  { %v12544_v62 = vpop.eup %12543  ;;  %2812 = vmatprep.subr.bf16.mxu0 %v13835_v9  ;;  %2853 = vmatprep.subr.bf16.mxu1 %v13837_v44 }
 0x37d   :  { %v12546_v63 = vpop.eup %12545  ;;  %v2005_v50 = vadd.f32 1.0, %v12544_v62  ;;  %2842 = vmatprep.mubr.bf16.mxu0 %v16142_v53  ;;  %2883 = vmatprep.mubr.bf16.mxu1 %v16142_v53  ;;  %v13866_v62 = vld [vmem:[#allocation8 + $0x6c] ss:$16 sps:$4 sm:$0xff]  }
 0x37e   :  { %v2006_v55 = vadd.f32 1.0, %v12546_v63  ;;  %16265 = vst [vmem:[#allocation62_spill] sm:$0xff] %v13866_v62  ;;  %v13872_v63 = vld [vmem:[#allocation8 + $0x68] ss:$16 sps:$4 sm:$0xff]  }
 0x37f   :  { %12551 = vrcp.f32 %v2005_v50  ;;  %2813 = vmatpush1.bf16.msra.mxu0 %v13844_v14  ;;  %2854 = vmatpush1.bf16.msra.mxu1 %v13846_v58  ;;  %16267 = vst [vmem:[#allocation64_spill] sm:$0xff] %v13872_v63  ;;  %v13876_v50 = vld [vmem:[#allocation8 + $0x84] ss:$16 sps:$4 sm:$0xff]  }
 0x380   :  { %12553 = vrcp.f32 %v2006_v55  ;;  %2814 = vmatprep.subr.bf16.mxu0 %v13850_v54  ;;  %2855 = vmatprep.subr.bf16.mxu1 %v13852_v40  ;;  %16268 = vst [vmem:[#allocation65_spill] sm:$0xff] %v13876_v50  ;;  %v13878_v55 = vld [vmem:[#allocation8 + $0x8c] ss:$16 sps:$4 sm:$0xff]   ;;  %v12548_v40 = vpop.eup %12547 }
 0x381   :  { %16269 = vst [vmem:[#allocation66_spill] sm:$0xff] %v13878_v55  ;;  %v12550_v54 = vpop.eup %12549  ;;  %v2015_v9 = vadd.f32 1.0, %v12548_v40  ;;  %v13918_v40 = vld [vmem:[#allocation8 + $0xec] ss:$16 sps:$4 sm:$0xff]  }
 0x383   :  { %2815 = vmatpush1.bf16.msra.mxu0 %v13858_v47  ;;  %2856 = vmatpush1.bf16.msra.mxu1 %v13860_v21  ;;  %v13882_v47 = vld [vmem:[#allocation8 + $0x80] ss:$16 sps:$4 sm:$0xff]   ;;  %v13884_v21 = vld [vmem:[#allocation8 + $0x88] ss:$16 sps:$4 sm:$0xff]   ;;  %12555 = vrcp.f32 %v2015_v9 }
 0x384   :  { %2816 = vmatprep.subr.bf16.mxu0 %v13864_v13  ;;  %2857 = vmatprep.subr.bf16.mxu1 %v13866_v62  ;;  %v13888_v13 = vld [vmem:[#allocation8 + $0xa4] ss:$16 sps:$4 sm:$0xff]   ;;  %v13890_v62 = vld [vmem:[#allocation8 + $0xac] ss:$16 sps:$4 sm:$0xff]   ;;  %v13922_v9 = vld [vmem:[#allocation8 + $0xe0] ss:$16 sps:$4 sm:$0xff]  }
 0x387   :  { %2817 = vmatpush1.bf16.msra.mxu0 %v13870_v51  ;;  %2858 = vmatpush1.bf16.msra.mxu1 %v13872_v63  ;;  %v13895_v63 = vld [vmem:[#allocation8 + $0xa0] ss:$16 sps:$4 sm:$0xff]  }
 0x388   :  { %2818 = vmatprep.subr.bf16.mxu0 %v13876_v50  ;;  %2859 = vmatprep.subr.bf16.mxu1 %v13878_v55  ;;  %v13901_v55 = vld [vmem:[#allocation8 + $0xc4] ss:$16 sps:$4 sm:$0xff]   ;;  %v13903_v50 = vld [vmem:[#allocation8 + $0xcc] ss:$16 sps:$4 sm:$0xff]  }
 0x389   :  { %v12552_v58 = vpop.eup %12551  ;;  %16270 = vst [vmem:[#allocation67_spill] sm:$0xff] %v13903_v50 }
 0x38a   :  { %v12554_v14 = vpop.eup %12553  ;;  %v2019_v44 = vmul.f32 %v12552_v58, %v12550_v54  ;;  %v13916_v54 = vld [vmem:[#allocation8 + $0xe4] ss:$16 sps:$4 sm:$0xff]  }
 0x38b   :  { %v2018_v51 = vmul.f32 %v12554_v14, %v13574_v52  ;;  %2819 = vmatpush1.bf16.msra.mxu0 %v13882_v47  ;;  %2860 = vmatpush1.bf16.msra.mxu1 %v13884_v21  ;;  %v13909_v52 = vld [vmem:[#allocation8 + $0xc0] ss:$16 sps:$4 sm:$0xff]   ;;  %v13911_v14 = vld [vmem:[#allocation8 + $0xc8] ss:$16 sps:$4 sm:$0xff]  }
 0x38c   :  { %2820 = vmatprep.subr.bf16.mxu0 %v13888_v13  ;;  %2861 = vmatprep.subr.bf16.mxu1 %v13890_v62  ;;  %16271 = vst [vmem:[#allocation68_spill] sm:$0xff] %v13909_v52  ;;  %16272 = vst [vmem:[#allocation69_spill] sm:$0xff] %v13911_v14 }
 0x38d   :  { %v13905_v58 = vadd.f32 %v2019_v44, %v2018_v51  ;;  %v13924_v44 = vld [vmem:[#allocation8 + $0xe8] ss:$16 sps:$4 sm:$0xff]   ;;  %v12556_v51 = vpop.eup %12555 }
 0x38f   :  { %2821 = vmatpush1.bf16.msra.mxu0 %v13895_v63  ;;  %2862 = vmatpush1.bf16.msra.mxu1 %v13897_v37  ;;  %12557 = vtanh.f32 %v13905_v58 }
 0x390   :  { %2822 = vmatprep.subr.bf16.mxu0 %v13901_v55  ;;  %2863 = vmatprep.subr.bf16.mxu1 %v13903_v50 }
 0x393   :  { %2823 = vmatpush1.bf16.msra.mxu0 %v13909_v52  ;;  %2864 = vmatpush1.bf16.msra.mxu1 %v13911_v14 }
 0x394   :  { %2824 = vmatprep.subr.bf16.mxu0 %v13916_v54  ;;  %2865 = vmatprep.subr.bf16.mxu1 %v13918_v40 }
 0x397   :  { %2825 = vmatpush1.bf16.msra.mxu0 %v13922_v9  ;;  %2866 = vmatpush1.bf16.msra.mxu1 %v13924_v44 }
 0x398   :  { %3354 = vmatprep.subr.bf16.mxu0 %v13600_v28  ;;  %3395 = vmatprep.subr.bf16.mxu1 %v13606_v41 }
 0x399   :  { %v12558_v52 = vpop.eup %12557 }
 0x39a   :  { %v2022_v50 = vmul.f32 %v12558_v52, %v12556_v51  ;;  %v16283_v52 = vld [vmem:[#allocation26_spill] sm:$0xff]  ;;  %v16284_v51 = vld [vmem:[#allocation27_spill] sm:$0xff] }
 0x39c   :  { %2024 = vst [vmem:[#allocation2 + $0x2] sm:$0x3] %v2022_v50  ;;  %v2617_v14 = vpack.c.bf16 %v2022_v50, %v2022_v50 }
 0x39e   :  { %2843 = vmatmul.mubr.bf16.vlgmr.msra.gmra.mrb[36].mxu0 %v2617_v14  ;;  %2884 = vmatmul.mubr.bf16.vlgmr.msra.gmra.mrb[36].mxu1 %v2617_v14 }
 0x39f   :  { %3355 = vmatpush1.bf16.msra.mxu0 %v13602_v3  ;;  %3396 = vmatpush1.bf16.msra.mxu1 %v13604_v39  ;;  %v16274_v39 = vld [vmem:[#allocation34_spill] sm:$0xff] }
 0x3a0   :  { %3356 = vmatprep.subr.bf16.mxu0 %v13612_v49  ;;  %3397 = vmatprep.subr.bf16.mxu1 %v13618_v7  ;;  %v16275_v49 = vld [vmem:[#allocation35_spill] sm:$0xff]  ;;  %v2931_v7 = vpop.permute.xlu1 %2930 }
 0x3a1   :  { %3386 = vmatprep.mubr.bf16.mxu0 %v16142_v53  ;;  %3427 = vmatprep.mubr.bf16.mxu1 %v16142_v53 }
 0x3a3   :  { %v10766_v28 = vld [vmem:[#allocation2 + $0x2] sm:$0x3]  ;;  %3357 = vmatpush1.bf16.msra.mxu0 %v13614_v5  ;;  %3398 = vmatpush1.bf16.msra.mxu1 %v13616_v48  ;;  %v16276_v5 = vld [vmem:[#allocation36_spill] sm:$0xff] }
 0x3a4   :  { %v10785_v41 = vmul.f32 %v13596_v18, %v10766_v28  ;;  %3358 = vmatprep.subr.bf16.mxu0 %v13624_v33  ;;  %3399 = vmatprep.subr.bf16.mxu1 %v13630_v11  ;;  %v16273_v18 = vld [vmem:[#allocation32_spill] sm:$0xff]  ;;  %v16277_v48 = vld [vmem:[#allocation37_spill] sm:$0xff]  ;;  %v16278_v33 = vld [vmem:[#allocation19_spill] sm:$0xff]  ;;  %v2935_v28 = vmul.f32 %v2931_v7, %v16284_v51 }
 0x3a6   :  { %v10800_v3 = vsel %vm10796_vm0, %v10785_v41, 0.0 }
 0x3a7   :  { %10801 = vadd.xlane.f32.xlu1 %v10800_v3  ;;  %3359 = vmatpush1.bf16.msra.mxu0 %v13626_v6  ;;  %v2933_v6 = vmul.f32 %v2931_v7, %v16278_v33  ;;  %v16285_v3 = vld [vmem:[#allocation28_spill] sm:$0xff] }
 0x3a8   :  { %3400 = vmatpush1.bf16.msra.mxu1 %v13628_v8  ;;  %3360 = vmatprep.subr.bf16.mxu0 %v13636_v31  ;;  %v16279_v8 = vld [vmem:[#allocation20_spill] sm:$0xff]  ;;  %v16280_v31 = vld [vmem:[#allocation22_spill] sm:$0xff] }
 0x3a9   :  { %3401 = vmatprep.subr.bf16.mxu1 %v13642_v43  ;;  %v2934_v11 = vmul.f32 %v2931_v7, %v16279_v8 }
 0x3ab   :  { %3361 = vmatpush1.bf16.msra.mxu0 %v13638_v38  ;;  %v2937_v38 = vadd.f32 %v2933_v6, %v16280_v31 }
 0x3ac   :  { %3402 = vmatpush1.bf16.msra.mxu1 %v13640_v42  ;;  %3362 = vmatprep.subr.bf16.mxu0 %v13648_v57  ;;  %v16281_v57 = vld [vmem:[#allocation23_spill] sm:$0xff] }
 0x3ad   :  { %3403 = vmatprep.subr.bf16.mxu1 %v13654_v61 }
 0x3af   :  { %3363 = vmatpush1.bf16.msra.mxu0 %v13650_v22  ;;  %v2938_v22 = vadd.f32 %v2934_v11, %v16281_v57 }
 0x3b0   :  { %3404 = vmatpush1.bf16.msra.mxu1 %v13652_v23  ;;  %3364 = vmatprep.subr.bf16.mxu0 %v13662_v25 }
 0x3b1   :  { %3405 = vmatprep.subr.bf16.mxu1 %v13666_v2 }
 0x3b3   :  { %3365 = vmatpush1.bf16.msra.mxu0 %v13660_v59 }
 0x3b4   :  { %3406 = vmatpush1.bf16.msra.mxu1 %v13664_v36  ;;  %3366 = vmatprep.subr.bf16.mxu0 %v13668_v10  ;;  %v16282_v36 = vld [vmem:[#allocation24_spill] sm:$0xff] }
 0x3b5   :  { %3407 = vmatprep.subr.bf16.mxu1 %v13671_v4  ;;  %v2936_v2 = vmul.f32 %v2931_v7, %v16282_v36  ;;  %v16286_v7 = vld [vmem:[#allocation38_spill] sm:$0xff] }
 0x3b7   :  { %3367 = vmatpush1.bf16.msra.mxu0 %v13675_v26  ;;  %v2940_v14 = vadd.f32 %v2936_v2, %v16283_v52 }
 0x3b8   :  { %3408 = vmatpush1.bf16.msra.mxu1 %v13679_v30  ;;  %3368 = vmatprep.subr.bf16.mxu0 %v13681_v32 }
 0x3b9   :  { %3409 = vmatprep.subr.bf16.mxu1 %v16273_v18  ;;  %v2939_v18 = vadd.f32 %v2935_v28, %v16285_v3 }
 0x3bb   :  { %3369 = vmatpush1.bf16.msra.mxu0 %v16274_v39 }
 0x3bc   :  { %3410 = vmatpush1.bf16.msra.mxu1 %v16275_v49  ;;  %3436 = vmatprep.subr.bf16.mxu0 %v16276_v5 }
 0x3bd   :  { %3477 = vmatprep.subr.bf16.mxu1 %v16277_v48 }
 0x42d   :  { %v2487_v42 = vpop.f32.mrb[28].mxu0  ;;  %v2528_v43 = vpop.f32.mrb[28].mxu1 }
 0x42e   :  { %v2941_v23 = vadd.f32 %v2937_v38, %v2487_v42  ;;  %v2489_v61 = vpop.f32.mrb[29].mxu0  ;;  %v2530_v59 = vpop.f32.mrb[29].mxu1  ;;  %v2943_v49 = vadd.f32 %v2939_v18, %v2528_v43 }
 0x42f   :  { %v2942_v25 = vadd.f32 %v2938_v22, %v2489_v61  ;;  %v2491_v10 = vpop.f32.mrb[30].mxu0  ;;  %v2532_v4 = vpop.f32.mrb[30].mxu1  ;;  %v2944_v41 = vadd.f32 %v2940_v14, %v2530_v59 }
 0x430   :  { %v11284_v26 = vmul.f32 -1.442695, %v2941_v23  ;;  %v2492_v30 = vpop.f32.mrb[31].mxu0  ;;  %v2533_v32 = vpop.f32.mrb[31].mxu1 }
 0x431   :  { %v11285_v50 = vmul.f32 -1.442695, %v2942_v25  ;;  %v11286_v39 = vmul.f32 -1.442695, %v2944_v41 }
 0x432   :  { %12559 = vpow2.f32 %v11284_v26 }
 0x433   :  { %12561 = vpow2.f32 %v11285_v50 }
 0x434   :  { %12563 = vpow2.f32 %v11286_v39 }
 0x435   :  { %12565 = vtanh.f32 %v2943_v49  ;;  %v16287_v49 = vld [vmem:[#allocation31_spill] sm:$0xff] }
 0x43c   :  { %v12560_v5 = vpop.eup %12559 }
 0x43d   :  { %v12562_v48 = vpop.eup %12561  ;;  %v2951_v6 = vadd.f32 1.0, %v12560_v5  ;;  %v16288_v5 = vld [vmem:[#allocation33_spill] sm:$0xff] }
 0x43e   :  { %v2952_v11 = vadd.f32 1.0, %v12562_v48  ;;  %v12564_v38 = vpop.eup %12563  ;;  %v16289_v48 = vld [vmem:[#allocation39_spill] sm:$0xff] }
 0x43f   :  { %12567 = vrcp.f32 %v2951_v6  ;;  %v12566_v42 = vpop.eup %12565  ;;  %v2961_v25 = vadd.f32 1.0, %v12564_v38  ;;  %v16290_v6 = vld [vmem:[#allocation40_spill] sm:$0xff]  ;;  %v16292_v38 = vld [vmem:[#allocation17_spill] sm:$0xff] }
 0x440   :  { %12569 = vrcp.f32 %v2952_v11  ;;  %v16291_v11 = vld [vmem:[#allocation41_spill] sm:$0xff] }
 0x441   :  { %12571 = vrcp.f32 %v2961_v25  ;;  %v16297_v25 = vld [vmem:[#allocation21_spill] sm:$0xff] }
 0x449   :  { %v12568_v22 = vpop.eup %12567 }
 0x44a   :  { %v12570_v23 = vpop.eup %12569  ;;  %v2965_v61 = vmul.f32 %v12568_v22, %v12566_v42  ;;  %v16293_v42 = vld [vmem:[#allocation42_spill] sm:$0xff]  ;;  %v16294_v22 = vld [vmem:[#allocation43_spill] sm:$0xff] }
 0x44b   :  { %v2964_v59 = vmul.f32 %v12570_v23, %v16286_v7  ;;  %v12572_v28 = vpop.eup %12571  ;;  %v16295_v23 = vld [vmem:[#allocation18_spill] sm:$0xff]  ;;  %v16298_v7 = vld [vmem:[#allocation45_spill] sm:$0xff] }
 0x44d   :  { %v13977_v2 = vadd.f32 %v2965_v61, %v2964_v59  ;;  %v2569_v10 = vpop.f32.mrb[32].mxu0  ;;  %v2610_v43 = vpop.f32.mrb[32].mxu1  ;;  %v16296_v61 = vld [vmem:[#allocation44_spill] sm:$0xff]  ;;  %v16299_v59 = vld [vmem:[#allocation25_spill] sm:$0xff] }
 0x44e   :  { %v2571_v4 = vpop.f32.mrb[33].mxu0  ;;  %v2612_v26 = vpop.f32.mrb[33].mxu1 }
 0x44f   :  { %v2573_v30 = vpop.f32.mrb[34].mxu0  ;;  %v2614_v32 = vpop.f32.mrb[34].mxu1  ;;  %12573 = vtanh.f32 %v13977_v2 }
 0x450   :  { %v2574_v50 = vpop.f32.mrb[35].mxu0  ;;  %v2615_v14 = vpop.f32.mrb[35].mxu1  ;;  %v16300_v30 = vld [vmem:[#allocation46_spill] sm:$0xff]  ;;  %v16301_v32 = vld [vmem:[#allocation47_spill] sm:$0xff] }
 0x451   :  { %v16302_v50 = vld [vmem:[#allocation48_spill] sm:$0xff]  ;;  %v16303_v14 = vld [vmem:[#allocation49_spill] sm:$0xff] }
 0x459   :  { %v12574_v41 = vpop.eup %12573 }
 0x45a   :  { %v2968_v18 = vmul.f32 %v12574_v41, %v12572_v28  ;;  %v16304_v28 = vld [vmem:[#allocation50_spill] sm:$0xff]  ;;  %v16305_v41 = vld [vmem:[#allocation51_spill] sm:$0xff] }
 0x45c   :  { %v2969_v39 = vpack.c.bf16 %v2968_v18, %v2968_v18  ;;  %v16306_v18 = vld [vmem:[#allocation52_spill] sm:$0xff] }
 0x45e   :  { %3387 = vmatmul.mubr.bf16.vlgmr.msra.gmra.mrb[40].mxu0 %v2969_v39  ;;  %3428 = vmatmul.mubr.bf16.vlgmr.msra.gmra.mrb[40].mxu1 %v2969_v39 }
 0x45f   :  { %3437 = vmatpush1.bf16.msra.mxu0 %v16287_v49  ;;  %3478 = vmatpush1.bf16.msra.mxu1 %v16288_v5 }
 0x460   :  { %3438 = vmatprep.subr.bf16.mxu0 %v16289_v48  ;;  %3479 = vmatprep.subr.bf16.mxu1 %v16290_v6 }
 0x461   :  { %3468 = vmatprep.mubr.bf16.mxu0 %v16142_v53  ;;  %3509 = vmatprep.mubr.bf16.mxu1 %v16142_v53 }
 0x463   :  { %3439 = vmatpush1.bf16.msra.mxu0 %v16291_v11  ;;  %3480 = vmatpush1.bf16.msra.mxu1 %v16292_v38 }
 0x464   :  { %3440 = vmatprep.subr.bf16.mxu0 %v16293_v42  ;;  %3481 = vmatprep.subr.bf16.mxu1 %v16294_v22 }
 0x467   :  { %3441 = vmatpush1.bf16.msra.mxu0 %v16295_v23  ;;  %3482 = vmatpush1.bf16.msra.mxu1 %v16296_v61 }
 0x468   :  { %3442 = vmatprep.subr.bf16.mxu0 %v16297_v25  ;;  %3483 = vmatprep.subr.bf16.mxu1 %v16298_v7 }
 0x46b   :  { %3443 = vmatpush1.bf16.msra.mxu0 %v16299_v59  ;;  %3484 = vmatpush1.bf16.msra.mxu1 %v16300_v30 }
 0x46c   :  { %3444 = vmatprep.subr.bf16.mxu0 %v16301_v32  ;;  %3485 = vmatprep.subr.bf16.mxu1 %v16302_v50  ;;  %v16317_v32 = vld [vmem:[#allocation62_spill] sm:$0xff]  ;;  %v16318_v50 = vld [vmem:[#allocation63_spill] sm:$0xff] }
 0x46f   :  { %3445 = vmatpush1.bf16.msra.mxu0 %v16303_v14  ;;  %3486 = vmatpush1.bf16.msra.mxu1 %v16304_v28  ;;  %v16319_v14 = vld [vmem:[#allocation64_spill] sm:$0xff]  ;;  %v16320_v28 = vld [vmem:[#allocation65_spill] sm:$0xff] }
 0x470   :  { %3446 = vmatprep.subr.bf16.mxu0 %v16305_v41  ;;  %3487 = vmatprep.subr.bf16.mxu1 %v16306_v18  ;;  %v16321_v41 = vld [vmem:[#allocation66_spill] sm:$0xff] }
 0x471   :  { %v2844_v49 = vpop.f32.mrb[36].mxu0  ;;  %v2885_v5 = vpop.f32.mrb[36].mxu1 }
 0x472   :  { %v2892_v48 = vadd.f32 %v2844_v49, %v2569_v10  ;;  %v2894_v6 = vadd.f32 %v2885_v5, %v2610_v43  ;;  %v2846_v11 = vpop.f32.mrb[37].mxu0  ;;  %v2887_v38 = vpop.f32.mrb[37].mxu1 }
 0x473   :  { %v2893_v42 = vadd.f32 %v2846_v11, %v2571_v4  ;;  %v2895_v22 = vadd.f32 %v2887_v38, %v2612_v26  ;;  %v2848_v23 = vpop.f32.mrb[38].mxu0  ;;  %v2889_v61 = vpop.f32.mrb[38].mxu1  ;;  %3447 = vmatpush1.bf16.msra.mxu0 %v13786_v46  ;;  %3488 = vmatpush1.bf16.msra.mxu1 %v13788_v60  ;;  %v16314_v4 = vld [vmem:[#allocation59_spill] sm:$0xff]  ;;  %v16315_v26 = vld [vmem:[#allocation60_spill] sm:$0xff] }
 0x474   :  { %v2896_v25 = vadd.f32 %v2892_v48, %v13521_v45  ;;  %v2849_v7 = vpop.f32.mrb[39].mxu0  ;;  %v2890_v59 = vpop.f32.mrb[39].mxu1  ;;  %3448 = vmatprep.subr.bf16.mxu0 %v13790_v24  ;;  %3489 = vmatprep.subr.bf16.mxu1 %v13796_v16  ;;  %v16308_v24 = vld [vmem:[#allocation53_spill] sm:$0xff]  ;;  %v3872_v23 = vld [vmem:[#allocation5 + $0x8] sm:$0xff] }
 0x475   :  { %v2897_v10 = vadd.f32 %v2893_v42, %v13526_v17  ;;  %v2899_v46 = vadd.f32 %v2895_v22, %v13535_v29  ;;  %v3875_v22 = vld [vmem:[#allocation5 + $0x20] sm:$0xff] }
 0x476   :  { %v11280_v43 = vmul.f32 -1.442695, %v2896_v25  ;;  %v3876_v25 = vld [vmem:[#allocation5 + $0x28] sm:$0xff] }
 0x477   :  { %v11281_v30 = vmul.f32 -1.442695, %v2897_v10  ;;  %3449 = vmatpush1.bf16.msra.mxu0 %v13804_v0  ;;  %3490 = vmatpush1.bf16.msra.mxu1 %v13806_v56  ;;  %v11282_v16 = vmul.f32 -1.442695, %v2899_v46  ;;  %v16307_v0 = vld [vmem:[#allocation30_spill] sm:$0xff]  ;;  %v14067_v59 = vcombine.low %v3872_v23, %v3876_v25  ;;  %v14069_v10 = vcombine.high %v3872_v23, %v3876_v25 }
 0x478   :  { %12575 = vpow2.f32 %v11280_v43  ;;  %3450 = vmatprep.subr.bf16.mxu0 %v13810_v15  ;;  %3491 = vmatprep.subr.bf16.mxu1 %v13812_v19  ;;  %v2898_v60 = vadd.f32 %v2894_v6, %v16307_v0  ;;  %v16309_v56 = vld [vmem:[#allocation54_spill] sm:$0xff] }
 0x479   :  { %12577 = vpow2.f32 %v11281_v30  ;;  %v3879_v43 = vld [vmem:[#allocation5 + $0x40] sm:$0xff]  ;;  %v3880_v46 = vld [vmem:[#allocation5 + $0x48] sm:$0xff] }
 0x47a   :  { %12579 = vpow2.f32 %v11282_v16  ;;  %v3883_v30 = vld [vmem:[#allocation5 + $0x60] sm:$0xff]  ;;  %v3920_v25 = vld [vmem:[#allocation5 + $0x188] sm:$0xff] }
 0x47b   :  { %3451 = vmatpush1.bf16.msra.mxu0 %v13816_v1  ;;  %3492 = vmatpush1.bf16.msra.mxu1 %v13818_v35  ;;  %v16310_v35 = vld [vmem:[#allocation55_spill] sm:$0xff]  ;;  %12581 = vtanh.f32 %v2898_v60  ;;  %v14075_v16 = vcombine.high %v3879_v43, %v3883_v30 }
 0x47c   :  { %3711 = vmatprep.subr.bf16.mxu0 %v13822_v20  ;;  %3752 = vmatprep.subr.bf16.mxu1 %v13824_v27  ;;  %v16311_v20 = vld [vmem:[#allocation56_spill] sm:$0xff]  ;;  %v3884_v60 = vld [vmem:[#allocation5 + $0x68] sm:$0xff] }
 0x47e   :  { %3469 = vmatmul.mubr.bf16.vlgmr.msra.gmra.mrb[44].mxu0 %v2969_v39  ;;  %3510 = vmatmul.mubr.bf16.vlgmr.msra.gmra.mrb[44].mxu1 %v2969_v39  ;;  %v16316_v39 = vld [vmem:[#allocation61_spill] sm:$0xff] }
 0x47f   :  { %3712 = vmatpush1.bf16.msra.mxu0 %v13829_v12  ;;  %3753 = vmatpush1.bf16.msra.mxu1 %v13831_v34  ;;  %v16312_v12 = vld [vmem:[#allocation57_spill] sm:$0xff]  ;;  %v16313_v34 = vld [vmem:[#allocation58_spill] sm:$0xff] }
 0x480   :  { %3713 = vmatprep.subr.bf16.mxu0 %v16308_v24  ;;  %3754 = vmatprep.subr.bf16.mxu1 %v16309_v56  ;;  %v14077_v24 = vcombine.low %v3879_v43, %v3883_v30  ;;  %v14079_v56 = vcombine.low %v3880_v46, %v3884_v60  ;;  %v3924_v43 = vld [vmem:[#allocation5 + $0x1a8] sm:$0xff]  ;;  %v3927_v30 = vld [vmem:[#allocation5 + $0x1c0] sm:$0xff] }
 0x481   :  { %3743 = vmatprep.mubr.bf16.mxu0 %v16142_v53  ;;  %3784 = vmatprep.mubr.bf16.mxu1 %v16142_v53 }
 0x482   :  { %v12576_v15 = vpop.eup %12575 }
 0x483   :  { %v12578_v19 = vpop.eup %12577  ;;  %v2906_v1 = vadd.f32 1.0, %v12576_v15  ;;  %3714 = vmatpush1.bf16.msra.mxu0 %v16310_v35  ;;  %3755 = vmatpush1.bf16.msra.mxu1 %v16311_v20  ;;  %v14081_v15 = vcombine.high %v3880_v46, %v3884_v60  ;;  %v3888_v35 = vld [vmem:[#allocation5 + $0x88] sm:$0xff]  ;;  %v14134_v46 = vcombine.high %v3920_v25, %v3924_v43  ;;  %v3931_v60 = vld [vmem:[#allocation5 + $0x1e0] sm:$0xff] }
 0x484   :  { %v2907_v27 = vadd.f32 1.0, %v12578_v19  ;;  %3715 = vmatprep.subr.bf16.mxu0 %v16312_v12  ;;  %3756 = vmatprep.subr.bf16.mxu1 %v16313_v34  ;;  %v12580_v18 = vpop.eup %12579  ;;  %v3887_v19 = vld [vmem:[#allocation5 + $0x80] sm:$0xff] }
 0x485   :  { %12583 = vrcp.f32 %v2906_v1  ;;  %v12582_v49 = vpop.eup %12581  ;;  %v2916_v11 = vadd.f32 1.0, %v12580_v18  ;;  %v3891_v1 = vld [vmem:[#allocation5 + $0xa0] sm:$0xff] }
 0x486   :  { %12585 = vrcp.f32 %v2907_v27  ;;  %v14087_v20 = vcombine.high %v3887_v19, %v3891_v1  ;;  %v3892_v27 = vld [vmem:[#allocation5 + $0xa8] sm:$0xff]  ;;  %v14089_v12 = vcombine.low %v3887_v19, %v3891_v1 }
 0x487   :  { %3716 = vmatpush1.bf16.msra.mxu0 %v16314_v4  ;;  %3757 = vmatpush1.bf16.msra.mxu1 %v16315_v26  ;;  %12587 = vrcp.f32 %v2916_v11  ;;  %v14091_v34 = vcombine.low %v3888_v35, %v3892_v27  ;;  %v14093_v4 = vcombine.high %v3888_v35, %v3892_v27  ;;  %v3895_v26 = vld [vmem:[#allocation5 + $0xc0] sm:$0xff]  ;;  %v3908_v11 = vld [vmem:[#allocation5 + $0x128] sm:$0xff]  ;;  %v3873_v27 = vld [vmem:[#allocation5 + $0x10] sm:$0xff] }
 0x488   :  { %3717 = vmatprep.subr.bf16.mxu0 %v16316_v39  ;;  %3758 = vmatprep.subr.bf16.mxu1 %v16317_v32  ;;  %v3899_v39 = vld [vmem:[#allocation5 + $0xe0] sm:$0xff]  ;;  %v3896_v32 = vld [vmem:[#allocation5 + $0xc8] sm:$0xff] }
 0x489   :  { %v3928_v19 = vld [vmem:[#allocation5 + $0x1c8] sm:$0xff] }
 0x48a   :  { %v3932_v1 = vld [vmem:[#allocation5 + $0x1e8] sm:$0xff] }
 0x48b   :  { %3718 = vmatpush1.bf16.msra.mxu0 %v16318_v50  ;;  %3759 = vmatpush1.bf16.msra.mxu1 %v16319_v14  ;;  %v14099_v50 = vcombine.high %v3895_v26, %v3899_v39  ;;  %v3900_v14 = vld [vmem:[#allocation5 + $0xe8] sm:$0xff] }
 0x48c   :  { %3719 = vmatprep.subr.bf16.mxu0 %v16320_v28  ;;  %3760 = vmatprep.subr.bf16.mxu1 %v16321_v41  ;;  %v14101_v28 = vcombine.low %v3895_v26, %v3899_v39  ;;  %v14103_v41 = vcombine.low %v3896_v32, %v3900_v14  ;;  %v14105_v18 = vcombine.high %v3896_v32, %v3900_v14  ;;  %v3877_v26 = vld [vmem:[#allocation5 + $0x30] sm:$0xff]  ;;  %v3874_v39 = vld [vmem:[#allocation5 + $0x18] sm:$0xff] }
 0x48d   :  { %v14142_v32 = vcombine.low %v3920_v25, %v3924_v43  ;;  %v14144_v14 = vcombine.high %v3927_v30, %v3931_v60 }
 0x48f   :  { %v12584_v5 = vpop.eup %12583  ;;  %3720 = vmatpush1.bf16.msra.mxu0 %v13882_v47  ;;  %3761 = vmatpush1.bf16.msra.mxu1 %v13884_v21  ;;  %v16322_v47 = vld [vmem:[#allocation67_spill] sm:$0xff]  ;;  %v16323_v21 = vld [vmem:[#allocation68_spill] sm:$0xff] }
 0x490   :  { %v12586_v48 = vpop.eup %12585  ;;  %v2920_v6 = vmul.f32 %v12584_v5, %v12582_v49  ;;  %3721 = vmatprep.subr.bf16.mxu0 %v13888_v13  ;;  %3762 = vmatprep.subr.bf16.mxu1 %v13890_v62  ;;  %v16324_v13 = vld [vmem:[#allocation69_spill] sm:$0xff] }
 0x491   :  { %v2919_v38 = vmul.f32 %v12586_v48, %v13905_v58  ;;  %v3903_v49 = vld [vmem:[#allocation5 + $0x100] sm:$0xff]  ;;  %v3904_v48 = vld [vmem:[#allocation5 + $0x108] sm:$0xff] }
 0x492   :  { %v3907_v5 = vld [vmem:[#allocation5 + $0x120] sm:$0xff] }
 0x493   :  { %v14041_v42 = vadd.f32 %v2920_v6, %v2919_v38  ;;  %3722 = vmatpush1.bf16.msra.mxu0 %v13895_v63  ;;  %3763 = vmatpush1.bf16.msra.mxu1 %v13897_v37  ;;  %v12588_v37 = vpop.eup %12587  ;;  %v14111_v6 = vcombine.high %v3903_v49, %v3907_v5  ;;  %v14113_v38 = vcombine.low %v3903_v49, %v3907_v5  ;;  %v3878_v5 = vld [vmem:[#allocation5 + $0x38] sm:$0xff] }
 0x494   :  { %3723 = vmatprep.subr.bf16.mxu0 %v13901_v55  ;;  %3764 = vmatprep.subr.bf16.mxu1 %v16322_v47  ;;  %v14115_v47 = vcombine.low %v3904_v48, %v3908_v11  ;;  %v14146_v49 = vcombine.low %v3873_v27, %v3877_v26 }
 0x495   :  { %12589 = vtanh.f32 %v14041_v42 }
 0x496   :  { %16325 = vst [vmem:[#allocation70_spill] sm:$0xff] %v14146_v49 }
 0x497   :  { %3724 = vmatpush1.bf16.msra.mxu0 %v16323_v21  ;;  %3765 = vmatpush1.bf16.msra.mxu1 %v16324_v13  ;;  %v14117_v21 = vcombine.high %v3904_v48, %v3908_v11  ;;  %v3911_v13 = vld [vmem:[#allocation5 + $0x140] sm:$0xff]  ;;  %v14149_v48 = vcombine.high %v3928_v19, %v3932_v1  ;;  %v14151_v11 = vcombine.low %v3874_v39, %v3878_v5 }
 0x498   :  { %3725 = vmatprep.subr.bf16.mxu0 %v13916_v54  ;;  %3766 = vmatprep.subr.bf16.mxu1 %v13918_v40  ;;  %v14059_v54 = vld [vmem:[%s15805_s6] ss:$0 sm:$0xff] }
 0x499   :  { %16326 = vst [vmem:[#allocation32_spill] sm:$0xff] %v14149_v48  ;;  %16327 = vst [vmem:[#allocation34_spill] sm:$0xff] %v14151_v11 }
 0x49b   :  { %3726 = vmatpush1.bf16.msra.mxu0 %v13922_v9  ;;  %3767 = vmatpush1.bf16.msra.mxu1 %v13924_v44  ;;  %v3871_v44 = vld [vmem:[#allocation5] sm:$0xff] }
 0x49c   :  { %v14063_v61 = vcombine.high %v3871_v44, %v3875_v22  ;;  %v14065_v7 = vcombine.low %v3871_v44, %v3875_v22  ;;  %4296 = vmatprep.subr.bf16.mxu1 %v14069_v10 }
 0x49e   :  { %4255 = vmatprep.subr.bf16.mxu0 %v14063_v61 }
 0x49f   :  { %v12590_v62 = vpop.eup %12589 }
 0x4a0   :  { %v2923_v63 = vmul.f32 %v12590_v62, %v12588_v37  ;;  %v3915_v37 = vld [vmem:[#allocation5 + $0x160] sm:$0xff]  ;;  %v3912_v62 = vld [vmem:[#allocation5 + $0x148] sm:$0xff] }
 0x4a2   :  { %2925 = vst [vmem:[#allocation2 + $0x4] sm:$0x3] %v2923_v63  ;;  %v3518_v55 = vpack.c.bf16 %v2923_v63, %v2923_v63  ;;  %v14123_v63 = vcombine.low %v3911_v13, %v3915_v37 }
 0x4a4   :  { %3744 = vmatmul.mubr.bf16.vlgmr.msra.gmra.mrb[48].mxu0 %v3518_v55  ;;  %3785 = vmatmul.mubr.bf16.vlgmr.msra.gmra.mrb[48].mxu1 %v3518_v55  ;;  %v14125_v55 = vcombine.high %v3911_v13, %v3915_v37  ;;  %v14154_v13 = vcombine.low %v3927_v30, %v3931_v60  ;;  %v14158_v37 = vcombine.low %v3928_v19, %v3932_v1 }
 0x4a5   :  { %4287 = vmatprep.mubr.bf16.mxu0 %v16142_v53  ;;  %4328 = vmatprep.mubr.bf16.mxu1 %v16142_v53 }
 0x4a6   :  { %4256 = vmatpush1.bf16.msra.mxu0 %v14065_v7  ;;  %4297 = vmatpush1.bf16.msra.mxu1 %v14067_v59  ;;  %16328 = vst [vmem:[#allocation35_spill] sm:$0xff] %v14154_v13  ;;  %16329 = vst [vmem:[#allocation36_spill] sm:$0xff] %v14158_v37 }
 0x4a7   :  { %4257 = vmatprep.subr.bf16.mxu0 %v14075_v16  ;;  %4298 = vmatprep.subr.bf16.mxu1 %v14081_v15 }
 0x4a9   :  { %v10767_v58 = vld [vmem:[#allocation2 + $0x4] sm:$0x3] }
 0x4aa   :  { %v10786_v40 = vmul.f32 %v14059_v54, %v10767_v58  ;;  %4258 = vmatpush1.bf16.msra.mxu0 %v14077_v24  ;;  %4299 = vmatpush1.bf16.msra.mxu1 %v14079_v56  ;;  %v3916_v58 = vld [vmem:[#allocation5 + $0x168] sm:$0xff] }
 0x4ab   :  { %4259 = vmatprep.subr.bf16.mxu0 %v14087_v20  ;;  %4300 = vmatprep.subr.bf16.mxu1 %v14093_v4  ;;  %v14127_v44 = vcombine.low %v3912_v62, %v3916_v58  ;;  %v14129_v22 = vcombine.high %v3912_v62, %v3916_v58  ;;  %v14160_v62 = vcombine.high %v3873_v27, %v3877_v26 }
 0x4ac   :  { %v10803_v9 = vsel %vm10796_vm0, %v10786_v40, 0.0  ;;  %v3919_v40 = vld [vmem:[#allocation5 + $0x180] sm:$0xff]  ;;  %v14163_v58 = vcombine.high %v3874_v39, %v3878_v5 }
 0x4ad   :  { %10804 = vadd.xlane.f32.xlu0 %v10803_v9  ;;  %v3923_v9 = vld [vmem:[#allocation5 + $0x1a0] sm:$0xff]  ;;  %16330 = vst [vmem:[#allocation37_spill] sm:$0xff] %v14160_v62 }
 0x4ae   :  { %4260 = vmatpush1.bf16.msra.mxu0 %v14089_v12  ;;  %4301 = vmatpush1.bf16.msra.mxu1 %v14091_v34  ;;  %v14131_v23 = vcombine.high %v3919_v40, %v3923_v9  ;;  %v14138_v35 = vcombine.low %v3919_v40, %v3923_v9  ;;  %16331 = vst [vmem:[#allocation38_spill] sm:$0xff] %v14163_v58  ;;  %v3832_v40 = vpop.permute.xlu0 %3831 }
 0x4af   :  { %4261 = vmatprep.subr.bf16.mxu0 %v14099_v50  ;;  %4302 = vmatprep.subr.bf16.mxu1 %v14105_v18  ;;  %v3834_v9 = vmul.f32 %v3832_v40, %v16278_v33  ;;  %v3835_v25 = vmul.f32 %v3832_v40, %v16279_v8  ;;  %v3837_v5 = vmul.f32 %v3832_v40, %v16282_v36 }
 0x4b1   :  { %v3838_v43 = vadd.f32 %v3834_v9, %v16280_v31  ;;  %v3839_v19 = vadd.f32 %v3835_v25, %v16281_v57  ;;  %v3841_v9 = vadd.f32 %v3837_v5, %v16283_v52  ;;  %v3836_v31 = vmul.f32 %v3832_v40, %v16284_v51 }
 0x4b2   :  { %4262 = vmatpush1.bf16.msra.mxu0 %v14101_v28  ;;  %4303 = vmatpush1.bf16.msra.mxu1 %v14103_v41 }
 0x4b3   :  { %4263 = vmatprep.subr.bf16.mxu0 %v14111_v6  ;;  %4304 = vmatprep.subr.bf16.mxu1 %v14117_v21  ;;  %v3840_v25 = vadd.f32 %v3836_v31, %v16285_v3  ;;  %v3902_v3 = vld [vmem:[#allocation5 + $0xf8] sm:$0xff] }
 0x4b6   :  { %4264 = vmatpush1.bf16.msra.mxu0 %v14113_v38  ;;  %4305 = vmatpush1.bf16.msra.mxu1 %v14115_v47 }
 0x4b7   :  { %4265 = vmatprep.subr.bf16.mxu0 %v14125_v55  ;;  %4306 = vmatprep.subr.bf16.mxu1 %v14129_v22 }
 0x4ba   :  { %4266 = vmatpush1.bf16.msra.mxu0 %v14123_v63  ;;  %4307 = vmatpush1.bf16.msra.mxu1 %v14127_v44 }
 0x4bb   :  { %4267 = vmatprep.subr.bf16.mxu0 %v14131_v23  ;;  %4308 = vmatprep.subr.bf16.mxu1 %v14134_v46 }
 0x4be   :  { %4268 = vmatpush1.bf16.msra.mxu0 %v14138_v35  ;;  %4309 = vmatpush1.bf16.msra.mxu1 %v14142_v32 }
 0x4bf   :  { %4269 = vmatprep.subr.bf16.mxu0 %v14144_v14  ;;  %4310 = vmatprep.subr.bf16.mxu1 %v14149_v48 }
 0x4c2   :  { %4270 = vmatpush1.bf16.msra.mxu0 %v14154_v13  ;;  %4311 = vmatpush1.bf16.msra.mxu1 %v14158_v37 }
 0x4c3   :  { %4337 = vmatprep.subr.bf16.mxu0 %v14160_v62  ;;  %4378 = vmatprep.subr.bf16.mxu1 %v14163_v58 }
 0x531   :  { %v3388_v30 = vpop.f32.mrb[40].mxu0  ;;  %v3429_v60 = vpop.f32.mrb[40].mxu1 }
 0x532   :  { %v3842_v1 = vadd.f32 %v3838_v43, %v3388_v30  ;;  %v3390_v27 = vpop.f32.mrb[41].mxu0  ;;  %v3431_v26 = vpop.f32.mrb[41].mxu1  ;;  %v3844_v30 = vadd.f32 %v3840_v25, %v3429_v60 }
 0x533   :  { %v3843_v39 = vadd.f32 %v3839_v19, %v3390_v27  ;;  %v3392_v62 = vpop.f32.mrb[42].mxu0  ;;  %v3433_v37 = vpop.f32.mrb[42].mxu1  ;;  %v3845_v8 = vadd.f32 %v3841_v9, %v3431_v26 }
 0x534   :  { %v11387_v58 = vmul.f32 -1.442695, %v3842_v1  ;;  %v3393_v13 = vpop.f32.mrb[43].mxu0  ;;  %v3434_v48 = vpop.f32.mrb[43].mxu1 }
 0x535   :  { %v11388_v33 = vmul.f32 -1.442695, %v3843_v39  ;;  %v11389_v43 = vmul.f32 -1.442695, %v3845_v8 }
 0x536   :  { %12591 = vpow2.f32 %v11387_v58 }
 0x537   :  { %12593 = vpow2.f32 %v11388_v33 }
 0x538   :  { %12595 = vpow2.f32 %v11389_v43 }
 0x539   :  { %12597 = vtanh.f32 %v3844_v30  ;;  %v3881_v30 = vld [vmem:[#allocation5 + $0x50] sm:$0xff] }
 0x540   :  { %v12592_v19 = vpop.eup %12591 }
 0x541   :  { %v12594_v27 = vpop.eup %12593  ;;  %v3852_v36 = vadd.f32 1.0, %v12592_v19  ;;  %v3885_v19 = vld [vmem:[#allocation5 + $0x70] sm:$0xff] }
 0x542   :  { %v3853_v37 = vadd.f32 1.0, %v12594_v27  ;;  %v12596_v48 = vpop.eup %12595  ;;  %v3882_v27 = vld [vmem:[#allocation5 + $0x58] sm:$0xff] }
 0x543   :  { %12599 = vrcp.f32 %v3852_v36  ;;  %v12598_v13 = vpop.eup %12597  ;;  %v3862_v1 = vadd.f32 1.0, %v12596_v48 }
 0x544   :  { %12601 = vrcp.f32 %v3853_v37  ;;  %v3886_v37 = vld [vmem:[#allocation5 + $0x78] sm:$0xff] }
 0x545   :  { %12603 = vrcp.f32 %v3862_v1  ;;  %v3893_v1 = vld [vmem:[#allocation5 + $0xb0] sm:$0xff] }
 0x54d   :  { %v12600_v33 = vpop.eup %12599 }
 0x54e   :  { %v12602_v62 = vpop.eup %12601  ;;  %v3866_v58 = vmul.f32 %v12600_v33, %v12598_v13  ;;  %v14191_v33 = vcombine.high %v3881_v30, %v3885_v19 }
 0x54f   :  { %v3865_v40 = vmul.f32 %v12602_v62, %v13977_v2  ;;  %v12604_v43 = vpop.eup %12603  ;;  %v14193_v62 = vcombine.high %v3882_v27, %v3886_v37 }
 0x550   :  { %16333 = vst [vmem:[#allocation33_spill] sm:$0xff] %v14191_v33 }
 0x551   :  { %v14178_v26 = vadd.f32 %v3866_v58, %v3865_v40  ;;  %v14180_v8 = vpop.f32.mrb[44].mxu0  ;;  %v14182_v31 = vpop.f32.mrb[44].mxu1  ;;  %16334 = vst [vmem:[#allocation39_spill] sm:$0xff] %v14193_v62  ;;  %v3889_v58 = vld [vmem:[#allocation5 + $0x90] sm:$0xff]  ;;  %v3890_v40 = vld [vmem:[#allocation5 + $0x98] sm:$0xff] }
 0x552   :  { %v14184_v60 = vpop.f32.mrb[45].mxu0  ;;  %v14186_v39 = vpop.f32.mrb[45].mxu1 }
 0x553   :  { %16332 = vst [vmem:[#allocation31_spill] sm:$0xff] %v14178_v26  ;;  %v3474_v36 = vpop.f32.mrb[46].mxu0  ;;  %v3515_v5 = vpop.f32.mrb[46].mxu1  ;;  %12605 = vtanh.f32 %v14178_v26  ;;  %v3898_v26 = vld [vmem:[#allocation5 + $0xd8] sm:$0xff] }
 0x554   :  { %v3475_v9 = vpop.f32.mrb[47].mxu0  ;;  %v3516_v25 = vpop.f32.mrb[47].mxu1  ;;  %v3894_v36 = vld [vmem:[#allocation5 + $0xb8] sm:$0xff]  ;;  %v14199_v5 = vcombine.low %v3881_v30, %v3885_v19  ;;  %v14213_v30 = vcombine.low %v3889_v58, %v3893_v1 }
 0x555   :  { %v14201_v9 = vcombine.low %v3882_v27, %v3886_v37  ;;  %v14205_v25 = vcombine.high %v3889_v58, %v3893_v1  ;;  %v14215_v19 = vcombine.low %v3890_v40, %v3894_v36  ;;  %v14221_v37 = vcombine.high %v3898_v26, %v3902_v3 }
 0x556   :  { %16335 = vst [vmem:[#allocation40_spill] sm:$0xff] %v14199_v5  ;;  %16339 = vst [vmem:[#allocation43_spill] sm:$0xff] %v14213_v30  ;;  %v14227_v1 = vcombine.low %v3898_v26, %v3902_v3 }
 0x557   :  { %16336 = vst [vmem:[#allocation41_spill] sm:$0xff] %v14201_v9  ;;  %16337 = vst [vmem:[#allocation17_spill] sm:$0xff] %v14205_v25 }
 0x558   :  { %16340 = vst [vmem:[#allocation18_spill] sm:$0xff] %v14215_v19  ;;  %16342 = vst [vmem:[#allocation21_spill] sm:$0xff] %v14221_v37 }
 0x559   :  { %16344 = vst [vmem:[#allocation25_spill] sm:$0xff] %v14227_v1 }
 0x55d   :  { %v12606_v2 = vpop.eup %12605 }
 0x55e   :  { %v3869_v48 = vmul.f32 %v12606_v2, %v12604_v43  ;;  %v14207_v43 = vcombine.high %v3890_v40, %v3894_v36  ;;  %v3897_v2 = vld [vmem:[#allocation5 + $0xd0] sm:$0xff] }
 0x560   :  { %v14189_v13 = vpack.c.bf16 %v3869_v48, %v3869_v48  ;;  %16338 = vst [vmem:[#allocation42_spill] sm:$0xff] %v14207_v43  ;;  %v3901_v48 = vld [vmem:[#allocation5 + $0xf0] sm:$0xff] }
 0x561   :  { %v14219_v27 = vcombine.high %v3897_v2, %v3901_v48  ;;  %v14225_v58 = vcombine.low %v3897_v2, %v3901_v48 }
 0x562   :  { %4288 = vmatmul.mubr.bf16.vlgmr.msra.gmra.mrb[52].mxu0 %v14189_v13  ;;  %4329 = vmatmul.mubr.bf16.vlgmr.msra.gmra.mrb[52].mxu1 %v14189_v13 }
 0x563   :  { %4338 = vmatpush1.bf16.msra.mxu0 %v14146_v49  ;;  %4379 = vmatpush1.bf16.msra.mxu1 %v14151_v11  ;;  %16341 = vst [vmem:[#allocation44_spill] sm:$0xff] %v14219_v27  ;;  %v3906_v11 = vld [vmem:[#allocation5 + $0x118] sm:$0xff]  ;;  %16343 = vst [vmem:[#allocation45_spill] sm:$0xff] %v14225_v58 }
 0x564   :  { %4339 = vmatprep.subr.bf16.mxu0 %v14191_v33  ;;  %4380 = vmatprep.subr.bf16.mxu1 %v14193_v62  ;;  %v3905_v62 = vld [vmem:[#allocation5 + $0x110] sm:$0xff]  ;;  %v3910_v49 = vld [vmem:[#allocation5 + $0x138] sm:$0xff] }
 0x565   :  { %4369 = vmatprep.mubr.bf16.mxu0 %v16142_v53  ;;  %4410 = vmatprep.mubr.bf16.mxu1 %v16142_v53  ;;  %v3909_v33 = vld [vmem:[#allocation5 + $0x130] sm:$0xff]  ;;  %v14233_v36 = vcombine.high %v3906_v11, %v3910_v49  ;;  %v14239_v3 = vcombine.low %v3906_v11, %v3910_v49 }
 0x566   :  { %v14231_v40 = vcombine.high %v3905_v62, %v3909_v33  ;;  %v14237_v2 = vcombine.low %v3905_v62, %v3909_v33 }
 0x567   :  { %4340 = vmatpush1.bf16.msra.mxu0 %v14199_v5  ;;  %4381 = vmatpush1.bf16.msra.mxu1 %v14201_v9  ;;  %16346 = vst [vmem:[#allocation47_spill] sm:$0xff] %v14233_v36  ;;  %v3914_v9 = vld [vmem:[#allocation5 + $0x158] sm:$0xff]  ;;  %16348 = vst [vmem:[#allocation49_spill] sm:$0xff] %v14239_v3 }
 0x568   :  { %4341 = vmatprep.subr.bf16.mxu0 %v14205_v25  ;;  %4382 = vmatprep.subr.bf16.mxu1 %v14207_v43  ;;  %16345 = vst [vmem:[#allocation46_spill] sm:$0xff] %v14231_v40  ;;  %v3913_v43 = vld [vmem:[#allocation5 + $0x150] sm:$0xff]  ;;  %v3918_v5 = vld [vmem:[#allocation5 + $0x178] sm:$0xff]  ;;  %16347 = vst [vmem:[#allocation48_spill] sm:$0xff] %v14237_v2 }
 0x569   :  { %v3917_v25 = vld [vmem:[#allocation5 + $0x170] sm:$0xff]  ;;  %v14245_v48 = vcombine.high %v3914_v9, %v3918_v5  ;;  %v14251_v49 = vcombine.low %v3914_v9, %v3918_v5 }
 0x56a   :  { %v14243_v26 = vcombine.high %v3913_v43, %v3917_v25  ;;  %v14249_v33 = vcombine.low %v3913_v43, %v3917_v25 }
 0x56b   :  { %4342 = vmatpush1.bf16.msra.mxu0 %v14213_v30  ;;  %4383 = vmatpush1.bf16.msra.mxu1 %v14215_v19  ;;  %16350 = vst [vmem:[#allocation51_spill] sm:$0xff] %v14245_v48  ;;  %v3922_v19 = vld [vmem:[#allocation5 + $0x198] sm:$0xff]  ;;  %16352 = vst [vmem:[#allocation53_spill] sm:$0xff] %v14251_v49 }
 0x56c   :  { %4343 = vmatprep.subr.bf16.mxu0 %v14219_v27  ;;  %4384 = vmatprep.subr.bf16.mxu1 %v14221_v37  ;;  %16349 = vst [vmem:[#allocation50_spill] sm:$0xff] %v14243_v26  ;;  %v3921_v37 = vld [vmem:[#allocation5 + $0x190] sm:$0xff]  ;;  %v3926_v30 = vld [vmem:[#allocation5 + $0x1b8] sm:$0xff]  ;;  %16351 = vst [vmem:[#allocation52_spill] sm:$0xff] %v14249_v33 }
 0x56d   :  { %v3925_v27 = vld [vmem:[#allocation5 + $0x1b0] sm:$0xff]  ;;  %v14257_v62 = vcombine.high %v3922_v19, %v3926_v30  ;;  %v14263_v9 = vcombine.low %v3922_v19, %v3926_v30 }
 0x56e   :  { %v14255_v11 = vcombine.high %v3921_v37, %v3925_v27  ;;  %v14261_v5 = vcombine.low %v3921_v37, %v3925_v27 }
 0x56f   :  { %4344 = vmatpush1.bf16.msra.mxu0 %v14225_v58  ;;  %4385 = vmatpush1.bf16.msra.mxu1 %v14227_v1  ;;  %16353 = vst [vmem:[#allocation54_spill] sm:$0xff] %v14257_v62  ;;  %v3930_v1 = vld [vmem:[#allocation5 + $0x1d8] sm:$0xff] }
 0x570   :  { %4345 = vmatprep.subr.bf16.mxu0 %v14231_v40  ;;  %4386 = vmatprep.subr.bf16.mxu1 %v14233_v36  ;;  %v3929_v36 = vld [vmem:[#allocation5 + $0x1d0] sm:$0xff]  ;;  %v3934_v58 = vld [vmem:[#allocation5 + $0x1f8] sm:$0xff] }
 0x571   :  { %v3933_v40 = vld [vmem:[#allocation5 + $0x1f0] sm:$0xff]  ;;  %v14271_v52 = vcombine.high %v3930_v1, %v3934_v58 }
 0x572   :  { %v14265_v25 = vcombine.high %v3929_v36, %v3933_v40 }
 0x573   :  { %4346 = vmatpush1.bf16.msra.mxu0 %v14237_v2  ;;  %4387 = vmatpush1.bf16.msra.mxu1 %v14239_v3 }
 0x574   :  { %4347 = vmatprep.subr.bf16.mxu0 %v14243_v26  ;;  %4388 = vmatprep.subr.bf16.mxu1 %v14245_v48 }
 0x577   :  { %v3745_v51 = vpop.f32.mrb[48].mxu0  ;;  %v3786_v2 = vpop.f32.mrb[48].mxu1  ;;  %4348 = vmatpush1.bf16.msra.mxu0 %v14249_v33  ;;  %4389 = vmatpush1.bf16.msra.mxu1 %v14251_v49 }
 0x578   :  { %v3793_v43 = vadd.f32 %v3745_v51, %v14180_v8  ;;  %v3795_v48 = vadd.f32 %v3786_v2, %v14182_v31  ;;  %v3747_v26 = vpop.f32.mrb[49].mxu0  ;;  %v3788_v3 = vpop.f32.mrb[49].mxu1  ;;  %4349 = vmatprep.subr.bf16.mxu0 %v14255_v11  ;;  %4390 = vmatprep.subr.bf16.mxu1 %v14257_v62  ;;  %v14279_v31 = vcombine.low %v3929_v36, %v3933_v40  ;;  %v14291_v40 = vld [vmem:[#allocation8] ss:$16 sps:$4 sm:$0xff]   ;;  %v14299_v36 = vld [vmem:[#allocation8 + $0x2c] ss:$16 sps:$4 sm:$0xff]  }
 0x579   :  { %v3794_v49 = vadd.f32 %v3747_v26, %v14184_v60  ;;  %v3796_v27 = vadd.f32 %v3788_v3, %v14186_v39  ;;  %v3749_v30 = vpop.f32.mrb[50].mxu0  ;;  %v3790_v19 = vpop.f32.mrb[50].mxu1  ;;  %v14281_v2 = vcombine.low %v3930_v1, %v3934_v58  ;;  %v14285_v60 = vld [vmem:[#allocation8 + $0x4] ss:$16 sps:$4 sm:$0xff]   ;;  %v14287_v39 = vld [vmem:[#allocation8 + $0xc] ss:$16 sps:$4 sm:$0xff]  }
 0x57a   :  { %v3797_v37 = vadd.f32 %v3793_v43, %v13521_v45  ;;  %v3750_v33 = vpop.f32.mrb[51].mxu0  ;;  %v3791_v51 = vpop.f32.mrb[51].mxu1  ;;  %v14293_v58 = vld [vmem:[#allocation8 + $0x8] ss:$16 sps:$4 sm:$0xff]   ;;  %v14297_v1 = vld [vmem:[#allocation8 + $0x24] ss:$16 sps:$4 sm:$0xff]  }
 0x57b   :  { %v3798_v8 = vadd.f32 %v3794_v49, %v13526_v17  ;;  %4350 = vmatpush1.bf16.msra.mxu0 %v14261_v5  ;;  %4391 = vmatpush1.bf16.msra.mxu1 %v14263_v9  ;;  %v3800_v26 = vadd.f32 %v3796_v27, %v13535_v29  ;;  %v14306_v33 = vld [vmem:[#allocation8 + $0x20] ss:$16 sps:$4 sm:$0xff]   ;;  %v14308_v49 = vld [vmem:[#allocation8 + $0x28] ss:$16 sps:$4 sm:$0xff]   ;;  %v14314_v43 = vld [vmem:[#allocation8 + $0x4c] ss:$16 sps:$4 sm:$0xff]  }
 0x57c   :  { %v11383_v62 = vmul.f32 -1.442695, %v3797_v37  ;;  %4351 = vmatprep.subr.bf16.mxu0 %v14265_v25  ;;  %4392 = vmatprep.subr.bf16.mxu1 %v14271_v52  ;;  %16354 = vst [vmem:[#allocation55_spill] sm:$0xff] %v14306_v33  ;;  %16355 = vst [vmem:[#allocation56_spill] sm:$0xff] %v14308_v49  ;;  %v14321_v30 = vld [vmem:[#allocation8 + $0x40] ss:$16 sps:$4 sm:$0xff]  }
 0x57d   :  { %v11384_v3 = vmul.f32 -1.442695, %v3798_v8  ;;  %16357 = vst [vmem:[#allocation58_spill] sm:$0xff] %v14314_v43  ;;  %v11385_v27 = vmul.f32 -1.442695, %v3800_v26  ;;  %16358 = vst [vmem:[#allocation59_spill] sm:$0xff] %v14321_v30 }
 0x57e   :  { %12607 = vpow2.f32 %v11383_v62  ;;  %v14312_v62 = vld [vmem:[#allocation8 + $0x44] ss:$16 sps:$4 sm:$0xff]   ;;  %v14323_v19 = vld [vmem:[#allocation8 + $0x48] ss:$16 sps:$4 sm:$0xff]   ;;  %v14329_v8 = vld [vmem:[#allocation8 + $0x6c] ss:$16 sps:$4 sm:$0xff]  }
 0x57f   :  { %12609 = vpow2.f32 %v11384_v3  ;;  %4352 = vmatpush1.bf16.msra.mxu0 %v14279_v31  ;;  %4393 = vmatpush1.bf16.msra.mxu1 %v14281_v2  ;;  %16356 = vst [vmem:[#allocation57_spill] sm:$0xff] %v14312_v62  ;;  %16359 = vst [vmem:[#allocation60_spill] sm:$0xff] %v14323_v19  ;;  %v14327_v51 = vld [vmem:[#allocation8 + $0x64] ss:$16 sps:$4 sm:$0xff]  }
 0x580   :  { %4612 = vmatprep.subr.bf16.mxu0 %v14285_v60  ;;  %4653 = vmatprep.subr.bf16.mxu1 %v14287_v39  ;;  %16360 = vst [vmem:[#allocation61_spill] sm:$0xff] %v14327_v51  ;;  %16361 = vst [vmem:[#allocation62_spill] sm:$0xff] %v14329_v8  ;;  %12611 = vpow2.f32 %v11385_v27  ;;  %v14345_v27 = vld [vmem:[#allocation8 + $0x80] ss:$16 sps:$4 sm:$0xff]  }
 0x581   :  { %16366 = vst [vmem:[#allocation67_spill] sm:$0xff] %v14345_v27 }
 0x582   :  { %4370 = vmatmul.mubr.bf16.vlgmr.msra.gmra.mrb[56].mxu0 %v14189_v13  ;;  %4411 = vmatmul.mubr.bf16.vlgmr.msra.gmra.mrb[56].mxu1 %v14189_v13  ;;  %v3799_v13 = vadd.f32 %v3795_v48, %v16307_v0  ;;  %v14333_v0 = vld [vmem:[#allocation8 + $0x60] ss:$16 sps:$4 sm:$0xff]  }
 0x583   :  { %4613 = vmatpush1.bf16.msra.mxu0 %v14291_v40  ;;  %4654 = vmatpush1.bf16.msra.mxu1 %v14293_v58  ;;  %16362 = vst [vmem:[#allocation63_spill] sm:$0xff] %v14333_v0 }
 0x584   :  { %4614 = vmatprep.subr.bf16.mxu0 %v14297_v1  ;;  %4655 = vmatprep.subr.bf16.mxu1 %v14299_v36  ;;  %12613 = vtanh.f32 %v3799_v13  ;;  %v14347_v13 = vld [vmem:[#allocation8 + $0x88] ss:$16 sps:$4 sm:$0xff]  }
 0x585   :  { %4644 = vmatprep.mubr.bf16.mxu0 %v16142_v53  ;;  %4685 = vmatprep.mubr.bf16.mxu1 %v16142_v53  ;;  %16367 = vst [vmem:[#allocation68_spill] sm:$0xff] %v14347_v13 }
 0x587   :  { %4615 = vmatpush1.bf16.msra.mxu0 %v14306_v33  ;;  %4656 = vmatpush1.bf16.msra.mxu1 %v14308_v49  ;;  %v14335_v49 = vld [vmem:[#allocation8 + $0x68] ss:$16 sps:$4 sm:$0xff]  }
 0x588   :  { %v12608_v37 = vpop.eup %12607  ;;  %4616 = vmatprep.subr.bf16.mxu0 %v14312_v62  ;;  %4657 = vmatprep.subr.bf16.mxu1 %v14314_v43  ;;  %16363 = vst [vmem:[#allocation64_spill] sm:$0xff] %v14335_v49  ;;  %v14339_v43 = vld [vmem:[#allocation8 + $0x84] ss:$16 sps:$4 sm:$0xff]   ;;  %v14372_v33 = vld [vmem:[#allocation8 + $0xc8] ss:$16 sps:$4 sm:$0xff]  }
 0x589   :  { %v12610_v3 = vpop.eup %12609  ;;  %v3807_v26 = vadd.f32 1.0, %v12608_v37  ;;  %16364 = vst [vmem:[#allocation65_spill] sm:$0xff] %v14339_v43  ;;  %v14341_v37 = vld [vmem:[#allocation8 + $0x8c] ss:$16 sps:$4 sm:$0xff]  }
 0x58a   :  { %v3808_v48 = vadd.f32 1.0, %v12610_v3  ;;  %16365 = vst [vmem:[#allocation66_spill] sm:$0xff] %v14341_v37  ;;  %v14351_v3 = vld [vmem:[#allocation8 + $0xa4] ss:$16 sps:$4 sm:$0xff]  }
 0x58b   :  { %12615 = vrcp.f32 %v3807_v26  ;;  %4617 = vmatpush1.bf16.msra.mxu0 %v14321_v30  ;;  %4658 = vmatpush1.bf16.msra.mxu1 %v14323_v19  ;;  %16368 = vst [vmem:[#allocation69_spill] sm:$0xff] %v14351_v3  ;;  %v14353_v26 = vld [vmem:[#allocation8 + $0xac] ss:$16 sps:$4 sm:$0xff]  }
 0x58c   :  { %12617 = vrcp.f32 %v3808_v48  ;;  %4618 = vmatprep.subr.bf16.mxu0 %v14327_v51  ;;  %4659 = vmatprep.subr.bf16.mxu1 %v14329_v8  ;;  %16369 = vst [vmem:[#allocation71_spill] sm:$0xff] %v14353_v26  ;;  %v12612_v48 = vpop.eup %12611 }
 0x58d   :  { %v3817_v62 = vadd.f32 1.0, %v12612_v48  ;;  %v16379_v48 = vld [vmem:[#allocation26_spill] sm:$0xff] }
 0x58e   :  { %v12614_v8 = vpop.eup %12613 }
 0x58f   :  { %4619 = vmatpush1.bf16.msra.mxu0 %v14333_v0  ;;  %4660 = vmatpush1.bf16.msra.mxu1 %v14335_v49  ;;  %v14357_v0 = vld [vmem:[#allocation8 + $0xa0] ss:$16 sps:$4 sm:$0xff]   ;;  %v14359_v49 = vld [vmem:[#allocation8 + $0xa8] ss:$16 sps:$4 sm:$0xff]   ;;  %12619 = vrcp.f32 %v3817_v62 }
 0x590   :  { %4620 = vmatprep.subr.bf16.mxu0 %v14339_v43  ;;  %4661 = vmatprep.subr.bf16.mxu1 %v14341_v37  ;;  %v14363_v43 = vld [vmem:[#allocation8 + $0xc4] ss:$16 sps:$4 sm:$0xff]   ;;  %v14365_v37 = vld [vmem:[#allocation8 + $0xcc] ss:$16 sps:$4 sm:$0xff]  }
 0x593   :  { %4621 = vmatpush1.bf16.msra.mxu0 %v14345_v27  ;;  %4662 = vmatpush1.bf16.msra.mxu1 %v14347_v13  ;;  %v14370_v13 = vld [vmem:[#allocation8 + $0xc0] ss:$16 sps:$4 sm:$0xff]  }
 0x594   :  { %4622 = vmatprep.subr.bf16.mxu0 %v14351_v3  ;;  %4663 = vmatprep.subr.bf16.mxu1 %v14353_v26  ;;  %v14376_v26 = vld [vmem:[#allocation8 + $0xe4] ss:$16 sps:$4 sm:$0xff]   ;;  %v14378_v3 = vld [vmem:[#allocation8 + $0xec] ss:$16 sps:$4 sm:$0xff]  }
 0x595   :  { %v12616_v51 = vpop.eup %12615 }
 0x596   :  { %v12618_v19 = vpop.eup %12617  ;;  %v3821_v30 = vmul.f32 %v12616_v51, %v12614_v8 }
 0x597   :  { %v3820_v27 = vmul.f32 %v12618_v19, %v14041_v42  ;;  %4623 = vmatpush1.bf16.msra.mxu0 %v14357_v0  ;;  %4664 = vmatpush1.bf16.msra.mxu1 %v14359_v49  ;;  %v14384_v42 = vld [vmem:[#allocation8 + $0xe0] ss:$16 sps:$4 sm:$0xff]   ;;  %v14386_v19 = vld [vmem:[#allocation8 + $0xe8] ss:$16 sps:$4 sm:$0xff]  }
 0x598   :  { %4624 = vmatprep.subr.bf16.mxu0 %v14363_v43  ;;  %4665 = vmatprep.subr.bf16.mxu1 %v14365_v37 }
 0x599   :  { %v14380_v51 = vadd.f32 %v3821_v30, %v3820_v27  ;;  %v12620_v62 = vpop.eup %12619 }
 0x59b   :  { %4625 = vmatpush1.bf16.msra.mxu0 %v14370_v13  ;;  %4666 = vmatpush1.bf16.msra.mxu1 %v14372_v33  ;;  %12621 = vtanh.f32 %v14380_v51 }
 0x59c   :  { %4626 = vmatprep.subr.bf16.mxu0 %v14376_v26  ;;  %4667 = vmatprep.subr.bf16.mxu1 %v14378_v3 }
 0x59f   :  { %4627 = vmatpush1.bf16.msra.mxu0 %v14384_v42  ;;  %4668 = vmatpush1.bf16.msra.mxu1 %v14386_v19 }
 0x5a0   :  { %5156 = vmatprep.subr.bf16.mxu0 %v14063_v61  ;;  %5197 = vmatprep.subr.bf16.mxu1 %v14069_v10 }
 0x5a5   :  { %v12622_v30 = vpop.eup %12621 }
 0x5a6   :  { %v3824_v8 = vmul.f32 %v12622_v30, %v12620_v62  ;;  %v16380_v30 = vld [vmem:[#allocation27_spill] sm:$0xff] }
 0x5a8   :  { %3826 = vst [vmem:[#allocation2 + $0x6] sm:$0x3] %v3824_v8  ;;  %v4419_v27 = vpack.c.bf16 %v3824_v8, %v3824_v8 }
 0x5aa   :  { %4645 = vmatmul.mubr.bf16.vlgmr.msra.gmra.mrb[60].mxu0 %v4419_v27  ;;  %4686 = vmatmul.mubr.bf16.vlgmr.msra.gmra.mrb[60].mxu1 %v4419_v27 }
 0x5ab   :  { %5157 = vmatpush1.bf16.msra.mxu0 %v14065_v7  ;;  %5198 = vmatpush1.bf16.msra.mxu1 %v14067_v59  ;;  %v16371_v59 = vld [vmem:[#allocation35_spill] sm:$0xff] }
 0x5ac   :  { %5158 = vmatprep.subr.bf16.mxu0 %v14075_v16  ;;  %5199 = vmatprep.subr.bf16.mxu1 %v14081_v15  ;;  %v16372_v16 = vld [vmem:[#allocation36_spill] sm:$0xff]  ;;  %v4733_v15 = vpop.permute.xlu1 %4732 }
 0x5ad   :  { %5188 = vmatprep.mubr.bf16.mxu0 %v16142_v53  ;;  %5229 = vmatprep.mubr.bf16.mxu1 %v16142_v53  ;;  %v4737_v8 = vmul.f32 %v4733_v15, %v16380_v30 }
 0x5af   :  { %v10768_v61 = vld [vmem:[#allocation2 + $0x6] sm:$0x3]  ;;  %5159 = vmatpush1.bf16.msra.mxu0 %v14077_v24  ;;  %5200 = vmatpush1.bf16.msra.mxu1 %v14079_v56  ;;  %v16373_v24 = vld [vmem:[#allocation37_spill] sm:$0xff] }
 0x5b0   :  { %v10787_v10 = vmul.f32 %v14059_v54, %v10768_v61  ;;  %5160 = vmatprep.subr.bf16.mxu0 %v14087_v20  ;;  %5201 = vmatprep.subr.bf16.mxu1 %v14093_v4  ;;  %v16370_v54 = vld [vmem:[#allocation32_spill] sm:$0xff]  ;;  %v16374_v56 = vld [vmem:[#allocation38_spill] sm:$0xff]  ;;  %v16375_v20 = vld [vmem:[#allocation19_spill] sm:$0xff] }
 0x5b1   :  { %v16381_v61 = vld [vmem:[#allocation28_spill] sm:$0xff] }
 0x5b2   :  { %v10806_v7 = vsel %vm10796_vm0, %v10787_v10, 0.0  ;;  %v4741_v10 = vadd.f32 %v4737_v8, %v16381_v61 }
 0x5b3   :  { %10807 = vadd.xlane.f32.xlu0 %v10806_v7  ;;  %5161 = vmatpush1.bf16.msra.mxu0 %v14089_v12  ;;  %v4735_v12 = vmul.f32 %v4733_v15, %v16375_v20 }
 0x5b4   :  { %5202 = vmatpush1.bf16.msra.mxu1 %v14091_v34  ;;  %5162 = vmatprep.subr.bf16.mxu0 %v14099_v50  ;;  %v16376_v34 = vld [vmem:[#allocation20_spill] sm:$0xff]  ;;  %v16377_v50 = vld [vmem:[#allocation22_spill] sm:$0xff] }
 0x5b5   :  { %5203 = vmatprep.subr.bf16.mxu1 %v14105_v18  ;;  %v4736_v4 = vmul.f32 %v4733_v15, %v16376_v34 }
 0x5b7   :  { %5163 = vmatpush1.bf16.msra.mxu0 %v14101_v28  ;;  %v4739_v28 = vadd.f32 %v4735_v12, %v16377_v50 }
 0x5b8   :  { %5204 = vmatpush1.bf16.msra.mxu1 %v14103_v41  ;;  %5164 = vmatprep.subr.bf16.mxu0 %v14111_v6  ;;  %v4740_v6 = vadd.f32 %v4736_v4, %v16281_v57 }
 0x5b9   :  { %5205 = vmatprep.subr.bf16.mxu1 %v14117_v21 }
 0x5bb   :  { %5165 = vmatpush1.bf16.msra.mxu0 %v14113_v38 }
 0x5bc   :  { %5206 = vmatpush1.bf16.msra.mxu1 %v14115_v47  ;;  %5166 = vmatprep.subr.bf16.mxu0 %v14125_v55  ;;  %v16378_v55 = vld [vmem:[#allocation24_spill] sm:$0xff] }
 0x5bd   :  { %5207 = vmatprep.subr.bf16.mxu1 %v14129_v22 }
 0x5bf   :  { %5167 = vmatpush1.bf16.msra.mxu0 %v14123_v63 }
 0x5c0   :  { %5208 = vmatpush1.bf16.msra.mxu1 %v14127_v44  ;;  %5168 = vmatprep.subr.bf16.mxu0 %v14131_v23  ;;  %v4738_v44 = vmul.f32 %v4733_v15, %v16378_v55  ;;  %v16382_v15 = vld [vmem:[#allocation31_spill] sm:$0xff] }
 0x5c1   :  { %5209 = vmatprep.subr.bf16.mxu1 %v14134_v46 }
 0x5c2   :  { %v4742_v62 = vadd.f32 %v4738_v44, %v16379_v48 }
 0x5c3   :  { %5169 = vmatpush1.bf16.msra.mxu0 %v14138_v35 }
 0x5c4   :  { %5210 = vmatpush1.bf16.msra.mxu1 %v14142_v32  ;;  %5170 = vmatprep.subr.bf16.mxu0 %v14144_v14 }
 0x5c5   :  { %5211 = vmatprep.subr.bf16.mxu1 %v16370_v54 }
 0x5c7   :  { %5171 = vmatpush1.bf16.msra.mxu0 %v16371_v59 }
 0x5c8   :  { %5212 = vmatpush1.bf16.msra.mxu1 %v16372_v16  ;;  %5238 = vmatprep.subr.bf16.mxu0 %v16373_v24 }
 0x5c9   :  { %5279 = vmatprep.subr.bf16.mxu1 %v16374_v56 }
 0x635   :  { %v4289_v41 = vpop.f32.mrb[52].mxu0  ;;  %v4330_v18 = vpop.f32.mrb[52].mxu1 }
 0x636   :  { %v4743_v38 = vadd.f32 %v4739_v28, %v4289_v41  ;;  %v4291_v47 = vpop.f32.mrb[53].mxu0  ;;  %v4332_v21 = vpop.f32.mrb[53].mxu1  ;;  %v4745_v54 = vadd.f32 %v4741_v10, %v4330_v18  ;;  %v16383_v10 = vld [vmem:[#allocation70_spill] sm:$0xff] }
 0x637   :  { %v4744_v63 = vadd.f32 %v4740_v6, %v4291_v47  ;;  %v4293_v22 = vpop.f32.mrb[54].mxu0  ;;  %v4334_v23 = vpop.f32.mrb[54].mxu1  ;;  %v4746_v27 = vadd.f32 %v4742_v62, %v4332_v21 }
 0x638   :  { %v11490_v46 = vmul.f32 -1.442695, %v4743_v38  ;;  %v4294_v35 = vpop.f32.mrb[55].mxu0  ;;  %v4335_v32 = vpop.f32.mrb[55].mxu1 }
 0x639   :  { %v11491_v14 = vmul.f32 -1.442695, %v4744_v63  ;;  %v11492_v7 = vmul.f32 -1.442695, %v4746_v27 }
 0x63a   :  { %12623 = vpow2.f32 %v11490_v46 }
 0x63b   :  { %12625 = vpow2.f32 %v11491_v14 }
 0x63c   :  { %12627 = vpow2.f32 %v11492_v7  ;;  %v16384_v7 = vld [vmem:[#allocation34_spill] sm:$0xff] }
 0x63d   :  { %12629 = vtanh.f32 %v4745_v54  ;;  %v16385_v54 = vld [vmem:[#allocation33_spill] sm:$0xff] }
 0x644   :  { %v12624_v59 = vpop.eup %12623 }
 0x645   :  { %v12626_v16 = vpop.eup %12625  ;;  %v4753_v24 = vadd.f32 1.0, %v12624_v59  ;;  %v16386_v59 = vld [vmem:[#allocation39_spill] sm:$0xff] }
 0x646   :  { %v4754_v56 = vadd.f32 1.0, %v12626_v16  ;;  %v12628_v12 = vpop.eup %12627  ;;  %v16387_v16 = vld [vmem:[#allocation40_spill] sm:$0xff] }
 0x647   :  { %12631 = vrcp.f32 %v4753_v24  ;;  %v12630_v4 = vpop.eup %12629  ;;  %v4763_v38 = vadd.f32 1.0, %v12628_v12  ;;  %v16388_v24 = vld [vmem:[#allocation41_spill] sm:$0xff]  ;;  %v16390_v12 = vld [vmem:[#allocation42_spill] sm:$0xff] }
 0x648   :  { %12633 = vrcp.f32 %v4754_v56  ;;  %v16389_v56 = vld [vmem:[#allocation17_spill] sm:$0xff] }
 0x649   :  { %12635 = vrcp.f32 %v4763_v38  ;;  %v16395_v38 = vld [vmem:[#allocation45_spill] sm:$0xff] }
 0x651   :  { %v12632_v28 = vpop.eup %12631 }
 0x652   :  { %v12634_v41 = vpop.eup %12633  ;;  %v4767_v6 = vmul.f32 %v12632_v28, %v12630_v4  ;;  %v16391_v4 = vld [vmem:[#allocation43_spill] sm:$0xff]  ;;  %v16392_v28 = vld [vmem:[#allocation18_spill] sm:$0xff] }
 0x653   :  { %v4766_v47 = vmul.f32 %v12634_v41, %v16382_v15  ;;  %v12636_v14 = vpop.eup %12635  ;;  %v16393_v41 = vld [vmem:[#allocation44_spill] sm:$0xff]  ;;  %v16396_v15 = vld [vmem:[#allocation25_spill] sm:$0xff] }
 0x655   :  { %v14440_v21 = vadd.f32 %v4767_v6, %v4766_v47  ;;  %v4371_v63 = vpop.f32.mrb[56].mxu0  ;;  %v4412_v18 = vpop.f32.mrb[56].mxu1  ;;  %v16394_v6 = vld [vmem:[#allocation21_spill] sm:$0xff]  ;;  %v16397_v47 = vld [vmem:[#allocation46_spill] sm:$0xff] }
 0x656   :  { %v4373_v44 = vpop.f32.mrb[57].mxu0  ;;  %v4414_v22 = vpop.f32.mrb[57].mxu1 }
 0x657   :  { %v4375_v23 = vpop.f32.mrb[58].mxu0  ;;  %v4416_v46 = vpop.f32.mrb[58].mxu1  ;;  %12637 = vtanh.f32 %v14440_v21 }
 0x658   :  { %v4376_v35 = vpop.f32.mrb[59].mxu0  ;;  %v4417_v32 = vpop.f32.mrb[59].mxu1  ;;  %v16398_v23 = vld [vmem:[#allocation47_spill] sm:$0xff]  ;;  %v16399_v46 = vld [vmem:[#allocation48_spill] sm:$0xff] }
 0x659   :  { %v16400_v35 = vld [vmem:[#allocation49_spill] sm:$0xff]  ;;  %v16401_v32 = vld [vmem:[#allocation50_spill] sm:$0xff] }
 0x661   :  { %v12638_v62 = vpop.eup %12637 }
 0x662   :  { %v4770_v8 = vmul.f32 %v12638_v62, %v12636_v14  ;;  %v16402_v14 = vld [vmem:[#allocation51_spill] sm:$0xff]  ;;  %v16403_v62 = vld [vmem:[#allocation52_spill] sm:$0xff] }
 0x664   :  { %v4771_v27 = vpack.c.bf16 %v4770_v8, %v4770_v8  ;;  %v16404_v8 = vld [vmem:[#allocation53_spill] sm:$0xff] }
 0x666   :  { %5189 = vmatmul.mubr.bf16.vlgmr.msra.gmra.mrb[64].mxu0 %v4771_v27  ;;  %5230 = vmatmul.mubr.bf16.vlgmr.msra.gmra.mrb[64].mxu1 %v4771_v27 }
 0x667   :  { %5239 = vmatpush1.bf16.msra.mxu0 %v16383_v10  ;;  %5280 = vmatpush1.bf16.msra.mxu1 %v16384_v7  ;;  %v16405_v10 = vld [vmem:[#allocation54_spill] sm:$0xff] }
 0x668   :  { %5240 = vmatprep.subr.bf16.mxu0 %v16385_v54  ;;  %5281 = vmatprep.subr.bf16.mxu1 %v16386_v59 }
 0x669   :  { %5270 = vmatprep.mubr.bf16.mxu0 %v16142_v53  ;;  %5311 = vmatprep.mubr.bf16.mxu1 %v16142_v53 }
 0x66b   :  { %5241 = vmatpush1.bf16.msra.mxu0 %v16387_v16  ;;  %5282 = vmatpush1.bf16.msra.mxu1 %v16388_v24 }
 0x66c   :  { %5242 = vmatprep.subr.bf16.mxu0 %v16389_v56  ;;  %5283 = vmatprep.subr.bf16.mxu1 %v16390_v12 }
 0x66f   :  { %5243 = vmatpush1.bf16.msra.mxu0 %v16391_v4  ;;  %5284 = vmatpush1.bf16.msra.mxu1 %v16392_v28 }
 0x670   :  { %5244 = vmatprep.subr.bf16.mxu0 %v16393_v41  ;;  %5285 = vmatprep.subr.bf16.mxu1 %v16394_v6 }
 0x673   :  { %5245 = vmatpush1.bf16.msra.mxu0 %v16395_v38  ;;  %5286 = vmatpush1.bf16.msra.mxu1 %v16396_v15 }
 0x674   :  { %5246 = vmatprep.subr.bf16.mxu0 %v16397_v47  ;;  %5287 = vmatprep.subr.bf16.mxu1 %v16398_v23  ;;  %v16414_v47 = vld [vmem:[#allocation62_spill] sm:$0xff]  ;;  %v16415_v23 = vld [vmem:[#allocation63_spill] sm:$0xff] }
 0x677   :  { %5247 = vmatpush1.bf16.msra.mxu0 %v16399_v46  ;;  %5288 = vmatpush1.bf16.msra.mxu1 %v16400_v35  ;;  %v16416_v46 = vld [vmem:[#allocation64_spill] sm:$0xff]  ;;  %v16417_v35 = vld [vmem:[#allocation65_spill] sm:$0xff] }
 0x678   :  { %5248 = vmatprep.subr.bf16.mxu0 %v16401_v32  ;;  %5289 = vmatprep.subr.bf16.mxu1 %v16402_v14  ;;  %v16418_v32 = vld [vmem:[#allocation66_spill] sm:$0xff]  ;;  %v16419_v14 = vld [vmem:[#allocation67_spill] sm:$0xff] }
 0x67b   :  { %5249 = vmatpush1.bf16.msra.mxu0 %v16403_v62  ;;  %5290 = vmatpush1.bf16.msra.mxu1 %v16404_v8  ;;  %v16420_v62 = vld [vmem:[#allocation68_spill] sm:$0xff]  ;;  %v16421_v8 = vld [vmem:[#allocation69_spill] sm:$0xff] }
 0x67c   :  { %5250 = vmatprep.subr.bf16.mxu0 %v14255_v11  ;;  %5291 = vmatprep.subr.bf16.mxu1 %v16405_v10  ;;  %v16422_v10 = vld [vmem:[#allocation71_spill] sm:$0xff] }
 0x67d   :  { %v4646_v7 = vpop.f32.mrb[60].mxu0  ;;  %v4687_v54 = vpop.f32.mrb[60].mxu1 }
 0x67e   :  { %v4694_v59 = vadd.f32 %v4646_v7, %v4371_v63  ;;  %v4696_v16 = vadd.f32 %v4687_v54, %v4412_v18  ;;  %v4648_v24 = vpop.f32.mrb[61].mxu0  ;;  %v4689_v56 = vpop.f32.mrb[61].mxu1 }
 0x67f   :  { %v4695_v12 = vadd.f32 %v4648_v24, %v4373_v44  ;;  %v4697_v4 = vadd.f32 %v4689_v56, %v4414_v22  ;;  %v4650_v28 = vpop.f32.mrb[62].mxu0  ;;  %v4691_v41 = vpop.f32.mrb[62].mxu1  ;;  %5251 = vmatpush1.bf16.msra.mxu0 %v14261_v5  ;;  %5292 = vmatpush1.bf16.msra.mxu1 %v14263_v9  ;;  %v16406_v9 = vld [vmem:[#allocation55_spill] sm:$0xff]  ;;  %v16412_v44 = vld [vmem:[#allocation60_spill] sm:$0xff] }
 0x680   :  { %v4698_v6 = vadd.f32 %v4694_v59, %v13521_v45  ;;  %v4651_v38 = vpop.f32.mrb[63].mxu0  ;;  %v4692_v11 = vpop.f32.mrb[63].mxu1  ;;  %5252 = vmatprep.subr.bf16.mxu0 %v14265_v25  ;;  %5293 = vmatprep.subr.bf16.mxu1 %v14271_v52  ;;  %v16407_v25 = vld [vmem:[#allocation56_spill] sm:$0xff]  ;;  %v5678_v41 = vld [vmem:[#allocation5 + $0x28] sm:$0xff] }
 0x681   :  { %v4699_v63 = vadd.f32 %v4695_v12, %v13526_v17  ;;  %v4701_v5 = vadd.f32 %v4697_v4, %v13535_v29 }
 0x682   :  { %v11486_v18 = vmul.f32 -1.442695, %v4698_v6 }
 0x683   :  { %v11487_v15 = vmul.f32 -1.442695, %v4699_v63  ;;  %5253 = vmatpush1.bf16.msra.mxu0 %v14279_v31  ;;  %5294 = vmatpush1.bf16.msra.mxu1 %v14281_v2  ;;  %v11488_v52 = vmul.f32 -1.442695, %v4701_v5  ;;  %v16408_v31 = vld [vmem:[#allocation30_spill] sm:$0xff] }
 0x684   :  { %12639 = vpow2.f32 %v11486_v18  ;;  %5513 = vmatprep.subr.bf16.mxu0 %v14285_v60  ;;  %5554 = vmatprep.subr.bf16.mxu1 %v14287_v39  ;;  %v4700_v2 = vadd.f32 %v4696_v16, %v16408_v31  ;;  %v16409_v60 = vld [vmem:[#allocation57_spill] sm:$0xff]  ;;  %v16410_v39 = vld [vmem:[#allocation58_spill] sm:$0xff] }
 0x685   :  { %12641 = vpow2.f32 %v11487_v15  ;;  %v5681_v63 = vld [vmem:[#allocation5 + $0x40] sm:$0xff]  ;;  %v5682_v15 = vld [vmem:[#allocation5 + $0x48] sm:$0xff] }
 0x686   :  { %5271 = vmatmul.mubr.bf16.vlgmr.msra.gmra.mrb[68].mxu0 %v4771_v27  ;;  %5312 = vmatmul.mubr.bf16.vlgmr.msra.gmra.mrb[68].mxu1 %v4771_v27  ;;  %12643 = vpow2.f32 %v11488_v52  ;;  %v16413_v27 = vld [vmem:[#allocation61_spill] sm:$0xff]  ;;  %v5686_v52 = vld [vmem:[#allocation5 + $0x68] sm:$0xff] }
 0x687   :  { %5514 = vmatpush1.bf16.msra.mxu0 %v14291_v40  ;;  %5555 = vmatpush1.bf16.msra.mxu1 %v14293_v58  ;;  %12645 = vtanh.f32 %v4700_v2  ;;  %v5685_v18 = vld [vmem:[#allocation5 + $0x60] sm:$0xff]  ;;  %v14544_v2 = vcombine.high %v5682_v15, %v5686_v52 }
 0x688   :  { %5515 = vmatprep.subr.bf16.mxu0 %v14297_v1  ;;  %5556 = vmatprep.subr.bf16.mxu1 %v14299_v36  ;;  %v16411_v36 = vld [vmem:[#allocation59_spill] sm:$0xff]  ;;  %v14538_v5 = vcombine.high %v5681_v63, %v5685_v18 }
 0x689   :  { %5545 = vmatprep.mubr.bf16.mxu0 %v16142_v53  ;;  %5586 = vmatprep.mubr.bf16.mxu1 %v16142_v53 }
 0x68b   :  { %5516 = vmatpush1.bf16.msra.mxu0 %v16406_v9  ;;  %5557 = vmatpush1.bf16.msra.mxu1 %v16407_v25  ;;  %v14540_v9 = vcombine.low %v5681_v63, %v5685_v18  ;;  %v14542_v25 = vcombine.low %v5682_v15, %v5686_v52  ;;  %v5726_v63 = vld [vmem:[#allocation5 + $0x1a8] sm:$0xff]  ;;  %v5729_v18 = vld [vmem:[#allocation5 + $0x1c0] sm:$0xff] }
 0x68c   :  { %5517 = vmatprep.subr.bf16.mxu0 %v16409_v60  ;;  %5558 = vmatprep.subr.bf16.mxu1 %v16410_v39  ;;  %v5689_v60 = vld [vmem:[#allocation5 + $0x80] sm:$0xff] }
 0x68d   :  { %v5693_v39 = vld [vmem:[#allocation5 + $0xa0] sm:$0xff] }
 0x68e   :  { %v12640_v40 = vpop.eup %12639  ;;  %v5733_v52 = vld [vmem:[#allocation5 + $0x1e0] sm:$0xff] }
 0x68f   :  { %v12642_v58 = vpop.eup %12641  ;;  %v4708_v1 = vadd.f32 1.0, %v12640_v40  ;;  %5518 = vmatpush1.bf16.msra.mxu0 %v16411_v36  ;;  %5559 = vmatpush1.bf16.msra.mxu1 %v16412_v44  ;;  %v5690_v40 = vld [vmem:[#allocation5 + $0x88] sm:$0xff]  ;;  %v14552_v36 = vcombine.low %v5689_v60, %v5693_v39 }
 0x690   :  { %v4709_v22 = vadd.f32 1.0, %v12642_v58  ;;  %5519 = vmatprep.subr.bf16.mxu0 %v16413_v27  ;;  %5560 = vmatprep.subr.bf16.mxu1 %v16414_v47  ;;  %v12644_v7 = vpop.eup %12643  ;;  %v14550_v58 = vcombine.high %v5689_v60, %v5693_v39  ;;  %v5697_v27 = vld [vmem:[#allocation5 + $0xc0] sm:$0xff]  ;;  %v5730_v60 = vld [vmem:[#allocation5 + $0x1c8] sm:$0xff] }
 0x691   :  { %12647 = vrcp.f32 %v4708_v1  ;;  %v12646_v54 = vpop.eup %12645  ;;  %v4718_v56 = vadd.f32 1.0, %v12644_v7  ;;  %v5694_v1 = vld [vmem:[#allocation5 + $0xa8] sm:$0xff]  ;;  %v5701_v47 = vld [vmem:[#allocation5 + $0xe0] sm:$0xff] }
 0x692   :  { %12649 = vrcp.f32 %v4709_v22  ;;  %v14554_v44 = vcombine.low %v5690_v40, %v5694_v1  ;;  %v14556_v22 = vcombine.high %v5690_v40, %v5694_v1  ;;  %v5706_v7 = vld [vmem:[#allocation5 + $0x108] sm:$0xff]  ;;  %v5675_v1 = vld [vmem:[#allocation5 + $0x10] sm:$0xff] }
 0x693   :  { %5520 = vmatpush1.bf16.msra.mxu0 %v16415_v23  ;;  %5561 = vmatpush1.bf16.msra.mxu1 %v16416_v46  ;;  %12651 = vrcp.f32 %v4718_v56  ;;  %v5698_v23 = vld [vmem:[#allocation5 + $0xc8] sm:$0xff]  ;;  %v14562_v46 = vcombine.high %v5697_v27, %v5701_v47 }
 0x694   :  { %5521 = vmatprep.subr.bf16.mxu0 %v16417_v35  ;;  %5562 = vmatprep.subr.bf16.mxu1 %v16418_v32  ;;  %v5702_v35 = vld [vmem:[#allocation5 + $0xe8] sm:$0xff]  ;;  %v14564_v32 = vcombine.low %v5697_v27, %v5701_v47  ;;  %v5679_v27 = vld [vmem:[#allocation5 + $0x30] sm:$0xff]  ;;  %v5676_v47 = vld [vmem:[#allocation5 + $0x18] sm:$0xff] }
 0x695   :  { %v5734_v39 = vld [vmem:[#allocation5 + $0x1e8] sm:$0xff] }
 0x697   :  { %5522 = vmatpush1.bf16.msra.mxu0 %v16419_v14  ;;  %5563 = vmatpush1.bf16.msra.mxu1 %v16420_v62  ;;  %v14566_v14 = vcombine.low %v5698_v23, %v5702_v35  ;;  %v14568_v62 = vcombine.high %v5698_v23, %v5702_v35  ;;  %v14607_v35 = vcombine.high %v5729_v18, %v5733_v52 }
 0x698   :  { %5523 = vmatprep.subr.bf16.mxu0 %v16421_v8  ;;  %5564 = vmatprep.subr.bf16.mxu1 %v16422_v10  ;;  %v5705_v8 = vld [vmem:[#allocation5 + $0x100] sm:$0xff] }
 0x699   :  { %v5709_v10 = vld [vmem:[#allocation5 + $0x120] sm:$0xff] }
 0x69b   :  { %v12648_v59 = vpop.eup %12647  ;;  %5524 = vmatpush1.bf16.msra.mxu0 %v14357_v0  ;;  %5565 = vmatpush1.bf16.msra.mxu1 %v14359_v49 }
 0x69c   :  { %v12650_v16 = vpop.eup %12649  ;;  %v4722_v24 = vmul.f32 %v12648_v59, %v12646_v54  ;;  %5525 = vmatprep.subr.bf16.mxu0 %v14363_v43  ;;  %5566 = vmatprep.subr.bf16.mxu1 %v14365_v37  ;;  %v14574_v54 = vcombine.high %v5705_v8, %v5709_v10  ;;  %v5710_v59 = vld [vmem:[#allocation5 + $0x128] sm:$0xff] }
 0x69d   :  { %v4721_v12 = vmul.f32 %v12650_v16, %v14380_v51  ;;  %v12652_v0 = vpop.eup %12651  ;;  %v5673_v51 = vld [vmem:[#allocation5] sm:$0xff]  ;;  %v14576_v16 = vcombine.low %v5705_v8, %v5709_v10  ;;  %v14580_v56 = vcombine.high %v5706_v7, %v5710_v59  ;;  %v14609_v8 = vcombine.low %v5675_v1, %v5679_v27  ;;  %v5680_v10 = vld [vmem:[#allocation5 + $0x38] sm:$0xff] }
 0x69f   :  { %v14508_v4 = vadd.f32 %v4722_v24, %v4721_v12  ;;  %5526 = vmatpush1.bf16.msra.mxu0 %v14370_v13  ;;  %5567 = vmatpush1.bf16.msra.mxu1 %v14372_v33  ;;  %v14522_v13 = vld [vmem:[%s15805_s6] ss:$0 sm:$0xff]  ;;  %v14578_v24 = vcombine.low %v5706_v7, %v5710_v59  ;;  %v5713_v12 = vld [vmem:[#allocation5 + $0x140] sm:$0xff]  ;;  %16423 = vst [vmem:[#allocation32_spill] sm:$0xff] %v14609_v8 }
 0x6a0   :  { %5527 = vmatprep.subr.bf16.mxu0 %v14376_v26  ;;  %5568 = vmatprep.subr.bf16.mxu1 %v14378_v3  ;;  %v14612_v7 = vcombine.high %v5730_v60, %v5734_v39  ;;  %v14614_v59 = vcombine.low %v5676_v47, %v5680_v10 }
 0x6a1   :  { %12653 = vtanh.f32 %v14508_v4 }
 0x6a2   :  { %16424 = vst [vmem:[#allocation35_spill] sm:$0xff] %v14612_v7  ;;  %16425 = vst [vmem:[#allocation36_spill] sm:$0xff] %v14614_v59 }
 0x6a3   :  { %5528 = vmatpush1.bf16.msra.mxu0 %v14384_v42  ;;  %5569 = vmatpush1.bf16.msra.mxu1 %v14386_v19  ;;  %v5677_v42 = vld [vmem:[#allocation5 + $0x20] sm:$0xff]  ;;  %v5674_v19 = vld [vmem:[#allocation5 + $0x8] sm:$0xff] }
 0x6a4   :  { %v14526_v28 = vcombine.high %v5673_v51, %v5677_v42  ;;  %v14528_v6 = vcombine.low %v5673_v51, %v5677_v42  ;;  %v14530_v38 = vcombine.low %v5674_v19, %v5678_v41  ;;  %v14532_v11 = vcombine.high %v5674_v19, %v5678_v41  ;;  %v5722_v41 = vld [vmem:[#allocation5 + $0x188] sm:$0xff] }
 0x6a5   :  { %v14597_v15 = vcombine.high %v5722_v41, %v5726_v63  ;;  %v14605_v23 = vcombine.low %v5722_v41, %v5726_v63 }
 0x6a6   :  { %6057 = vmatprep.subr.bf16.mxu0 %v14526_v28  ;;  %6098 = vmatprep.subr.bf16.mxu1 %v14532_v11 }
 0x6ab   :  { %v12654_v49 = vpop.eup %12653 }
 0x6ac   :  { %v4725_v43 = vmul.f32 %v12654_v49, %v12652_v0  ;;  %v5717_v0 = vld [vmem:[#allocation5 + $0x160] sm:$0xff]  ;;  %v5714_v49 = vld [vmem:[#allocation5 + $0x148] sm:$0xff] }
 0x6ae   :  { %4727 = vst [vmem:[#allocation2 + $0x8] sm:$0x3] %v4725_v43  ;;  %v5320_v37 = vpack.c.bf16 %v4725_v43, %v4725_v43  ;;  %v14586_v43 = vcombine.low %v5713_v12, %v5717_v0 }
 0x6b0   :  { %5546 = vmatmul.mubr.bf16.vlgmr.msra.gmra.mrb[72].mxu0 %v5320_v37  ;;  %5587 = vmatmul.mubr.bf16.vlgmr.msra.gmra.mrb[72].mxu1 %v5320_v37  ;;  %v14588_v37 = vcombine.high %v5713_v12, %v5717_v0  ;;  %v14617_v12 = vcombine.low %v5729_v18, %v5733_v52  ;;  %v14621_v0 = vcombine.low %v5730_v60, %v5734_v39 }
 0x6b1   :  { %6089 = vmatprep.mubr.bf16.mxu0 %v16142_v53  ;;  %6130 = vmatprep.mubr.bf16.mxu1 %v16142_v53 }
 0x6b2   :  { %6058 = vmatpush1.bf16.msra.mxu0 %v14528_v6  ;;  %6099 = vmatpush1.bf16.msra.mxu1 %v14530_v38  ;;  %16426 = vst [vmem:[#allocation37_spill] sm:$0xff] %v14617_v12  ;;  %16427 = vst [vmem:[#allocation38_spill] sm:$0xff] %v14621_v0 }
 0x6b3   :  { %6059 = vmatprep.subr.bf16.mxu0 %v14538_v5  ;;  %6100 = vmatprep.subr.bf16.mxu1 %v14544_v2 }
 0x6b5   :  { %v10769_v33 = vld [vmem:[#allocation2 + $0x8] sm:$0x3] }
 0x6b6   :  { %v10788_v3 = vmul.f32 %v14522_v13, %v10769_v33  ;;  %6060 = vmatpush1.bf16.msra.mxu0 %v14540_v9  ;;  %6101 = vmatpush1.bf16.msra.mxu1 %v14542_v25  ;;  %v5718_v33 = vld [vmem:[#allocation5 + $0x168] sm:$0xff] }
 0x6b7   :  { %6061 = vmatprep.subr.bf16.mxu0 %v14550_v58  ;;  %6102 = vmatprep.subr.bf16.mxu1 %v14556_v22  ;;  %v14590_v51 = vcombine.low %v5714_v49, %v5718_v33  ;;  %v14592_v42 = vcombine.high %v5714_v49, %v5718_v33  ;;  %v14623_v49 = vcombine.high %v5675_v1, %v5679_v27 }
 0x6b8   :  { %v10809_v26 = vsel %vm10796_vm0, %v10788_v3, 0.0  ;;  %v5721_v3 = vld [vmem:[#allocation5 + $0x180] sm:$0xff]  ;;  %v14626_v33 = vcombine.high %v5676_v47, %v5680_v10 }
 0x6b9   :  { %10810 = vadd.xlane.f32.xlu1 %v10809_v26  ;;  %v5725_v26 = vld [vmem:[#allocation5 + $0x1a0] sm:$0xff]  ;;  %16428 = vst [vmem:[#allocation31_spill] sm:$0xff] %v14623_v49 }
 0x6ba   :  { %6062 = vmatpush1.bf16.msra.mxu0 %v14552_v36  ;;  %6103 = vmatpush1.bf16.msra.mxu1 %v14554_v44  ;;  %v14594_v19 = vcombine.high %v5721_v3, %v5725_v26  ;;  %v14601_v40 = vcombine.low %v5721_v3, %v5725_v26  ;;  %16429 = vst [vmem:[#allocation70_spill] sm:$0xff] %v14626_v33  ;;  %v5634_v3 = vpop.permute.xlu0 %5633 }
 0x6bb   :  { %6063 = vmatprep.subr.bf16.mxu0 %v14562_v46  ;;  %6104 = vmatprep.subr.bf16.mxu1 %v14568_v62  ;;  %v5636_v26 = vmul.f32 %v5634_v3, %v16375_v20  ;;  %v5637_v41 = vmul.f32 %v5634_v3, %v16376_v34  ;;  %v5639_v10 = vmul.f32 %v5634_v3, %v16378_v55 }
 0x6bd   :  { %v5640_v63 = vadd.f32 %v5636_v26, %v16377_v50  ;;  %v5641_v60 = vadd.f32 %v5637_v41, %v16281_v57  ;;  %v5643_v26 = vadd.f32 %v5639_v10, %v16379_v48  ;;  %v5638_v50 = vmul.f32 %v5634_v3, %v16380_v30 }
 0x6be   :  { %6064 = vmatpush1.bf16.msra.mxu0 %v14564_v32  ;;  %6105 = vmatpush1.bf16.msra.mxu1 %v14566_v14 }
 0x6bf   :  { %6065 = vmatprep.subr.bf16.mxu0 %v14574_v54  ;;  %6106 = vmatprep.subr.bf16.mxu1 %v14580_v56  ;;  %v5642_v41 = vadd.f32 %v5638_v50, %v16381_v61  ;;  %v5704_v61 = vld [vmem:[#allocation5 + $0xf8] sm:$0xff] }
 0x6c2   :  { %6066 = vmatpush1.bf16.msra.mxu0 %v14576_v16  ;;  %6107 = vmatpush1.bf16.msra.mxu1 %v14578_v24 }
 0x6c3   :  { %6067 = vmatprep.subr.bf16.mxu0 %v14588_v37  ;;  %6108 = vmatprep.subr.bf16.mxu1 %v14592_v42 }
 0x6c6   :  { %6068 = vmatpush1.bf16.msra.mxu0 %v14586_v43  ;;  %6109 = vmatpush1.bf16.msra.mxu1 %v14590_v51 }
 0x6c7   :  { %6069 = vmatprep.subr.bf16.mxu0 %v14594_v19  ;;  %6110 = vmatprep.subr.bf16.mxu1 %v14597_v15 }
 0x6ca   :  { %6070 = vmatpush1.bf16.msra.mxu0 %v14601_v40  ;;  %6111 = vmatpush1.bf16.msra.mxu1 %v14605_v23 }
 0x6cb   :  { %6071 = vmatprep.subr.bf16.mxu0 %v14607_v35  ;;  %6112 = vmatprep.subr.bf16.mxu1 %v14612_v7 }
 0x6ce   :  { %6072 = vmatpush1.bf16.msra.mxu0 %v14617_v12  ;;  %6113 = vmatpush1.bf16.msra.mxu1 %v14621_v0 }
 0x6cf   :  { %6139 = vmatprep.subr.bf16.mxu0 %v14623_v49  ;;  %6180 = vmatprep.subr.bf16.mxu1 %v14626_v33 }
 0x739   :  { %v5190_v18 = vpop.f32.mrb[64].mxu0  ;;  %v5231_v52 = vpop.f32.mrb[64].mxu1 }
 0x73a   :  { %v5644_v39 = vadd.f32 %v5640_v63, %v5190_v18  ;;  %v5192_v1 = vpop.f32.mrb[65].mxu0  ;;  %v5233_v27 = vpop.f32.mrb[65].mxu1  ;;  %v5646_v18 = vadd.f32 %v5642_v41, %v5231_v52 }
 0x73b   :  { %v5645_v47 = vadd.f32 %v5641_v60, %v5192_v1  ;;  %v5194_v49 = vpop.f32.mrb[66].mxu0  ;;  %v5235_v0 = vpop.f32.mrb[66].mxu1  ;;  %v5647_v34 = vadd.f32 %v5643_v26, %v5233_v27 }
 0x73c   :  { %v11593_v33 = vmul.f32 -1.442695, %v5644_v39  ;;  %v5195_v12 = vpop.f32.mrb[67].mxu0  ;;  %v5236_v7 = vpop.f32.mrb[67].mxu1 }
 0x73d   :  { %v11594_v20 = vmul.f32 -1.442695, %v5645_v47  ;;  %v11595_v63 = vmul.f32 -1.442695, %v5647_v34 }
 0x73e   :  { %12655 = vpow2.f32 %v11593_v33 }
 0x73f   :  { %12657 = vpow2.f32 %v11594_v20 }
 0x740   :  { %12659 = vpow2.f32 %v11595_v63 }
 0x741   :  { %12661 = vtanh.f32 %v5646_v18  ;;  %v5683_v18 = vld [vmem:[#allocation5 + $0x50] sm:$0xff] }
 0x748   :  { %v12656_v60 = vpop.eup %12655 }
 0x749   :  { %v12658_v1 = vpop.eup %12657  ;;  %v5654_v55 = vadd.f32 1.0, %v12656_v60  ;;  %v5687_v60 = vld [vmem:[#allocation5 + $0x70] sm:$0xff] }
 0x74a   :  { %v5655_v0 = vadd.f32 1.0, %v12658_v1  ;;  %v12660_v7 = vpop.eup %12659  ;;  %v5684_v1 = vld [vmem:[#allocation5 + $0x58] sm:$0xff] }
 0x74b   :  { %12663 = vrcp.f32 %v5654_v55  ;;  %v12662_v12 = vpop.eup %12661  ;;  %v5664_v39 = vadd.f32 1.0, %v12660_v7 }
 0x74c   :  { %12665 = vrcp.f32 %v5655_v0  ;;  %v5688_v0 = vld [vmem:[#allocation5 + $0x78] sm:$0xff] }
 0x74d   :  { %12667 = vrcp.f32 %v5664_v39  ;;  %v5695_v39 = vld [vmem:[#allocation5 + $0xb0] sm:$0xff] }
 0x755   :  { %v12664_v20 = vpop.eup %12663 }
 0x756   :  { %v12666_v49 = vpop.eup %12665  ;;  %v5668_v33 = vmul.f32 %v12664_v20, %v12662_v12  ;;  %v14654_v20 = vcombine.high %v5683_v18, %v5687_v60 }
 0x757   :  { %v5667_v3 = vmul.f32 %v12666_v49, %v14440_v21  ;;  %v12668_v63 = vpop.eup %12667  ;;  %v14656_v49 = vcombine.high %v5684_v1, %v5688_v0 }
 0x758   :  { %16431 = vst [vmem:[#allocation33_spill] sm:$0xff] %v14654_v20 }
 0x759   :  { %v14641_v27 = vadd.f32 %v5668_v33, %v5667_v3  ;;  %v14643_v34 = vpop.f32.mrb[68].mxu0  ;;  %v14645_v50 = vpop.f32.mrb[68].mxu1  ;;  %16432 = vst [vmem:[#allocation39_spill] sm:$0xff] %v14656_v49  ;;  %v5691_v33 = vld [vmem:[#allocation5 + $0x90] sm:$0xff]  ;;  %v5692_v3 = vld [vmem:[#allocation5 + $0x98] sm:$0xff] }
 0x75a   :  { %v14647_v52 = vpop.f32.mrb[69].mxu0  ;;  %v14649_v47 = vpop.f32.mrb[69].mxu1 }
 0x75b   :  { %16430 = vst [vmem:[#allocation34_spill] sm:$0xff] %v14641_v27  ;;  %v5276_v55 = vpop.f32.mrb[70].mxu0  ;;  %v5317_v10 = vpop.f32.mrb[70].mxu1  ;;  %12669 = vtanh.f32 %v14641_v27  ;;  %v5700_v27 = vld [vmem:[#allocation5 + $0xd8] sm:$0xff] }
 0x75c   :  { %v5277_v26 = vpop.f32.mrb[71].mxu0  ;;  %v5318_v41 = vpop.f32.mrb[71].mxu1  ;;  %v5696_v55 = vld [vmem:[#allocation5 + $0xb8] sm:$0xff]  ;;  %v14662_v10 = vcombine.low %v5683_v18, %v5687_v60  ;;  %v14676_v18 = vcombine.low %v5691_v33, %v5695_v39 }
 0x75d   :  { %v14664_v26 = vcombine.low %v5684_v1, %v5688_v0  ;;  %v14668_v41 = vcombine.high %v5691_v33, %v5695_v39  ;;  %v14678_v60 = vcombine.low %v5692_v3, %v5696_v55  ;;  %v14684_v0 = vcombine.high %v5700_v27, %v5704_v61 }
 0x75e   :  { %16433 = vst [vmem:[#allocation40_spill] sm:$0xff] %v14662_v10  ;;  %16437 = vst [vmem:[#allocation43_spill] sm:$0xff] %v14676_v18  ;;  %v14690_v39 = vcombine.low %v5700_v27, %v5704_v61 }
 0x75f   :  { %16434 = vst [vmem:[#allocation41_spill] sm:$0xff] %v14664_v26  ;;  %16435 = vst [vmem:[#allocation17_spill] sm:$0xff] %v14668_v41 }
 0x760   :  { %16438 = vst [vmem:[#allocation18_spill] sm:$0xff] %v14678_v60  ;;  %16440 = vst [vmem:[#allocation21_spill] sm:$0xff] %v14684_v0 }
 0x761   :  { %16442 = vst [vmem:[#allocation25_spill] sm:$0xff] %v14690_v39 }
 0x765   :  { %v12670_v21 = vpop.eup %12669 }
 0x766   :  { %v5671_v7 = vmul.f32 %v12670_v21, %v12668_v63  ;;  %v14670_v63 = vcombine.high %v5692_v3, %v5696_v55  ;;  %v5699_v21 = vld [vmem:[#allocation5 + $0xd0] sm:$0xff] }
 0x768   :  { %v14652_v12 = vpack.c.bf16 %v5671_v7, %v5671_v7  ;;  %16436 = vst [vmem:[#allocation42_spill] sm:$0xff] %v14670_v63  ;;  %v5703_v7 = vld [vmem:[#allocation5 + $0xf0] sm:$0xff] }
 0x769   :  { %v14682_v1 = vcombine.high %v5699_v21, %v5703_v7  ;;  %v14688_v33 = vcombine.low %v5699_v21, %v5703_v7 }
 0x76a   :  { %6090 = vmatmul.mubr.bf16.vlgmr.msra.gmra.mrb[76].mxu0 %v14652_v12  ;;  %6131 = vmatmul.mubr.bf16.vlgmr.msra.gmra.mrb[76].mxu1 %v14652_v12 }
 0x76b   :  { %6140 = vmatpush1.bf16.msra.mxu0 %v14609_v8  ;;  %6181 = vmatpush1.bf16.msra.mxu1 %v14614_v59  ;;  %16439 = vst [vmem:[#allocation44_spill] sm:$0xff] %v14682_v1  ;;  %v5708_v59 = vld [vmem:[#allocation5 + $0x118] sm:$0xff]  ;;  %16441 = vst [vmem:[#allocation45_spill] sm:$0xff] %v14688_v33 }
 0x76c   :  { %6141 = vmatprep.subr.bf16.mxu0 %v14654_v20  ;;  %6182 = vmatprep.subr.bf16.mxu1 %v14656_v49  ;;  %v5707_v49 = vld [vmem:[#allocation5 + $0x110] sm:$0xff]  ;;  %v5712_v8 = vld [vmem:[#allocation5 + $0x138] sm:$0xff] }
 0x76d   :  { %6171 = vmatprep.mubr.bf16.mxu0 %v16142_v53  ;;  %6212 = vmatprep.mubr.bf16.mxu1 %v16142_v53  ;;  %v5711_v20 = vld [vmem:[#allocation5 + $0x130] sm:$0xff]  ;;  %v14696_v55 = vcombine.high %v5708_v59, %v5712_v8  ;;  %v14702_v61 = vcombine.low %v5708_v59, %v5712_v8 }
 0x76e   :  { %v14694_v3 = vcombine.high %v5707_v49, %v5711_v20  ;;  %v14700_v21 = vcombine.low %v5707_v49, %v5711_v20 }
 0x76f   :  { %6142 = vmatpush1.bf16.msra.mxu0 %v14662_v10  ;;  %6183 = vmatpush1.bf16.msra.mxu1 %v14664_v26  ;;  %16444 = vst [vmem:[#allocation47_spill] sm:$0xff] %v14696_v55  ;;  %v5716_v26 = vld [vmem:[#allocation5 + $0x158] sm:$0xff] }
 0x770   :  { %6143 = vmatprep.subr.bf16.mxu0 %v14668_v41  ;;  %6184 = vmatprep.subr.bf16.mxu1 %v14670_v63  ;;  %16443 = vst [vmem:[#allocation46_spill] sm:$0xff] %v14694_v3  ;;  %v5715_v63 = vld [vmem:[#allocation5 + $0x150] sm:$0xff]  ;;  %v5720_v10 = vld [vmem:[#allocation5 + $0x178] sm:$0xff] }
 0x771   :  { %v5719_v41 = vld [vmem:[#allocation5 + $0x170] sm:$0xff]  ;;  %v14708_v7 = vcombine.high %v5716_v26, %v5720_v10  ;;  %v14714_v8 = vcombine.low %v5716_v26, %v5720_v10 }
 0x772   :  { %v14706_v27 = vcombine.high %v5715_v63, %v5719_v41  ;;  %v14712_v20 = vcombine.low %v5715_v63, %v5719_v41 }
 0x773   :  { %6144 = vmatpush1.bf16.msra.mxu0 %v14676_v18  ;;  %6185 = vmatpush1.bf16.msra.mxu1 %v14678_v60  ;;  %16446 = vst [vmem:[#allocation49_spill] sm:$0xff] %v14708_v7  ;;  %v5724_v60 = vld [vmem:[#allocation5 + $0x198] sm:$0xff]  ;;  %16448 = vst [vmem:[#allocation51_spill] sm:$0xff] %v14714_v8 }
 0x774   :  { %6145 = vmatprep.subr.bf16.mxu0 %v14682_v1  ;;  %6186 = vmatprep.subr.bf16.mxu1 %v14684_v0  ;;  %16445 = vst [vmem:[#allocation48_spill] sm:$0xff] %v14706_v27  ;;  %v5723_v0 = vld [vmem:[#allocation5 + $0x190] sm:$0xff]  ;;  %v5728_v18 = vld [vmem:[#allocation5 + $0x1b8] sm:$0xff]  ;;  %16447 = vst [vmem:[#allocation50_spill] sm:$0xff] %v14712_v20 }
 0x775   :  { %v5727_v1 = vld [vmem:[#allocation5 + $0x1b0] sm:$0xff]  ;;  %v14720_v49 = vcombine.high %v5724_v60, %v5728_v18  ;;  %v14726_v10 = vcombine.low %v5724_v60, %v5728_v18 }
 0x776   :  { %v14718_v59 = vcombine.high %v5723_v0, %v5727_v1  ;;  %v14724_v41 = vcombine.low %v5723_v0, %v5727_v1 }
 0x777   :  { %6146 = vmatpush1.bf16.msra.mxu0 %v14688_v33  ;;  %6187 = vmatpush1.bf16.msra.mxu1 %v14690_v39  ;;  %16450 = vst [vmem:[#allocation53_spill] sm:$0xff] %v14720_v49  ;;  %v5732_v39 = vld [vmem:[#allocation5 + $0x1d8] sm:$0xff]  ;;  %16451 = vst [vmem:[#allocation54_spill] sm:$0xff] %v14726_v10 }
 0x778   :  { %6147 = vmatprep.subr.bf16.mxu0 %v14694_v3  ;;  %6188 = vmatprep.subr.bf16.mxu1 %v14696_v55  ;;  %16449 = vst [vmem:[#allocation52_spill] sm:$0xff] %v14718_v59  ;;  %v5731_v55 = vld [vmem:[#allocation5 + $0x1d0] sm:$0xff]  ;;  %v5736_v33 = vld [vmem:[#allocation5 + $0x1f8] sm:$0xff] }
 0x779   :  { %v5735_v3 = vld [vmem:[#allocation5 + $0x1f0] sm:$0xff]  ;;  %v14732_v63 = vcombine.high %v5732_v39, %v5736_v33  ;;  %v14738_v1 = vcombine.low %v5732_v39, %v5736_v33 }
 0x77a   :  { %v14730_v26 = vcombine.high %v5731_v55, %v5735_v3 }
 0x77b   :  { %6148 = vmatpush1.bf16.msra.mxu0 %v14700_v21  ;;  %6189 = vmatpush1.bf16.msra.mxu1 %v14702_v61  ;;  %16453 = vst [vmem:[#allocation56_spill] sm:$0xff] %v14732_v63 }
 0x77c   :  { %6149 = vmatprep.subr.bf16.mxu0 %v14706_v27  ;;  %6190 = vmatprep.subr.bf16.mxu1 %v14708_v7  ;;  %16452 = vst [vmem:[#allocation55_spill] sm:$0xff] %v14730_v26 }
 0x77f   :  { %6150 = vmatpush1.bf16.msra.mxu0 %v14712_v20  ;;  %6191 = vmatpush1.bf16.msra.mxu1 %v14714_v8  ;;  %v14736_v20 = vcombine.low %v5731_v55, %v5735_v3  ;;  %v14746_v8 = vld [vmem:[#allocation8 + $0xc] ss:$16 sps:$4 sm:$0xff]  }
 0x780   :  { %6151 = vmatprep.subr.bf16.mxu0 %v14718_v59  ;;  %6192 = vmatprep.subr.bf16.mxu1 %v14720_v49  ;;  %v14744_v59 = vld [vmem:[#allocation8 + $0x4] ss:$16 sps:$4 sm:$0xff]  }
 0x783   :  { %v5547_v7 = vpop.f32.mrb[72].mxu0  ;;  %v5588_v27 = vpop.f32.mrb[72].mxu1  ;;  %6152 = vmatpush1.bf16.msra.mxu0 %v14724_v41  ;;  %6193 = vmatpush1.bf16.msra.mxu1 %v14726_v10 }
 0x784   :  { %v5595_v18 = vadd.f32 %v5547_v7, %v14643_v34  ;;  %v5597_v60 = vadd.f32 %v5588_v27, %v14645_v50  ;;  %v5549_v0 = vpop.f32.mrb[73].mxu0  ;;  %v5590_v49 = vpop.f32.mrb[73].mxu1  ;;  %6153 = vmatprep.subr.bf16.mxu0 %v14730_v26  ;;  %6194 = vmatprep.subr.bf16.mxu1 %v14732_v63  ;;  %v14754_v7 = vld [vmem:[#allocation8] ss:$16 sps:$4 sm:$0xff]   ;;  %v14756_v63 = vld [vmem:[#allocation8 + $0x8] ss:$16 sps:$4 sm:$0xff]  }
 0x785   :  { %v5596_v10 = vadd.f32 %v5549_v0, %v14647_v52  ;;  %v5598_v3 = vadd.f32 %v5590_v49, %v14649_v47  ;;  %v5551_v33 = vpop.f32.mrb[74].mxu0  ;;  %v5592_v39 = vpop.f32.mrb[74].mxu1  ;;  %v14760_v52 = vld [vmem:[#allocation8 + $0x24] ss:$16 sps:$4 sm:$0xff]   ;;  %v14762_v47 = vld [vmem:[#allocation8 + $0x2c] ss:$16 sps:$4 sm:$0xff]  }
 0x786   :  { %v5599_v34 = vadd.f32 %v5595_v18, %v13521_v45  ;;  %v5552_v55 = vpop.f32.mrb[75].mxu0  ;;  %v5593_v50 = vpop.f32.mrb[75].mxu1  ;;  %v14770_v18 = vld [vmem:[#allocation8 + $0x28] ss:$16 sps:$4 sm:$0xff]   ;;  %v14774_v0 = vld [vmem:[#allocation8 + $0x44] ss:$16 sps:$4 sm:$0xff]  }
 0x787   :  { %v5600_v27 = vadd.f32 %v5596_v10, %v13526_v17  ;;  %6154 = vmatpush1.bf16.msra.mxu0 %v14736_v20  ;;  %6195 = vmatpush1.bf16.msra.mxu1 %v14738_v1  ;;  %v14768_v10 = vld [vmem:[#allocation8 + $0x20] ss:$16 sps:$4 sm:$0xff]   ;;  %16455 = vst [vmem:[#allocation58_spill] sm:$0xff] %v14770_v18  ;;  %16456 = vst [vmem:[#allocation59_spill] sm:$0xff] %v14774_v0  ;;  %v5602_v33 = vadd.f32 %v5598_v3, %v13535_v29  ;;  %v14785_v39 = vld [vmem:[#allocation8 + $0x48] ss:$16 sps:$4 sm:$0xff]  }
 0x788   :  { %v11589_v26 = vmul.f32 -1.442695, %v5599_v34  ;;  %6414 = vmatprep.subr.bf16.mxu0 %v14744_v59  ;;  %6455 = vmatprep.subr.bf16.mxu1 %v14746_v8  ;;  %16454 = vst [vmem:[#allocation57_spill] sm:$0xff] %v14768_v10  ;;  %16459 = vst [vmem:[#allocation62_spill] sm:$0xff] %v14785_v39  ;;  %v14789_v34 = vld [vmem:[#allocation8 + $0x64] ss:$16 sps:$4 sm:$0xff]   ;;  %v5601_v50 = vadd.f32 %v5597_v60, %v16408_v31 }
 0x789   :  { %v11590_v49 = vmul.f32 -1.442695, %v5600_v27  ;;  %16460 = vst [vmem:[#allocation63_spill] sm:$0xff] %v14789_v34  ;;  %v14791_v55 = vld [vmem:[#allocation8 + $0x6c] ss:$16 sps:$4 sm:$0xff]  }
 0x78a   :  { %12671 = vpow2.f32 %v11589_v26  ;;  %6172 = vmatmul.mubr.bf16.vlgmr.msra.gmra.mrb[80].mxu0 %v14652_v12  ;;  %6213 = vmatmul.mubr.bf16.vlgmr.msra.gmra.mrb[80].mxu1 %v14652_v12  ;;  %v14776_v26 = vld [vmem:[#allocation8 + $0x4c] ss:$16 sps:$4 sm:$0xff]   ;;  %v14783_v12 = vld [vmem:[#allocation8 + $0x40] ss:$16 sps:$4 sm:$0xff]   ;;  %16461 = vst [vmem:[#allocation64_spill] sm:$0xff] %v14791_v55 }
 0x78b   :  { %12673 = vpow2.f32 %v11590_v49  ;;  %6415 = vmatpush1.bf16.msra.mxu0 %v14754_v7  ;;  %6456 = vmatpush1.bf16.msra.mxu1 %v14756_v63  ;;  %16457 = vst [vmem:[#allocation60_spill] sm:$0xff] %v14776_v26  ;;  %16458 = vst [vmem:[#allocation61_spill] sm:$0xff] %v14783_v12  ;;  %v11591_v3 = vmul.f32 -1.442695, %v5602_v33  ;;  %v14796_v27 = vld [vmem:[#allocation8 + $0x60] ss:$16 sps:$4 sm:$0xff]  }
 0x78c   :  { %6416 = vmatprep.subr.bf16.mxu0 %v14760_v52  ;;  %6457 = vmatprep.subr.bf16.mxu1 %v14762_v47  ;;  %16462 = vst [vmem:[#allocation65_spill] sm:$0xff] %v14796_v27  ;;  %v14798_v49 = vld [vmem:[#allocation8 + $0x68] ss:$16 sps:$4 sm:$0xff]   ;;  %v14808_v31 = vld [vmem:[#allocation8 + $0x80] ss:$16 sps:$4 sm:$0xff]  }
 0x78d   :  { %6446 = vmatprep.mubr.bf16.mxu0 %v16142_v53  ;;  %6487 = vmatprep.mubr.bf16.mxu1 %v16142_v53  ;;  %16463 = vst [vmem:[#allocation66_spill] sm:$0xff] %v14798_v49  ;;  %12675 = vpow2.f32 %v11591_v3  ;;  %16466 = vst [vmem:[#allocation69_spill] sm:$0xff] %v14808_v31  ;;  %v14822_v3 = vld [vmem:[#allocation8 + $0xa8] ss:$16 sps:$4 sm:$0xff]  }
 0x78e   :  { %12677 = vtanh.f32 %v5601_v50  ;;  %16471 = vst [vmem:[#allocation75_spill] sm:$0xff] %v14822_v3  ;;  %v14826_v50 = vld [vmem:[#allocation8 + $0xc4] ss:$16 sps:$4 sm:$0xff]  }
 0x78f   :  { %6417 = vmatpush1.bf16.msra.mxu0 %v14768_v10  ;;  %6458 = vmatpush1.bf16.msra.mxu1 %v14770_v18 }
 0x790   :  { %6418 = vmatprep.subr.bf16.mxu0 %v14774_v0  ;;  %6459 = vmatprep.subr.bf16.mxu1 %v14776_v26  ;;  %v14802_v26 = vld [vmem:[#allocation8 + $0x84] ss:$16 sps:$4 sm:$0xff]   ;;  %v14804_v0 = vld [vmem:[#allocation8 + $0x8c] ss:$16 sps:$4 sm:$0xff]  }
 0x791   :  { %16464 = vst [vmem:[#allocation67_spill] sm:$0xff] %v14802_v26  ;;  %16465 = vst [vmem:[#allocation68_spill] sm:$0xff] %v14804_v0 }
 0x793   :  { %6419 = vmatpush1.bf16.msra.mxu0 %v14783_v12  ;;  %6460 = vmatpush1.bf16.msra.mxu1 %v14785_v39  ;;  %v14810_v39 = vld [vmem:[#allocation8 + $0x88] ss:$16 sps:$4 sm:$0xff]  }
 0x794   :  { %v12672_v18 = vpop.eup %12671  ;;  %6420 = vmatprep.subr.bf16.mxu0 %v14789_v34  ;;  %6461 = vmatprep.subr.bf16.mxu1 %v14791_v55  ;;  %16467 = vst [vmem:[#allocation71_spill] sm:$0xff] %v14810_v39  ;;  %v14814_v55 = vld [vmem:[#allocation8 + $0xa4] ss:$16 sps:$4 sm:$0xff]   ;;  %v14847_v12 = vld [vmem:[#allocation8 + $0xe8] ss:$16 sps:$4 sm:$0xff]  }
 0x795   :  { %v12674_v33 = vpop.eup %12673  ;;  %v5609_v10 = vadd.f32 1.0, %v12672_v18  ;;  %16468 = vst [vmem:[#allocation72_spill] sm:$0xff] %v14814_v55  ;;  %v14816_v18 = vld [vmem:[#allocation8 + $0xac] ss:$16 sps:$4 sm:$0xff]  }
 0x796   :  { %v5610_v60 = vadd.f32 1.0, %v12674_v33  ;;  %16469 = vst [vmem:[#allocation73_spill] sm:$0xff] %v14816_v18  ;;  %v14828_v33 = vld [vmem:[#allocation8 + $0xcc] ss:$16 sps:$4 sm:$0xff]  }
 0x797   :  { %12679 = vrcp.f32 %v5609_v10  ;;  %6421 = vmatpush1.bf16.msra.mxu0 %v14796_v27  ;;  %6462 = vmatpush1.bf16.msra.mxu1 %v14798_v49  ;;  %v14820_v10 = vld [vmem:[#allocation8 + $0xa0] ss:$16 sps:$4 sm:$0xff]   ;;  %16472 = vst [vmem:[#allocation76_spill] sm:$0xff] %v14828_v33 }
 0x798   :  { %12681 = vrcp.f32 %v5610_v60  ;;  %6422 = vmatprep.subr.bf16.mxu0 %v14802_v26  ;;  %6463 = vmatprep.subr.bf16.mxu1 %v14804_v0  ;;  %16470 = vst [vmem:[#allocation74_spill] sm:$0xff] %v14820_v10  ;;  %v12676_v60 = vpop.eup %12675 }
 0x799   :  { %v12678_v0 = vpop.eup %12677  ;;  %v5619_v34 = vadd.f32 1.0, %v12676_v60  ;;  %v16482_v60 = vld [vmem:[#allocation28_spill] sm:$0xff] }
 0x79b   :  { %6423 = vmatpush1.bf16.msra.mxu0 %v14808_v31  ;;  %6464 = vmatpush1.bf16.msra.mxu1 %v14810_v39  ;;  %v14832_v31 = vld [vmem:[#allocation8 + $0xc0] ss:$16 sps:$4 sm:$0xff]   ;;  %v14834_v39 = vld [vmem:[#allocation8 + $0xc8] ss:$16 sps:$4 sm:$0xff]   ;;  %12683 = vrcp.f32 %v5619_v34 }
 0x79c   :  { %6424 = vmatprep.subr.bf16.mxu0 %v14814_v55  ;;  %6465 = vmatprep.subr.bf16.mxu1 %v14816_v18  ;;  %v14838_v55 = vld [vmem:[#allocation8 + $0xe4] ss:$16 sps:$4 sm:$0xff]   ;;  %v14840_v18 = vld [vmem:[#allocation8 + $0xec] ss:$16 sps:$4 sm:$0xff]  }
 0x79f   :  { %6425 = vmatpush1.bf16.msra.mxu0 %v14820_v10  ;;  %6466 = vmatpush1.bf16.msra.mxu1 %v14822_v3  ;;  %v14845_v3 = vld [vmem:[#allocation8 + $0xe0] ss:$16 sps:$4 sm:$0xff]  }
 0x7a0   :  { %6426 = vmatprep.subr.bf16.mxu0 %v14826_v50  ;;  %6467 = vmatprep.subr.bf16.mxu1 %v14828_v33 }
 0x7a1   :  { %v12680_v26 = vpop.eup %12679 }
 0x7a2   :  { %v12682_v49 = vpop.eup %12681  ;;  %v5623_v27 = vmul.f32 %v12680_v26, %v12678_v0 }
 0x7a3   :  { %v5622_v10 = vmul.f32 %v12682_v49, %v14508_v4  ;;  %6427 = vmatpush1.bf16.msra.mxu0 %v14832_v31  ;;  %6468 = vmatpush1.bf16.msra.mxu1 %v14834_v39 }
 0x7a4   :  { %6428 = vmatprep.subr.bf16.mxu0 %v14838_v55  ;;  %6469 = vmatprep.subr.bf16.mxu1 %v14840_v18 }
 0x7a5   :  { %v14851_v33 = vadd.f32 %v5623_v27, %v5622_v10  ;;  %v12684_v4 = vpop.eup %12683 }
 0x7a7   :  { %6429 = vmatpush1.bf16.msra.mxu0 %v14845_v3  ;;  %6470 = vmatpush1.bf16.msra.mxu1 %v14847_v12  ;;  %12685 = vtanh.f32 %v14851_v33 }
 0x7a8   :  { %6958 = vmatprep.subr.bf16.mxu0 %v14526_v28  ;;  %6999 = vmatprep.subr.bf16.mxu1 %v14532_v11 }
 0x7b1   :  { %v12686_v0 = vpop.eup %12685 }
 0x7b2   :  { %v5626_v26 = vmul.f32 %v12686_v0, %v12684_v4 }
 0x7b4   :  { %5628 = vst [vmem:[#allocation2 + $0xa] sm:$0x3] %v5626_v26  ;;  %v6221_v49 = vpack.c.bf16 %v5626_v26, %v5626_v26 }
 0x7b6   :  { %6447 = vmatmul.mubr.bf16.vlgmr.msra.gmra.mrb[84].mxu0 %v6221_v49  ;;  %6488 = vmatmul.mubr.bf16.vlgmr.msra.gmra.mrb[84].mxu1 %v6221_v49 }
 0x7b7   :  { %6959 = vmatpush1.bf16.msra.mxu0 %v14528_v6  ;;  %7000 = vmatpush1.bf16.msra.mxu1 %v14530_v38  ;;  %v16474_v38 = vld [vmem:[#allocation37_spill] sm:$0xff] }
 0x7b8   :  { %6960 = vmatprep.subr.bf16.mxu0 %v14538_v5  ;;  %7001 = vmatprep.subr.bf16.mxu1 %v14544_v2  ;;  %v16475_v5 = vld [vmem:[#allocation38_spill] sm:$0xff]  ;;  %v6535_v2 = vpop.permute.xlu1 %6534 }
 0x7b9   :  { %6990 = vmatprep.mubr.bf16.mxu0 %v16142_v53  ;;  %7031 = vmatprep.mubr.bf16.mxu1 %v16142_v53  ;;  %v6539_v27 = vmul.f32 %v6535_v2, %v16380_v30 }
 0x7bb   :  { %v10770_v28 = vld [vmem:[#allocation2 + $0xa] sm:$0x3]  ;;  %6961 = vmatpush1.bf16.msra.mxu0 %v14540_v9  ;;  %7002 = vmatpush1.bf16.msra.mxu1 %v14542_v25  ;;  %v6543_v4 = vadd.f32 %v6539_v27, %v16482_v60 }
 0x7bc   :  { %v10789_v11 = vmul.f32 %v14522_v13, %v10770_v28  ;;  %6962 = vmatprep.subr.bf16.mxu0 %v14550_v58  ;;  %7003 = vmatprep.subr.bf16.mxu1 %v14556_v22  ;;  %v16473_v13 = vld [vmem:[#allocation35_spill] sm:$0xff]  ;;  %v16477_v25 = vld [vmem:[#allocation70_spill] sm:$0xff] }
 0x7bd   :  { %v16476_v9 = vld [vmem:[#allocation31_spill] sm:$0xff] }
 0x7be   :  { %v10812_v6 = vsel %vm10796_vm0, %v10789_v11, 0.0  ;;  %v16478_v58 = vld [vmem:[#allocation19_spill] sm:$0xff] }
 0x7bf   :  { %10813 = vadd.xlane.f32.xlu0 %v10812_v6  ;;  %6963 = vmatpush1.bf16.msra.mxu0 %v14552_v36  ;;  %v6537_v36 = vmul.f32 %v6535_v2, %v16478_v58  ;;  %v16487_v27 = vld [vmem:[#allocation39_spill] sm:$0xff] }
 0x7c0   :  { %7004 = vmatpush1.bf16.msra.mxu1 %v14554_v44  ;;  %6964 = vmatprep.subr.bf16.mxu0 %v14562_v46  ;;  %v16479_v44 = vld [vmem:[#allocation20_spill] sm:$0xff]  ;;  %v16480_v46 = vld [vmem:[#allocation22_spill] sm:$0xff] }
 0x7c1   :  { %7005 = vmatprep.subr.bf16.mxu1 %v14568_v62  ;;  %v6538_v22 = vmul.f32 %v6535_v2, %v16479_v44 }
 0x7c3   :  { %6965 = vmatpush1.bf16.msra.mxu0 %v14564_v32  ;;  %v6541_v32 = vadd.f32 %v6537_v36, %v16480_v46 }
 0x7c4   :  { %7006 = vmatpush1.bf16.msra.mxu1 %v14566_v14  ;;  %6966 = vmatprep.subr.bf16.mxu0 %v14574_v54  ;;  %v6542_v54 = vadd.f32 %v6538_v22, %v16281_v57 }
 0x7c5   :  { %7007 = vmatprep.subr.bf16.mxu1 %v14580_v56 }
 0x7c7   :  { %6967 = vmatpush1.bf16.msra.mxu0 %v14576_v16 }
 0x7c8   :  { %7008 = vmatpush1.bf16.msra.mxu1 %v14578_v24  ;;  %6968 = vmatprep.subr.bf16.mxu0 %v14588_v37  ;;  %v16481_v37 = vld [vmem:[#allocation24_spill] sm:$0xff] }
 0x7c9   :  { %7009 = vmatprep.subr.bf16.mxu1 %v14592_v42 }
 0x7cb   :  { %6969 = vmatpush1.bf16.msra.mxu0 %v14586_v43 }
 0x7cc   :  { %7010 = vmatpush1.bf16.msra.mxu1 %v14590_v51  ;;  %6970 = vmatprep.subr.bf16.mxu0 %v14594_v19  ;;  %v6540_v51 = vmul.f32 %v6535_v2, %v16481_v37  ;;  %v16483_v2 = vld [vmem:[#allocation34_spill] sm:$0xff] }
 0x7cd   :  { %7011 = vmatprep.subr.bf16.mxu1 %v14597_v15 }
 0x7ce   :  { %v6544_v34 = vadd.f32 %v6540_v51, %v16379_v48 }
 0x7cf   :  { %6971 = vmatpush1.bf16.msra.mxu0 %v14601_v40 }
 0x7d0   :  { %7012 = vmatpush1.bf16.msra.mxu1 %v14605_v23  ;;  %6972 = vmatprep.subr.bf16.mxu0 %v14607_v35 }
 0x7d1   :  { %7013 = vmatprep.subr.bf16.mxu1 %v16473_v13 }
 0x7d3   :  { %6973 = vmatpush1.bf16.msra.mxu0 %v16474_v38 }
 0x7d4   :  { %7014 = vmatpush1.bf16.msra.mxu1 %v16475_v5  ;;  %7040 = vmatprep.subr.bf16.mxu0 %v16476_v9 }
 0x7d5   :  { %7081 = vmatprep.subr.bf16.mxu1 %v16477_v25 }
 0x83d   :  { %v6091_v14 = vpop.f32.mrb[76].mxu0  ;;  %v6132_v62 = vpop.f32.mrb[76].mxu1 }
 0x83e   :  { %v6545_v16 = vadd.f32 %v6541_v32, %v6091_v14  ;;  %v6093_v24 = vpop.f32.mrb[77].mxu0  ;;  %v6134_v56 = vpop.f32.mrb[77].mxu1  ;;  %v6547_v26 = vadd.f32 %v6543_v4, %v6132_v62  ;;  %v16489_v4 = vld [vmem:[#allocation41_spill] sm:$0xff] }
 0x83f   :  { %v6546_v43 = vadd.f32 %v6542_v54, %v6093_v24  ;;  %v6095_v42 = vpop.f32.mrb[78].mxu0  ;;  %v6136_v19 = vpop.f32.mrb[78].mxu1  ;;  %v6548_v10 = vadd.f32 %v6544_v34, %v6134_v56  ;;  %v16486_v34 = vld [vmem:[#allocation33_spill] sm:$0xff] }
 0x840   :  { %v11696_v15 = vmul.f32 -1.442695, %v6545_v16  ;;  %v6096_v40 = vpop.f32.mrb[79].mxu0  ;;  %v6137_v23 = vpop.f32.mrb[79].mxu1 }
 0x841   :  { %v11697_v35 = vmul.f32 -1.442695, %v6546_v43  ;;  %v11698_v0 = vmul.f32 -1.442695, %v6548_v10  ;;  %v16484_v23 = vld [vmem:[#allocation32_spill] sm:$0xff] }
 0x842   :  { %12687 = vpow2.f32 %v11696_v15  ;;  %v16488_v10 = vld [vmem:[#allocation40_spill] sm:$0xff] }
 0x843   :  { %12689 = vpow2.f32 %v11697_v35  ;;  %v16485_v35 = vld [vmem:[#allocation36_spill] sm:$0xff] }
 0x844   :  { %12691 = vpow2.f32 %v11698_v0  ;;  %v16490_v0 = vld [vmem:[#allocation17_spill] sm:$0xff] }
 0x845   :  { %12693 = vtanh.f32 %v6547_v26  ;;  %v16491_v26 = vld [vmem:[#allocation42_spill] sm:$0xff] }
 0x84c   :  { %v12688_v49 = vpop.eup %12687 }
 0x84d   :  { %v12690_v28 = vpop.eup %12689  ;;  %v6555_v11 = vadd.f32 1.0, %v12688_v49  ;;  %v16492_v49 = vld [vmem:[#allocation43_spill] sm:$0xff] }
 0x84e   :  { %v6556_v6 = vadd.f32 1.0, %v12690_v28  ;;  %v12692_v13 = vpop.eup %12691  ;;  %v16493_v28 = vld [vmem:[#allocation18_spill] sm:$0xff] }
 0x84f   :  { %12695 = vrcp.f32 %v6555_v11  ;;  %v12694_v38 = vpop.eup %12693  ;;  %v6565_v36 = vadd.f32 1.0, %v12692_v13  ;;  %v16494_v11 = vld [vmem:[#allocation44_spill] sm:$0xff]  ;;  %v16496_v13 = vld [vmem:[#allocation45_spill] sm:$0xff] }
 0x850   :  { %12697 = vrcp.f32 %v6556_v6  ;;  %v16495_v6 = vld [vmem:[#allocation21_spill] sm:$0xff] }
 0x851   :  { %12699 = vrcp.f32 %v6565_v36  ;;  %v16501_v36 = vld [vmem:[#allocation49_spill] sm:$0xff] }
 0x859   :  { %v12696_v5 = vpop.eup %12695 }
 0x85a   :  { %v12698_v9 = vpop.eup %12697  ;;  %v6569_v25 = vmul.f32 %v12696_v5, %v12694_v38  ;;  %v16497_v38 = vld [vmem:[#allocation25_spill] sm:$0xff]  ;;  %v16498_v5 = vld [vmem:[#allocation46_spill] sm:$0xff] }
 0x85b   :  { %v6568_v22 = vmul.f32 %v12698_v9, %v16483_v2  ;;  %v12700_v42 = vpop.eup %12699  ;;  %v16499_v9 = vld [vmem:[#allocation47_spill] sm:$0xff]  ;;  %v16502_v2 = vld [vmem:[#allocation50_spill] sm:$0xff] }
 0x85d   :  { %v14903_v32 = vadd.f32 %v6569_v25, %v6568_v22  ;;  %v6173_v14 = vpop.f32.mrb[80].mxu0  ;;  %v6214_v62 = vpop.f32.mrb[80].mxu1  ;;  %v16500_v25 = vld [vmem:[#allocation48_spill] sm:$0xff]  ;;  %v16503_v22 = vld [vmem:[#allocation51_spill] sm:$0xff] }
 0x85e   :  { %v6175_v54 = vpop.f32.mrb[81].mxu0  ;;  %v6216_v16 = vpop.f32.mrb[81].mxu1 }
 0x85f   :  { %v6177_v24 = vpop.f32.mrb[82].mxu0  ;;  %v6218_v56 = vpop.f32.mrb[82].mxu1  ;;  %12701 = vtanh.f32 %v14903_v32 }
 0x860   :  { %v6178_v43 = vpop.f32.mrb[83].mxu0  ;;  %v6219_v51 = vpop.f32.mrb[83].mxu1  ;;  %v16504_v24 = vld [vmem:[#allocation52_spill] sm:$0xff]  ;;  %v16505_v56 = vld [vmem:[#allocation53_spill] sm:$0xff] }
 0x861   :  { %v16506_v43 = vld [vmem:[#allocation54_spill] sm:$0xff]  ;;  %v16507_v51 = vld [vmem:[#allocation55_spill] sm:$0xff] }
 0x869   :  { %v12702_v19 = vpop.eup %12701 }
 0x86a   :  { %v6572_v15 = vmul.f32 %v12702_v19, %v12700_v42 }
 0x86c   :  { %v6573_v40 = vpack.c.bf16 %v6572_v15, %v6572_v15 }
 0x86e   :  { %6991 = vmatmul.mubr.bf16.vlgmr.msra.gmra.mrb[88].mxu0 %v6573_v40  ;;  %7032 = vmatmul.mubr.bf16.vlgmr.msra.gmra.mrb[88].mxu1 %v6573_v40 }
 0x86f   :  { %7041 = vmatpush1.bf16.msra.mxu0 %v16484_v23  ;;  %7082 = vmatpush1.bf16.msra.mxu1 %v16485_v35 }
 0x870   :  { %7042 = vmatprep.subr.bf16.mxu0 %v16486_v34  ;;  %7083 = vmatprep.subr.bf16.mxu1 %v16487_v27 }
 0x871   :  { %7072 = vmatprep.mubr.bf16.mxu0 %v16142_v53  ;;  %7113 = vmatprep.mubr.bf16.mxu1 %v16142_v53 }
 0x873   :  { %7043 = vmatpush1.bf16.msra.mxu0 %v16488_v10  ;;  %7084 = vmatpush1.bf16.msra.mxu1 %v16489_v4 }
 0x874   :  { %7044 = vmatprep.subr.bf16.mxu0 %v16490_v0  ;;  %7085 = vmatprep.subr.bf16.mxu1 %v16491_v26 }
 0x877   :  { %7045 = vmatpush1.bf16.msra.mxu0 %v16492_v49  ;;  %7086 = vmatpush1.bf16.msra.mxu1 %v16493_v28  ;;  %v16516_v49 = vld [vmem:[#allocation63_spill] sm:$0xff]  ;;  %v16517_v28 = vld [vmem:[#allocation64_spill] sm:$0xff] }
 0x878   :  { %7046 = vmatprep.subr.bf16.mxu0 %v16494_v11  ;;  %7087 = vmatprep.subr.bf16.mxu1 %v16495_v6 }
 0x87b   :  { %7047 = vmatpush1.bf16.msra.mxu0 %v16496_v13  ;;  %7088 = vmatpush1.bf16.msra.mxu1 %v16497_v38  ;;  %v16518_v38 = vld [vmem:[#allocation65_spill] sm:$0xff] }
 0x87c   :  { %7048 = vmatprep.subr.bf16.mxu0 %v16498_v5  ;;  %7089 = vmatprep.subr.bf16.mxu1 %v16499_v9  ;;  %v16519_v5 = vld [vmem:[#allocation66_spill] sm:$0xff] }
 0x87f   :  { %7049 = vmatpush1.bf16.msra.mxu0 %v14700_v21  ;;  %7090 = vmatpush1.bf16.msra.mxu1 %v14702_v61  ;;  %v16508_v21 = vld [vmem:[#allocation56_spill] sm:$0xff] }
 0x880   :  { %7050 = vmatprep.subr.bf16.mxu0 %v16500_v25  ;;  %7091 = vmatprep.subr.bf16.mxu1 %v16501_v36  ;;  %v16520_v25 = vld [vmem:[#allocation67_spill] sm:$0xff]  ;;  %v16521_v36 = vld [vmem:[#allocation68_spill] sm:$0xff] }
 0x883   :  { %7051 = vmatpush1.bf16.msra.mxu0 %v16502_v2  ;;  %7092 = vmatpush1.bf16.msra.mxu1 %v16503_v22  ;;  %v16522_v2 = vld [vmem:[#allocation69_spill] sm:$0xff]  ;;  %v16523_v22 = vld [vmem:[#allocation71_spill] sm:$0xff] }
 0x884   :  { %7052 = vmatprep.subr.bf16.mxu0 %v16504_v24  ;;  %7093 = vmatprep.subr.bf16.mxu1 %v16505_v56  ;;  %v16524_v24 = vld [vmem:[#allocation72_spill] sm:$0xff]  ;;  %v16525_v56 = vld [vmem:[#allocation73_spill] sm:$0xff] }
 0x887   :  { %7053 = vmatpush1.bf16.msra.mxu0 %v14724_v41  ;;  %7094 = vmatpush1.bf16.msra.mxu1 %v16506_v43  ;;  %v16526_v43 = vld [vmem:[#allocation74_spill] sm:$0xff] }
 0x888   :  { %7054 = vmatprep.subr.bf16.mxu0 %v16507_v51  ;;  %7095 = vmatprep.subr.bf16.mxu1 %v16508_v21  ;;  %v16527_v51 = vld [vmem:[#allocation75_spill] sm:$0xff]  ;;  %v16528_v21 = vld [vmem:[#allocation76_spill] sm:$0xff] }
 0x889   :  { %v6448_v61 = vpop.f32.mrb[84].mxu0  ;;  %v6489_v42 = vpop.f32.mrb[84].mxu1 }
 0x88a   :  { %v6496_v19 = vadd.f32 %v6448_v61, %v6173_v14  ;;  %v6498_v15 = vadd.f32 %v6489_v42, %v6214_v62  ;;  %v6450_v23 = vpop.f32.mrb[85].mxu0  ;;  %v6491_v35 = vpop.f32.mrb[85].mxu1 }
 0x88b   :  { %v6497_v34 = vadd.f32 %v6450_v23, %v6175_v54  ;;  %v6499_v27 = vadd.f32 %v6491_v35, %v6216_v16  ;;  %v6452_v10 = vpop.f32.mrb[86].mxu0  ;;  %v6493_v4 = vpop.f32.mrb[86].mxu1  ;;  %7055 = vmatpush1.bf16.msra.mxu0 %v14736_v20  ;;  %7096 = vmatpush1.bf16.msra.mxu1 %v14738_v1  ;;  %v16511_v1 = vld [vmem:[#allocation59_spill] sm:$0xff]  ;;  %v16513_v16 = vld [vmem:[#allocation61_spill] sm:$0xff] }
 0x88c   :  { %v6500_v41 = vadd.f32 %v6496_v19, %v13521_v45  ;;  %v6453_v0 = vpop.f32.mrb[87].mxu0  ;;  %v6494_v26 = vpop.f32.mrb[87].mxu1  ;;  %7315 = vmatprep.subr.bf16.mxu0 %v14744_v59  ;;  %7356 = vmatprep.subr.bf16.mxu1 %v14746_v8  ;;  %v16509_v8 = vld [vmem:[#allocation57_spill] sm:$0xff]  ;;  %v16510_v59 = vld [vmem:[#allocation58_spill] sm:$0xff] }
 0x88d   :  { %v6501_v14 = vadd.f32 %v6497_v34, %v13526_v17  ;;  %v6503_v20 = vadd.f32 %v6499_v27, %v13535_v29  ;;  %v7479_v4 = vld [vmem:[#allocation5 + $0x20] sm:$0xff]  ;;  %v7480_v26 = vld [vmem:[#allocation5 + $0x28] sm:$0xff] }
 0x88e   :  { %v11692_v62 = vmul.f32 -1.442695, %v6500_v41  ;;  %7073 = vmatmul.mubr.bf16.vlgmr.msra.gmra.mrb[92].mxu0 %v6573_v40  ;;  %7114 = vmatmul.mubr.bf16.vlgmr.msra.gmra.mrb[92].mxu1 %v6573_v40  ;;  %v7476_v41 = vld [vmem:[#allocation5 + $0x8] sm:$0xff] }
 0x88f   :  { %v11693_v54 = vmul.f32 -1.442695, %v6501_v14  ;;  %7316 = vmatpush1.bf16.msra.mxu0 %v14754_v7  ;;  %7357 = vmatpush1.bf16.msra.mxu1 %v14756_v63  ;;  %v16512_v7 = vld [vmem:[#allocation60_spill] sm:$0xff]  ;;  %v11694_v63 = vmul.f32 -1.442695, %v6503_v20  ;;  %v7483_v20 = vld [vmem:[#allocation5 + $0x40] sm:$0xff] }
 0x890   :  { %12703 = vpow2.f32 %v11692_v62  ;;  %7317 = vmatprep.subr.bf16.mxu0 %v14760_v52  ;;  %7358 = vmatprep.subr.bf16.mxu1 %v14762_v47  ;;  %v16514_v52 = vld [vmem:[#allocation62_spill] sm:$0xff]  ;;  %v14993_v62 = vcombine.low %v7476_v41, %v7480_v26 }
 0x891   :  { %12705 = vpow2.f32 %v11693_v54  ;;  %7347 = vmatprep.mubr.bf16.mxu0 %v16142_v53  ;;  %7388 = vmatprep.mubr.bf16.mxu1 %v16142_v53  ;;  %v16515_v47 = vld [vmem:[#allocation30_spill] sm:$0xff]  ;;  %v14995_v54 = vcombine.high %v7476_v41, %v7480_v26 }
 0x892   :  { %v6502_v40 = vadd.f32 %v6498_v15, %v16515_v47  ;;  %12707 = vpow2.f32 %v11694_v63  ;;  %v7524_v26 = vld [vmem:[#allocation5 + $0x188] sm:$0xff] }
 0x893   :  { %7318 = vmatpush1.bf16.msra.mxu0 %v16509_v8  ;;  %7359 = vmatpush1.bf16.msra.mxu1 %v16510_v59  ;;  %v7487_v8 = vld [vmem:[#allocation5 + $0x60] sm:$0xff]  ;;  %v7484_v59 = vld [vmem:[#allocation5 + $0x48] sm:$0xff] }
 0x894   :  { %7319 = vmatprep.subr.bf16.mxu0 %v16511_v1  ;;  %7360 = vmatprep.subr.bf16.mxu1 %v16512_v7  ;;  %12709 = vtanh.f32 %v6502_v40  ;;  %v15001_v1 = vcombine.high %v7483_v20, %v7487_v8  ;;  %v7488_v7 = vld [vmem:[#allocation5 + $0x68] sm:$0xff]  ;;  %v15003_v63 = vcombine.low %v7483_v20, %v7487_v8  ;;  %v7491_v40 = vld [vmem:[#allocation5 + $0x80] sm:$0xff] }
 0x895   :  { %v7528_v20 = vld [vmem:[#allocation5 + $0x1a8] sm:$0xff]  ;;  %v7531_v8 = vld [vmem:[#allocation5 + $0x1c0] sm:$0xff] }
 0x897   :  { %7320 = vmatpush1.bf16.msra.mxu0 %v16513_v16  ;;  %7361 = vmatpush1.bf16.msra.mxu1 %v16514_v52  ;;  %v15005_v16 = vcombine.low %v7484_v59, %v7488_v7  ;;  %v15007_v52 = vcombine.high %v7484_v59, %v7488_v7  ;;  %v15060_v59 = vcombine.high %v7524_v26, %v7528_v20  ;;  %v7535_v7 = vld [vmem:[#allocation5 + $0x1e0] sm:$0xff] }
 0x898   :  { %7321 = vmatprep.subr.bf16.mxu0 %v16516_v49  ;;  %7362 = vmatprep.subr.bf16.mxu1 %v16517_v28  ;;  %v7495_v49 = vld [vmem:[#allocation5 + $0xa0] sm:$0xff]  ;;  %v7492_v28 = vld [vmem:[#allocation5 + $0x88] sm:$0xff] }
 0x89a   :  { %v12704_v11 = vpop.eup %12703 }
 0x89b   :  { %v12706_v6 = vpop.eup %12705  ;;  %v6510_v13 = vadd.f32 1.0, %v12704_v11  ;;  %7322 = vmatpush1.bf16.msra.mxu0 %v16518_v38  ;;  %7363 = vmatpush1.bf16.msra.mxu1 %v16519_v5  ;;  %v15013_v11 = vcombine.high %v7491_v40, %v7495_v49 }
 0x89c   :  { %v6511_v9 = vadd.f32 1.0, %v12706_v6  ;;  %7323 = vmatprep.subr.bf16.mxu0 %v16520_v25  ;;  %7364 = vmatprep.subr.bf16.mxu1 %v16521_v36  ;;  %v12708_v61 = vpop.eup %12707  ;;  %v7496_v6 = vld [vmem:[#allocation5 + $0xa8] sm:$0xff]  ;;  %v7503_v25 = vld [vmem:[#allocation5 + $0xe0] sm:$0xff] }
 0x89d   :  { %12711 = vrcp.f32 %v6510_v13  ;;  %v6520_v35 = vadd.f32 1.0, %v12708_v61  ;;  %v15015_v13 = vcombine.low %v7491_v40, %v7495_v49  ;;  %v15017_v38 = vcombine.low %v7492_v28, %v7496_v6  ;;  %v7500_v36 = vld [vmem:[#allocation5 + $0xc8] sm:$0xff] }
 0x89e   :  { %12713 = vrcp.f32 %v6511_v9  ;;  %v12710_v42 = vpop.eup %12709  ;;  %v15019_v5 = vcombine.high %v7492_v28, %v7496_v6  ;;  %v7499_v9 = vld [vmem:[#allocation5 + $0xc0] sm:$0xff]  ;;  %v7508_v61 = vld [vmem:[#allocation5 + $0x108] sm:$0xff]  ;;  %v7477_v6 = vld [vmem:[#allocation5 + $0x10] sm:$0xff] }
 0x89f   :  { %7324 = vmatpush1.bf16.msra.mxu0 %v16522_v2  ;;  %7365 = vmatpush1.bf16.msra.mxu1 %v16523_v22  ;;  %12715 = vrcp.f32 %v6520_v35  ;;  %v15025_v2 = vcombine.high %v7499_v9, %v7503_v25  ;;  %v7504_v22 = vld [vmem:[#allocation5 + $0xe8] sm:$0xff] }
 0x8a0   :  { %7325 = vmatprep.subr.bf16.mxu0 %v16524_v24  ;;  %7366 = vmatprep.subr.bf16.mxu1 %v16525_v56  ;;  %v15027_v24 = vcombine.low %v7499_v9, %v7503_v25  ;;  %v15029_v56 = vcombine.low %v7500_v36, %v7504_v22  ;;  %v7532_v40 = vld [vmem:[#allocation5 + $0x1c8] sm:$0xff]  ;;  %v7481_v9 = vld [vmem:[#allocation5 + $0x30] sm:$0xff]  ;;  %v7478_v25 = vld [vmem:[#allocation5 + $0x18] sm:$0xff] }
 0x8a1   :  { %v7536_v49 = vld [vmem:[#allocation5 + $0x1e8] sm:$0xff] }
 0x8a3   :  { %7326 = vmatpush1.bf16.msra.mxu0 %v16526_v43  ;;  %7367 = vmatpush1.bf16.msra.mxu1 %v16527_v51  ;;  %v15031_v43 = vcombine.high %v7500_v36, %v7504_v22  ;;  %v7507_v51 = vld [vmem:[#allocation5 + $0x100] sm:$0xff]  ;;  %v15068_v36 = vcombine.low %v7524_v26, %v7528_v20  ;;  %v15070_v22 = vcombine.high %v7531_v8, %v7535_v7 }
 0x8a4   :  { %7327 = vmatprep.subr.bf16.mxu0 %v14826_v50  ;;  %7368 = vmatprep.subr.bf16.mxu1 %v16528_v21  ;;  %v7511_v21 = vld [vmem:[#allocation5 + $0x120] sm:$0xff] }
 0x8a7   :  { %v12712_v19 = vpop.eup %12711  ;;  %7328 = vmatpush1.bf16.msra.mxu0 %v14832_v31  ;;  %7369 = vmatpush1.bf16.msra.mxu1 %v14834_v39 }
 0x8a8   :  { %v12714_v15 = vpop.eup %12713  ;;  %v6524_v23 = vmul.f32 %v12712_v19, %v12710_v42  ;;  %7329 = vmatprep.subr.bf16.mxu0 %v14838_v55  ;;  %7370 = vmatprep.subr.bf16.mxu1 %v14840_v18  ;;  %v14985_v18 = vld [vmem:[%s15805_s6] ss:$0 sm:$0xff]  ;;  %v15037_v42 = vcombine.high %v7507_v51, %v7511_v21  ;;  %v7512_v19 = vld [vmem:[#allocation5 + $0x128] sm:$0xff] }
 0x8a9   :  { %v6523_v34 = vmul.f32 %v12714_v15, %v14851_v33  ;;  %v12716_v31 = vpop.eup %12715  ;;  %v7475_v33 = vld [vmem:[#allocation5] sm:$0xff]  ;;  %v15039_v15 = vcombine.low %v7507_v51, %v7511_v21  ;;  %v15043_v35 = vcombine.high %v7508_v61, %v7512_v19  ;;  %v15072_v51 = vcombine.low %v7477_v6, %v7481_v9  ;;  %v7482_v21 = vld [vmem:[#allocation5 + $0x38] sm:$0xff] }
 0x8aa   :  { %v14989_v0 = vcombine.high %v7475_v33, %v7479_v4  ;;  %v14991_v14 = vcombine.low %v7475_v33, %v7479_v4 }
 0x8ab   :  { %v14975_v27 = vadd.f32 %v6524_v23, %v6523_v34  ;;  %7330 = vmatpush1.bf16.msra.mxu0 %v14845_v3  ;;  %7371 = vmatpush1.bf16.msra.mxu1 %v14847_v12  ;;  %v15041_v23 = vcombine.low %v7508_v61, %v7512_v19  ;;  %v7515_v34 = vld [vmem:[#allocation5 + $0x140] sm:$0xff]  ;;  %16529 = vst [vmem:[#allocation35_spill] sm:$0xff] %v15072_v51 }
 0x8ac   :  { %7859 = vmatprep.subr.bf16.mxu0 %v14989_v0  ;;  %7900 = vmatprep.subr.bf16.mxu1 %v14995_v54  ;;  %v15075_v61 = vcombine.high %v7532_v40, %v7536_v49  ;;  %v15077_v19 = vcombine.low %v7478_v25, %v7482_v21 }
 0x8ad   :  { %12717 = vtanh.f32 %v14975_v27 }
 0x8ae   :  { %16530 = vst [vmem:[#allocation37_spill] sm:$0xff] %v15075_v61  ;;  %16531 = vst [vmem:[#allocation38_spill] sm:$0xff] %v15077_v19 }
 0x8b7   :  { %v12718_v39 = vpop.eup %12717 }
 0x8b8   :  { %v6527_v50 = vmul.f32 %v12718_v39, %v12716_v31  ;;  %v7519_v31 = vld [vmem:[#allocation5 + $0x160] sm:$0xff]  ;;  %v7516_v39 = vld [vmem:[#allocation5 + $0x148] sm:$0xff] }
 0x8ba   :  { %6529 = vst [vmem:[#allocation2 + $0xc] sm:$0x3] %v6527_v50  ;;  %v7122_v10 = vpack.c.bf16 %v6527_v50, %v6527_v50  ;;  %v15049_v50 = vcombine.low %v7515_v34, %v7519_v31 }
 0x8bc   :  { %7348 = vmatmul.mubr.bf16.vlgmr.msra.gmra.mrb[96].mxu0 %v7122_v10  ;;  %7389 = vmatmul.mubr.bf16.vlgmr.msra.gmra.mrb[96].mxu1 %v7122_v10  ;;  %v15051_v10 = vcombine.high %v7515_v34, %v7519_v31  ;;  %v15080_v34 = vcombine.low %v7531_v8, %v7535_v7  ;;  %v15084_v31 = vcombine.low %v7532_v40, %v7536_v49 }
 0x8bd   :  { %7891 = vmatprep.mubr.bf16.mxu0 %v16142_v53  ;;  %7932 = vmatprep.mubr.bf16.mxu1 %v16142_v53 }
 0x8be   :  { %7860 = vmatpush1.bf16.msra.mxu0 %v14991_v14  ;;  %7901 = vmatpush1.bf16.msra.mxu1 %v14993_v62  ;;  %16532 = vst [vmem:[#allocation31_spill] sm:$0xff] %v15080_v34  ;;  %16533 = vst [vmem:[#allocation70_spill] sm:$0xff] %v15084_v31 }
 0x8bf   :  { %7861 = vmatprep.subr.bf16.mxu0 %v15001_v1  ;;  %7902 = vmatprep.subr.bf16.mxu1 %v15007_v52 }
 0x8c1   :  { %v10771_v55 = vld [vmem:[#allocation2 + $0xc] sm:$0x3] }
 0x8c2   :  { %v10790_v12 = vmul.f32 %v14985_v18, %v10771_v55  ;;  %7862 = vmatpush1.bf16.msra.mxu0 %v15003_v63  ;;  %7903 = vmatpush1.bf16.msra.mxu1 %v15005_v16  ;;  %v7520_v55 = vld [vmem:[#allocation5 + $0x168] sm:$0xff] }
 0x8c3   :  { %7863 = vmatprep.subr.bf16.mxu0 %v15013_v11  ;;  %7904 = vmatprep.subr.bf16.mxu1 %v15019_v5  ;;  %v15053_v33 = vcombine.low %v7516_v39, %v7520_v55  ;;  %v15055_v4 = vcombine.high %v7516_v39, %v7520_v55  ;;  %v15086_v39 = vcombine.high %v7477_v6, %v7481_v9 }
 0x8c4   :  { %v10815_v3 = vsel %vm10796_vm0, %v10790_v12, 0.0  ;;  %v7523_v12 = vld [vmem:[#allocation5 + $0x180] sm:$0xff]  ;;  %v15089_v55 = vcombine.high %v7478_v25, %v7482_v21 }
 0x8c5   :  { %10816 = vadd.xlane.f32.xlu1 %v10815_v3  ;;  %v7527_v3 = vld [vmem:[#allocation5 + $0x1a0] sm:$0xff]  ;;  %16534 = vst [vmem:[#allocation34_spill] sm:$0xff] %v15086_v39 }
 0x8c6   :  { %7864 = vmatpush1.bf16.msra.mxu0 %v15015_v13  ;;  %7905 = vmatpush1.bf16.msra.mxu1 %v15017_v38  ;;  %v15057_v41 = vcombine.high %v7523_v12, %v7527_v3  ;;  %v15064_v28 = vcombine.low %v7523_v12, %v7527_v3  ;;  %16535 = vst [vmem:[#allocation32_spill] sm:$0xff] %v15089_v55  ;;  %v7436_v12 = vpop.permute.xlu0 %7435 }
 0x8c7   :  { %7865 = vmatprep.subr.bf16.mxu0 %v15025_v2  ;;  %7906 = vmatprep.subr.bf16.mxu1 %v15031_v43  ;;  %v7438_v3 = vmul.f32 %v7436_v12, %v16478_v58  ;;  %v7439_v26 = vmul.f32 %v7436_v12, %v16479_v44  ;;  %v7441_v21 = vmul.f32 %v7436_v12, %v16481_v37 }
 0x8c9   :  { %v7442_v20 = vadd.f32 %v7438_v3, %v16480_v46  ;;  %v7443_v40 = vadd.f32 %v7439_v26, %v16281_v57  ;;  %v7445_v3 = vadd.f32 %v7441_v21, %v16379_v48  ;;  %v7440_v46 = vmul.f32 %v7436_v12, %v16380_v30 }
 0x8ca   :  { %7866 = vmatpush1.bf16.msra.mxu0 %v15027_v24  ;;  %7907 = vmatpush1.bf16.msra.mxu1 %v15029_v56 }
 0x8cb   :  { %7867 = vmatprep.subr.bf16.mxu0 %v15037_v42  ;;  %7908 = vmatprep.subr.bf16.mxu1 %v15043_v35  ;;  %v7444_v26 = vadd.f32 %v7440_v46, %v16482_v60  ;;  %v7506_v60 = vld [vmem:[#allocation5 + $0xf8] sm:$0xff] }
 0x8ce   :  { %7868 = vmatpush1.bf16.msra.mxu0 %v15039_v15  ;;  %7909 = vmatpush1.bf16.msra.mxu1 %v15041_v23 }
 0x8cf   :  { %7869 = vmatprep.subr.bf16.mxu0 %v15051_v10  ;;  %7910 = vmatprep.subr.bf16.mxu1 %v15055_v4 }
 0x8d2   :  { %7870 = vmatpush1.bf16.msra.mxu0 %v15049_v50  ;;  %7911 = vmatpush1.bf16.msra.mxu1 %v15053_v33 }
 0x8d3   :  { %7871 = vmatprep.subr.bf16.mxu0 %v15057_v41  ;;  %7912 = vmatprep.subr.bf16.mxu1 %v15060_v59 }
 0x8d6   :  { %7872 = vmatpush1.bf16.msra.mxu0 %v15064_v28  ;;  %7913 = vmatpush1.bf16.msra.mxu1 %v15068_v36 }
 0x8d7   :  { %7873 = vmatprep.subr.bf16.mxu0 %v15070_v22  ;;  %7914 = vmatprep.subr.bf16.mxu1 %v15075_v61 }
 0x8da   :  { %7874 = vmatpush1.bf16.msra.mxu0 %v15080_v34  ;;  %7915 = vmatpush1.bf16.msra.mxu1 %v15084_v31 }
 0x8db   :  { %7941 = vmatprep.subr.bf16.mxu0 %v15086_v39  ;;  %7982 = vmatprep.subr.bf16.mxu1 %v15089_v55 }
 0x941   :  { %v6992_v8 = vpop.f32.mrb[88].mxu0  ;;  %v7033_v7 = vpop.f32.mrb[88].mxu1 }
 0x942   :  { %v7446_v49 = vadd.f32 %v7442_v20, %v6992_v8  ;;  %v6994_v6 = vpop.f32.mrb[89].mxu0  ;;  %v7035_v9 = vpop.f32.mrb[89].mxu1  ;;  %v7448_v8 = vadd.f32 %v7444_v26, %v7033_v7 }
 0x943   :  { %v7447_v25 = vadd.f32 %v7443_v40, %v6994_v6  ;;  %v6996_v39 = vpop.f32.mrb[90].mxu0  ;;  %v7037_v31 = vpop.f32.mrb[90].mxu1  ;;  %v7449_v44 = vadd.f32 %v7445_v3, %v7035_v9 }
 0x944   :  { %v11799_v55 = vmul.f32 -1.442695, %v7446_v49  ;;  %v6997_v34 = vpop.f32.mrb[91].mxu0  ;;  %v7038_v61 = vpop.f32.mrb[91].mxu1 }
 0x945   :  { %v11800_v58 = vmul.f32 -1.442695, %v7447_v25  ;;  %v11801_v20 = vmul.f32 -1.442695, %v7449_v44 }
 0x946   :  { %12719 = vpow2.f32 %v11799_v55 }
 0x947   :  { %12721 = vpow2.f32 %v11800_v58 }
 0x948   :  { %12723 = vpow2.f32 %v11801_v20 }
 0x949   :  { %12725 = vtanh.f32 %v7448_v8  ;;  %v7485_v8 = vld [vmem:[#allocation5 + $0x50] sm:$0xff] }
 0x950   :  { %v12720_v40 = vpop.eup %12719 }
 0x951   :  { %v12722_v6 = vpop.eup %12721  ;;  %v7456_v37 = vadd.f32 1.0, %v12720_v40  ;;  %v7489_v40 = vld [vmem:[#allocation5 + $0x70] sm:$0xff] }
 0x952   :  { %v7457_v31 = vadd.f32 1.0, %v12722_v6  ;;  %v12724_v61 = vpop.eup %12723  ;;  %v7486_v6 = vld [vmem:[#allocation5 + $0x58] sm:$0xff] }
 0x953   :  { %12727 = vrcp.f32 %v7456_v37  ;;  %v12726_v34 = vpop.eup %12725  ;;  %v7466_v49 = vadd.f32 1.0, %v12724_v61 }
 0x954   :  { %12729 = vrcp.f32 %v7457_v31  ;;  %v7490_v31 = vld [vmem:[#allocation5 + $0x78] sm:$0xff] }
 0x955   :  { %12731 = vrcp.f32 %v7466_v49  ;;  %v7497_v49 = vld [vmem:[#allocation5 + $0xb0] sm:$0xff] }
 0x95d   :  { %v12728_v58 = vpop.eup %12727 }
 0x95e   :  { %v12730_v39 = vpop.eup %12729  ;;  %v7470_v55 = vmul.f32 %v12728_v58, %v12726_v34  ;;  %v15117_v58 = vcombine.high %v7485_v8, %v7489_v40 }
 0x95f   :  { %v7469_v12 = vmul.f32 %v12730_v39, %v14903_v32  ;;  %v12732_v20 = vpop.eup %12731  ;;  %v15119_v39 = vcombine.high %v7486_v6, %v7490_v31 }
 0x960   :  { %16537 = vst [vmem:[#allocation33_spill] sm:$0xff] %v15117_v58 }
 0x961   :  { %v15104_v9 = vadd.f32 %v7470_v55, %v7469_v12  ;;  %v15106_v44 = vpop.f32.mrb[92].mxu0  ;;  %v15108_v46 = vpop.f32.mrb[92].mxu1  ;;  %16538 = vst [vmem:[#allocation39_spill] sm:$0xff] %v15119_v39  ;;  %v7493_v55 = vld [vmem:[#allocation5 + $0x90] sm:$0xff]  ;;  %v7494_v12 = vld [vmem:[#allocation5 + $0x98] sm:$0xff] }
 0x962   :  { %v15110_v7 = vpop.f32.mrb[93].mxu0  ;;  %v15112_v25 = vpop.f32.mrb[93].mxu1 }
 0x963   :  { %16536 = vst [vmem:[#allocation36_spill] sm:$0xff] %v15104_v9  ;;  %v7078_v37 = vpop.f32.mrb[94].mxu0  ;;  %v7119_v21 = vpop.f32.mrb[94].mxu1  ;;  %12733 = vtanh.f32 %v15104_v9  ;;  %v7502_v9 = vld [vmem:[#allocation5 + $0xd8] sm:$0xff] }
 0x964   :  { %v7079_v3 = vpop.f32.mrb[95].mxu0  ;;  %v7120_v26 = vpop.f32.mrb[95].mxu1  ;;  %v7498_v37 = vld [vmem:[#allocation5 + $0xb8] sm:$0xff]  ;;  %v15125_v21 = vcombine.low %v7485_v8, %v7489_v40  ;;  %v15139_v8 = vcombine.low %v7493_v55, %v7497_v49 }
 0x965   :  { %v15127_v3 = vcombine.low %v7486_v6, %v7490_v31  ;;  %v15131_v26 = vcombine.high %v7493_v55, %v7497_v49  ;;  %v15141_v40 = vcombine.low %v7494_v12, %v7498_v37  ;;  %v15147_v31 = vcombine.high %v7502_v9, %v7506_v60 }
 0x966   :  { %16539 = vst [vmem:[#allocation40_spill] sm:$0xff] %v15125_v21  ;;  %16543 = vst [vmem:[#allocation43_spill] sm:$0xff] %v15139_v8  ;;  %v15153_v49 = vcombine.low %v7502_v9, %v7506_v60 }
 0x967   :  { %16540 = vst [vmem:[#allocation41_spill] sm:$0xff] %v15127_v3  ;;  %16541 = vst [vmem:[#allocation17_spill] sm:$0xff] %v15131_v26 }
 0x968   :  { %16544 = vst [vmem:[#allocation18_spill] sm:$0xff] %v15141_v40  ;;  %16546 = vst [vmem:[#allocation21_spill] sm:$0xff] %v15147_v31 }
 0x969   :  { %16548 = vst [vmem:[#allocation25_spill] sm:$0xff] %v15153_v49 }
 0x96d   :  { %v12734_v32 = vpop.eup %12733 }
 0x96e   :  { %v7473_v61 = vmul.f32 %v12734_v32, %v12732_v20  ;;  %v15133_v20 = vcombine.high %v7494_v12, %v7498_v37  ;;  %v7501_v32 = vld [vmem:[#allocation5 + $0xd0] sm:$0xff] }
 0x970   :  { %v15115_v34 = vpack.c.bf16 %v7473_v61, %v7473_v61  ;;  %16542 = vst [vmem:[#allocation42_spill] sm:$0xff] %v15133_v20  ;;  %v7505_v61 = vld [vmem:[#allocation5 + $0xf0] sm:$0xff] }
 0x971   :  { %v15145_v6 = vcombine.high %v7501_v32, %v7505_v61  ;;  %v15151_v55 = vcombine.low %v7501_v32, %v7505_v61 }
 0x972   :  { %7892 = vmatmul.mubr.bf16.vlgmr.msra.gmra.mrb[100].mxu0 %v15115_v34  ;;  %7933 = vmatmul.mubr.bf16.vlgmr.msra.gmra.mrb[100].mxu1 %v15115_v34 }
 0x973   :  { %7942 = vmatpush1.bf16.msra.mxu0 %v15072_v51  ;;  %7983 = vmatpush1.bf16.msra.mxu1 %v15077_v19  ;;  %16545 = vst [vmem:[#allocation44_spill] sm:$0xff] %v15145_v6  ;;  %v7510_v19 = vld [vmem:[#allocation5 + $0x118] sm:$0xff]  ;;  %16547 = vst [vmem:[#allocation45_spill] sm:$0xff] %v15151_v55 }
 0x974   :  { %7943 = vmatprep.subr.bf16.mxu0 %v15117_v58  ;;  %7984 = vmatprep.subr.bf16.mxu1 %v15119_v39  ;;  %v7509_v39 = vld [vmem:[#allocation5 + $0x110] sm:$0xff]  ;;  %v7514_v51 = vld [vmem:[#allocation5 + $0x138] sm:$0xff] }
 0x975   :  { %7973 = vmatprep.mubr.bf16.mxu0 %v16142_v53  ;;  %8014 = vmatprep.mubr.bf16.mxu1 %v16142_v53  ;;  %v7513_v58 = vld [vmem:[#allocation5 + $0x130] sm:$0xff]  ;;  %v15159_v37 = vcombine.high %v7510_v19, %v7514_v51  ;;  %v15165_v60 = vcombine.low %v7510_v19, %v7514_v51 }
 0x976   :  { %v15157_v12 = vcombine.high %v7509_v39, %v7513_v58  ;;  %v15163_v32 = vcombine.low %v7509_v39, %v7513_v58 }
 0x977   :  { %7944 = vmatpush1.bf16.msra.mxu0 %v15125_v21  ;;  %7985 = vmatpush1.bf16.msra.mxu1 %v15127_v3  ;;  %16550 = vst [vmem:[#allocation47_spill] sm:$0xff] %v15159_v37  ;;  %v7518_v3 = vld [vmem:[#allocation5 + $0x158] sm:$0xff] }
 0x978   :  { %7945 = vmatprep.subr.bf16.mxu0 %v15131_v26  ;;  %7986 = vmatprep.subr.bf16.mxu1 %v15133_v20  ;;  %16549 = vst [vmem:[#allocation46_spill] sm:$0xff] %v15157_v12  ;;  %v7517_v20 = vld [vmem:[#allocation5 + $0x150] sm:$0xff]  ;;  %v7522_v21 = vld [vmem:[#allocation5 + $0x178] sm:$0xff] }
 0x979   :  { %v7521_v26 = vld [vmem:[#allocation5 + $0x170] sm:$0xff]  ;;  %v15171_v61 = vcombine.high %v7518_v3, %v7522_v21  ;;  %v15177_v51 = vcombine.low %v7518_v3, %v7522_v21 }
 0x97a   :  { %v15169_v9 = vcombine.high %v7517_v20, %v7521_v26  ;;  %v15175_v58 = vcombine.low %v7517_v20, %v7521_v26 }
 0x97b   :  { %7946 = vmatpush1.bf16.msra.mxu0 %v15139_v8  ;;  %7987 = vmatpush1.bf16.msra.mxu1 %v15141_v40  ;;  %16551 = vst [vmem:[#allocation48_spill] sm:$0xff] %v15171_v61  ;;  %v7526_v40 = vld [vmem:[#allocation5 + $0x198] sm:$0xff] }
 0x97c   :  { %7947 = vmatprep.subr.bf16.mxu0 %v15145_v6  ;;  %7988 = vmatprep.subr.bf16.mxu1 %v15147_v31  ;;  %v7525_v31 = vld [vmem:[#allocation5 + $0x190] sm:$0xff]  ;;  %v7530_v8 = vld [vmem:[#allocation5 + $0x1b8] sm:$0xff]  ;;  %16552 = vst [vmem:[#allocation49_spill] sm:$0xff] %v15175_v58 }
 0x97d   :  { %v7529_v6 = vld [vmem:[#allocation5 + $0x1b0] sm:$0xff]  ;;  %v15183_v39 = vcombine.high %v7526_v40, %v7530_v8  ;;  %v15189_v21 = vcombine.low %v7526_v40, %v7530_v8  ;;  %v15207_v40 = vld [vmem:[#allocation8 + $0xc] ss:$16 sps:$4 sm:$0xff]  }
 0x97e   :  { %v15181_v19 = vcombine.high %v7525_v31, %v7529_v6  ;;  %v15187_v26 = vcombine.low %v7525_v31, %v7529_v6  ;;  %v15205_v8 = vld [vmem:[#allocation8 + $0x4] ss:$16 sps:$4 sm:$0xff]   ;;  %16561 = vst [vmem:[#allocation58_spill] sm:$0xff] %v15207_v40 }
 0x97f   :  { %7948 = vmatpush1.bf16.msra.mxu0 %v15151_v55  ;;  %7989 = vmatpush1.bf16.msra.mxu1 %v15153_v49  ;;  %16554 = vst [vmem:[#allocation51_spill] sm:$0xff] %v15183_v39  ;;  %v7534_v49 = vld [vmem:[#allocation5 + $0x1d8] sm:$0xff]  ;;  %16556 = vst [vmem:[#allocation53_spill] sm:$0xff] %v15189_v21 }
 0x980   :  { %7949 = vmatprep.subr.bf16.mxu0 %v15157_v12  ;;  %7990 = vmatprep.subr.bf16.mxu1 %v15159_v37  ;;  %16553 = vst [vmem:[#allocation50_spill] sm:$0xff] %v15181_v19  ;;  %v7533_v37 = vld [vmem:[#allocation5 + $0x1d0] sm:$0xff]  ;;  %v7538_v55 = vld [vmem:[#allocation5 + $0x1f8] sm:$0xff]  ;;  %16555 = vst [vmem:[#allocation52_spill] sm:$0xff] %v15187_v26 }
 0x981   :  { %v7537_v12 = vld [vmem:[#allocation5 + $0x1f0] sm:$0xff]  ;;  %v15195_v20 = vcombine.high %v7534_v49, %v7538_v55 }
 0x982   :  { %v15193_v3 = vcombine.high %v7533_v37, %v7537_v12 }
 0x983   :  { %7950 = vmatpush1.bf16.msra.mxu0 %v15163_v32  ;;  %7991 = vmatpush1.bf16.msra.mxu1 %v15165_v60  ;;  %16558 = vst [vmem:[#allocation55_spill] sm:$0xff] %v15195_v20 }
 0x984   :  { %7951 = vmatprep.subr.bf16.mxu0 %v15169_v9  ;;  %7992 = vmatprep.subr.bf16.mxu1 %v15171_v61  ;;  %16557 = vst [vmem:[#allocation54_spill] sm:$0xff] %v15193_v3  ;;  %v15199_v61 = vcombine.low %v7533_v37, %v7537_v12  ;;  %v15213_v12 = vld [vmem:[#allocation8 + $0x8] ss:$16 sps:$4 sm:$0xff]  }
 0x986   :  { %16559 = vst [vmem:[#allocation56_spill] sm:$0xff] %v15199_v61 }
 0x987   :  { %7952 = vmatpush1.bf16.msra.mxu0 %v15175_v58  ;;  %7993 = vmatpush1.bf16.msra.mxu1 %v15177_v51  ;;  %v15201_v58 = vcombine.low %v7534_v49, %v7538_v55 }
 0x988   :  { %7953 = vmatprep.subr.bf16.mxu0 %v15181_v19  ;;  %7994 = vmatprep.subr.bf16.mxu1 %v15183_v39 }
 0x989   :  { %16560 = vst [vmem:[#allocation57_spill] sm:$0xff] %v15201_v58 }
 0x98b   :  { %7954 = vmatpush1.bf16.msra.mxu0 %v15187_v26  ;;  %7995 = vmatpush1.bf16.msra.mxu1 %v15189_v21  ;;  %v15211_v26 = vld [vmem:[#allocation8] ss:$16 sps:$4 sm:$0xff]   ;;  %v15221_v21 = vld [vmem:[#allocation8 + $0x2c] ss:$16 sps:$4 sm:$0xff]  }
 0x98c   :  { %7955 = vmatprep.subr.bf16.mxu0 %v15193_v3  ;;  %7996 = vmatprep.subr.bf16.mxu1 %v15195_v20  ;;  %v15219_v3 = vld [vmem:[#allocation8 + $0x24] ss:$16 sps:$4 sm:$0xff]  }
 0x98f   :  { %v7349_v6 = vpop.f32.mrb[96].mxu0  ;;  %v7390_v31 = vpop.f32.mrb[96].mxu1  ;;  %7956 = vmatpush1.bf16.msra.mxu0 %v15199_v61  ;;  %7997 = vmatpush1.bf16.msra.mxu1 %v15201_v58 }
 0x990   :  { %v7397_v55 = vadd.f32 %v7349_v6, %v15106_v44  ;;  %v7399_v49 = vadd.f32 %v7390_v31, %v15108_v46  ;;  %v7351_v37 = vpop.f32.mrb[97].mxu0  ;;  %v7392_v20 = vpop.f32.mrb[97].mxu1  ;;  %8216 = vmatprep.subr.bf16.mxu0 %v15205_v8  ;;  %8257 = vmatprep.subr.bf16.mxu1 %v15207_v40  ;;  %v15231_v40 = vld [vmem:[#allocation8 + $0x20] ss:$16 sps:$4 sm:$0xff]  }
 0x991   :  { %v7398_v58 = vadd.f32 %v7351_v37, %v15110_v7  ;;  %v7400_v61 = vadd.f32 %v7392_v20, %v15112_v25  ;;  %v7353_v39 = vpop.f32.mrb[98].mxu0  ;;  %v7394_v19 = vpop.f32.mrb[98].mxu1  ;;  %v15233_v7 = vld [vmem:[#allocation8 + $0x28] ss:$16 sps:$4 sm:$0xff]   ;;  %v15253_v37 = vld [vmem:[#allocation8 + $0x6c] ss:$16 sps:$4 sm:$0xff]  }
 0x992   :  { %v7401_v44 = vadd.f32 %v7397_v55, %v13521_v45  ;;  %v7354_v6 = vpop.f32.mrb[99].mxu0  ;;  %v7395_v46 = vpop.f32.mrb[99].mxu1  ;;  %7974 = vmatmul.mubr.bf16.vlgmr.msra.gmra.mrb[104].mxu0 %v15115_v34  ;;  %8015 = vmatmul.mubr.bf16.vlgmr.msra.gmra.mrb[104].mxu1 %v15115_v34  ;;  %v15237_v19 = vld [vmem:[#allocation8 + $0x44] ss:$16 sps:$4 sm:$0xff]   ;;  %v15239_v39 = vld [vmem:[#allocation8 + $0x4c] ss:$16 sps:$4 sm:$0xff]  }
 0x993   :  { %v7402_v31 = vadd.f32 %v7398_v58, %v13526_v17  ;;  %8217 = vmatpush1.bf16.msra.mxu0 %v15211_v26  ;;  %8258 = vmatpush1.bf16.msra.mxu1 %v15213_v12  ;;  %16562 = vst [vmem:[#allocation59_spill] sm:$0xff] %v15239_v39  ;;  %v15245_v58 = vld [vmem:[#allocation8 + $0x40] ss:$16 sps:$4 sm:$0xff]   ;;  %v15247_v20 = vld [vmem:[#allocation8 + $0x48] ss:$16 sps:$4 sm:$0xff]   ;;  %16566 = vst [vmem:[#allocation63_spill] sm:$0xff] %v15253_v37 }
 0x994   :  { %v11795_v25 = vmul.f32 -1.442695, %v7401_v44  ;;  %8218 = vmatprep.subr.bf16.mxu0 %v15219_v3  ;;  %8259 = vmatprep.subr.bf16.mxu1 %v15221_v21  ;;  %16563 = vst [vmem:[#allocation60_spill] sm:$0xff] %v15245_v58  ;;  %16564 = vst [vmem:[#allocation61_spill] sm:$0xff] %v15247_v20  ;;  %v15251_v55 = vld [vmem:[#allocation8 + $0x64] ss:$16 sps:$4 sm:$0xff]   ;;  %v7404_v44 = vadd.f32 %v7400_v61, %v13535_v29 }
 0x995   :  { %v11796_v34 = vmul.f32 -1.442695, %v7402_v31  ;;  %8248 = vmatprep.mubr.bf16.mxu0 %v16142_v53  ;;  %8289 = vmatprep.mubr.bf16.mxu1 %v16142_v53  ;;  %16565 = vst [vmem:[#allocation62_spill] sm:$0xff] %v15251_v55  ;;  %v15258_v6 = vld [vmem:[#allocation8 + $0x60] ss:$16 sps:$4 sm:$0xff]  }
 0x996   :  { %12735 = vpow2.f32 %v11795_v25  ;;  %v15260_v46 = vld [vmem:[#allocation8 + $0x68] ss:$16 sps:$4 sm:$0xff]   ;;  %v15264_v31 = vld [vmem:[#allocation8 + $0x84] ss:$16 sps:$4 sm:$0xff]   ;;  %v15266_v25 = vld [vmem:[#allocation8 + $0x8c] ss:$16 sps:$4 sm:$0xff]  }
 0x997   :  { %12737 = vpow2.f32 %v11796_v34  ;;  %8219 = vmatpush1.bf16.msra.mxu0 %v15231_v40  ;;  %8260 = vmatpush1.bf16.msra.mxu1 %v15233_v7  ;;  %16567 = vst [vmem:[#allocation64_spill] sm:$0xff] %v15260_v46  ;;  %16568 = vst [vmem:[#allocation65_spill] sm:$0xff] %v15266_v25  ;;  %v11797_v34 = vmul.f32 -1.442695, %v7404_v44  ;;  %v15271_v61 = vld [vmem:[#allocation8 + $0x80] ss:$16 sps:$4 sm:$0xff]  }
 0x998   :  { %8220 = vmatprep.subr.bf16.mxu0 %v15237_v19  ;;  %8261 = vmatprep.subr.bf16.mxu1 %v15239_v39  ;;  %v7403_v39 = vadd.f32 %v7399_v49, %v16515_v47  ;;  %16569 = vst [vmem:[#allocation66_spill] sm:$0xff] %v15271_v61  ;;  %v15283_v47 = vld [vmem:[#allocation8 + $0xa0] ss:$16 sps:$4 sm:$0xff]  }
 0x999   :  { %12739 = vpow2.f32 %v11797_v34  ;;  %16573 = vst [vmem:[#allocation71_spill] sm:$0xff] %v15283_v47  ;;  %v15301_v34 = vld [vmem:[#allocation8 + $0xe4] ss:$16 sps:$4 sm:$0xff]  }
 0x99a   :  { %12741 = vtanh.f32 %v7403_v39  ;;  %v15297_v39 = vld [vmem:[#allocation8 + $0xc8] ss:$16 sps:$4 sm:$0xff]   ;;  %16579 = vst [vmem:[#allocation77_spill] sm:$0xff] %v15301_v34 }
 0x99b   :  { %8221 = vmatpush1.bf16.msra.mxu0 %v15245_v58  ;;  %8262 = vmatpush1.bf16.msra.mxu1 %v15247_v20  ;;  %v15273_v20 = vld [vmem:[#allocation8 + $0x88] ss:$16 sps:$4 sm:$0xff]   ;;  %16578 = vst [vmem:[#allocation76_spill] sm:$0xff] %v15297_v39 }
 0x99c   :  { %8222 = vmatprep.subr.bf16.mxu0 %v15251_v55  ;;  %8263 = vmatprep.subr.bf16.mxu1 %v15253_v37  ;;  %16570 = vst [vmem:[#allocation67_spill] sm:$0xff] %v15273_v20  ;;  %v15277_v37 = vld [vmem:[#allocation8 + $0xa4] ss:$16 sps:$4 sm:$0xff]   ;;  %v15279_v55 = vld [vmem:[#allocation8 + $0xac] ss:$16 sps:$4 sm:$0xff]  }
 0x99d   :  { %16571 = vst [vmem:[#allocation68_spill] sm:$0xff] %v15277_v37  ;;  %16572 = vst [vmem:[#allocation69_spill] sm:$0xff] %v15279_v55 }
 0x99f   :  { %8223 = vmatpush1.bf16.msra.mxu0 %v15258_v6  ;;  %8264 = vmatpush1.bf16.msra.mxu1 %v15260_v46  ;;  %v15285_v46 = vld [vmem:[#allocation8 + $0xa8] ss:$16 sps:$4 sm:$0xff]  }
 0x9a0   :  { %v12736_v58 = vpop.eup %12735  ;;  %8224 = vmatprep.subr.bf16.mxu0 %v15264_v31  ;;  %8265 = vmatprep.subr.bf16.mxu1 %v15266_v25  ;;  %16574 = vst [vmem:[#allocation72_spill] sm:$0xff] %v15285_v46  ;;  %v15289_v25 = vld [vmem:[#allocation8 + $0xc4] ss:$16 sps:$4 sm:$0xff]  }
 0x9a1   :  { %v12738_v44 = vpop.eup %12737  ;;  %v7411_v29 = vadd.f32 1.0, %v12736_v58  ;;  %16575 = vst [vmem:[#allocation73_spill] sm:$0xff] %v15289_v25  ;;  %v15291_v58 = vld [vmem:[#allocation8 + $0xcc] ss:$16 sps:$4 sm:$0xff]  }
 0x9a2   :  { %v7412_v49 = vadd.f32 1.0, %v12738_v44  ;;  %16576 = vst [vmem:[#allocation74_spill] sm:$0xff] %v15291_v58  ;;  %v15303_v44 = vld [vmem:[#allocation8 + $0xec] ss:$16 sps:$4 sm:$0xff]  }
 0x9a3   :  { %12743 = vrcp.f32 %v7411_v29  ;;  %8225 = vmatpush1.bf16.msra.mxu0 %v15271_v61  ;;  %8266 = vmatpush1.bf16.msra.mxu1 %v15273_v20  ;;  %v15295_v29 = vld [vmem:[#allocation8 + $0xc0] ss:$16 sps:$4 sm:$0xff]   ;;  %16580 = vst [vmem:[#allocation78_spill] sm:$0xff] %v15303_v44 }
 0x9a4   :  { %12745 = vrcp.f32 %v7412_v49  ;;  %8226 = vmatprep.subr.bf16.mxu0 %v15277_v37  ;;  %8267 = vmatprep.subr.bf16.mxu1 %v15279_v55  ;;  %16577 = vst [vmem:[#allocation75_spill] sm:$0xff] %v15295_v29  ;;  %v12740_v49 = vpop.eup %12739 }
 0x9a5   :  { %v12742_v55 = vpop.eup %12741  ;;  %v7421_v20 = vadd.f32 1.0, %v12740_v49 }
 0x9a7   :  { %8227 = vmatpush1.bf16.msra.mxu0 %v15283_v47  ;;  %8268 = vmatpush1.bf16.msra.mxu1 %v15285_v46  ;;  %v15307_v47 = vld [vmem:[#allocation8 + $0xe0] ss:$16 sps:$4 sm:$0xff]   ;;  %v15309_v46 = vld [vmem:[#allocation8 + $0xe8] ss:$16 sps:$4 sm:$0xff]   ;;  %12747 = vrcp.f32 %v7421_v20 }
 0x9a8   :  { %8228 = vmatprep.subr.bf16.mxu0 %v15289_v25  ;;  %8269 = vmatprep.subr.bf16.mxu1 %v15291_v58 }
 0x9ab   :  { %8229 = vmatpush1.bf16.msra.mxu0 %v15295_v29  ;;  %8270 = vmatpush1.bf16.msra.mxu1 %v15297_v39 }
 0x9ac   :  { %8230 = vmatprep.subr.bf16.mxu0 %v15301_v34  ;;  %8271 = vmatprep.subr.bf16.mxu1 %v15303_v44 }
 0x9ad   :  { %v12744_v25 = vpop.eup %12743 }
 0x9ae   :  { %v12746_v58 = vpop.eup %12745  ;;  %v7425_v37 = vmul.f32 %v12744_v25, %v12742_v55  ;;  %v16590_v25 = vld [vmem:[#allocation28_spill] sm:$0xff] }
 0x9af   :  { %v7424_v61 = vmul.f32 %v12746_v58, %v14975_v27  ;;  %8231 = vmatpush1.bf16.msra.mxu0 %v15307_v47  ;;  %8272 = vmatpush1.bf16.msra.mxu1 %v15309_v46 }
 0x9b0   :  { %8760 = vmatprep.subr.bf16.mxu0 %v14989_v0  ;;  %8801 = vmatprep.subr.bf16.mxu1 %v14995_v54  ;;  %v16583_v54 = vld [vmem:[#allocation70_spill] sm:$0xff] }
 0x9b1   :  { %v15318_v39 = vadd.f32 %v7425_v37, %v7424_v61  ;;  %v12748_v44 = vpop.eup %12747 }
 0x9b3   :  { %12749 = vtanh.f32 %v15318_v39 }
 0x9bd   :  { %v12750_v34 = vpop.eup %12749 }
 0x9be   :  { %v7428_v29 = vmul.f32 %v12750_v34, %v12748_v44 }
 0x9c0   :  { %7430 = vst [vmem:[#allocation2 + $0xe] sm:$0x3] %v7428_v29  ;;  %v8023_v55 = vpack.c.bf16 %v7428_v29, %v7428_v29 }
 0x9c2   :  { %8249 = vmatmul.mubr.bf16.vlgmr.msra.gmra.mrb[108].mxu0 %v8023_v55  ;;  %8290 = vmatmul.mubr.bf16.vlgmr.msra.gmra.mrb[108].mxu1 %v8023_v55 }
 0x9c3   :  { %8761 = vmatpush1.bf16.msra.mxu0 %v14991_v14  ;;  %8802 = vmatpush1.bf16.msra.mxu1 %v14993_v62  ;;  %v16582_v62 = vld [vmem:[#allocation31_spill] sm:$0xff] }
 0x9c4   :  { %8762 = vmatprep.subr.bf16.mxu0 %v15001_v1  ;;  %8803 = vmatprep.subr.bf16.mxu1 %v15007_v52  ;;  %v16584_v1 = vld [vmem:[#allocation34_spill] sm:$0xff]  ;;  %v16586_v52 = vld [vmem:[#allocation19_spill] sm:$0xff] }
 0x9c5   :  { %8792 = vmatprep.mubr.bf16.mxu0 %v16142_v53  ;;  %8833 = vmatprep.mubr.bf16.mxu1 %v16142_v53 }
 0x9c7   :  { %v10772_v27 = vld [vmem:[#allocation2 + $0xe] sm:$0x3]  ;;  %8763 = vmatpush1.bf16.msra.mxu0 %v15003_v63  ;;  %8804 = vmatpush1.bf16.msra.mxu1 %v15005_v16  ;;  %v16585_v63 = vld [vmem:[#allocation32_spill] sm:$0xff]  ;;  %v8337_v16 = vpop.permute.xlu1 %8336 }
 0x9c8   :  { %v10791_v0 = vmul.f32 %v14985_v18, %v10772_v27  ;;  %8764 = vmatprep.subr.bf16.mxu0 %v15013_v11  ;;  %8805 = vmatprep.subr.bf16.mxu1 %v15019_v5  ;;  %v16581_v18 = vld [vmem:[#allocation37_spill] sm:$0xff]  ;;  %v8339_v11 = vmul.f32 %v8337_v16, %v16586_v52  ;;  %v16588_v5 = vld [vmem:[#allocation22_spill] sm:$0xff]  ;;  %v8341_v20 = vmul.f32 %v8337_v16, %v16380_v30 }
 0x9ca   :  { %v10818_v14 = vsel %vm10796_vm0, %v10791_v0, 0.0  ;;  %v8345_v61 = vadd.f32 %v8341_v20, %v16590_v25  ;;  %v16598_v20 = vld [vmem:[#allocation17_spill] sm:$0xff] }
 0x9cb   :  { %10819 = vadd.xlane.f32.xlu0 %v10818_v14  ;;  %8765 = vmatpush1.bf16.msra.mxu0 %v15015_v13  ;;  %v16587_v13 = vld [vmem:[#allocation20_spill] sm:$0xff] }
 0x9cc   :  { %8806 = vmatpush1.bf16.msra.mxu1 %v15017_v38  ;;  %8766 = vmatprep.subr.bf16.mxu0 %v15025_v2  ;;  %v8340_v38 = vmul.f32 %v8337_v16, %v16587_v13  ;;  %v8343_v2 = vadd.f32 %v8339_v11, %v16588_v5 }
 0x9cd   :  { %8807 = vmatprep.subr.bf16.mxu1 %v15031_v43 }
 0x9ce   :  { %v8344_v43 = vadd.f32 %v8340_v38, %v16281_v57 }
 0x9cf   :  { %8767 = vmatpush1.bf16.msra.mxu0 %v15027_v24 }
 0x9d0   :  { %8808 = vmatpush1.bf16.msra.mxu1 %v15029_v56  ;;  %8768 = vmatprep.subr.bf16.mxu0 %v15037_v42 }
 0x9d1   :  { %8809 = vmatprep.subr.bf16.mxu1 %v15043_v35 }
 0x9d3   :  { %8769 = vmatpush1.bf16.msra.mxu0 %v15039_v15 }
 0x9d4   :  { %8810 = vmatpush1.bf16.msra.mxu1 %v15041_v23  ;;  %8770 = vmatprep.subr.bf16.mxu0 %v15051_v10 }
 0x9d5   :  { %8811 = vmatprep.subr.bf16.mxu1 %v15055_v4 }
 0x9d7   :  { %8771 = vmatpush1.bf16.msra.mxu0 %v15049_v50  ;;  %v16589_v50 = vld [vmem:[#allocation24_spill] sm:$0xff] }
 0x9d8   :  { %8812 = vmatpush1.bf16.msra.mxu1 %v15053_v33  ;;  %8772 = vmatprep.subr.bf16.mxu0 %v15057_v41  ;;  %v8342_v10 = vmul.f32 %v8337_v16, %v16589_v50 }
 0x9d9   :  { %8813 = vmatprep.subr.bf16.mxu1 %v15060_v59 }
 0x9db   :  { %8773 = vmatpush1.bf16.msra.mxu0 %v15064_v28 }
 0x9dc   :  { %8814 = vmatpush1.bf16.msra.mxu1 %v15068_v36  ;;  %8774 = vmatprep.subr.bf16.mxu0 %v15070_v22  ;;  %v8346_v22 = vadd.f32 %v8342_v10, %v16379_v48 }
 0x9dd   :  { %8815 = vmatprep.subr.bf16.mxu1 %v16581_v18 }
 0x9df   :  { %8775 = vmatpush1.bf16.msra.mxu0 %v16582_v62 }
 0x9e0   :  { %8816 = vmatpush1.bf16.msra.mxu1 %v16583_v54  ;;  %8842 = vmatprep.subr.bf16.mxu0 %v16584_v1  ;;  %v16591_v1 = vld [vmem:[#allocation36_spill] sm:$0xff] }
 0x9e1   :  { %8883 = vmatprep.subr.bf16.mxu1 %v16585_v63 }
 0xa45   :  { %v7893_v24 = vpop.f32.mrb[100].mxu0  ;;  %v7934_v56 = vpop.f32.mrb[100].mxu1 }
 0xa46   :  { %v8347_v42 = vadd.f32 %v8343_v2, %v7893_v24  ;;  %v7895_v15 = vpop.f32.mrb[101].mxu0  ;;  %v7936_v23 = vpop.f32.mrb[101].mxu1  ;;  %v8349_v29 = vadd.f32 %v8345_v61, %v7934_v56  ;;  %v16600_v61 = vld [vmem:[#allocation43_spill] sm:$0xff] }
 0xa47   :  { %v8348_v35 = vadd.f32 %v8344_v43, %v7895_v15  ;;  %v7897_v33 = vpop.f32.mrb[102].mxu0  ;;  %v7938_v4 = vpop.f32.mrb[102].mxu1  ;;  %v8350_v37 = vadd.f32 %v8346_v22, %v7936_v23  ;;  %v16597_v22 = vld [vmem:[#allocation41_spill] sm:$0xff] }
 0xa48   :  { %v11902_v41 = vmul.f32 -1.442695, %v8347_v42  ;;  %v7898_v59 = vpop.f32.mrb[103].mxu0  ;;  %v7939_v28 = vpop.f32.mrb[103].mxu1  ;;  %v16592_v4 = vld [vmem:[#allocation35_spill] sm:$0xff] }
 0xa49   :  { %v11903_v36 = vmul.f32 -1.442695, %v8348_v35  ;;  %v11904_v58 = vmul.f32 -1.442695, %v8350_v37  ;;  %v16594_v59 = vld [vmem:[#allocation33_spill] sm:$0xff]  ;;  %v16595_v28 = vld [vmem:[#allocation39_spill] sm:$0xff] }
 0xa4a   :  { %12751 = vpow2.f32 %v11902_v41  ;;  %v16593_v41 = vld [vmem:[#allocation38_spill] sm:$0xff] }
 0xa4b   :  { %12753 = vpow2.f32 %v11903_v36  ;;  %v16596_v36 = vld [vmem:[#allocation40_spill] sm:$0xff]  ;;  %v16599_v37 = vld [vmem:[#allocation42_spill] sm:$0xff] }
 0xa4c   :  { %12755 = vpow2.f32 %v11904_v58  ;;  %v16601_v58 = vld [vmem:[#allocation18_spill] sm:$0xff] }
 0xa4d   :  { %12757 = vtanh.f32 %v8349_v29  ;;  %v16602_v29 = vld [vmem:[#allocation44_spill] sm:$0xff] }
 0xa54   :  { %v12752_v34 = vpop.eup %12751 }
 0xa55   :  { %v12754_v44 = vpop.eup %12753  ;;  %v8357_v49 = vadd.f32 1.0, %v12752_v34  ;;  %v16603_v34 = vld [vmem:[#allocation21_spill] sm:$0xff] }
 0xa56   :  { %v8358_v55 = vadd.f32 1.0, %v12754_v44  ;;  %v12756_v27 = vpop.eup %12755  ;;  %v16604_v44 = vld [vmem:[#allocation45_spill] sm:$0xff] }
 0xa57   :  { %12759 = vrcp.f32 %v8357_v49  ;;  %v12758_v0 = vpop.eup %12757  ;;  %v8367_v54 = vadd.f32 1.0, %v12756_v27  ;;  %v16605_v49 = vld [vmem:[#allocation25_spill] sm:$0xff]  ;;  %v16607_v27 = vld [vmem:[#allocation47_spill] sm:$0xff] }
 0xa58   :  { %12761 = vrcp.f32 %v8358_v55  ;;  %v16606_v55 = vld [vmem:[#allocation46_spill] sm:$0xff] }
 0xa59   :  { %12763 = vrcp.f32 %v8367_v54  ;;  %v16612_v54 = vld [vmem:[#allocation52_spill] sm:$0xff] }
 0xa61   :  { %v12760_v14 = vpop.eup %12759 }
 0xa62   :  { %v12762_v18 = vpop.eup %12761  ;;  %v8371_v62 = vmul.f32 %v12760_v14, %v12758_v0  ;;  %v16608_v0 = vld [vmem:[#allocation48_spill] sm:$0xff]  ;;  %v16609_v14 = vld [vmem:[#allocation49_spill] sm:$0xff] }
 0xa63   :  { %v8370_v63 = vmul.f32 %v12762_v18, %v16591_v1  ;;  %v12764_v23 = vpop.eup %12763  ;;  %v16610_v18 = vld [vmem:[#allocation50_spill] sm:$0xff]  ;;  %v16613_v1 = vld [vmem:[#allocation53_spill] sm:$0xff] }
 0xa65   :  { %v15366_v16 = vadd.f32 %v8371_v62, %v8370_v63  ;;  %v7975_v11 = vpop.f32.mrb[104].mxu0  ;;  %v8016_v38 = vpop.f32.mrb[104].mxu1  ;;  %v16611_v62 = vld [vmem:[#allocation51_spill] sm:$0xff]  ;;  %v16614_v63 = vld [vmem:[#allocation54_spill] sm:$0xff] }
 0xa66   :  { %v7977_v2 = vpop.f32.mrb[105].mxu0  ;;  %v8018_v24 = vpop.f32.mrb[105].mxu1 }
 0xa67   :  { %v7979_v56 = vpop.f32.mrb[106].mxu0  ;;  %v8020_v43 = vpop.f32.mrb[106].mxu1  ;;  %12765 = vtanh.f32 %v15366_v16 }
 0xa68   :  { %v7980_v42 = vpop.f32.mrb[107].mxu0  ;;  %v8021_v15 = vpop.f32.mrb[107].mxu1  ;;  %v16618_v56 = vld [vmem:[#allocation58_spill] sm:$0xff] }
 0xa71   :  { %v12766_v35 = vpop.eup %12765 }
 0xa72   :  { %v8374_v10 = vmul.f32 %v12766_v35, %v12764_v23 }
 0xa74   :  { %v8375_v33 = vpack.c.bf16 %v8374_v10, %v8374_v10 }
 0xa76   :  { %8793 = vmatmul.mubr.bf16.vlgmr.msra.gmra.mrb[112].mxu0 %v8375_v33  ;;  %8834 = vmatmul.mubr.bf16.vlgmr.msra.gmra.mrb[112].mxu1 %v8375_v33 }
 0xa77   :  { %8843 = vmatpush1.bf16.msra.mxu0 %v16592_v4  ;;  %8884 = vmatpush1.bf16.msra.mxu1 %v16593_v41 }
 0xa78   :  { %8844 = vmatprep.subr.bf16.mxu0 %v16594_v59  ;;  %8885 = vmatprep.subr.bf16.mxu1 %v16595_v28 }
 0xa79   :  { %8874 = vmatprep.mubr.bf16.mxu0 %v16142_v53  ;;  %8915 = vmatprep.mubr.bf16.mxu1 %v16142_v53 }
 0xa7b   :  { %8845 = vmatpush1.bf16.msra.mxu0 %v16596_v36  ;;  %8886 = vmatpush1.bf16.msra.mxu1 %v16597_v22  ;;  %v16624_v22 = vld [vmem:[#allocation63_spill] sm:$0xff] }
 0xa7c   :  { %8846 = vmatprep.subr.bf16.mxu0 %v16598_v20  ;;  %8887 = vmatprep.subr.bf16.mxu1 %v16599_v37  ;;  %v16627_v37 = vld [vmem:[#allocation65_spill] sm:$0xff] }
 0xa7f   :  { %8847 = vmatpush1.bf16.msra.mxu0 %v16600_v61  ;;  %8888 = vmatpush1.bf16.msra.mxu1 %v16601_v58 }
 0xa80   :  { %8848 = vmatprep.subr.bf16.mxu0 %v16602_v29  ;;  %8889 = vmatprep.subr.bf16.mxu1 %v16603_v34  ;;  %v16628_v34 = vld [vmem:[#allocation66_spill] sm:$0xff] }
 0xa83   :  { %8849 = vmatpush1.bf16.msra.mxu0 %v16604_v44  ;;  %8890 = vmatpush1.bf16.msra.mxu1 %v16605_v49  ;;  %v16629_v44 = vld [vmem:[#allocation67_spill] sm:$0xff] }
 0xa84   :  { %8850 = vmatprep.subr.bf16.mxu0 %v16606_v55  ;;  %8891 = vmatprep.subr.bf16.mxu1 %v16607_v27  ;;  %v16630_v55 = vld [vmem:[#allocation68_spill] sm:$0xff]  ;;  %v16632_v27 = vld [vmem:[#allocation71_spill] sm:$0xff] }
 0xa87   :  { %8851 = vmatpush1.bf16.msra.mxu0 %v15163_v32  ;;  %8892 = vmatpush1.bf16.msra.mxu1 %v15165_v60  ;;  %v16615_v32 = vld [vmem:[#allocation55_spill] sm:$0xff]  ;;  %v16616_v60 = vld [vmem:[#allocation56_spill] sm:$0xff] }
 0xa88   :  { %8852 = vmatprep.subr.bf16.mxu0 %v15169_v9  ;;  %8893 = vmatprep.subr.bf16.mxu1 %v16608_v0  ;;  %v16617_v9 = vld [vmem:[#allocation57_spill] sm:$0xff] }
 0xa89   :  { %v16634_v0 = vld [vmem:[#allocation73_spill] sm:$0xff] }
 0xa8b   :  { %8853 = vmatpush1.bf16.msra.mxu0 %v16609_v14  ;;  %8894 = vmatpush1.bf16.msra.mxu1 %v15177_v51  ;;  %v16635_v14 = vld [vmem:[#allocation74_spill] sm:$0xff] }
 0xa8c   :  { %8854 = vmatprep.subr.bf16.mxu0 %v16610_v18  ;;  %8895 = vmatprep.subr.bf16.mxu1 %v16611_v62  ;;  %v16636_v18 = vld [vmem:[#allocation75_spill] sm:$0xff]  ;;  %v16637_v62 = vld [vmem:[#allocation76_spill] sm:$0xff] }
 0xa8f   :  { %8855 = vmatpush1.bf16.msra.mxu0 %v16612_v54  ;;  %8896 = vmatpush1.bf16.msra.mxu1 %v16613_v1  ;;  %v16638_v54 = vld [vmem:[#allocation77_spill] sm:$0xff]  ;;  %v16639_v1 = vld [vmem:[#allocation78_spill] sm:$0xff] }
 0xa90   :  { %8856 = vmatprep.subr.bf16.mxu0 %v16614_v63  ;;  %8897 = vmatprep.subr.bf16.mxu1 %v16615_v32 }
 0xa93   :  { %8857 = vmatpush1.bf16.msra.mxu0 %v16616_v60  ;;  %8898 = vmatpush1.bf16.msra.mxu1 %v16617_v9 }
 0xa94   :  { %9117 = vmatprep.subr.bf16.mxu0 %v15205_v8  ;;  %9158 = vmatprep.subr.bf16.mxu1 %v16618_v56 }
 0xa95   :  { %v8250_v51 = vpop.f32.mrb[108].mxu0  ;;  %v8291_v43 = vpop.f32.mrb[108].mxu1 }
 0xa96   :  { %v8298_v42 = vadd.f32 %v8250_v51, %v7975_v11  ;;  %v8300_v15 = vadd.f32 %v8291_v43, %v8016_v38  ;;  %v8252_v23 = vpop.f32.mrb[109].mxu0  ;;  %v8293_v35 = vpop.f32.mrb[109].mxu1  ;;  %8875 = vmatmul.mubr.bf16.vlgmr.msra.gmra.mrb[116].mxu0 %v8375_v33  ;;  %8916 = vmatmul.mubr.bf16.vlgmr.msra.gmra.mrb[116].mxu1 %v8375_v33  ;;  %v16623_v33 = vld [vmem:[#allocation62_spill] sm:$0xff] }
 0xa97   :  { %v8299_v10 = vadd.f32 %v8252_v23, %v7977_v2  ;;  %v8301_v4 = vadd.f32 %v8293_v35, %v8018_v24  ;;  %v8254_v41 = vpop.f32.mrb[110].mxu0  ;;  %v8295_v59 = vpop.f32.mrb[110].mxu1  ;;  %9118 = vmatpush1.bf16.msra.mxu0 %v15211_v26  ;;  %9159 = vmatpush1.bf16.msra.mxu1 %v15213_v12  ;;  %v16619_v26 = vld [vmem:[#allocation59_spill] sm:$0xff]  ;;  %v16621_v12 = vld [vmem:[#allocation60_spill] sm:$0xff]  ;;  %v16622_v24 = vld [vmem:[#allocation61_spill] sm:$0xff] }
 0xa98   :  { %v8302_v8 = vadd.f32 %v8298_v42, %v13521_v45  ;;  %v8255_v28 = vpop.f32.mrb[111].mxu0  ;;  %v8296_v36 = vpop.f32.mrb[111].mxu1  ;;  %9119 = vmatprep.subr.bf16.mxu0 %v15219_v3  ;;  %9160 = vmatprep.subr.bf16.mxu1 %v15221_v21  ;;  %v16620_v3 = vld [vmem:[#allocation15_spill] sm:$0xff]  ;;  %v9277_v41 = vld [vmem:[#allocation5] sm:$0xff] }
 0xa99   :  { %v8303_v11 = vadd.f32 %v8299_v10, %v13526_v17  ;;  %9149 = vmatprep.mubr.bf16.mxu0 %v16142_v53  ;;  %9190 = vmatprep.mubr.bf16.mxu1 %v16142_v53  ;;  %v8305_v21 = vadd.f32 %v8301_v4, %v16620_v3  ;;  %v9281_v59 = vld [vmem:[#allocation5 + $0x20] sm:$0xff]  ;;  %v9282_v36 = vld [vmem:[#allocation5 + $0x28] sm:$0xff] }
 0xa9a   :  { %v11898_v38 = vmul.f32 -1.442695, %v8302_v8  ;;  %v9278_v8 = vld [vmem:[#allocation5 + $0x8] sm:$0xff]  ;;  %v12009_v28 = vcombine.high %v9277_v41, %v9281_v59 }
 0xa9b   :  { %v11899_v2 = vmul.f32 -1.442695, %v8303_v11  ;;  %9120 = vmatpush1.bf16.msra.mxu0 %v15231_v40  ;;  %9161 = vmatpush1.bf16.msra.mxu1 %v15233_v7  ;;  %v11900_v20 = vmul.f32 -1.442695, %v8305_v21  ;;  %v16625_v40 = vld [vmem:[#allocation64_spill] sm:$0xff]  ;;  %v16626_v7 = vld [vmem:[#allocation30_spill] sm:$0xff]  ;;  %v12008_v11 = vcombine.low %v9277_v41, %v9281_v59 }
 0xa9c   :  { %12767 = vpow2.f32 %v11898_v38  ;;  %9121 = vmatprep.subr.bf16.mxu0 %v15237_v19  ;;  %9162 = vmatprep.subr.bf16.mxu1 %v16619_v26  ;;  %v8304_v19 = vadd.f32 %v8300_v15, %v16626_v7  ;;  %v12010_v38 = vcombine.low %v9278_v8, %v9282_v36  ;;  %v9285_v26 = vld [vmem:[#allocation5 + $0x40] sm:$0xff] }
 0xa9d   :  { %12769 = vpow2.f32 %v11899_v2  ;;  %v12011_v2 = vcombine.high %v9278_v8, %v9282_v36  ;;  %v9289_v21 = vld [vmem:[#allocation5 + $0x60] sm:$0xff]  ;;  %v9330_v36 = vld [vmem:[#allocation5 + $0x1a8] sm:$0xff] }
 0xa9e   :  { %12771 = vpow2.f32 %v11900_v20 }
 0xa9f   :  { %9122 = vmatpush1.bf16.msra.mxu0 %v16621_v12  ;;  %9163 = vmatpush1.bf16.msra.mxu1 %v16622_v24  ;;  %12773 = vtanh.f32 %v8304_v19  ;;  %v9286_v12 = vld [vmem:[#allocation5 + $0x48] sm:$0xff]  ;;  %v12017_v24 = vcombine.high %v9285_v26, %v9289_v21  ;;  %v9293_v19 = vld [vmem:[#allocation5 + $0x80] sm:$0xff] }
 0xaa0   :  { %9123 = vmatprep.subr.bf16.mxu0 %v16623_v33  ;;  %9164 = vmatprep.subr.bf16.mxu1 %v16624_v22  ;;  %v9290_v33 = vld [vmem:[#allocation5 + $0x68] sm:$0xff]  ;;  %v12016_v22 = vcombine.low %v9285_v26, %v9289_v21 }
 0xaa1   :  { %v12018_v20 = vcombine.low %v9286_v12, %v9290_v33  ;;  %v9334_v26 = vld [vmem:[#allocation5 + $0x1c8] sm:$0xff] }
 0xaa2   :  { %v9338_v21 = vld [vmem:[#allocation5 + $0x1e8] sm:$0xff] }
 0xaa3   :  { %9124 = vmatpush1.bf16.msra.mxu0 %v15258_v6  ;;  %9165 = vmatpush1.bf16.msra.mxu1 %v16625_v40  ;;  %v16631_v6 = vld [vmem:[#allocation69_spill] sm:$0xff]  ;;  %v12019_v40 = vcombine.high %v9286_v12, %v9290_v33  ;;  %v9283_v33 = vld [vmem:[#allocation5 + $0x30] sm:$0xff] }
 0xaa4   :  { %9125 = vmatprep.subr.bf16.mxu0 %v15264_v31  ;;  %9166 = vmatprep.subr.bf16.mxu1 %v16627_v37  ;;  %v16633_v31 = vld [vmem:[#allocation72_spill] sm:$0xff]  ;;  %v9297_v37 = vld [vmem:[#allocation5 + $0xa0] sm:$0xff] }
 0xaa6   :  { %v12768_v61 = vpop.eup %12767 }
 0xaa7   :  { %v12770_v58 = vpop.eup %12769  ;;  %v8312_v29 = vadd.f32 1.0, %v12768_v61  ;;  %9126 = vmatpush1.bf16.msra.mxu0 %v16628_v34  ;;  %9167 = vmatpush1.bf16.msra.mxu1 %v16629_v44  ;;  %v9294_v61 = vld [vmem:[#allocation5 + $0x88] sm:$0xff]  ;;  %v12024_v34 = vcombine.low %v9293_v19, %v9297_v37 }
 0xaa8   :  { %v8313_v49 = vadd.f32 1.0, %v12770_v58  ;;  %9127 = vmatprep.subr.bf16.mxu0 %v16630_v55  ;;  %9168 = vmatprep.subr.bf16.mxu1 %v16631_v6  ;;  %v12772_v63 = vpop.eup %12771  ;;  %v12025_v58 = vcombine.high %v9293_v19, %v9297_v37  ;;  %v9301_v55 = vld [vmem:[#allocation5 + $0xc0] sm:$0xff]  ;;  %v9284_v37 = vld [vmem:[#allocation5 + $0x38] sm:$0xff] }
 0xaa9   :  { %12775 = vrcp.f32 %v8312_v29  ;;  %v12774_v32 = vpop.eup %12773  ;;  %v8322_v51 = vadd.f32 1.0, %v12772_v63  ;;  %v9298_v29 = vld [vmem:[#allocation5 + $0xa8] sm:$0xff]  ;;  %v9305_v6 = vld [vmem:[#allocation5 + $0xe0] sm:$0xff] }
 0xaaa   :  { %12777 = vrcp.f32 %v8313_v49  ;;  %v12026_v44 = vcombine.low %v9294_v61, %v9298_v29  ;;  %v12027_v49 = vcombine.high %v9294_v61, %v9298_v29  ;;  %v9310_v63 = vld [vmem:[#allocation5 + $0x108] sm:$0xff]  ;;  %v12067_v61 = vcombine.high %v9334_v26, %v9338_v21 }
 0xaab   :  { %9128 = vmatpush1.bf16.msra.mxu0 %v16632_v27  ;;  %9169 = vmatpush1.bf16.msra.mxu1 %v16633_v31  ;;  %12779 = vrcp.f32 %v8322_v51  ;;  %v9302_v27 = vld [vmem:[#allocation5 + $0xc8] sm:$0xff]  ;;  %v12033_v31 = vcombine.high %v9301_v55, %v9305_v6 }
 0xaac   :  { %9129 = vmatprep.subr.bf16.mxu0 %v16634_v0  ;;  %9170 = vmatprep.subr.bf16.mxu1 %v16635_v14  ;;  %v9306_v0 = vld [vmem:[#allocation5 + $0xe8] sm:$0xff]  ;;  %v12032_v14 = vcombine.low %v9301_v55, %v9305_v6  ;;  %v9238_v55 = vpop.permute.xlu0 %9237 }
 0xaad   :  { %v9240_v6 = vmul.f32 %v9238_v55, %v16586_v52 }
 0xaaf   :  { %9130 = vmatpush1.bf16.msra.mxu0 %v16636_v18  ;;  %9171 = vmatpush1.bf16.msra.mxu1 %v16637_v62  ;;  %v12034_v18 = vcombine.low %v9302_v27, %v9306_v0  ;;  %v12035_v62 = vcombine.high %v9302_v27, %v9306_v0  ;;  %v9241_v27 = vmul.f32 %v9238_v55, %v16587_v13 }
 0xab0   :  { %9131 = vmatprep.subr.bf16.mxu0 %v16638_v54  ;;  %9172 = vmatprep.subr.bf16.mxu1 %v16639_v1  ;;  %v9309_v54 = vld [vmem:[#allocation5 + $0x100] sm:$0xff] }
 0xab1   :  { %v9313_v1 = vld [vmem:[#allocation5 + $0x120] sm:$0xff] }
 0xab3   :  { %v12776_v60 = vpop.eup %12775  ;;  %9132 = vmatpush1.bf16.msra.mxu0 %v15307_v47  ;;  %9173 = vmatpush1.bf16.msra.mxu1 %v15309_v46  ;;  %v15448_v46 = vld [vmem:[%s15805_s6] ss:$0 sm:$0xff] }
 0xab4   :  { %v12778_v9 = vpop.eup %12777  ;;  %v8326_v56 = vmul.f32 %v12776_v60, %v12774_v32  ;;  %9661 = vmatprep.subr.bf16.mxu0 %v12009_v28  ;;  %9702 = vmatprep.subr.bf16.mxu1 %v12011_v2  ;;  %v12041_v32 = vcombine.high %v9309_v54, %v9313_v1  ;;  %v9314_v60 = vld [vmem:[#allocation5 + $0x128] sm:$0xff]  ;;  %v9337_v2 = vld [vmem:[#allocation5 + $0x1e0] sm:$0xff] }
 0xab5   :  { %v8325_v43 = vmul.f32 %v12778_v9, %v15318_v39  ;;  %v12780_v15 = vpop.eup %12779  ;;  %v12040_v9 = vcombine.low %v9309_v54, %v9313_v1  ;;  %v12043_v51 = vcombine.high %v9310_v63, %v9314_v60  ;;  %v9326_v28 = vld [vmem:[#allocation5 + $0x188] sm:$0xff] }
 0xab7   :  { %v15440_v42 = vadd.f32 %v8326_v56, %v8325_v43  ;;  %v12042_v56 = vcombine.low %v9310_v63, %v9314_v60  ;;  %v9317_v43 = vld [vmem:[#allocation5 + $0x140] sm:$0xff] }
 0xab9   :  { %12781 = vtanh.f32 %v15440_v42 }
 0xac3   :  { %v12782_v23 = vpop.eup %12781 }
 0xac4   :  { %v8329_v35 = vmul.f32 %v12782_v23, %v12780_v15  ;;  %v9321_v15 = vld [vmem:[#allocation5 + $0x160] sm:$0xff]  ;;  %v9318_v23 = vld [vmem:[#allocation5 + $0x148] sm:$0xff] }
 0xac6   :  { %8331 = vst [vmem:[#allocation2 + $0x10] sm:$0x3] %v8329_v35  ;;  %v8924_v10 = vpack.c.bf16 %v8329_v35, %v8329_v35  ;;  %v12048_v35 = vcombine.low %v9317_v43, %v9321_v15 }
 0xac8   :  { %9150 = vmatmul.mubr.bf16.vlgmr.msra.gmra.mrb[120].mxu0 %v8924_v10  ;;  %9191 = vmatmul.mubr.bf16.vlgmr.msra.gmra.mrb[120].mxu1 %v8924_v10  ;;  %v12049_v10 = vcombine.high %v9317_v43, %v9321_v15 }
 0xac9   :  { %9693 = vmatprep.mubr.bf16.mxu0 %v16142_v53  ;;  %9734 = vmatprep.mubr.bf16.mxu1 %v16142_v53 }
 0xaca   :  { %9662 = vmatpush1.bf16.msra.mxu0 %v12008_v11  ;;  %9703 = vmatpush1.bf16.msra.mxu1 %v12010_v38  ;;  %v9333_v11 = vld [vmem:[#allocation5 + $0x1c0] sm:$0xff]  ;;  %v12059_v38 = vcombine.high %v9326_v28, %v9330_v36 }
 0xacb   :  { %9663 = vmatprep.subr.bf16.mxu0 %v12017_v24  ;;  %9704 = vmatprep.subr.bf16.mxu1 %v12019_v40  ;;  %v9279_v24 = vld [vmem:[#allocation5 + $0x10] sm:$0xff]  ;;  %v12065_v40 = vcombine.high %v9333_v11, %v9337_v2  ;;  %v12064_v29 = vcombine.low %v9333_v11, %v9337_v2 }
 0xacc   :  { %v15452_v19 = vcombine.low %v9279_v24, %v9283_v33 }
 0xacd   :  { %v10773_v47 = vld [vmem:[#allocation2 + $0x10] sm:$0x3] }
 0xace   :  { %v10792_v39 = vmul.f32 %v15448_v46, %v10773_v47  ;;  %9664 = vmatpush1.bf16.msra.mxu0 %v12016_v22  ;;  %9705 = vmatpush1.bf16.msra.mxu1 %v12018_v20  ;;  %v9322_v47 = vld [vmem:[#allocation5 + $0x168] sm:$0xff]  ;;  %v9280_v22 = vld [vmem:[#allocation5 + $0x18] sm:$0xff]  ;;  %v12058_v20 = vcombine.low %v9326_v28, %v9330_v36 }
 0xacf   :  { %9665 = vmatprep.subr.bf16.mxu0 %v12025_v58  ;;  %9706 = vmatprep.subr.bf16.mxu1 %v12027_v49  ;;  %v12050_v41 = vcombine.low %v9318_v23, %v9322_v47  ;;  %v12051_v59 = vcombine.high %v9318_v23, %v9322_v47  ;;  %v15454_v58 = vcombine.low %v9280_v22, %v9284_v37 }
 0xad0   :  { %v10821_v4 = vsel %vm10796_vm0, %v10792_v39, 0.0  ;;  %v9325_v39 = vld [vmem:[#allocation5 + $0x180] sm:$0xff]  ;;  %v15458_v49 = vcombine.high %v9280_v22, %v9284_v37 }
 0xad1   :  { %10822 = vadd.xlane.f32.xlu1 %v10821_v4  ;;  %v9329_v4 = vld [vmem:[#allocation5 + $0x1a0] sm:$0xff] }
 0xad2   :  { %9666 = vmatpush1.bf16.msra.mxu0 %v12024_v34  ;;  %9707 = vmatpush1.bf16.msra.mxu1 %v12026_v44  ;;  %v12057_v8 = vcombine.high %v9325_v39, %v9329_v4  ;;  %v12056_v12 = vcombine.low %v9325_v39, %v9329_v4  ;;  %v12066_v34 = vcombine.low %v9334_v26, %v9338_v21 }
 0xad3   :  { %9667 = vmatprep.subr.bf16.mxu0 %v12033_v31  ;;  %9708 = vmatprep.subr.bf16.mxu1 %v12035_v62  ;;  %v15456_v44 = vcombine.high %v9279_v24, %v9283_v33  ;;  %v9244_v31 = vadd.f32 %v9240_v6, %v16588_v5  ;;  %v9287_v6 = vld [vmem:[#allocation5 + $0x50] sm:$0xff] }
 0xad6   :  { %9668 = vmatpush1.bf16.msra.mxu0 %v12032_v14  ;;  %9709 = vmatpush1.bf16.msra.mxu1 %v12034_v18  ;;  %v9245_v18 = vadd.f32 %v9241_v27, %v16281_v57  ;;  %v9291_v27 = vld [vmem:[#allocation5 + $0x70] sm:$0xff] }
 0xad7   :  { %9669 = vmatprep.subr.bf16.mxu0 %v12041_v32  ;;  %9710 = vmatprep.subr.bf16.mxu1 %v12043_v51  ;;  %v9243_v32 = vmul.f32 %v9238_v55, %v16589_v50 }
 0xad9   :  { %v9247_v23 = vadd.f32 %v9243_v32, %v16379_v48  ;;  %v9296_v32 = vld [vmem:[#allocation5 + $0x98] sm:$0xff] }
 0xada   :  { %9670 = vmatpush1.bf16.msra.mxu0 %v12040_v9  ;;  %9711 = vmatpush1.bf16.msra.mxu1 %v12042_v56  ;;  %v15602_v48 = vld [vmem:[#allocation8 + $0x4c] ss:$16 sps:$4 sm:$0xff]  }
 0xadb   :  { %9671 = vmatprep.subr.bf16.mxu0 %v12049_v10  ;;  %9712 = vmatprep.subr.bf16.mxu1 %v12051_v59 }
 0xade   :  { %9672 = vmatpush1.bf16.msra.mxu0 %v12048_v35  ;;  %9713 = vmatpush1.bf16.msra.mxu1 %v12050_v41  ;;  %v9242_v35 = vmul.f32 %v9238_v55, %v16380_v30 }
 0xadf   :  { %9673 = vmatprep.subr.bf16.mxu0 %v12057_v8  ;;  %9714 = vmatprep.subr.bf16.mxu1 %v12059_v38 }
 0xae0   :  { %v9246_v47 = vadd.f32 %v9242_v35, %v16590_v25  ;;  %v9304_v35 = vld [vmem:[#allocation5 + $0xd8] sm:$0xff] }
 0xae2   :  { %9674 = vmatpush1.bf16.msra.mxu0 %v12056_v12  ;;  %9715 = vmatpush1.bf16.msra.mxu1 %v12058_v20 }
 0xae3   :  { %9675 = vmatprep.subr.bf16.mxu0 %v12065_v40  ;;  %9716 = vmatprep.subr.bf16.mxu1 %v12067_v61 }
 0xae6   :  { %9676 = vmatpush1.bf16.msra.mxu0 %v12064_v29  ;;  %9717 = vmatpush1.bf16.msra.mxu1 %v12066_v34 }
 0xae7   :  { %9743 = vmatprep.subr.bf16.mxu0 %v15456_v44  ;;  %9784 = vmatprep.subr.bf16.mxu1 %v15458_v49 }
 0xb49   :  { %v8794_v0 = vpop.f32.mrb[112].mxu0  ;;  %v8835_v14 = vpop.f32.mrb[112].mxu1 }
 0xb4a   :  { %v9248_v62 = vadd.f32 %v9244_v31, %v8794_v0  ;;  %v8796_v54 = vpop.f32.mrb[113].mxu0  ;;  %v8837_v1 = vpop.f32.mrb[113].mxu1  ;;  %v9250_v4 = vadd.f32 %v9246_v47, %v8835_v14  ;;  %v9288_v31 = vld [vmem:[#allocation5 + $0x58] sm:$0xff] }
 0xb4b   :  { %v9249_v63 = vadd.f32 %v9245_v18, %v8796_v54  ;;  %v8798_v60 = vpop.f32.mrb[114].mxu0  ;;  %v8839_v9 = vpop.f32.mrb[114].mxu1  ;;  %v9251_v10 = vadd.f32 %v9247_v23, %v8837_v1  ;;  %v9292_v0 = vld [vmem:[#allocation5 + $0x78] sm:$0xff]  ;;  %v9295_v1 = vld [vmem:[#allocation5 + $0x90] sm:$0xff] }
 0xb4c   :  { %v12005_v56 = vmul.f32 -1.442695, %v9248_v62  ;;  %v8799_v51 = vpop.f32.mrb[115].mxu0  ;;  %v8840_v43 = vpop.f32.mrb[115].mxu1  ;;  %v15484_v62 = vcombine.high %v9287_v6, %v9291_v27  ;;  %v15486_v54 = vcombine.high %v9288_v31, %v9292_v0  ;;  %v9300_v60 = vld [vmem:[#allocation5 + $0xb8] sm:$0xff]  ;;  %v15492_v9 = vcombine.low %v9287_v6, %v9291_v27  ;;  %v9307_v23 = vld [vmem:[#allocation5 + $0xf0] sm:$0xff] }
 0xb4d   :  { %v12006_v15 = vmul.f32 -1.442695, %v9249_v63  ;;  %v12007_v39 = vmul.f32 -1.442695, %v9251_v10  ;;  %v9299_v63 = vld [vmem:[#allocation5 + $0xb0] sm:$0xff]  ;;  %v15500_v43 = vcombine.high %v9296_v32, %v9300_v60  ;;  %v9308_v10 = vld [vmem:[#allocation5 + $0xf8] sm:$0xff] }
 0xb4e   :  { %12783 = vpow2.f32 %v12005_v56  ;;  %v15494_v56 = vcombine.low %v9288_v31, %v9292_v0  ;;  %v15498_v51 = vcombine.high %v9295_v1, %v9299_v63  ;;  %v15506_v47 = vcombine.low %v9295_v1, %v9299_v63  ;;  %v9331_v27 = vld [vmem:[#allocation5 + $0x1b0] sm:$0xff]  ;;  %v9328_v31 = vld [vmem:[#allocation5 + $0x198] sm:$0xff] }
 0xb4f   :  { %12785 = vpow2.f32 %v12006_v15  ;;  %v9303_v15 = vld [vmem:[#allocation5 + $0xd0] sm:$0xff]  ;;  %v9332_v0 = vld [vmem:[#allocation5 + $0x1b8] sm:$0xff] }
 0xb50   :  { %12787 = vpow2.f32 %v12007_v39  ;;  %v15508_v39 = vcombine.low %v9296_v32, %v9300_v60  ;;  %v15550_v32 = vcombine.high %v9328_v31, %v9332_v0  ;;  %v9335_v60 = vld [vmem:[#allocation5 + $0x1d0] sm:$0xff] }
 0xb51   :  { %12789 = vtanh.f32 %v9250_v4  ;;  %v15512_v4 = vcombine.high %v9303_v15, %v9307_v23 }
 0xb58   :  { %v12784_v41 = vpop.eup %12783 }
 0xb59   :  { %v12786_v59 = vpop.eup %12785  ;;  %v9258_v8 = vadd.f32 1.0, %v12784_v41  ;;  %v15514_v41 = vcombine.high %v9304_v35, %v9308_v10 }
 0xb5a   :  { %v9259_v28 = vadd.f32 1.0, %v12786_v59  ;;  %v12788_v36 = vpop.eup %12787  ;;  %v9311_v59 = vld [vmem:[#allocation5 + $0x110] sm:$0xff] }
 0xb5b   :  { %12791 = vrcp.f32 %v9258_v8  ;;  %v12790_v11 = vpop.eup %12789  ;;  %v9268_v21 = vadd.f32 1.0, %v12788_v36  ;;  %v9315_v8 = vld [vmem:[#allocation5 + $0x130] sm:$0xff]  ;;  %v9316_v36 = vld [vmem:[#allocation5 + $0x138] sm:$0xff] }
 0xb5c   :  { %12793 = vrcp.f32 %v9259_v28  ;;  %v9312_v28 = vld [vmem:[#allocation5 + $0x118] sm:$0xff] }
 0xb5d   :  { %12795 = vrcp.f32 %v9268_v21  ;;  %v9319_v21 = vld [vmem:[#allocation5 + $0x150] sm:$0xff] }
 0xb65   :  { %v12792_v38 = vpop.eup %12791 }
 0xb66   :  { %v12794_v2 = vpop.eup %12793  ;;  %v9272_v26 = vmul.f32 %v12792_v38, %v12790_v11  ;;  %v15518_v11 = vcombine.low %v9303_v15, %v9307_v23  ;;  %v15520_v38 = vcombine.low %v9304_v35, %v9308_v10  ;;  %v9339_v15 = vld [vmem:[#allocation5 + $0x1f0] sm:$0xff]  ;;  %v9336_v23 = vld [vmem:[#allocation5 + $0x1d8] sm:$0xff] }
 0xb67   :  { %v9271_v12 = vmul.f32 %v12794_v2, %v15366_v16  ;;  %v12796_v55 = vpop.eup %12795  ;;  %v15524_v2 = vcombine.high %v9311_v59, %v9315_v8  ;;  %v9340_v35 = vld [vmem:[#allocation5 + $0x1f8] sm:$0xff] }
 0xb69   :  { %v15471_v24 = vadd.f32 %v9272_v26, %v9271_v12  ;;  %v15473_v33 = vpop.f32.mrb[116].mxu0  ;;  %v15475_v22 = vpop.f32.mrb[116].mxu1  ;;  %v15526_v26 = vcombine.high %v9312_v28, %v9316_v36  ;;  %v9323_v12 = vld [vmem:[#allocation5 + $0x170] sm:$0xff] }
 0xb6a   :  { %v15477_v20 = vpop.f32.mrb[117].mxu0  ;;  %v15479_v40 = vpop.f32.mrb[117].mxu1 }
 0xb6b   :  { %16640 = vst [vmem:[#allocation37_spill] sm:$0xff] %v15471_v24  ;;  %v8880_v37 = vpop.f32.mrb[118].mxu0  ;;  %v8921_v61 = vpop.f32.mrb[118].mxu1  ;;  %12797 = vtanh.f32 %v15471_v24 }
 0xb6c   :  { %v8881_v29 = vpop.f32.mrb[119].mxu0  ;;  %v8922_v34 = vpop.f32.mrb[119].mxu1  ;;  %v9320_v37 = vld [vmem:[#allocation5 + $0x158] sm:$0xff] }
 0xb6d   :  { %v9324_v61 = vld [vmem:[#allocation5 + $0x178] sm:$0xff]  ;;  %v15530_v29 = vcombine.low %v9311_v59, %v9315_v8  ;;  %v15532_v34 = vcombine.low %v9312_v28, %v9316_v36  ;;  %v15556_v59 = vcombine.low %v9328_v31, %v9332_v0  ;;  %v15560_v8 = vcombine.high %v9335_v60, %v9339_v15 }
 0xb6e   :  { %v15538_v6 = vcombine.high %v9320_v37, %v9324_v61  ;;  %v15544_v1 = vcombine.low %v9320_v37, %v9324_v61  ;;  %v15562_v28 = vcombine.high %v9336_v23, %v9340_v35  ;;  %v15566_v36 = vcombine.low %v9335_v60, %v9339_v15  ;;  %v15574_v37 = vld [vmem:[#allocation8 + $0xc] ss:$16 sps:$4 sm:$0xff]   ;;  %v15578_v61 = vld [vmem:[#allocation8] ss:$16 sps:$4 sm:$0xff]  }
 0xb6f   :  { %16641 = vst [vmem:[#allocation31_spill] sm:$0xff] %v15578_v61  ;;  %v15586_v31 = vld [vmem:[#allocation8 + $0x2c] ss:$16 sps:$4 sm:$0xff]   ;;  %v15592_v15 = vld [vmem:[#allocation8 + $0x20] ss:$16 sps:$4 sm:$0xff]  }
 0xb70   :  { %16643 = vst [vmem:[#allocation34_spill] sm:$0xff] %v15586_v31 }
 0xb75   :  { %v12798_v16 = vpop.eup %12797 }
 0xb76   :  { %v9275_v14 = vmul.f32 %v12798_v16, %v12796_v55  ;;  %v15536_v55 = vcombine.high %v9319_v21, %v9323_v12  ;;  %v9327_v16 = vld [vmem:[#allocation5 + $0x190] sm:$0xff] }
 0xb77   :  { %v15548_v63 = vcombine.high %v9327_v16, %v9331_v27  ;;  %v15554_v10 = vcombine.low %v9327_v16, %v9331_v27  ;;  %v15580_v16 = vld [vmem:[#allocation8 + $0x8] ss:$16 sps:$4 sm:$0xff]   ;;  %v15584_v27 = vld [vmem:[#allocation8 + $0x24] ss:$16 sps:$4 sm:$0xff]  }
 0xb78   :  { %v15482_v18 = vpack.c.bf16 %v9275_v14, %v9275_v14  ;;  %v15542_v14 = vcombine.low %v9319_v21, %v9323_v12  ;;  %v15568_v21 = vcombine.low %v9336_v23, %v9340_v35  ;;  %v15572_v12 = vld [vmem:[#allocation8 + $0x4] ss:$16 sps:$4 sm:$0xff]   ;;  %16642 = vst [vmem:[#allocation70_spill] sm:$0xff] %v15580_v16  ;;  %v15594_v23 = vld [vmem:[#allocation8 + $0x28] ss:$16 sps:$4 sm:$0xff]  }
 0xb7a   :  { %9694 = vmatmul.mubr.bf16.vlgmr.msra.gmra.mrb[124].mxu0 %v15482_v18  ;;  %9735 = vmatmul.mubr.bf16.vlgmr.msra.gmra.mrb[124].mxu1 %v15482_v18 }
 0xb7b   :  { %9744 = vmatpush1.bf16.msra.mxu0 %v15452_v19  ;;  %9785 = vmatpush1.bf16.msra.mxu1 %v15454_v58 }
 0xb7c   :  { %9745 = vmatprep.subr.bf16.mxu0 %v15484_v62  ;;  %9786 = vmatprep.subr.bf16.mxu1 %v15486_v54 }
 0xb7d   :  { %9775 = vmatprep.mubr.bf16.mxu0 %v16142_v53  ;;  %9816 = vmatprep.mubr.bf16.mxu1 %v16142_v53 }
 0xb7f   :  { %9746 = vmatpush1.bf16.msra.mxu0 %v15492_v9  ;;  %9787 = vmatpush1.bf16.msra.mxu1 %v15494_v56 }
 0xb80   :  { %9747 = vmatprep.subr.bf16.mxu0 %v15498_v51  ;;  %9788 = vmatprep.subr.bf16.mxu1 %v15500_v43 }
 0xb83   :  { %9748 = vmatpush1.bf16.msra.mxu0 %v15506_v47  ;;  %9789 = vmatpush1.bf16.msra.mxu1 %v15508_v39 }
 0xb84   :  { %9749 = vmatprep.subr.bf16.mxu0 %v15512_v4  ;;  %9790 = vmatprep.subr.bf16.mxu1 %v15514_v41 }
 0xb87   :  { %9750 = vmatpush1.bf16.msra.mxu0 %v15518_v11  ;;  %9791 = vmatpush1.bf16.msra.mxu1 %v15520_v38 }
 0xb88   :  { %9751 = vmatprep.subr.bf16.mxu0 %v15524_v2  ;;  %9792 = vmatprep.subr.bf16.mxu1 %v15526_v26 }
 0xb8b   :  { %9752 = vmatpush1.bf16.msra.mxu0 %v15530_v29  ;;  %9793 = vmatpush1.bf16.msra.mxu1 %v15532_v34 }
 0xb8c   :  { %9753 = vmatprep.subr.bf16.mxu0 %v15536_v55  ;;  %9794 = vmatprep.subr.bf16.mxu1 %v15538_v6 }
 0xb8f   :  { %9754 = vmatpush1.bf16.msra.mxu0 %v15542_v14  ;;  %9795 = vmatpush1.bf16.msra.mxu1 %v15544_v1 }
 0xb90   :  { %9755 = vmatprep.subr.bf16.mxu0 %v15548_v63  ;;  %9796 = vmatprep.subr.bf16.mxu1 %v15550_v32 }
 0xb93   :  { %9756 = vmatpush1.bf16.msra.mxu0 %v15554_v10  ;;  %9797 = vmatpush1.bf16.msra.mxu1 %v15556_v59 }
 0xb94   :  { %9757 = vmatprep.subr.bf16.mxu0 %v15560_v8  ;;  %9798 = vmatprep.subr.bf16.mxu1 %v15562_v28 }
 0xb97   :  { %9758 = vmatpush1.bf16.msra.mxu0 %v15566_v36  ;;  %9799 = vmatpush1.bf16.msra.mxu1 %v15568_v21 }
 0xb98   :  { %10018 = vmatprep.subr.bf16.mxu0 %v15572_v12  ;;  %10059 = vmatprep.subr.bf16.mxu1 %v15574_v37 }
 0xb9a   :  { %9776 = vmatmul.mubr.bf16.vlgmr.msra.gmra.mrb[128].mxu0 %v15482_v18  ;;  %9817 = vmatmul.mubr.bf16.vlgmr.msra.gmra.mrb[128].mxu1 %v15482_v18  ;;  %v15600_v18 = vld [vmem:[#allocation8 + $0x44] ss:$16 sps:$4 sm:$0xff]  }
 0xb9b   :  { %v9151_v0 = vpop.f32.mrb[120].mxu0  ;;  %v9192_v60 = vpop.f32.mrb[120].mxu1  ;;  %10019 = vmatpush1.bf16.msra.mxu0 %v15578_v61  ;;  %10060 = vmatpush1.bf16.msra.mxu1 %v15580_v16 }
 0xb9c   :  { %v9199_v35 = vadd.f32 %v9151_v0, %v15473_v33  ;;  %v9201_v24 = vadd.f32 %v9192_v60, %v15475_v22  ;;  %v9153_v25 = vpop.f32.mrb[121].mxu0  ;;  %v9194_v30 = vpop.f32.mrb[121].mxu1  ;;  %10020 = vmatprep.subr.bf16.mxu0 %v15584_v27  ;;  %10061 = vmatprep.subr.bf16.mxu1 %v15586_v31  ;;  %v15612_v31 = vld [vmem:[#allocation8 + $0x40] ss:$16 sps:$4 sm:$0xff]  }
 0xb9d   :  { %v9200_v16 = vadd.f32 %v9153_v25, %v15477_v20  ;;  %v9202_v61 = vadd.f32 %v9194_v30, %v15479_v40  ;;  %v9155_v50 = vpop.f32.mrb[122].mxu0  ;;  %v9196_v57 = vpop.f32.mrb[122].mxu1  ;;  %10050 = vmatprep.mubr.bf16.mxu0 %v16142_v53  ;;  %10091 = vmatprep.mubr.bf16.mxu1 %v16142_v53  ;;  %v15614_v25 = vld [vmem:[#allocation8 + $0x48] ss:$16 sps:$4 sm:$0xff]   ;;  %v15624_v40 = vld [vmem:[#allocation8 + $0x60] ss:$16 sps:$4 sm:$0xff]  }
 0xb9e   :  { %v9203_v33 = vadd.f32 %v9199_v35, %v13521_v45  ;;  %v9156_v22 = vpop.f32.mrb[123].mxu0  ;;  %v9197_v0 = vpop.f32.mrb[123].mxu1  ;;  %v15618_v57 = vld [vmem:[#allocation8 + $0x64] ss:$16 sps:$4 sm:$0xff]   ;;  %v15620_v50 = vld [vmem:[#allocation8 + $0x6c] ss:$16 sps:$4 sm:$0xff]   ;;  %v9205_v45 = vadd.f32 %v9201_v24, %v16626_v7 }
 0xb9f   :  { %v9204_v60 = vadd.f32 %v9200_v16, %v13526_v17  ;;  %10021 = vmatpush1.bf16.msra.mxu0 %v15592_v15  ;;  %10062 = vmatpush1.bf16.msra.mxu1 %v15594_v23  ;;  %16644 = vst [vmem:[#allocation32_spill] sm:$0xff] %v15624_v40  ;;  %v15626_v16 = vld [vmem:[#allocation8 + $0x68] ss:$16 sps:$4 sm:$0xff]   ;;  %v15630_v35 = vld [vmem:[#allocation8 + $0x84] ss:$16 sps:$4 sm:$0xff]   ;;  %v9206_v22 = vadd.f32 %v9202_v61, %v16620_v3 }
 0xba0   :  { %v12001_v30 = vmul.f32 -1.442695, %v9203_v33  ;;  %10022 = vmatprep.subr.bf16.mxu0 %v15600_v18  ;;  %10063 = vmatprep.subr.bf16.mxu1 %v15602_v48  ;;  %16645 = vst [vmem:[#allocation19_spill] sm:$0xff] %v15626_v16  ;;  %16646 = vst [vmem:[#allocation20_spill] sm:$0xff] %v15630_v35  ;;  %v15632_v33 = vld [vmem:[#allocation8 + $0x8c] ss:$16 sps:$4 sm:$0xff]  }
 0xba1   :  { %v12002_v20 = vmul.f32 -1.442695, %v9204_v60  ;;  %16647 = vst [vmem:[#allocation22_spill] sm:$0xff] %v15632_v33  ;;  %v15637_v0 = vld [vmem:[#allocation8 + $0x80] ss:$16 sps:$4 sm:$0xff]  }
 0xba2   :  { %12799 = vpow2.f32 %v12001_v30  ;;  %v15639_v60 = vld [vmem:[#allocation8 + $0x88] ss:$16 sps:$4 sm:$0xff]   ;;  %v15643_v30 = vld [vmem:[#allocation8 + $0xa4] ss:$16 sps:$4 sm:$0xff]   ;;  %v12003_v17 = vmul.f32 -1.442695, %v9206_v22 }
 0xba3   :  { %12801 = vpow2.f32 %v12002_v20  ;;  %10023 = vmatpush1.bf16.msra.mxu0 %v15612_v31  ;;  %10064 = vmatpush1.bf16.msra.mxu1 %v15614_v25  ;;  %16648 = vst [vmem:[#allocation36_spill] sm:$0xff] %v15639_v60  ;;  %v15645_v20 = vld [vmem:[#allocation8 + $0xac] ss:$16 sps:$4 sm:$0xff]   ;;  %v15650_v61 = vld [vmem:[#allocation8 + $0xa0] ss:$16 sps:$4 sm:$0xff]  }
 0xba4   :  { %10024 = vmatprep.subr.bf16.mxu0 %v15618_v57  ;;  %10065 = vmatprep.subr.bf16.mxu1 %v15620_v50  ;;  %16649 = vst [vmem:[#allocation35_spill] sm:$0xff] %v15645_v20  ;;  %v15652_v3 = vld [vmem:[#allocation8 + $0xa8] ss:$16 sps:$4 sm:$0xff]   ;;  %12803 = vpow2.f32 %v12003_v17  ;;  %v15662_v7 = vld [vmem:[#allocation8 + $0xc0] ss:$16 sps:$4 sm:$0xff]  }
 0xba5   :  { %16650 = vst [vmem:[#allocation38_spill] sm:$0xff] %v15652_v3  ;;  %12805 = vtanh.f32 %v9205_v45  ;;  %16653 = vst [vmem:[#allocation40_spill] sm:$0xff] %v15662_v7  ;;  %v15674_v45 = vld [vmem:[#allocation8 + $0xe0] ss:$16 sps:$4 sm:$0xff]   ;;  %v15676_v17 = vld [vmem:[#allocation8 + $0xe8] ss:$16 sps:$4 sm:$0xff]  }
 0xba6   :  { %16657 = vst [vmem:[#allocation43_spill] sm:$0xff] %v15674_v45  ;;  %16658 = vst [vmem:[#allocation18_spill] sm:$0xff] %v15676_v17 }
 0xba7   :  { %10025 = vmatpush1.bf16.msra.mxu0 %v15624_v40  ;;  %10066 = vmatpush1.bf16.msra.mxu1 %v15626_v16 }
 0xba8   :  { %10026 = vmatprep.subr.bf16.mxu0 %v15630_v35  ;;  %10067 = vmatprep.subr.bf16.mxu1 %v15632_v33  ;;  %v15656_v33 = vld [vmem:[#allocation8 + $0xc4] ss:$16 sps:$4 sm:$0xff]   ;;  %v15658_v35 = vld [vmem:[#allocation8 + $0xcc] ss:$16 sps:$4 sm:$0xff]  }
 0xba9   :  { %16651 = vst [vmem:[#allocation33_spill] sm:$0xff] %v15656_v33  ;;  %16652 = vst [vmem:[#allocation39_spill] sm:$0xff] %v15658_v35 }
 0xbab   :  { %10027 = vmatpush1.bf16.msra.mxu0 %v15637_v0  ;;  %10068 = vmatpush1.bf16.msra.mxu1 %v15639_v60  ;;  %v15664_v60 = vld [vmem:[#allocation8 + $0xc8] ss:$16 sps:$4 sm:$0xff]  }
 0xbac   :  { %v12800_v16 = vpop.eup %12799  ;;  %10028 = vmatprep.subr.bf16.mxu0 %v15643_v30  ;;  %10069 = vmatprep.subr.bf16.mxu1 %v15645_v20  ;;  %16654 = vst [vmem:[#allocation41_spill] sm:$0xff] %v15664_v60  ;;  %v15668_v20 = vld [vmem:[#allocation8 + $0xe4] ss:$16 sps:$4 sm:$0xff]  }
 0xbad   :  { %v12802_v22 = vpop.eup %12801  ;;  %v9213_v40 = vadd.f32 1.0, %v12800_v16  ;;  %16655 = vst [vmem:[#allocation17_spill] sm:$0xff] %v15668_v20  ;;  %v15670_v16 = vld [vmem:[#allocation8 + $0xec] ss:$16 sps:$4 sm:$0xff]  }
 0xbae   :  { %v9214_v24 = vadd.f32 1.0, %v12802_v22  ;;  %16656 = vst [vmem:[#allocation42_spill] sm:$0xff] %v15670_v16 }
 0xbaf   :  { %12807 = vrcp.f32 %v9213_v40  ;;  %10029 = vmatpush1.bf16.msra.mxu0 %v15650_v61  ;;  %10070 = vmatpush1.bf16.msra.mxu1 %v15652_v3  ;;  %v12804_v40 = vpop.eup %12803 }
 0xbb0   :  { %12809 = vrcp.f32 %v9214_v24  ;;  %10030 = vmatprep.subr.bf16.mxu0 %v15656_v33  ;;  %10071 = vmatprep.subr.bf16.mxu1 %v15658_v35  ;;  %v12806_v22 = vpop.eup %12805  ;;  %v9223_v35 = vadd.f32 1.0, %v12804_v40 }
 0xbb2   :  { %12811 = vrcp.f32 %v9223_v35 }
 0xbb3   :  { %10031 = vmatpush1.bf16.msra.mxu0 %v15662_v7  ;;  %10072 = vmatpush1.bf16.msra.mxu1 %v15664_v60 }
 0xbb4   :  { %10032 = vmatprep.subr.bf16.mxu0 %v15668_v20  ;;  %10073 = vmatprep.subr.bf16.mxu1 %v15670_v16 }
 0xbb7   :  { %10033 = vmatpush1.bf16.msra.mxu0 %v15674_v45  ;;  %10074 = vmatpush1.bf16.msra.mxu1 %v15676_v17 }
 0xbb8   :  { %10370 = vmatprep.subr.bf16.mxu0 %v15456_v44  ;;  %10411 = vmatprep.subr.bf16.mxu1 %v15458_v49 }
 0xbb9   :  { %v12808_v24 = vpop.eup %12807 }
 0xbba   :  { %v12810_v60 = vpop.eup %12809  ;;  %v9227_v7 = vmul.f32 %v12808_v24, %v12806_v22 }
 0xbbb   :  { %v9226_v33 = vmul.f32 %v12810_v60, %v15440_v42  ;;  %v16664_v60 = vld [vmem:[#allocation37_spill] sm:$0xff] }
 0xbbc   :  { %v12812_v16 = vpop.eup %12811 }
 0xbbd   :  { %v15685_v3 = vadd.f32 %v9227_v7, %v9226_v33 }
 0xbbf   :  { %12813 = vtanh.f32 %v15685_v3 }
 0xbc9   :  { %v12814_v45 = vpop.eup %12813 }
 0xbca   :  { %v9230_v20 = vmul.f32 %v12814_v45, %v12812_v16 }
 0xbcc   :  { %9232 = vst [vmem:[#allocation2 + $0x12] sm:$0x3] %v9230_v20  ;;  %v9825_v17 = vpack.c.bf16 %v9230_v20, %v9230_v20 }
 0xbce   :  { %10051 = vmatmul.mubr.bf16.vlgmr.msra.gmra.mrb[132].mxu0 %v9825_v17  ;;  %10092 = vmatmul.mubr.bf16.vlgmr.msra.gmra.mrb[132].mxu1 %v9825_v17 }
 0xbcf   :  { %10371 = vmatpush1.bf16.msra.mxu0 %v15452_v19  ;;  %10412 = vmatpush1.bf16.msra.mxu1 %v15454_v58 }
 0xbd0   :  { %10372 = vmatprep.subr.bf16.mxu0 %v15484_v62  ;;  %10413 = vmatprep.subr.bf16.mxu1 %v15486_v54 }
 0xbd1   :  { %10402 = vmatprep.mubr.bf16.mxu0 %v16142_v53  ;;  %10443 = vmatprep.mubr.bf16.mxu1 %v16142_v53 }
 0xbd3   :  { %v10774_v7 = vld [vmem:[#allocation2 + $0x12] sm:$0x3]  ;;  %10373 = vmatpush1.bf16.msra.mxu0 %v15492_v9  ;;  %10414 = vmatpush1.bf16.msra.mxu1 %v15494_v56 }
 0xbd4   :  { %v10793_v42 = vmul.f32 %v15448_v46, %v10774_v7  ;;  %10374 = vmatprep.subr.bf16.mxu0 %v15498_v51  ;;  %10415 = vmatprep.subr.bf16.mxu1 %v15500_v43  ;;  %v10139_v46 = vpop.permute.xlu1 %10138  ;;  %v16659_v9 = vld [vmem:[#allocation23_spill] sm:$0xff] }
 0xbd5   :  { %v10141_v58 = vmul.f32 %v10139_v46, %v16586_v52  ;;  %v10142_v44 = vmul.f32 %v10139_v46, %v16587_v13  ;;  %v16661_v13 = vld [vmem:[#allocation26_spill] sm:$0xff] }
 0xbd6   :  { %v10824_v19 = vsel %vm10796_vm0, %v10793_v42, 0.0 }
 0xbd7   :  { %10825 = vadd.xlane.f32.xlu0 %v10824_v19  ;;  %10375 = vmatpush1.bf16.msra.mxu0 %v15506_v47  ;;  %v10145_v49 = vadd.f32 %v10141_v58, %v16588_v5  ;;  %v10146_v56 = vadd.f32 %v10142_v44, %v16659_v9  ;;  %v16667_v9 = vld [vmem:[#allocation34_spill] sm:$0xff] }
 0xbd8   :  { %10416 = vmatpush1.bf16.msra.mxu1 %v15508_v39  ;;  %10376 = vmatprep.subr.bf16.mxu0 %v15512_v4  ;;  %v16660_v4 = vld [vmem:[#allocation24_spill] sm:$0xff] }
 0xbd9   :  { %10417 = vmatprep.subr.bf16.mxu1 %v15514_v41  ;;  %v10144_v41 = vmul.f32 %v10139_v46, %v16660_v4 }
 0xbdb   :  { %10377 = vmatpush1.bf16.msra.mxu0 %v15518_v11  ;;  %v10148_v5 = vadd.f32 %v10144_v41, %v16661_v13 }
 0xbdc   :  { %10418 = vmatpush1.bf16.msra.mxu1 %v15520_v38  ;;  %10378 = vmatprep.subr.bf16.mxu0 %v15524_v2 }
 0xbdd   :  { %10419 = vmatprep.subr.bf16.mxu1 %v15526_v26 }
 0xbdf   :  { %10379 = vmatpush1.bf16.msra.mxu0 %v15530_v29 }
 0xbe0   :  { %10420 = vmatpush1.bf16.msra.mxu1 %v15532_v34  ;;  %10380 = vmatprep.subr.bf16.mxu0 %v15536_v55  ;;  %v16662_v34 = vld [vmem:[#allocation27_spill] sm:$0xff] }
 0xbe1   :  { %10421 = vmatprep.subr.bf16.mxu1 %v15538_v6  ;;  %v10143_v55 = vmul.f32 %v10139_v46, %v16662_v34 }
 0xbe3   :  { %10381 = vmatpush1.bf16.msra.mxu0 %v15542_v14  ;;  %v16663_v14 = vld [vmem:[#allocation28_spill] sm:$0xff] }
 0xbe4   :  { %10422 = vmatpush1.bf16.msra.mxu1 %v15544_v1  ;;  %10382 = vmatprep.subr.bf16.mxu0 %v15548_v63  ;;  %v10147_v1 = vadd.f32 %v10143_v55, %v16663_v14  ;;  %v16684_v55 = vld [vmem:[#allocation14_spill] sm:$0xff] }
 0xbe5   :  { %10423 = vmatprep.subr.bf16.mxu1 %v15550_v32 }
 0xbe7   :  { %10383 = vmatpush1.bf16.msra.mxu0 %v15554_v10 }
 0xbe8   :  { %10424 = vmatpush1.bf16.msra.mxu1 %v15556_v59  ;;  %10384 = vmatprep.subr.bf16.mxu0 %v15560_v8 }
 0xbe9   :  { %10425 = vmatprep.subr.bf16.mxu1 %v15562_v28 }
 0xbeb   :  { %10385 = vmatpush1.bf16.msra.mxu0 %v15566_v36 }
 0xbec   :  { %10426 = vmatpush1.bf16.msra.mxu1 %v15568_v21  ;;  %10645 = vmatprep.subr.bf16.mxu0 %v15572_v12 }
 0xbed   :  { %10686 = vmatprep.subr.bf16.mxu1 %v15574_v37 }
 0xc4d   :  { %v9695_v62 = vpop.f32.mrb[124].mxu0  ;;  %v9736_v54 = vpop.f32.mrb[124].mxu1 }
 0xc4e   :  { %v10149_v51 = vadd.f32 %v10145_v49, %v9695_v62  ;;  %v9697_v43 = vpop.f32.mrb[125].mxu0  ;;  %v9738_v47 = vpop.f32.mrb[125].mxu1  ;;  %v10151_v32 = vadd.f32 %v10147_v1, %v9736_v54  ;;  %v16665_v62 = vld [vmem:[#allocation31_spill] sm:$0xff]  ;;  %v16666_v54 = vld [vmem:[#allocation70_spill] sm:$0xff] }
 0xc4f   :  { %v10150_v39 = vadd.f32 %v10146_v56, %v9697_v43  ;;  %v9699_v11 = vpop.f32.mrb[126].mxu0  ;;  %v9740_v38 = vpop.f32.mrb[126].mxu1  ;;  %v10152_v6 = vadd.f32 %v10148_v5, %v9738_v47  ;;  %v16669_v56 = vld [vmem:[#allocation19_spill] sm:$0xff] }
 0xc50   :  { %v12108_v2 = vmul.f32 -1.442695, %v10149_v51  ;;  %v9700_v26 = vpop.f32.mrb[127].mxu0  ;;  %v9741_v29 = vpop.f32.mrb[127].mxu1  ;;  %v16679_v51 = vld [vmem:[#allocation17_spill] sm:$0xff]  ;;  %v16681_v43 = vld [vmem:[#allocation43_spill] sm:$0xff] }
 0xc51   :  { %v12109_v52 = vmul.f32 -1.442695, %v10150_v39  ;;  %v12110_v63 = vmul.f32 -1.442695, %v10152_v6 }
 0xc52   :  { %12815 = vpow2.f32 %v12108_v2 }
 0xc53   :  { %12817 = vpow2.f32 %v12109_v52  ;;  %v16683_v52 = vld [vmem:[#allocation29_spill] sm:$0xff] }
 0xc54   :  { %12819 = vpow2.f32 %v12110_v63  ;;  %v16685_v63 = vld [vmem:[#allocation15_spill] sm:$0xff] }
 0xc55   :  { %12821 = vtanh.f32 %v10151_v32 }
 0xc5c   :  { %v12816_v10 = vpop.eup %12815 }
 0xc5d   :  { %v12818_v59 = vpop.eup %12817  ;;  %v10159_v8 = vadd.f32 1.0, %v12816_v10 }
 0xc5e   :  { %v10160_v28 = vadd.f32 1.0, %v12818_v59  ;;  %v12820_v36 = vpop.eup %12819  ;;  %v16686_v59 = vld [vmem:[#allocation30_spill] sm:$0xff] }
 0xc5f   :  { %12823 = vrcp.f32 %v10159_v8  ;;  %v12822_v21 = vpop.eup %12821  ;;  %v10169_v33 = vadd.f32 1.0, %v12820_v36 }
 0xc60   :  { %12825 = vrcp.f32 %v10160_v28 }
 0xc61   :  { %12827 = vrcp.f32 %v10169_v33 }
 0xc69   :  { %v12824_v12 = vpop.eup %12823 }
 0xc6a   :  { %v12826_v37 = vpop.eup %12825  ;;  %v10173_v35 = vmul.f32 %v12824_v12, %v12822_v21 }
 0xc6b   :  { %v10172_v20 = vmul.f32 %v12826_v37, %v16664_v60  ;;  %v12828_v46 = vpop.eup %12827 }
 0xc6d   :  { %v10174_v16 = vadd.f32 %v10173_v35, %v10172_v20  ;;  %v9777_v45 = vpop.f32.mrb[128].mxu0  ;;  %v9818_v17 = vpop.f32.mrb[128].mxu1 }
 0xc6e   :  { %v9779_v40 = vpop.f32.mrb[129].mxu0  ;;  %v9820_v22 = vpop.f32.mrb[129].mxu1 }
 0xc6f   :  { %12829 = vtanh.f32 %v10174_v16  ;;  %10762 = vst [vmem:[#allocation3 + $0x2] sm:$0x3] %v10174_v16  ;;  %v9781_v24 = vpop.f32.mrb[130].mxu0  ;;  %v9822_v7 = vpop.f32.mrb[130].mxu1 }
 0xc70   :  { %v9782_v42 = vpop.f32.mrb[131].mxu0  ;;  %v9823_v19 = vpop.f32.mrb[131].mxu1 }
 0xc71   :  { %v12867_v19 = vld [vmem:[%s15805_s6] ss:$0 sm:$0xff]  ;;  %s12948_s6 = smov [#allocation10]  }
 0xc72   :  { %s10965_s22 = sshll.u32 %s12948_s6, 4  ;;  %s10966_s22 = int_to_ptr.vmem [resolvable:$true] %s10965_s22 }
 0xc73   :  { %s12912_s23 = scalar_lea.vmem %s10966_s22, 32  ;;  %p12917_p3 = scmp.lt.s32.totalorder %s10966_s22, %s10966_s22 }
 0xc74   :  { %p12913_p2 = scmp.ne.s32.totalorder %s10966_s22, %s12912_s23  ;;  %p12918_p4 = scmp.lt.s32.totalorder %s12912_s23, %s12912_s23 }
 0xc76   :  { %p12919_p5 = por %p12918_p4, %p12917_p3 }
 0xc78   :  { %p12920_p6 = pnand %p12919_p5, %p12913_p2 }
 0xc79   :  { %v12830_v58 = vpop.eup %12829 }
 0xc7a   :  { %v10176_v44 = vmul.f32 %v12830_v58, %v12828_v46 }
 0xc7c   :  { %v10177_v49 = vpack.c.bf16 %v10176_v44, %v10176_v44  ;;  %10761 = vst [vmem:[#allocation3] sm:$0x3] %v10176_v44 }
 0xc7e   :  { %10403 = vmatmul.mubr.bf16.vlgmr.msra.gmra.mrb[136].mxu0 %v10177_v49  ;;  %10444 = vmatmul.mubr.bf16.vlgmr.msra.gmra.mrb[136].mxu1 %v10177_v49 }
 0xc7f   :  { %10646 = vmatpush1.bf16.msra.mxu0 %v16665_v62  ;;  %10687 = vmatpush1.bf16.msra.mxu1 %v16666_v54 }
 0xc80   :  { %10647 = vmatprep.subr.bf16.mxu0 %v15584_v27  ;;  %10688 = vmatprep.subr.bf16.mxu1 %v16667_v9  ;;  %v16668_v27 = vld [vmem:[#allocation32_spill] sm:$0xff] }
 0xc81   :  { %10677 = vmatprep.mubr.bf16.mxu0 %v16142_v53  ;;  %10718 = vmatprep.mubr.bf16.mxu1 %v16142_v53  ;;  %v16670_v53 = vld [vmem:[#allocation20_spill] sm:$0xff] }
 0xc83   :  { %10648 = vmatpush1.bf16.msra.mxu0 %v15592_v15  ;;  %10689 = vmatpush1.bf16.msra.mxu1 %v15594_v23  ;;  %v16671_v15 = vld [vmem:[#allocation22_spill] sm:$0xff]  ;;  %v16672_v23 = vld [vmem:[#allocation36_spill] sm:$0xff] }
 0xc84   :  { %10649 = vmatprep.subr.bf16.mxu0 %v15600_v18  ;;  %10690 = vmatprep.subr.bf16.mxu1 %v15602_v48  ;;  %v16673_v48 = vld [vmem:[#allocation35_spill] sm:$0xff]  ;;  %v16675_v18 = vld [vmem:[#allocation33_spill] sm:$0xff] }
 0xc87   :  { %10650 = vmatpush1.bf16.msra.mxu0 %v15612_v31  ;;  %10691 = vmatpush1.bf16.msra.mxu1 %v15614_v25  ;;  %v16674_v31 = vld [vmem:[#allocation38_spill] sm:$0xff]  ;;  %v16676_v25 = vld [vmem:[#allocation39_spill] sm:$0xff] }
 0xc88   :  { %10651 = vmatprep.subr.bf16.mxu0 %v15618_v57  ;;  %10692 = vmatprep.subr.bf16.mxu1 %v15620_v50  ;;  %v16677_v57 = vld [vmem:[#allocation40_spill] sm:$0xff]  ;;  %v16678_v50 = vld [vmem:[#allocation41_spill] sm:$0xff] }
 0xc8b   :  { %10652 = vmatpush1.bf16.msra.mxu0 %v16668_v27  ;;  %10693 = vmatpush1.bf16.msra.mxu1 %v16669_v56 }
 0xc8c   :  { %10653 = vmatprep.subr.bf16.mxu0 %v16670_v53  ;;  %10694 = vmatprep.subr.bf16.mxu1 %v16671_v15 }
 0xc8f   :  { %10654 = vmatpush1.bf16.msra.mxu0 %v15637_v0  ;;  %10695 = vmatpush1.bf16.msra.mxu1 %v16672_v23  ;;  %v16680_v0 = vld [vmem:[#allocation42_spill] sm:$0xff] }
 0xc90   :  { %10655 = vmatprep.subr.bf16.mxu0 %v15643_v30  ;;  %10696 = vmatprep.subr.bf16.mxu1 %v16673_v48  ;;  %v16682_v30 = vld [vmem:[#allocation18_spill] sm:$0xff] }
 0xc93   :  { %10656 = vmatpush1.bf16.msra.mxu0 %v15650_v61  ;;  %10697 = vmatpush1.bf16.msra.mxu1 %v16674_v31 }
 0xc94   :  { %10657 = vmatprep.subr.bf16.mxu0 %v16675_v18  ;;  %10698 = vmatprep.subr.bf16.mxu1 %v16676_v25 }
 0xc97   :  { %10658 = vmatpush1.bf16.msra.mxu0 %v16677_v57  ;;  %10699 = vmatpush1.bf16.msra.mxu1 %v16678_v50 }
 0xc98   :  { %10659 = vmatprep.subr.bf16.mxu0 %v16679_v51  ;;  %10700 = vmatprep.subr.bf16.mxu1 %v16680_v0 }
 0xc9b   :  { %10660 = vmatpush1.bf16.msra.mxu0 %v16681_v43  ;;  %10701 = vmatpush1.bf16.msra.mxu1 %v16682_v30 }
 0xca1   :  { %v10052_v47 = vpop.f32.mrb[132].mxu0  ;;  %v10093_v61 = vpop.f32.mrb[132].mxu1 }
 0xca2   :  { %v10100_v39 = vadd.f32 %v10052_v47, %v9777_v45  ;;  %v10102_v4 = vadd.f32 %v10093_v61, %v9818_v17  ;;  %v10054_v41 = vpop.f32.mrb[133].mxu0  ;;  %v10095_v11 = vpop.f32.mrb[133].mxu1 }
 0xca3   :  { %v10101_v38 = vadd.f32 %v10054_v41, %v9779_v40  ;;  %v10103_v2 = vadd.f32 %v10095_v11, %v9820_v22  ;;  %v10056_v26 = vpop.f32.mrb[134].mxu0  ;;  %v10097_v29 = vpop.f32.mrb[134].mxu1 }
 0xca4   :  { %v10104_v13 = vadd.f32 %v10100_v39, %v16683_v52  ;;  %v10057_v5 = vpop.f32.mrb[135].mxu0  ;;  %v10098_v34 = vpop.f32.mrb[135].mxu1  ;;  %v10106_v8 = vadd.f32 %v10102_v4, %v16686_v59 }
 0xca5   :  { %v10105_v6 = vadd.f32 %v10101_v38, %v16684_v55  ;;  %v10107_v32 = vadd.f32 %v10103_v2, %v16685_v63 }
 0xca6   :  { %v12104_v14 = vmul.f32 -1.442695, %v10104_v13 }
 0xca7   :  { %v12105_v1 = vmul.f32 -1.442695, %v10105_v6  ;;  %v12106_v10 = vmul.f32 -1.442695, %v10107_v32 }
 0xca8   :  { %12831 = vpow2.f32 %v12104_v14 }
 0xca9   :  { %12833 = vpow2.f32 %v12105_v1 }
 0xcaa   :  { %12835 = vpow2.f32 %v12106_v10 }
 0xcab   :  { %12837 = vtanh.f32 %v10106_v8 }
 0xcb2   :  { %v12832_v28 = vpop.eup %12831 }
 0xcb3   :  { %v12834_v36 = vpop.eup %12833  ;;  %v10114_v21 = vadd.f32 1.0, %v12832_v28 }
 0xcb4   :  { %v10115_v12 = vadd.f32 1.0, %v12834_v36  ;;  %v12836_v37 = vpop.eup %12835 }
 0xcb5   :  { %12839 = vrcp.f32 %v10114_v21  ;;  %v12838_v35 = vpop.eup %12837  ;;  %v10124_v16 = vadd.f32 1.0, %v12836_v37  ;;  %v10799_v21 = vpop.xlane.xlu0 %10798  ;;  %v16687_v37 = vlaneseq }
 0xcb6   :  { %12841 = vrcp.f32 %v10115_v12 }
 0xcb7   :  { %12843 = vrcp.f32 %v10124_v16 }
 0xcb9   :  { %v10805_v12 = vpop.xlane.xlu0 %10804 }
 0xcbf   :  { %v12840_v33 = vpop.eup %12839 }
 0xcc0   :  { %v12842_v60 = vpop.eup %12841  ;;  %v10128_v20 = vmul.f32 %v12840_v33, %v12838_v35  ;;  %v10846_v35 = vand.u32 127, %v16687_v37  ;;  %v10802_v33 = vpop.xlane.xlu1 %10801 }
 0xcc1   :  { %v10127_v45 = vmul.f32 %v12842_v60, %v15685_v3  ;;  %v12844_v40 = vpop.eup %12843  ;;  %v12179_v3 = vld [vmem:[#allocation4] ss:$0 sm:$0xff]  ;;  %v10808_v60 = vpop.xlane.xlu0 %10807 }
 0xcc3   :  { %v10129_v17 = vadd.f32 %v10128_v20, %v10127_v45  ;;  %v16688_v20 = vld [vmem:[#allocation16_spill] sm:$0xff] }
 0xcc4   :  { %v10849_v16 = vsub.s32 %v10846_v35, %v16688_v20  ;;  %v10811_v45 = vpop.xlane.xlu1 %10810 }
 0xcc5   :  { %12845 = vtanh.f32 %v10129_v17 }
 0xccf   :  { %v12846_v22 = vpop.eup %12845 }
 0xcd0   :  { %v10131_v24 = vmul.f32 %v12846_v22, %v12844_v40  ;;  %v10854_v40 = vrot.slane %v10802_v33, %v10849_v16  ;;  %v10858_v22 = vrot.slane %v10805_v12, %v10849_v16 }
 0xcd2   :  { %10133 = vst [vmem:[#allocation2 + $0x14] sm:$0x3] %v10131_v24  ;;  %v10452_v7 = vpack.c.bf16 %v10131_v24, %v10131_v24  ;;  %v10850_v24 = vrot.slane %v10799_v21, %v10849_v16 }
 0xcd4   :  { %10678 = vmatmul.mubr.bf16.vlgmr.msra.gmra.mrb[140].mxu0 %v10452_v7  ;;  %10719 = vmatmul.mubr.bf16.vlgmr.msra.gmra.mrb[140].mxu1 %v10452_v7  ;;  %v10862_v7 = vrot.slane %v10808_v60, %v10849_v16 }
 0xcd9   :  { %v10775_v42 = vld [vmem:[#allocation2 + $0x14] sm:$0x3] }
 0xcda   :  { %v10794_v46 = vmul.f32 %v12867_v19, %v10775_v42  ;;  %v10817_v42 = vpop.xlane.xlu1 %10816 }
 0xcdc   :  { %v10827_v58 = vsel %vm10796_vm0, %v10794_v46, 0.0 }
 0xcdd   :  { %10828 = vadd.xlane.f32.xlu1 %v10827_v58  ;;  %v10896_v58 = vsel %vm10895_vm1, %v10854_v40, %v10850_v24 }
 0xcee   :  { %10953 = vperm.xlu1 %12190, %v12179_v3  }
 0xd51   :  { %v10404_v44 = vpop.f32.mrb[136].mxu0  ;;  %v10445_v49 = vpop.f32.mrb[136].mxu1 }
 0xd52   :  { %v10406_v62 = vpop.f32.mrb[137].mxu0  ;;  %v10447_v54 = vpop.f32.mrb[137].mxu1 }
 0xd53   :  { %v10408_v9 = vpop.f32.mrb[138].mxu0  ;;  %v10449_v27 = vpop.f32.mrb[138].mxu1 }
 0xd54   :  { %v10409_v56 = vpop.f32.mrb[139].mxu0  ;;  %v10450_v53 = vpop.f32.mrb[139].mxu1 }
 0xda7   :  { %v10679_v15 = vpop.f32.mrb[140].mxu0  ;;  %v10720_v23 = vpop.f32.mrb[140].mxu1 }
 0xda8   :  { %v10727_v48 = vadd.f32 %v10679_v15, %v10404_v44  ;;  %v10729_v31 = vadd.f32 %v10720_v23, %v10445_v49  ;;  %v10681_v18 = vpop.f32.mrb[141].mxu0  ;;  %v10722_v25 = vpop.f32.mrb[141].mxu1  ;;  %v10898_v44 = vsel %vm10897_vm2, %v10858_v22, %v10896_v58  ;;  %v10874_v49 = vrot.slane %v10817_v42, %v10849_v16 }
 0xda9   :  { %v10728_v57 = vadd.f32 %v10681_v18, %v10406_v62  ;;  %v10730_v50 = vadd.f32 %v10722_v25, %v10447_v54  ;;  %v10683_v51 = vpop.f32.mrb[142].mxu0  ;;  %v10724_v0 = vpop.f32.mrb[142].mxu1  ;;  %v10900_v62 = vsel %vm10899_vm3, %v10862_v7, %v10898_v44 }
 0xdaa   :  { %v10731_v43 = vadd.f32 %v10727_v48, %v16683_v52  ;;  %v10684_v30 = vpop.f32.mrb[143].mxu0  ;;  %v10725_v47 = vpop.f32.mrb[143].mxu1  ;;  %v10733_v38 = vadd.f32 %v10729_v31, %v16686_v59 }
 0xdab   :  { %v10732_v61 = vadd.f32 %v10728_v57, %v16684_v55  ;;  %v10734_v41 = vadd.f32 %v10730_v50, %v16685_v63  ;;  %v10823_v15 = vpop.xlane.xlu1 %10822 }
 0xdac   :  { %v12175_v39 = vmul.f32 -1.442695, %v10731_v43  ;;  %v10882_v25 = vrot.slane %v10823_v15, %v10849_v16 }
 0xdad   :  { %v12176_v4 = vmul.f32 -1.442695, %v10732_v61  ;;  %v12177_v11 = vmul.f32 -1.442695, %v10734_v41 }
 0xdae   :  { %12847 = vpow2.f32 %v12175_v39 }
 0xdaf   :  { %12849 = vpow2.f32 %v12176_v4  ;;  %v10829_v48 = vpop.xlane.xlu1 %10828 }
 0xdb0   :  { %12851 = vpow2.f32 %v12177_v11  ;;  %v10890_v18 = vrot.slane %v10829_v48, %v10849_v16 }
 0xdb1   :  { %12853 = vtanh.f32 %v10733_v38 }
 0xdb3   :  { %v10954_v30 = vpop.permute.xlu1 %10953 }
 0xdb8   :  { %v12848_v2 = vpop.eup %12847 }
 0xdb9   :  { %v12850_v26 = vpop.eup %12849  ;;  %v10741_v29 = vadd.f32 1.0, %v12848_v2 }
 0xdba   :  { %v10742_v13 = vadd.f32 1.0, %v12850_v26  ;;  %v12852_v52 = vpop.eup %12851 }
 0xdbb   :  { %12855 = vrcp.f32 %v10741_v29  ;;  %v12854_v5 = vpop.eup %12853  ;;  %v10751_v14 = vadd.f32 1.0, %v12852_v52 }
 0xdbc   :  { %12857 = vrcp.f32 %v10742_v13 }
 0xdbd   :  { %12859 = vrcp.f32 %v10751_v14 }
 0xdc5   :  { %v12856_v34 = vpop.eup %12855 }
 0xdc6   :  { %v12858_v55 = vpop.eup %12857  ;;  %v10755_v6 = vmul.f32 %v12856_v34, %v12854_v5 }
 0xdc7   :  { %v10754_v1 = vmul.f32 %v12858_v55, %v10129_v17  ;;  %v12860_v63 = vpop.eup %12859  ;;  %v10814_v17 = vpop.xlane.xlu0 %10813 }
 0xdc8   :  { %v10870_v3 = vrot.slane %v10814_v17, %v10849_v16 }
 0xdc9   :  { %v10756_v32 = vadd.f32 %v10755_v6, %v10754_v1 }
 0xdcb   :  { %12861 = vtanh.f32 %v10756_v32  ;;  %10764 = vst [vmem:[#allocation3 + $0x6] sm:$0x3] %v10756_v32  ;;  %v10820_v46 = vpop.xlane.xlu0 %10819 }
 0xdcc   :  { %v10878_v54 = vrot.slane %v10820_v46, %v10849_v16 }
 0xdcf   :  { %v10826_v23 = vpop.xlane.xlu0 %10825 }
 0xdd0   :  { %v10886_v31 = vrot.slane %v10826_v23, %v10849_v16 }
 0xdd2   :  { %v10909_v50 = vsel %vm10895_vm1, %v10886_v31, %v10882_v25 }
 0xdd3   :  { %v10910_v0 = vsel %vm10897_vm2, %v10890_v18, %v10909_v50 }
 0xdd5   :  { %v12862_v10 = vpop.eup %12861 }
 0xdd6   :  { %v10758_v59 = vmul.f32 %v12862_v10, %v12860_v63 }
 0xdd8   :  { %10760 = vst [vmem:[#allocation2 + $0x16] sm:$0x3] %v10758_v59  ;;  %10763 = vst [vmem:[#allocation3 + $0x4] sm:$0x3] %v10758_v59 }
 0xddf   :  { %v10776_v8 = vld [vmem:[#allocation2 + $0x16] sm:$0x3] }
 0xde0   :  { %v10795_v28 = vmul.f32 %v12867_v19, %v10776_v8  ;;  %v10866_v19 = vrot.slane %v10811_v45, %v10849_v16 }
 0xde2   :  { %v10830_v36 = vsel %vm10796_vm0, %v10795_v28, 0.0  ;;  %v10902_v9 = vsel %vm10901_vm4, %v10866_v19, %v10900_v62 }
 0xde3   :  { %10831 = vadd.xlane.f32.xlu0 %v10830_v36  ;;  %v10904_v27 = vsel %vm10903_vm5, %v10870_v3, %v10902_v9 }
 0xde4   :  { %v10906_v56 = vsel %vm10905_vm6, %v10874_v49, %v10904_v27 }
 0xde5   :  { %v10908_v53 = vsel %vm10907_vm7, %v10878_v54, %v10906_v56 }
 0xe10   :  { %10914 = vxpose.xlu0.b32.start [1/2] (short) (narrow) %v10908_v53, 8 }
 0xe70   :  { %v10832_v57 = vpop.xlane.xlu0 %10831 }
 0xe71   :  { %v10894_v51 = vrot.slane %v10832_v57, %v10849_v16 }
 0xe73   :  { %v10911_v43 = vsel %vm10899_vm3, %v10894_v51, %v10910_v0 }
 0xe74   :  { %10915 = vxpose.xlu0.b32.end [2/2] (short) (narrow) %v10911_v43, 8 }
 0xef0   :  { %v10930_v47 = vpop.trf.xlu0 }
 0xef1   :  { %v10956_v61 = vadd.f32 %v10954_v30, %v10930_v47 }
 0xef3   :  { %10958 = vst.msk [vmem:[#allocation10] sm:$0x3] %vm10957_vm8, %v10956_v61 }
 0xef4   :  { %12923 = shalt.err (!%p12920_p6)
}
 0xef5   :  { %s12924_s4 = scalar_lea.hbm %s15807_s8, 32 }
 0xef6   :  { %p12925_p7 = scmp.ne.s32.totalorder %s15807_s8, %s12924_s4  ;;  %p12928_p8 = scmp.lt.u32.totalorder %s12924_s4, %s15807_s8 }
 0xef8   :  { %p12930_p9 = pnand %p12928_p8, %p12925_p7 }
 0xefa   :  { %12933 = shalt.err (!%p12930_p9)
}
 0xefb   :  { %10968 = dma.vmem_to_hbm [thread:$0]  %s10966_s22, 32, %s15807_s8, [#allocation7]  }
 0xefc   :  { %12938 = dma.done.wait [#allocation7], 32  }
 0xefd   :  { %12939 = vsyncadd [#allocation7], 4294967264 }
 0xefe   :  { %10972 = vsyncpa [#allocation6], 1 }
 0xeff   :  { %10973 = vsyncpa [#allocation9], 1 }
 0xf00   :  { %10974 = vsyncpa [#allocation7], 1 }

</bundles_post_ra>
